<compile_context>
chip_gen: v7x
topology: tpu7x:2x2x1
jax: 0.10.0
libtpu: 0.0.40
codegen_flags: <defaults>
</compile_context>

<pallas_src>
import functools

import jax
import jax.numpy as jnp
from jax.experimental import pallas as pl
from jax.experimental.pallas import tpu as pltpu

BN_EPS = 1e-5


def _round_up(x, m):
    return (x + m - 1) // m * m


# ---------------------------------------------------------------------------
# Fused 4-layer MLP kernel.
# Grid: (nk2,) over the K chunks of layer 2 (reduction axis -> "arbitrary").
#   step 0       : compute layer 1 fully (resident W1), init layer-2 accumulator
#   every step k : h2 += h1[k-chunk] @ W2[k-chunk]            (streamed, pipelined)
#   last step    : BN/ReLU layer 2, then layers 3 and 4 (resident W3/W4), write output
# ---------------------------------------------------------------------------
def _mlp_kernel(x_ref, w1_ref, s1_ref, t1_ref,
                w2_ref, s2_ref, t2_ref,
                w3_ref, s3_ref, t3_ref,
                w4_ref, t4_ref,
                o_ref, h1_ref, h2_ref, *, tk2, nk2):
    k = pl.program_id(0)

    @pl.when(k == 0)
    def _():
        h2_ref[...] = jnp.zeros_like(h2_ref)
        # Layer 1: h1 = relu((x @ W1) * s1 + t1), written chunk-wise into the
        # (nk2, B, tk2) scratch so layer 2 can index chunks along the leading axis.
        for i in range(nk2):                      # static unrolled (nk2 == 4)
            lo, hi = i * tk2, (i + 1) * tk2
            a1 = jnp.dot(x_ref[...], w1_ref[:, lo:hi],
                         preferred_element_type=jnp.float32)
            h1_ref[i] = jnp.maximum(a1 * s1_ref[:, lo:hi] + t1_ref[:, lo:hi], 0.0)

    # Layer 2 partial product for this grid step's streamed weight chunk.
    h2_ref[...] += jnp.dot(h1_ref[k], w2_ref[...],
                           preferred_element_type=jnp.float32)

    @pl.when(k == nk2 - 1)
    def _():
        # Layer 2 epilogue (BN + ReLU); Dropout is identity in eval.
        h2 = jnp.maximum(h2_ref[...] * s2_ref[...] + t2_ref[...], 0.0)
        # Layer 3 (BN + ReLU).
        a3 = jnp.dot(h2, w3_ref[...], preferred_element_type=jnp.float32)
        h3 = jnp.maximum(a3 * s3_ref[...] + t3_ref[...], 0.0)
        # Layer 4 (plain Linear).
        a4 = jnp.dot(h3, w4_ref[...], preferred_element_type=jnp.float32)
        o_ref[...] = (a4 + t4_ref[...]).astype(o_ref.dtype)


def fused_mlp(xp, w1, s1, t1, w2, s2, t2, w3, s3, t3, w4, t4, *, tk2=1280):
    """Fused forward on padded tensors.  xp:(Bp,K1p) f32, weights (Kp,Np) f32."""
    Bp, K1p = xp.shape
    N1p = w1.shape[1]
    N2p = w2.shape[1]
    N3p = w3.shape[1]
    N4p = w4.shape[1]
    assert w1.shape[0] == K1p and w2.shape[0] == N1p
    assert w3.shape[0] == N2p and w4.shape[0] == N3p
    assert Bp % 8 == 0 and N1p % tk2 == 0
    nk2 = N1p // tk2

    kernel = functools.partial(_mlp_kernel, tk2=tk2, nk2=nk2)
    const = lambda k: (0, 0)  # resident blocks: DMA'd once, never re-fetched

    return pl.pallas_call(
        kernel,
        out_shape=jax.ShapeDtypeStruct((Bp, N4p), jnp.float32),
        grid_spec=pltpu.PrefetchScalarGridSpec(
            num_scalar_prefetch=0,
            grid=(nk2,),
            in_specs=[
                pl.BlockSpec((Bp, K1p), const),          # x        (resident)
                pl.BlockSpec((K1p, N1p), const),         # W1       (resident, 2.5 MB)
                pl.BlockSpec((1, N1p), const),           # scale1
                pl.BlockSpec((1, N1p), const),           # shift1
                pl.BlockSpec((tk2, N2p), lambda k: (k, 0)),  # W2 chunk (streamed, ~5 MB)
                pl.BlockSpec((1, N2p), const),           # scale2
                pl.BlockSpec((1, N2p), const),           # shift2
                pl.BlockSpec((N2p, N3p), const),         # W3       (resident, 1.5 MB)
                pl.BlockSpec((1, N3p), const),           # scale3
                pl.BlockSpec((1, N3p), const),           # shift3
                pl.BlockSpec((N3p, N4p), const),         # W4       (resident, 0.2 MB)
                pl.BlockSpec((1, N4p), const),           # bias4
            ],
            out_specs=pl.BlockSpec((Bp, N4p), const),
            scratch_shapes=[
                pltpu.VMEM((nk2, Bp, tk2), jnp.float32),  # layer-1 activations
                pltpu.VMEM((Bp, N2p), jnp.float32),       # layer-2 accumulator
            ],
        ),
        compiler_params=pltpu.CompilerParams(
            # Single reduction axis -> "arbitrary".  (Workload is DMA-bound; no point
            # manufacturing a parallel axis for megacore on v7x.)
            dimension_semantics=("arbitrary",),
            # ~19.5 MiB worst-case usage; raise explicitly so v5e's 16 MiB default
            # scoped-VMEM limit does not reject these tiles.  32 MiB is safe on all of
            # v5e/v6e (128 MiB physical) and v7x (64 MiB physical per TC).
            vmem_limit_bytes=32 * 1024 * 1024,
        ),
    )(xp, w1, s1, t1, w2, s2, t2, w3, s3, t3, w4, t4)


# ---------------------------------------------------------------------------
# Parameter setup (deterministic, in-script)
# ---------------------------------------------------------------------------
def kaiming_uniform(key, fan_in, fan_out):
    # nn.init.kaiming_uniform_(w, nonlinearity='relu'): bound = sqrt(2) * sqrt(3/fan_in)
    bound = jnp.sqrt(2.0) * jnp.sqrt(3.0 / fan_in)
    # PyTorch stores weight as (out, in); build directly as (in, out) for x @ W.
    return jax.random.uniform(key, (fan_in, fan_out), jnp.float32, -bound, bound)


def init_params(key, input_space, output_space):
    dims = [input_space, 5000, 1000, 300, output_space]
    has_bn = [True, True, True, False]
    params = []
    for i in range(4):
        key, kw, kb = jax.random.split(key, 3)
        fan_in, fan_out = dims[i], dims[i + 1]
        w = kaiming_uniform(kw, fan_in, fan_out)
        bb = 1.0 / jnp.sqrt(fan_in)  # default nn.Linear bias init
        b = jax.random.uniform(kb, (fan_out,), jnp.float32, -bb, bb)
        if has_bn[i]:
            # BN eval with mean=0, var=1, gamma=1, beta=0 folded into the linear.
            bn_scale = 1.0 / jnp.sqrt(1.0 + BN_EPS)
            scale = jnp.full((fan_out,), bn_scale, jnp.float32)
            shift = b * bn_scale
            relu = True
        else:
            scale = jnp.ones((fan_out,), jnp.float32)
            shift = b
            relu = False
        params.append(dict(w=w, scale=scale, shift=shift, relu=relu))
    return params


def prepare_padded(params):
    """One-time: zero-pad weights / folded-BN vectors to (8,128)-aligned shapes."""
    def padw(w):
        kin, kout = w.shape
        pin, pout = _round_up(kin, 128), _round_up(kout, 128)
        return jnp.zeros((pin, pout), jnp.float32).at[:kin, :kout].set(w)

    def padv(v):
        n = v.shape[0]
        return jnp.zeros((1, _round_up(n, 128)), jnp.float32).at[0, :n].set(v)

    p1, p2, p3, p4 = params
    return (padw(p1["w"]), padv(p1["scale"]), padv(p1["shift"]),
            padw(p2["w"]), padv(p2["scale"]), padv(p2["shift"]),
            padw(p3["w"]), padv(p3["scale"]), padv(p3["shift"]),
            padw(p4["w"]), padv(p4["shift"]))


def make_forward(padded, in_dim, out_dim):
    """Build a jitted forward over pre-padded parameters (padding hoisted out)."""
    K1p = padded[0].shape[0]

    @jax.jit
    def forward(x):
        B = x.shape[0]
        Bp = _round_up(B, 8)
        xp = jnp.zeros((Bp, K1p), jnp.float32).at[:B, :in_dim].set(x)
        yp = fused_mlp(xp, *padded)
        return yp[:B, :out_dim]

    return forward


# ---------------------------------------------------------------------------
# Pure-JAX reference (same folded-BN inference semantics)
# ---------------------------------------------------------------------------
def reference_forward(x, params):
    h = x
    for p in params:
        h = jnp.dot(h, p["w"], precision=jax.lax.Precision.HIGHEST)
        h = h * p["scale"][None, :] + p["shift"][None, :]
        if p["relu"]:
            h = jnp.maximum(h, 0.0)
    return h


# ---------------------------------------------------------------------------
if __name__ == "__main__":
    key = jax.random.PRNGKey(0)
    k_params, k_x = jax.random.split(key)

    input_space = 32     # small input feature size
    output_space = 2     # matches the 2-class CE weight in the module
    batch = 8

    params = init_params(k_params, input_space, output_space)

    # One-time setup (kept out of the per-call hot path).
    padded = prepare_padded(params)
    padded = tuple(jax.block_until_ready(a) for a in padded)
    forward = make_forward(padded, input_space, output_space)

    x = jax.random.normal(k_x, (batch, input_space), jnp.float32)

    y = jax.block_until_ready(forward(x))

    y_ref = reference_forward(x, params)
    assert y.shape == (batch, output_space)
    err = jnp.max(jnp.abs(y - y_ref))
    assert jnp.allclose(y, y_ref, atol=1e-3, rtol=1e-3), f"max err {err}"

    print("KERNEL_OK")
</pallas_src>

<mosaic_0001>
module attributes {stable_mosaic.version = 11 : i64} {
  func.func @_mlp_kernel(%arg0: i32, %arg1: memref<8x128xf32, #tpu.memory_space<vmem>>, %arg2: memref<128x5120xf32, #tpu.memory_space<vmem>>, %arg3: memref<1x5120xf32, #tpu.memory_space<vmem>>, %arg4: memref<1x5120xf32, #tpu.memory_space<vmem>>, %arg5: memref<1280x1024xf32, #tpu.memory_space<vmem>>, %arg6: memref<1x1024xf32, #tpu.memory_space<vmem>>, %arg7: memref<1x1024xf32, #tpu.memory_space<vmem>>, %arg8: memref<1024x384xf32, #tpu.memory_space<vmem>>, %arg9: memref<1x384xf32, #tpu.memory_space<vmem>>, %arg10: memref<1x384xf32, #tpu.memory_space<vmem>>, %arg11: memref<384x128xf32, #tpu.memory_space<vmem>>, %arg12: memref<1x128xf32, #tpu.memory_space<vmem>>, %arg13: memref<8x128xf32, #tpu.memory_space<vmem>>, %arg14: memref<4x8x1280xf32, #tpu.memory_space<vmem>>, %arg15: memref<8x1024xf32, #tpu.memory_space<vmem>>) attributes {dimension_semantics = [#tpu.dimension_semantics<arbitrary>], iteration_bounds = array<i64: 4>, scalar_prefetch = 0 : i64, scratch_operands = 2 : i64, tpu.core_type = #tpu.core_type<tc>, window_params = [{pipeline_mode = #tpu.pipeline_mode<synchronous>, transform_indices = @transform_0, window_bounds = array<i64: 8, 128>}, {pipeline_mode = #tpu.pipeline_mode<synchronous>, transform_indices = @transform_1, window_bounds = array<i64: 128, 5120>}, {pipeline_mode = #tpu.pipeline_mode<synchronous>, transform_indices = @transform_2, window_bounds = array<i64: 1, 5120>}, {pipeline_mode = #tpu.pipeline_mode<synchronous>, transform_indices = @transform_3, window_bounds = array<i64: 1, 5120>}, {transform_indices = @transform_4, window_bounds = array<i64: 1280, 1024>}, {pipeline_mode = #tpu.pipeline_mode<synchronous>, transform_indices = @transform_5, window_bounds = array<i64: 1, 1024>}, {pipeline_mode = #tpu.pipeline_mode<synchronous>, transform_indices = @transform_6, window_bounds = array<i64: 1, 1024>}, {pipeline_mode = #tpu.pipeline_mode<synchronous>, transform_indices = @transform_7, window_bounds = array<i64: 1024, 384>}, {pipeline_mode = #tpu.pipeline_mode<synchronous>, transform_indices = @transform_8, window_bounds = array<i64: 1, 384>}, {pipeline_mode = #tpu.pipeline_mode<synchronous>, transform_indices = @transform_9, window_bounds = array<i64: 1, 384>}, {pipeline_mode = #tpu.pipeline_mode<synchronous>, transform_indices = @transform_10, window_bounds = array<i64: 384, 128>}, {pipeline_mode = #tpu.pipeline_mode<synchronous>, transform_indices = @transform_11, window_bounds = array<i64: 1, 128>}, {pipeline_mode = #tpu.pipeline_mode<synchronous>, transform_indices = @transform_12, window_bounds = array<i64: 8, 128>}]} {
    %c0_i32 = arith.constant 0 : i32
    %0 = arith.cmpi eq, %arg0, %c0_i32 : i32
    %1 = arith.extui %0 : i1 to i32
    %c0_i32_0 = arith.constant 0 : i32
    %2 = arith.cmpi ne, %1, %c0_i32_0 : i32
    scf.if %2 {
      %cst_9 = arith.constant 0.000000e+00 : f32
      %14 = vector.broadcast %cst_9 : f32 to vector<8x1024xf32>
      %c0_10 = arith.constant 0 : index
      %c0_11 = arith.constant 0 : index
      %15 = vector.load %arg15[%c0_10, %c0_11] : memref<8x1024xf32, #tpu.memory_space<vmem>>, vector<8x1024xf32>
      tpu.vector_store %arg15[%c0_10, %c0_11], %14 {strides = array<i32>} : memref<8x1024xf32, #tpu.memory_space<vmem>>, vector<8x1024xf32>,
      %c0_12 = arith.constant 0 : index
      %c0_13 = arith.constant 0 : index
      %16 = vector.load %arg1[%c0_12, %c0_13] : memref<8x128xf32, #tpu.memory_space<vmem>>, vector<8x128xf32>
      %c0_14 = arith.constant 0 : index
      %c0_15 = arith.constant 0 : index
      %17 = vector.load %arg2[%c0_14, %c0_15] : memref<128x5120xf32, #tpu.memory_space<vmem>>, vector<128x1280xf32>
      %cst_16 = arith.constant dense<0.000000e+00> : vector<8x1280xf32>
      %18 = tpu.matmul %16, %17, %cst_16 {dimension_numbers = #tpu.dot_dimension_numbers<[1], [0], [0], [1], [0, 0, 1, 1], [], []>} : vector<8x128xf32>, vector<128x1280xf32>, vector<8x1280xf32> -> vector<8x1280xf32>
      %c0_17 = arith.constant 0 : index
      %c0_18 = arith.constant 0 : index
      %19 = vector.load %arg3[%c0_17, %c0_18] : memref<1x5120xf32, #tpu.memory_space<vmem>>, vector<1x1280xf32>
      %20 = vector.broadcast %19 : vector<1x1280xf32> to vector<8x1280xf32>
      %21 = arith.mulf %18, %20 : vector<8x1280xf32>
      %c0_19 = arith.constant 0 : index
      %c0_20 = arith.constant 0 : index
      %22 = vector.load %arg4[%c0_19, %c0_20] : memref<1x5120xf32, #tpu.memory_space<vmem>>, vector<1x1280xf32>
      %23 = vector.broadcast %22 : vector<1x1280xf32> to vector<8x1280xf32>
      %24 = arith.addf %21, %23 : vector<8x1280xf32>
      %cst_21 = arith.constant 0.000000e+00 : f32
      %25 = vector.broadcast %cst_21 : f32 to vector<8x1280xf32>
      %26 = arith.maximumf %24, %25 : vector<8x1280xf32>
      %c0_22 = arith.constant 0 : index
      %c0_23 = arith.constant 0 : index
      %c0_24 = arith.constant 0 : index
      %27 = vector.load %arg14[%c0_22, %c0_23, %c0_24] : memref<4x8x1280xf32, #tpu.memory_space<vmem>>, vector<1x8x1280xf32>
      %28 = vector.shape_cast %27 : vector<1x8x1280xf32> to vector<8x1280xf32>
      %29 = vector.shape_cast %26 : vector<8x1280xf32> to vector<1x8x1280xf32>
      tpu.vector_store %arg14[%c0_22, %c0_23, %c0_24], %29 {strides = array<i32>} : memref<4x8x1280xf32, #tpu.memory_space<vmem>>, vector<1x8x1280xf32>,
      %c0_25 = arith.constant 0 : index
      %c0_26 = arith.constant 0 : index
      %30 = vector.load %arg1[%c0_25, %c0_26] : memref<8x128xf32, #tpu.memory_space<vmem>>, vector<8x128xf32>
      %c0_27 = arith.constant 0 : index
      %c1280 = arith.constant 1280 : index
      %31 = vector.load %arg2[%c0_27, %c1280] : memref<128x5120xf32, #tpu.memory_space<vmem>>, vector<128x1280xf32>
      %cst_28 = arith.constant dense<0.000000e+00> : vector<8x1280xf32>
      %32 = tpu.matmul %30, %31, %cst_28 {dimension_numbers = #tpu.dot_dimension_numbers<[1], [0], [0], [1], [0, 0, 1, 1], [], []>} : vector<8x128xf32>, vector<128x1280xf32>, vector<8x1280xf32> -> vector<8x1280xf32>
      %c0_29 = arith.constant 0 : index
      %c1280_30 = arith.constant 1280 : index
      %33 = vector.load %arg3[%c0_29, %c1280_30] : memref<1x5120xf32, #tpu.memory_space<vmem>>, vector<1x1280xf32>
      %34 = vector.broadcast %33 : vector<1x1280xf32> to vector<8x1280xf32>
      %35 = arith.mulf %32, %34 : vector<8x1280xf32>
      %c0_31 = arith.constant 0 : index
      %c1280_32 = arith.constant 1280 : index
      %36 = vector.load %arg4[%c0_31, %c1280_32] : memref<1x5120xf32, #tpu.memory_space<vmem>>, vector<1x1280xf32>
      %37 = vector.broadcast %36 : vector<1x1280xf32> to vector<8x1280xf32>
      %38 = arith.addf %35, %37 : vector<8x1280xf32>
      %cst_33 = arith.constant 0.000000e+00 : f32
      %39 = vector.broadcast %cst_33 : f32 to vector<8x1280xf32>
      %40 = arith.maximumf %38, %39 : vector<8x1280xf32>
      %c1 = arith.constant 1 : index
      %c0_34 = arith.constant 0 : index
      %c0_35 = arith.constant 0 : index
      %41 = vector.load %arg14[%c1, %c0_34, %c0_35] : memref<4x8x1280xf32, #tpu.memory_space<vmem>>, vector<1x8x1280xf32>
      %42 = vector.shape_cast %41 : vector<1x8x1280xf32> to vector<8x1280xf32>
      %43 = vector.shape_cast %40 : vector<8x1280xf32> to vector<1x8x1280xf32>
      tpu.vector_store %arg14[%c1, %c0_34, %c0_35], %43 {strides = array<i32>} : memref<4x8x1280xf32, #tpu.memory_space<vmem>>, vector<1x8x1280xf32>,
      %c0_36 = arith.constant 0 : index
      %c0_37 = arith.constant 0 : index
      %44 = vector.load %arg1[%c0_36, %c0_37] : memref<8x128xf32, #tpu.memory_space<vmem>>, vector<8x128xf32>
      %c0_38 = arith.constant 0 : index
      %c2560 = arith.constant 2560 : index
      %45 = vector.load %arg2[%c0_38, %c2560] : memref<128x5120xf32, #tpu.memory_space<vmem>>, vector<128x1280xf32>
      %cst_39 = arith.constant dense<0.000000e+00> : vector<8x1280xf32>
      %46 = tpu.matmul %44, %45, %cst_39 {dimension_numbers = #tpu.dot_dimension_numbers<[1], [0], [0], [1], [0, 0, 1, 1], [], []>} : vector<8x128xf32>, vector<128x1280xf32>, vector<8x1280xf32> -> vector<8x1280xf32>
      %c0_40 = arith.constant 0 : index
      %c2560_41 = arith.constant 2560 : index
      %47 = vector.load %arg3[%c0_40, %c2560_41] : memref<1x5120xf32, #tpu.memory_space<vmem>>, vector<1x1280xf32>
      %48 = vector.broadcast %47 : vector<1x1280xf32> to vector<8x1280xf32>
      %49 = arith.mulf %46, %48 : vector<8x1280xf32>
      %c0_42 = arith.constant 0 : index
      %c2560_43 = arith.constant 2560 : index
      %50 = vector.load %arg4[%c0_42, %c2560_43] : memref<1x5120xf32, #tpu.memory_space<vmem>>, vector<1x1280xf32>
      %51 = vector.broadcast %50 : vector<1x1280xf32> to vector<8x1280xf32>
      %52 = arith.addf %49, %51 : vector<8x1280xf32>
      %cst_44 = arith.constant 0.000000e+00 : f32
      %53 = vector.broadcast %cst_44 : f32 to vector<8x1280xf32>
      %54 = arith.maximumf %52, %53 : vector<8x1280xf32>
      %c2 = arith.constant 2 : index
      %c0_45 = arith.constant 0 : index
      %c0_46 = arith.constant 0 : index
      %55 = vector.load %arg14[%c2, %c0_45, %c0_46] : memref<4x8x1280xf32, #tpu.memory_space<vmem>>, vector<1x8x1280xf32>
      %56 = vector.shape_cast %55 : vector<1x8x1280xf32> to vector<8x1280xf32>
      %57 = vector.shape_cast %54 : vector<8x1280xf32> to vector<1x8x1280xf32>
      tpu.vector_store %arg14[%c2, %c0_45, %c0_46], %57 {strides = array<i32>} : memref<4x8x1280xf32, #tpu.memory_space<vmem>>, vector<1x8x1280xf32>,
      %c0_47 = arith.constant 0 : index
      %c0_48 = arith.constant 0 : index
      %58 = vector.load %arg1[%c0_47, %c0_48] : memref<8x128xf32, #tpu.memory_space<vmem>>, vector<8x128xf32>
      %c0_49 = arith.constant 0 : index
      %c3840 = arith.constant 3840 : index
      %59 = vector.load %arg2[%c0_49, %c3840] : memref<128x5120xf32, #tpu.memory_space<vmem>>, vector<128x1280xf32>
      %cst_50 = arith.constant dense<0.000000e+00> : vector<8x1280xf32>
      %60 = tpu.matmul %58, %59, %cst_50 {dimension_numbers = #tpu.dot_dimension_numbers<[1], [0], [0], [1], [0, 0, 1, 1], [], []>} : vector<8x128xf32>, vector<128x1280xf32>, vector<8x1280xf32> -> vector<8x1280xf32>
      %c0_51 = arith.constant 0 : index
      %c3840_52 = arith.constant 3840 : index
      %61 = vector.load %arg3[%c0_51, %c3840_52] : memref<1x5120xf32, #tpu.memory_space<vmem>>, vector<1x1280xf32>
      %62 = vector.broadcast %61 : vector<1x1280xf32> to vector<8x1280xf32>
      %63 = arith.mulf %60, %62 : vector<8x1280xf32>
      %c0_53 = arith.constant 0 : index
      %c3840_54 = arith.constant 3840 : index
      %64 = vector.load %arg4[%c0_53, %c3840_54] : memref<1x5120xf32, #tpu.memory_space<vmem>>, vector<1x1280xf32>
      %65 = vector.broadcast %64 : vector<1x1280xf32> to vector<8x1280xf32>
      %66 = arith.addf %63, %65 : vector<8x1280xf32>
      %cst_55 = arith.constant 0.000000e+00 : f32
      %67 = vector.broadcast %cst_55 : f32 to vector<8x1280xf32>
      %68 = arith.maximumf %66, %67 : vector<8x1280xf32>
      %c3 = arith.constant 3 : index
      %c0_56 = arith.constant 0 : index
      %c0_57 = arith.constant 0 : index
      %69 = vector.load %arg14[%c3, %c0_56, %c0_57] : memref<4x8x1280xf32, #tpu.memory_space<vmem>>, vector<1x8x1280xf32>
      %70 = vector.shape_cast %69 : vector<1x8x1280xf32> to vector<8x1280xf32>
      %71 = vector.shape_cast %68 : vector<8x1280xf32> to vector<1x8x1280xf32>
      tpu.vector_store %arg14[%c3, %c0_56, %c0_57], %71 {strides = array<i32>} : memref<4x8x1280xf32, #tpu.memory_space<vmem>>, vector<1x8x1280xf32>,
    } else {
    }
    %c0 = arith.constant 0 : index
    %c0_1 = arith.constant 0 : index
    %3 = vector.load %arg15[%c0, %c0_1] : memref<8x1024xf32, #tpu.memory_space<vmem>>, vector<8x1024xf32>
    %4 = arith.index_cast %arg0 : i32 to index
    %c0_2 = arith.constant 0 : index
    %c0_3 = arith.constant 0 : index
    %5 = vector.load %arg14[%4, %c0_2, %c0_3] : memref<4x8x1280xf32, #tpu.memory_space<vmem>>, vector<1x8x1280xf32>
    %6 = vector.shape_cast %5 : vector<1x8x1280xf32> to vector<8x1280xf32>
    %c0_4 = arith.constant 0 : index
    %c0_5 = arith.constant 0 : index
    %7 = vector.load %arg5[%c0_4, %c0_5] : memref<1280x1024xf32, #tpu.memory_space<vmem>>, vector<1280x1024xf32>
    %cst = arith.constant dense<0.000000e+00> : vector<8x1024xf32>
    %8 = tpu.matmul %6, %7, %cst {dimension_numbers = #tpu.dot_dimension_numbers<[1], [0], [0], [1], [0, 0, 1, 1], [], []>} : vector<8x1280xf32>, vector<1280x1024xf32>, vector<8x1024xf32> -> vector<8x1024xf32>
    %9 = arith.addf %3, %8 : vector<8x1024xf32>
    %c0_6 = arith.constant 0 : index
    %c0_7 = arith.constant 0 : index
    %10 = vector.load %arg15[%c0_6, %c0_7] : memref<8x1024xf32, #tpu.memory_space<vmem>>, vector<8x1024xf32>
    tpu.vector_store %arg15[%c0_6, %c0_7], %9 {strides = array<i32>} : memref<8x1024xf32, #tpu.memory_space<vmem>>, vector<8x1024xf32>,
    %c3_i32 = arith.constant 3 : i32
    %11 = arith.cmpi eq, %arg0, %c3_i32 : i32
    %12 = arith.extui %11 : i1 to i32
    %c0_i32_8 = arith.constant 0 : i32
    %13 = arith.cmpi ne, %12, %c0_i32_8 : i32
    scf.if %13 {
      %c0_9 = arith.constant 0 : index
      %c0_10 = arith.constant 0 : index
      %14 = vector.load %arg15[%c0_9, %c0_10] : memref<8x1024xf32, #tpu.memory_space<vmem>>, vector<8x1024xf32>
      %c0_11 = arith.constant 0 : index
      %c0_12 = arith.constant 0 : index
      %15 = vector.load %arg6[%c0_11, %c0_12] : memref<1x1024xf32, #tpu.memory_space<vmem>>, vector<1x1024xf32>
      %16 = vector.broadcast %15 : vector<1x1024xf32> to vector<8x1024xf32>
      %17 = arith.mulf %14, %16 : vector<8x1024xf32>
      %c0_13 = arith.constant 0 : index
      %c0_14 = arith.constant 0 : index
      %18 = vector.load %arg7[%c0_13, %c0_14] : memref<1x1024xf32, #tpu.memory_space<vmem>>, vector<1x1024xf32>
      %19 = vector.broadcast %18 : vector<1x1024xf32> to vector<8x1024xf32>
      %20 = arith.addf %17, %19 : vector<8x1024xf32>
      %cst_15 = arith.constant 0.000000e+00 : f32
      %21 = vector.broadcast %cst_15 : f32 to vector<8x1024xf32>
      %22 = arith.maximumf %20, %21 : vector<8x1024xf32>
      %c0_16 = arith.constant 0 : index
      %c0_17 = arith.constant 0 : index
      %23 = vector.load %arg8[%c0_16, %c0_17] : memref<1024x384xf32, #tpu.memory_space<vmem>>, vector<1024x384xf32>
      %cst_18 = arith.constant dense<0.000000e+00> : vector<8x384xf32>
      %24 = tpu.matmul %22, %23, %cst_18 {dimension_numbers = #tpu.dot_dimension_numbers<[1], [0], [0], [1], [0, 0, 1, 1], [], []>} : vector<8x1024xf32>, vector<1024x384xf32>, vector<8x384xf32> -> vector<8x384xf32>
      %c0_19 = arith.constant 0 : index
      %c0_20 = arith.constant 0 : index
      %25 = vector.load %arg9[%c0_19, %c0_20] : memref<1x384xf32, #tpu.memory_space<vmem>>, vector<1x384xf32>
      %26 = vector.broadcast %25 : vector<1x384xf32> to vector<8x384xf32>
      %27 = arith.mulf %24, %26 : vector<8x384xf32>
      %c0_21 = arith.constant 0 : index
      %c0_22 = arith.constant 0 : index
      %28 = vector.load %arg10[%c0_21, %c0_22] : memref<1x384xf32, #tpu.memory_space<vmem>>, vector<1x384xf32>
      %29 = vector.broadcast %28 : vector<1x384xf32> to vector<8x384xf32>
      %30 = arith.addf %27, %29 : vector<8x384xf32>
      %cst_23 = arith.constant 0.000000e+00 : f32
      %31 = vector.broadcast %cst_23 : f32 to vector<8x384xf32>
      %32 = arith.maximumf %30, %31 : vector<8x384xf32>
      %c0_24 = arith.constant 0 : index
      %c0_25 = arith.constant 0 : index
      %33 = vector.load %arg11[%c0_24, %c0_25] : memref<384x128xf32, #tpu.memory_space<vmem>>, vector<384x128xf32>
      %cst_26 = arith.constant dense<0.000000e+00> : vector<8x128xf32>
      %34 = tpu.matmul %32, %33, %cst_26 {dimension_numbers = #tpu.dot_dimension_numbers<[1], [0], [0], [1], [0, 0, 1, 1], [], []>} : vector<8x384xf32>, vector<384x128xf32>, vector<8x128xf32> -> vector<8x128xf32>
      %c0_27 = arith.constant 0 : index
      %c0_28 = arith.constant 0 : index
      %35 = vector.load %arg12[%c0_27, %c0_28] : memref<1x128xf32, #tpu.memory_space<vmem>>, vector<1x128xf32>
      %36 = vector.broadcast %35 : vector<1x128xf32> to vector<8x128xf32>
      %37 = arith.addf %34, %36 : vector<8x128xf32>
      %c0_29 = arith.constant 0 : index
      %c0_30 = arith.constant 0 : index
      %38 = vector.load %arg13[%c0_29, %c0_30] : memref<8x128xf32, #tpu.memory_space<vmem>>, vector<8x128xf32>
      tpu.vector_store %arg13[%c0_29, %c0_30], %37 {strides = array<i32>} : memref<8x128xf32, #tpu.memory_space<vmem>>, vector<8x128xf32>,
    } else {
    }
    return
  }
  func.func @transform_0(%arg0: i32) -> (i32, i32) {
    %c0_i32 = arith.constant 0 : i32
    %c0_i32_0 = arith.constant 0 : i32
    %c0_i32_1 = arith.constant 0 : i32
    return %c0_i32, %c0_i32_0 : i32, i32
  }
  func.func @transform_1(%arg0: i32) -> (i32, i32) {
    %c0_i32 = arith.constant 0 : i32
    %c0_i32_0 = arith.constant 0 : i32
    %c0_i32_1 = arith.constant 0 : i32
    return %c0_i32, %c0_i32_0 : i32, i32
  }
  func.func @transform_2(%arg0: i32) -> (i32, i32) {
    %c0_i32 = arith.constant 0 : i32
    %c0_i32_0 = arith.constant 0 : i32
    %c0_i32_1 = arith.constant 0 : i32
    return %c0_i32, %c0_i32_0 : i32, i32
  }
  func.func @transform_3(%arg0: i32) -> (i32, i32) {
    %c0_i32 = arith.constant 0 : i32
    %c0_i32_0 = arith.constant 0 : i32
    %c0_i32_1 = arith.constant 0 : i32
    return %c0_i32, %c0_i32_0 : i32, i32
  }
  func.func @transform_4(%arg0: i32) -> (i32, i32) {
    %c0_i32 = arith.constant 0 : i32
    %c0_i32_0 = arith.constant 0 : i32
    return %arg0, %c0_i32 : i32, i32
  }
  func.func @transform_5(%arg0: i32) -> (i32, i32) {
    %c0_i32 = arith.constant 0 : i32
    %c0_i32_0 = arith.constant 0 : i32
    %c0_i32_1 = arith.constant 0 : i32
    return %c0_i32, %c0_i32_0 : i32, i32
  }
  func.func @transform_6(%arg0: i32) -> (i32, i32) {
    %c0_i32 = arith.constant 0 : i32
    %c0_i32_0 = arith.constant 0 : i32
    %c0_i32_1 = arith.constant 0 : i32
    return %c0_i32, %c0_i32_0 : i32, i32
  }
  func.func @transform_7(%arg0: i32) -> (i32, i32) {
    %c0_i32 = arith.constant 0 : i32
    %c0_i32_0 = arith.constant 0 : i32
    %c0_i32_1 = arith.constant 0 : i32
    return %c0_i32, %c0_i32_0 : i32, i32
  }
  func.func @transform_8(%arg0: i32) -> (i32, i32) {
    %c0_i32 = arith.constant 0 : i32
    %c0_i32_0 = arith.constant 0 : i32
    %c0_i32_1 = arith.constant 0 : i32
    return %c0_i32, %c0_i32_0 : i32, i32
  }
  func.func @transform_9(%arg0: i32) -> (i32, i32) {
    %c0_i32 = arith.constant 0 : i32
    %c0_i32_0 = arith.constant 0 : i32
    %c0_i32_1 = arith.constant 0 : i32
    return %c0_i32, %c0_i32_0 : i32, i32
  }
  func.func @transform_10(%arg0: i32) -> (i32, i32) {
    %c0_i32 = arith.constant 0 : i32
    %c0_i32_0 = arith.constant 0 : i32
    %c0_i32_1 = arith.constant 0 : i32
    return %c0_i32, %c0_i32_0 : i32, i32
  }
  func.func @transform_11(%arg0: i32) -> (i32, i32) {
    %c0_i32 = arith.constant 0 : i32
    %c0_i32_0 = arith.constant 0 : i32
    %c0_i32_1 = arith.constant 0 : i32
    return %c0_i32, %c0_i32_0 : i32, i32
  }
  func.func @transform_12(%arg0: i32) -> (i32, i32) {
    %c0_i32 = arith.constant 0 : i32
    %c0_i32_0 = arith.constant 0 : i32
    %c0_i32_1 = arith.constant 0 : i32
    return %c0_i32, %c0_i32_0 : i32, i32
  }
}

</mosaic_0001>

<bundles_post_ra>
// kernel: forward.1
= control target key start
LH: loop header
LB: loop body
LE: loop exit
PB: predicated region body
PF: predicated region fallthrough
CT: control target
= control target key end

     0   :  { %s12725_s0 = inlined_call_operand.vmem [shape: f32[8,128], index: 0, kind: input, shape index: {}]   ;;  %s12726_s1 = inlined_call_operand.hbm [shape: f32[128,5120], index: 1, kind: input, shape index: {}]   ;;  %s12727_s2 = inlined_call_operand.hbm [shape: f32[1,5120], index: 2, kind: input, shape index: {}]   ;;  %s12728_s3 = inlined_call_operand.hbm [shape: f32[1,5120], index: 3, kind: input, shape index: {}]   ;;  %s12729_s4 = inlined_call_operand.hbm [shape: f32[5120,1024], index: 4, kind: input, shape index: {}]   ;;  %s12730_s5 = inlined_call_operand.hbm [shape: f32[1,1024], index: 5, kind: input, shape index: {}]   ;;  %s12731_s6 = inlined_call_operand.hbm [shape: f32[1,1024], index: 6, kind: input, shape index: {}]   ;;  %s12732_s7 = inlined_call_operand.hbm [shape: f32[1024,384], index: 7, kind: input, shape index: {}]   ;;  %s12733_s8 = inlined_call_operand.hbm [shape: f32[1,384], index: 8, kind: input, shape index: {}]   ;;  %s12734_s9 = inlined_call_operand.hbm [shape: f32[1,384], index: 9, kind: input, shape index: {}]   ;;  %s12735_s10 = inlined_call_operand.hbm [shape: f32[384,128], index: 10, kind: input, shape index: {}]   ;;  %s12736_s11 = inlined_call_operand.hbm [shape: f32[1,128], index: 11, kind: input, shape index: {}]   ;;  %s12737_s12 = inlined_call_operand.vmem [shape: f32[8,128], index: 12, kind: output, shape index: {}]  }
   0x1   :  { %12742 = sst [smem:[#allocation29_spill]] %s12725_s0 }
   0x2   :  { %12743 = sst [smem:[#allocation30_spill]] %s12727_s2 }
   0x3   :  { %12744 = sst [smem:[#allocation31_spill]] %s12737_s12 }
   0x4   :  { %17 = vsyncpa [#allocation5], 0 }
   0x5   :  { %18 = vsyncpa [#allocation7], 0 }
   0x6   :  { %19 = vsyncpa [#allocation10], 0 }
   0x7   :  { %21 = vsyncpa [#allocation10 + $0x1], 0 }
   0x8   :  { %22 = vsyncpa [#allocation13], 0 }
   0x9   :  { %23 = vsyncpa [#allocation16], 0 }
   0xa   :  { %24 = vsyncpa [#allocation19], 0  ;;  %s10692_s21 = smov 0   ;;  %s10694_s22 = smov 0  }
   0xb   :  { %s10696_s23 = smov 0   ;;  %s10698_s24 = smov 0  }
   0xc LB: > { %s10604_s25 = smov [#allocation6]   ;;  %s10713_s27 = sadd.s32 4294967295, %s10602_s24   ;;  %s10602_s24 = sphi %s10698_s24, %s12773_s24   ;;  %s10598_s23 = sphi %s10696_s23, %s12772_s23   ;;  %s10594_s22 = sphi %s10694_s22, %s12771_s22   ;;  %s10590_s21 = sphi %s10692_s21, %s12770_s21  }
   0xd   : > { %s342_s26 = sshll.u32 %s10604_s25, 4  ;;  %p7406_p0 = scmp.ge.s32.totalorder %s10602_s24, 1  ;;  %s10719_s26 = int_to_ptr.vmem [resolvable:$true] %s342_s26 }
   0xe   : > { %p12740_p1 = scmp.eq.s32.totalorder %s10713_s27, 0  ;;  %p313_p2 = scmp.lt.s32.totalorder %s10602_s24, 5 }
   0xf   : > { %s10605_s29 = smov [#allocation11]   ;;  %s10606_s13 = smov [#allocation12]  }
  0x10   : > { %p10721_p4 = pnand %p7406_p0, %p313_p2  ;;  %s364_s30 = sshll.u32 %s10605_s29, 4  ;;  %s10727_s30 = int_to_ptr.vmem [resolvable:$true] %s364_s30 }
  0x11   : > { %s375_s14 = sshll.u32 %s10606_s13, 4  ;;  %s10607_s16 = smov [#allocation15]   ;;  %s10735_s14 = int_to_ptr.vmem [resolvable:$true] %s375_s14 }
  0x12   : > { %s12745_s28 = scalar_select %p10721_p4, 1, 0 }
  0x13   : > { %p10110_p5 = pneg %p10721_p4  ;;  %s10737_s17 = sshll.u32 %s10607_s16, 4  ;;  %s400_s17 = int_to_ptr.vmem [resolvable:$true] %s10737_s17 }
  0x14   : > { %12746 = sst [smem:[#allocation28_spill]] %s12745_s28  ;;  %s12748_s2 = sld [smem:[#allocation30_spill]] }
  0x15   : > { %p10731_p6 = pnand %p10110_p5, %p12740_p1 }
  0x17   : > { %p10747_p8 = pneg %p10731_p6 }
  0x1a   : > { %s10234_s20 = scalar_lea.hbm %s12748_s2, 640 }
  0x1b   : > { %p10235_p7 = scmp.ne.s32.totalorder %s12748_s2, %s10234_s20  ;;  %p10241_p11 = scmp.lt.u32.totalorder %s10234_s20, %s12748_s2 }
  0x1d   : > { %p10237_p9 = pnand %p10747_p8, %p10235_p7 }
  0x1f   : > { %p10238_p10 = pneg %p10237_p9 }
  0x21   : > { %p10243_p12 = pnand %p10241_p11, %p10238_p10 }
  0x23   : > { %10246 = shalt.err (!%p10243_p12)
}
  0x24   : > { %s10247_s18 = scalar_lea.vmem %s10719_s26, 640  ;;  %p10255_p5 = scmp.lt.s32.totalorder %s10719_s26, %s10719_s26 }
  0x25   : > { %p10248_p13 = scmp.ne.s32.totalorder %s10719_s26, %s10247_s18  ;;  %p10256_p3 = scmp.lt.s32.totalorder %s10247_s18, %s10247_s18 }
  0x27   : > { %p10250_p0 = pnand %p10248_p13, %p10747_p8  ;;  %p10257_p7 = por %p10256_p3, %p10255_p5 }
  0x29   : > { %p10251_p2 = pneg %p10250_p0 }
  0x2b   : > { %p10258_p9 = pnand %p10257_p7, %p10251_p2 }
  0x2d   : > { %10261 = shalt.err (!%p10258_p9)
}
  0x2e   : > { %10116 = dma.hbm_to_vmem [thread:$0]  (!%p10731_p6), %s12748_s2, 640, %s10719_s26, [#allocation7]  }
  0x2f   : > { %s10262_s29 = scalar_lea.hbm %s12730_s5, 128 }
  0x30   : > { %p10263_p10 = scmp.ne.s32.totalorder %s12730_s5, %s10262_s29  ;;  %p10269_p12 = scmp.lt.u32.totalorder %s10262_s29, %s12730_s5 }
  0x32   : > { %p10265_p3 = pnand %p10263_p10, %p10747_p8 }
  0x34   : > { %p10266_p11 = pneg %p10265_p3 }
  0x36   : > { %p10271_p13 = pnand %p10269_p12, %p10266_p11 }
  0x38   : > { %10274 = shalt.err (!%p10271_p13)
}
  0x39   : > { %s10275_s26 = scalar_lea.vmem %s10727_s30, 128  ;;  %p10283_p7 = scmp.lt.s32.totalorder %s10727_s30, %s10727_s30 }
  0x3a   : > { %p10276_p0 = scmp.ne.s32.totalorder %s10727_s30, %s10275_s26  ;;  %p10284_p9 = scmp.lt.s32.totalorder %s10275_s26, %s10275_s26 }
  0x3c   : > { %p10278_p2 = pnand %p10276_p0, %p10747_p8  ;;  %p10285_p10 = por %p10284_p9, %p10283_p7 }
  0x3e   : > { %p10279_p5 = pneg %p10278_p2 }
  0x40   : > { %p10286_p3 = pnand %p10285_p10, %p10279_p5 }
  0x42   : > { %10289 = shalt.err (!%p10286_p3)
}
  0x43   : > { %10122 = dma.hbm_to_vmem [thread:$0]  (!%p10731_p6), %s12730_s5, 128, %s10727_s30, [#allocation10]  }
  0x44   : > { %s10290_s20 = scalar_lea.hbm %s12731_s6, 128 }
  0x45   : > { %p10291_p11 = scmp.ne.s32.totalorder %s12731_s6, %s10290_s20  ;;  %p10297_p0 = scmp.lt.u32.totalorder %s10290_s20, %s12731_s6 }
  0x47   : > { %p10293_p12 = pnand %p10291_p11, %p10747_p8 }
  0x49   : > { %p10294_p13 = pneg %p10293_p12 }
  0x4b   : > { %p10299_p2 = pnand %p10297_p0, %p10294_p13 }
  0x4d   : > { %10302 = shalt.err (!%p10299_p2)
}
  0x4e   : > { %s10303_s30 = scalar_lea.vmem %s10735_s14, 128  ;;  %p10311_p10 = scmp.lt.s32.totalorder %s10735_s14, %s10735_s14 }
  0x4f   : > { %p10304_p5 = scmp.ne.s32.totalorder %s10735_s14, %s10303_s30  ;;  %p10312_p3 = scmp.lt.s32.totalorder %s10303_s30, %s10303_s30 }
  0x51   : > { %p10306_p7 = pnand %p10304_p5, %p10747_p8  ;;  %p10313_p11 = por %p10312_p3, %p10311_p10 }
  0x53   : > { %p10307_p9 = pneg %p10306_p7 }
  0x55   : > { %p10314_p12 = pnand %p10313_p11, %p10307_p9 }
  0x57   : > { %10317 = shalt.err (!%p10314_p12)
}
  0x58   : > { %10125 = dma.hbm_to_vmem [thread:$0]  (!%p10731_p6), %s12731_s6, 128, %s10735_s14, [#allocation13]  }
  0x59   : > { %s10608_s28 = smov [#allocation18]   ;;  %s10318_s25 = scalar_lea.hbm %s12733_s8, 48 }
  0x5a   : > { %s420_s12 = sshll.u32 %s10608_s28, 4  ;;  %p10319_p13 = scmp.ne.s32.totalorder %s12733_s8, %s10318_s25  ;;  %s421_s12 = int_to_ptr.vmem [resolvable:$true] %s420_s12 }
  0x5b   : > { %p10325_p5 = scmp.lt.u32.totalorder %s10318_s25, %s12733_s8 }
  0x5c   : > { %p10321_p0 = pnand %p10319_p13, %p10747_p8 }
  0x5e   : > { %p10322_p2 = pneg %p10321_p0 }
  0x60   : > { %p10327_p7 = pnand %p10325_p5, %p10322_p2 }
  0x62   : > { %10330 = shalt.err (!%p10327_p7)
}
  0x63   : > { %s10331_s14 = scalar_lea.vmem %s400_s17, 48  ;;  %s10338_s26 = scalar_lea.vmem %s400_s17, 64 }
  0x64   : > { %p10332_p9 = scmp.ne.s32.totalorder %s400_s17, %s10331_s14  ;;  %p10339_p11 = scmp.lt.s32.totalorder %s400_s17, %s400_s17 }
  0x65   : > { %p10340_p12 = scmp.lt.s32.totalorder %s10338_s26, %s10331_s14 }
  0x66   : > { %p10334_p10 = pnand %p10332_p9, %p10747_p8 }
  0x67   : > { %p10341_p1 = por %p10340_p12, %p10339_p11 }
  0x68   : > { %p10335_p3 = pneg %p10334_p10 }
  0x6a   : > { %p10342_p4 = pnand %p10341_p1, %p10335_p3 }
  0x6c   : > { %10345 = shalt.err (!%p10342_p4)
}
  0x6d   : > { %10131 = dma.hbm_to_vmem [thread:$0]  (!%p10731_p6), %s12733_s8, 48, %s400_s17, [#allocation16]  }
  0x6e   : > { %s10346_s25 = scalar_lea.hbm %s12735_s10, 6144 }
  0x6f   : > { %p10347_p13 = scmp.ne.s32.totalorder %s12735_s10, %s10346_s25  ;;  %p10353_p4 = scmp.lt.u32.totalorder %s10346_s25, %s12735_s10 }
  0x71   : > { %p10349_p0 = pnand %p10347_p13, %p10747_p8 }
  0x73   : > { %p10350_p1 = pneg %p10349_p0 }
  0x75   : > { %p10355_p2 = pnand %p10353_p4, %p10350_p1 }
  0x77   : > { %10358 = shalt.err (!%p10355_p2)
}
  0x78   : > { %s10359_s14 = scalar_lea.vmem %s421_s12, 6144  ;;  %p10367_p10 = scmp.lt.s32.totalorder %s421_s12, %s421_s12 }
  0x79   : > { %p10360_p5 = scmp.ne.s32.totalorder %s421_s12, %s10359_s14  ;;  %p10368_p3 = scmp.lt.s32.totalorder %s10359_s14, %s10359_s14 }
  0x7b   : > { %p10362_p7 = pnand %p10360_p5, %p10747_p8  ;;  %p10369_p11 = por %p10368_p3, %p10367_p10 }
  0x7d   : > { %p10363_p9 = pneg %p10362_p7 }
  0x7f   : > { %p10370_p12 = pnand %p10369_p11, %p10363_p9 }
  0x81   : > { %10373 = shalt.err (!%p10370_p12)
}
  0x82   : > { %s10609_s17 = smov 128   ;;  %s10610_s26 = smov 8  }
  0x83   : > { %10137 = dma.hbm_to_vmem [thread:$0]  (!%p10731_p6), %s12735_s10, 6144, %s421_s12, [#allocation19], %s10609_s17, %s10609_s17, %s10610_s26  }
  0x84   : > { %s10611_s19 = smov [#allocation4]   ;;  %s10374_s16 = scalar_lea.hbm %s12726_s1, 81920 }
  0x85   : > { %s328_s20 = sshll.u32 %s10611_s19, 4  ;;  %p10375_p13 = scmp.ne.s32.totalorder %s12726_s1, %s10374_s16  ;;  %s329_s20 = int_to_ptr.vmem [resolvable:$true] %s328_s20 }
  0x86   : > { %p10381_p4 = scmp.lt.u32.totalorder %s10374_s16, %s12726_s1 }
  0x87   : > { %p10377_p0 = pnand %p10375_p13, %p10747_p8 }
  0x89   : > { %p10378_p1 = pneg %p10377_p0 }
  0x8b   : > { %p10383_p2 = pnand %p10381_p4, %p10378_p1 }
  0x8d   : > { %10386 = shalt.err (!%p10383_p2)
}
  0x8e   : > { %s10387_s12 = scalar_lea.vmem %s329_s20, 81920  ;;  %p10395_p10 = scmp.lt.s32.totalorder %s329_s20, %s329_s20 }
  0x8f   : > { %p10388_p5 = scmp.ne.s32.totalorder %s329_s20, %s10387_s12  ;;  %p10396_p3 = scmp.lt.s32.totalorder %s10387_s12, %s10387_s12 }
  0x91   : > { %p10390_p7 = pnand %p10388_p5, %p10747_p8  ;;  %p10397_p11 = por %p10396_p3, %p10395_p10 }
  0x93   : > { %p10391_p9 = pneg %p10390_p7 }
  0x95   : > { %p10398_p12 = pnand %p10397_p11, %p10391_p9 }
  0x97   : > { %10401 = shalt.err (!%p10398_p12)
}
  0x98   : > { %s10612_s17 = smov 5120   ;;  %s10613_s26 = smov 320  }
  0x99   : > { %10113 = dma.hbm_to_vmem [thread:$0]  (!%p10731_p6), %s12726_s1, 81920, %s329_s20, [#allocation5], %s10612_s17, %s10612_s17, %s10613_s26  }
  0x9a   : > { %s10614_s28 = smov [#allocation8]   ;;  %s10615_s25 = smov [#allocation14]  }
  0x9b   : > { %s353_s19 = sshll.u32 %s10614_s28, 4  ;;  %s385_s29 = sshll.u32 %s10615_s25, 4  ;;  %s354_s19 = int_to_ptr.vmem [resolvable:$true] %s353_s19  ;;  %s10869_s29 = int_to_ptr.vmem [resolvable:$true] %s385_s29 }
  0x9c   : > { %s10402_s30 = scalar_lea.hbm %s12728_s3, 640 }
  0x9d   : > { %p10403_p13 = scmp.ne.s32.totalorder %s12728_s3, %s10402_s30  ;;  %p10409_p4 = scmp.lt.u32.totalorder %s10402_s30, %s12728_s3 }
  0x9f   : > { %p10405_p0 = pnand %p10403_p13, %p10747_p8 }
  0xa1   : > { %p10406_p1 = pneg %p10405_p0 }
  0xa3   : > { %p10411_p2 = pnand %p10409_p4, %p10406_p1 }
  0xa5   : > { %10414 = shalt.err (!%p10411_p2)
}
  0xa6   : > { %s10415_s17 = scalar_lea.vmem %s354_s19, 640  ;;  %p10423_p10 = scmp.lt.s32.totalorder %s354_s19, %s354_s19 }
  0xa7   : > { %p10416_p5 = scmp.ne.s32.totalorder %s354_s19, %s10415_s17  ;;  %p10424_p3 = scmp.lt.s32.totalorder %s10415_s17, %s10415_s17 }
  0xa9   : > { %p10418_p7 = pnand %p10416_p5, %p10747_p8  ;;  %p10425_p11 = por %p10424_p3, %p10423_p10 }
  0xab   : > { %p10419_p9 = pneg %p10418_p7 }
  0xad   : > { %p10426_p12 = pnand %p10425_p11, %p10419_p9 }
  0xaf   : > { %10429 = shalt.err (!%p10426_p12)
}
  0xb0   : > { %10119 = dma.hbm_to_vmem [thread:$0]  (!%p10731_p6), %s12728_s3, 640, %s354_s19, [#allocation7]  }
  0xb1   : > { %s10430_s16 = scalar_lea.hbm %s12732_s7, 49152 }
  0xb2   : > { %p10431_p13 = scmp.ne.s32.totalorder %s12732_s7, %s10430_s16  ;;  %p10437_p4 = scmp.lt.u32.totalorder %s10430_s16, %s12732_s7 }
  0xb4   : > { %p10433_p0 = pnand %p10431_p13, %p10747_p8 }
  0xb6   : > { %p10434_p1 = pneg %p10433_p0 }
  0xb8   : > { %p10439_p2 = pnand %p10437_p4, %p10434_p1 }
  0xba   : > { %10442 = shalt.err (!%p10439_p2)
}
  0xbb   : > { %s10443_s19 = scalar_lea.vmem %s10869_s29, 49152  ;;  %p10451_p10 = scmp.lt.s32.totalorder %s10869_s29, %s10869_s29 }
  0xbc   : > { %p10444_p5 = scmp.ne.s32.totalorder %s10869_s29, %s10443_s19  ;;  %p10452_p3 = scmp.lt.s32.totalorder %s10443_s19, %s10443_s19 }
  0xbe   : > { %p10446_p7 = pnand %p10444_p5, %p10747_p8  ;;  %p10453_p11 = por %p10452_p3, %p10451_p10 }
  0xc0   : > { %p10447_p9 = pneg %p10446_p7 }
  0xc2   : > { %p10454_p12 = pnand %p10453_p11, %p10447_p9 }
  0xc4   : > { %10457 = shalt.err (!%p10454_p12)
}
  0xc5   : > { %s10616_s2 = smov 384   ;;  %s10617_s20 = smov 24  }
  0xc6   : > { %10128 = dma.hbm_to_vmem [thread:$0]  (!%p10731_p6), %s12732_s7, 49152, %s10869_s29, [#allocation13], %s10616_s2, %s10616_s2, %s10617_s20  }
  0xc7   : > { %s10618_s0 = smov [#allocation17]   ;;  %s10619_s25 = smov [#allocation20]  }
  0xc8   : > { %s410_s28 = sshll.u32 %s10618_s0, 4  ;;  %s434_s16 = sshll.u32 %s10619_s25, 4  ;;  %s411_s28 = int_to_ptr.vmem [resolvable:$true] %s410_s28  ;;  %s10912_s16 = int_to_ptr.vmem [resolvable:$true] %s434_s16 }
  0xc9   : > { %s10458_s14 = scalar_lea.hbm %s12734_s9, 48 }
  0xca   : > { %p10459_p13 = scmp.ne.s32.totalorder %s12734_s9, %s10458_s14  ;;  %p10465_p4 = scmp.lt.u32.totalorder %s10458_s14, %s12734_s9 }
  0xcc   : > { %p10461_p0 = pnand %p10459_p13, %p10747_p8 }
  0xce   : > { %p10462_p1 = pneg %p10461_p0 }
  0xd0   : > { %p10467_p2 = pnand %p10465_p4, %p10462_p1 }
  0xd2   : > { %10470 = shalt.err (!%p10467_p2)
}
  0xd3   : > { %s10471_s2 = scalar_lea.vmem %s411_s28, 48  ;;  %s10478_s20 = scalar_lea.vmem %s411_s28, 64 }
  0xd4   : > { %p10472_p5 = scmp.ne.s32.totalorder %s411_s28, %s10471_s2  ;;  %p10479_p10 = scmp.lt.s32.totalorder %s411_s28, %s411_s28 }
  0xd5   : > { %p10480_p3 = scmp.lt.s32.totalorder %s10478_s20, %s10471_s2 }
  0xd6   : > { %p10474_p7 = pnand %p10472_p5, %p10747_p8 }
  0xd7   : > { %p10481_p11 = por %p10480_p3, %p10479_p10 }
  0xd8   : > { %p10475_p9 = pneg %p10474_p7 }
  0xda   : > { %p10482_p12 = pnand %p10481_p11, %p10475_p9 }
  0xdc   : > { %10485 = shalt.err (!%p10482_p12)
}
  0xdd   : > { %10134 = dma.hbm_to_vmem [thread:$0]  (!%p10731_p6), %s12734_s9, 48, %s411_s28, [#allocation16]  }
  0xde   : > { %s10486_s30 = scalar_lea.hbm %s12736_s11, 16 }
  0xdf   : > { %p10487_p13 = scmp.ne.s32.totalorder %s12736_s11, %s10486_s30  ;;  %p10493_p4 = scmp.lt.u32.totalorder %s10486_s30, %s12736_s11 }
  0xe1   : > { %p10489_p0 = pnand %p10487_p13, %p10747_p8 }
  0xe3   : > { %p10490_p1 = pneg %p10489_p0 }
  0xe5   : > { %p10495_p2 = pnand %p10493_p4, %p10490_p1 }
  0xe7   : > { %10498 = shalt.err (!%p10495_p2)
}
  0xe8   : > { %s10499_s28 = scalar_lea.vmem %s10912_s16, 16  ;;  %s10506_s29 = scalar_lea.vmem %s10912_s16, 32 }
  0xe9   : > { %p10500_p5 = scmp.ne.s32.totalorder %s10912_s16, %s10499_s28  ;;  %p10507_p10 = scmp.lt.s32.totalorder %s10912_s16, %s10912_s16 }
  0xea   : > { %p10508_p3 = scmp.lt.s32.totalorder %s10506_s29, %s10499_s28 }
  0xeb   : > { %p10502_p7 = pnand %p10500_p5, %p10747_p8 }
  0xec   : > { %p10509_p11 = por %p10508_p3, %p10507_p10 }
  0xed   : > { %p10503_p9 = pneg %p10502_p7 }
  0xef   : > { %p10510_p12 = pnand %p10509_p11, %p10503_p9 }
  0xf1   : > { %10513 = shalt.err (!%p10510_p12)
}
  0xf2   : > { %10140 = dma.hbm_to_vmem [thread:$0]  (!%p10731_p6), %s12736_s11, 16, %s10912_s16, [#allocation19]  }
  0xf3   : > { %s10957_s15 = sadd.s32 1, %s10602_s24   ;;  %s121_s13 = sadd.s32 1, %s10598_s23 }
  0xf4   : > { %s118_s26 = ssub.s32 %s10602_s24, %s10957_s15  ;;  %p128_p8 = scmp.ne.s32.totalorder %s10598_s23, %s10594_s22 }
  0xf5   : > { %p119_p13 = scmp.eq.s32.totalorder %s118_s26, 0  ;;  %p129_p0 = scmp.eq.s32.totalorder %s10602_s24, 0 }
  0xf6   : > { %p134_p1 = scmp.ne.s32.totalorder %s10594_s22, %s10590_s21  ;;  %p10155_p4 = scmp.lt.s32.totalorder %s10602_s24, 4 }
  0xf7   : > { %s10969_s0 = scalar_select %p119_p13, %s10598_s23, %s121_s13  }
  0xf8   : > { %p130_p2 = por %p129_p0, %p128_p8  ;;  %p12750_p5 = scmp.eq.s32.totalorder %s10713_s27, 0 }
  0xf9   : > { %s445_s18 = sand.u32 1, %s10602_s24   ;;  %s447_s16 = sand.u32 1, %s10598_s23  }
  0xfa   : > { %p10973_p7 = por %p12750_p5, %p134_p1  ;;  %s10066_s30 = smul.u32 10240, %s447_s16 }
  0xfb   : > { %s7440_s14 = smul.u32 163840, %s10602_s24  ;;  %p10980_p6 = pnand %p10155_p4, %p130_p2 }
  0xfc   : > { %s449_s28 = scalar_lea.vmem [#allocation9], %s10066_s30  ;;  %s10991_s24 = scalar_lea.sflag [#allocation10], %s445_s18 }
  0xfd   : > { %s10987_s21 = scalar_lea.hbm %s12729_s4, %s7440_s14  ;;  %s457_s29 = sshll.u32 %s449_s28, 4  ;;  %s10989_s29 = int_to_ptr.vmem [resolvable:$true] %s457_s29 }
  0xfe   : > { %s10514_s2 = scalar_lea.hbm %s10987_s21, 163840  ;;  %p10516_p10 = pneg %p10980_p6 }
  0xff   : > { %p10515_p9 = scmp.ne.s32.totalorder %s10987_s21, %s10514_s2  ;;  %s10519_s26 = scalar_lea.hbm %s12729_s4, 655360 }
 0x100   : > { %p10520_p12 = scmp.lt.u32.totalorder %s10987_s21, %s12729_s4  ;;  %p10521_p8 = scmp.lt.u32.totalorder %s10519_s26, %s10514_s2 }
 0x101   : > { %p10517_p3 = pnand %p10516_p10, %p10515_p9  ;;  %p10523_p0 = scmp.lt.u32.totalorder %s10514_s2, %s10987_s21 }
 0x102   : > { %p10522_p13 = por %p10521_p8, %p10520_p12 }
 0x103   : > { %p10518_p11 = pneg %p10517_p3 }
 0x104   : > { %p10524_p1 = por %p10523_p0, %p10522_p13 }
 0x106   : > { %p10525_p4 = pnand %p10524_p1, %p10518_p11 }
 0x108   : > { %10528 = shalt.err (!%p10525_p4)
}
 0x109   : > { %s10529_s18 = scalar_lea.vmem %s10989_s29, 163840  ;;  %s10620_s30 = smov [#allocation9]  }
 0x10a   : > { %p10530_p2 = scmp.ne.s32.totalorder %s10989_s29, %s10529_s18  ;;  %s10534_s19 = sshll.u32 %s10620_s30, 4  ;;  %s10535_s19 = int_to_ptr.vmem [resolvable:$false] %s10534_s19 }
 0x10b   : > { %s10536_s17 = scalar_lea.vmem %s10535_s19, 327680  ;;  %p10537_p3 = scmp.lt.s32.totalorder %s10989_s29, %s10535_s19 }
 0x10c   : > { %p10532_p5 = pnand %p10530_p2, %p10516_p10  ;;  %p10538_p12 = scmp.lt.s32.totalorder %s10536_s17, %s10529_s18 }
 0x10e   : > { %p10533_p9 = pneg %p10532_p5  ;;  %p10539_p8 = por %p10538_p12, %p10537_p3 }
 0x110   : > { %p10540_p13 = pnand %p10539_p8, %p10533_p9 }
 0x112   : > { %10543 = shalt.err (!%p10540_p13)
}
 0x113   : > { %s10621_s28 = smov 1024   ;;  %s10622_s2 = smov 64  }
 0x114   : > { %10144 = dma.hbm_to_vmem [thread:$0]  (!%p10980_p6), %s10987_s21, 163840, %s10989_s29, %s10991_s24, %s10621_s28, %s10621_s28, %s10622_s2  }
 0x115   : > { %s12753_s20 = sld [smem:[#allocation28_spill]] }
 0x11b   : > { %p12754_p10 = scmp.ne.s32.totalorder %s12753_s20, 0 }
 0x11c   : > { %p12755_p11 = scmp.eq.s32.totalorder (!%p12754_p10), %s10713_s27, 0 }
 0x11d   : > { %469 = sbr.rel (%p12754_p10) target bundleno = 2418 (0x972), region = 68 }
 0x124   : > { %10561 = dma.done.wait (%p12755_p11), [#allocation5], 81920   ;;  %p12756_p0 = pmov %p12755_p11 }
 0x126   : > { %10563 = vsyncadd (%p12756_p0), [#allocation5], 4294885376  ;;  %p12757_p1 = pmov %p12756_p0 }
 0x127   : > { %p12758_p4 = pmov %p12756_p0 }
 0x128   : > { %10565 = dma.done.wait (%p12757_p1), [#allocation7], 1280  }
 0x129   : > { %10567 = vsyncadd (%p12758_p4), [#allocation7], 4294966016  ;;  %s483_s12 = sand.u32 1, %s10713_s27   ;;  %s485_s21 = sand.u32 1, %s10594_s22  }
 0x12a   : > { %s10067_s29 = smul.u32 10240, %s485_s21  ;;  %s484_s24 = scalar_lea.sflag [#allocation10], %s483_s12 }
 0x12c   : > { %s11031_s13 = scalar_lea.vmem [#allocation9], %s10067_s29 }
 0x12d   : > { %10569 = dma.done.wait (%p10973_p7), %s484_s24, 163840  }
 0x12e   : > { %10571 = vsyncadd (%p10973_p7), %s484_s24, 4294803456  ;;  %p12759_p6 = pmov %p12756_p0 }
 0x12f   : > { %p12760_p2 = pmov %p12756_p0 }
 0x130   : > { %10573 = dma.done.wait (%p12759_p6), [#allocation10], 128  }
 0x131   : > { %10575 = vsyncadd (%p12760_p2), [#allocation10], 4294967168  ;;  %p12761_p5 = pmov %p12756_p0 }
 0x132   : > { %p12762_p9 = pmov %p12756_p0 }
 0x133   : > { %10577 = dma.done.wait (%p12761_p5), [#allocation13], 49280  }
 0x134   : > { %10579 = vsyncadd (%p12762_p9), [#allocation13], 4294918016  ;;  %p12763_p3 = pmov %p12756_p0 }
 0x135   : > { %p12764_p12 = pmov %p12756_p0 }
 0x136   : > { %10581 = dma.done.wait (%p12763_p3), [#allocation16], 96  }
 0x137   : > { %10583 = vsyncadd (%p12764_p12), [#allocation16], 4294967200  ;;  %p12765_p7 = pmov %p12756_p0 }
 0x138   : > { %p12766_p8 = pmov %p12756_p0 }
 0x139   : > { %10585 = dma.done.wait (%p12765_p7), [#allocation19], 6160  }
 0x13a   : > { %10587 = vsyncadd (%p12766_p8), [#allocation19], 4294961136  ;;  %p12767_p13 = scmp.ne.s32.totalorder %s10713_s27, 0 }
 0x13b   : > { %v566_v0 = vld [vmem:[#allocation4 + $0x8] sm:$0xff] (!%p12767_p13)  ;;  %v568_v2 = vld [vmem:[#allocation4 + $0x18] sm:$0xff] (!%p12767_p13)  ;;  %v565_v5 = vld [vmem:[#allocation4] sm:$0xff] (!%p12767_p13)  ;;  %v10623_v7 = vmov (!%p12767_p13), 0.0   ;;  %s12768_s16 = sld [smem:[#allocation29_spill]] (!%p12767_p13) }
 0x13c   : > { %555 = sbr.rel (%p12767_p13) target bundleno = 860 (0x35c), region = 116  ;;  %v576_v1 = vld [vmem:[#allocation4 + $0x148] sm:$0xff] (!%p12767_p13)  ;;  %v578_v4 = vld [vmem:[#allocation4 + $0x158] sm:$0xff] (!%p12767_p13)  ;;  %v575_v6 = vld [vmem:[#allocation4 + $0x140] sm:$0xff] (!%p12767_p13)  ;;  %556 = vst [vmem:[#allocation3] sm:$0xff] (!%p12767_p13), %v10623_v7  ;;  %789 = vmatprep.mubr.f32.mxu0 (!%p12767_p13), %v10623_v7  ;;  %860 = vmatprep.mubr.f32.mxu1 (!%p12767_p13), %v10623_v7 }
 0x13d   : > { %v7668_v3 = vpack.c.bf16 (!%p12767_p13), %v576_v1, %v566_v0  ;;  %557 = vst [vmem:[#allocation3 + $0x8] sm:$0xff] (!%p12767_p13), %v10623_v7  ;;  %558 = vst [vmem:[#allocation3 + $0x10] sm:$0xff] (!%p12767_p13), %v10623_v7  ;;  %v7700_v8 = vpack.c.bf16 (!%p12767_p13), %v578_v4, %v568_v2  ;;  %v7670_v9 = vpack.c.bf16 (!%p12767_p13), %v575_v6, %v565_v5  ;;  %v567_v10 = vld [vmem:[#allocation4 + $0x10] sm:$0xff] (!%p12767_p13)  ;;  %v586_v12 = vld [vmem:[#allocation4 + $0x288] sm:$0xff] (!%p12767_p13) }
 0x13e   : > { %559 = vst [vmem:[#allocation3 + $0x18] sm:$0xff] (!%p12767_p13), %v10623_v7  ;;  %560 = vst [vmem:[#allocation3 + $0x20] sm:$0xff] (!%p12767_p13), %v10623_v7  ;;  %v577_v11 = vld [vmem:[#allocation4 + $0x150] sm:$0xff] (!%p12767_p13)  ;;  %v596_v14 = vld [vmem:[#allocation4 + $0x3c8] sm:$0xff] (!%p12767_p13) }
 0x13f   : > { %561 = vst [vmem:[#allocation3 + $0x28] sm:$0xff] (!%p12767_p13), %v10623_v7  ;;  %562 = vst [vmem:[#allocation3 + $0x30] sm:$0xff] (!%p12767_p13), %v10623_v7  ;;  %7669 = vmatprep.subr.bf16.mxu0 (!%p12767_p13), %v7668_v3  ;;  %v7702_v13 = vpack.c.bf16 (!%p12767_p13), %v577_v11, %v567_v10  ;;  %v588_v15 = vld [vmem:[#allocation4 + $0x298] sm:$0xff] (!%p12767_p13)  ;;  %7701 = vmatprep.subr.bf16.mxu1 (!%p12767_p13), %v7700_v8  ;;  %v7672_v17 = vpack.c.bf16 (!%p12767_p13), %v596_v14, %v586_v12  ;;  %v585_v19 = vld [vmem:[#allocation4 + $0x280] sm:$0xff] (!%p12767_p13) }
 0x140   : > { %563 = vst [vmem:[#allocation3 + $0x38] sm:$0xff] (!%p12767_p13), %v10623_v7  ;;  %v598_v16 = vld [vmem:[#allocation4 + $0x3d8] sm:$0xff] (!%p12767_p13)  ;;  %7671 = vmatpush1.bf16.msra.mxu0 (!%p12767_p13), %v7670_v9  ;;  %v595_v20 = vld [vmem:[#allocation4 + $0x3c0] sm:$0xff] (!%p12767_p13)  ;;  %v587_v21 = vld [vmem:[#allocation4 + $0x290] sm:$0xff] (!%p12767_p13) }
 0x141   : > { %v7704_v18 = vpack.c.bf16 (!%p12767_p13), %v598_v16, %v588_v15  ;;  %7703 = vmatpush1.bf16.msra.mxu1 (!%p12767_p13), %v7702_v13  ;;  %v7674_v22 = vpack.c.bf16 (!%p12767_p13), %v595_v20, %v585_v19  ;;  %v597_v23 = vld [vmem:[#allocation4 + $0x3d0] sm:$0xff] (!%p12767_p13)  ;;  %v606_v24 = vld [vmem:[#allocation4 + $0x508] sm:$0xff] (!%p12767_p13)  ;;  %7673 = vmatprep.subr.bf16.mxu0 (!%p12767_p13), %v7672_v17  ;;  %v608_v28 = vld [vmem:[#allocation4 + $0x518] sm:$0xff] (!%p12767_p13) }
 0x142   : > { %v616_v25 = vld [vmem:[#allocation4 + $0x648] sm:$0xff] (!%p12767_p13)  ;;  %v7706_v26 = vpack.c.bf16 (!%p12767_p13), %v597_v23, %v587_v21  ;;  %v618_v29 = vld [vmem:[#allocation4 + $0x658] sm:$0xff] (!%p12767_p13)  ;;  %v605_v30 = vld [vmem:[#allocation4 + $0x500] sm:$0xff] (!%p12767_p13) }
 0x143   : > { %7705 = vmatprep.subr.bf16.mxu1 %v7704_v18  ;;  %v7676_v27 = vpack.c.bf16 %v616_v25, %v606_v24  ;;  %v7708_v31 = vpack.c.bf16 %v618_v29, %v608_v28  ;;  %v615_v32 = vld [vmem:[#allocation4 + $0x640] sm:$0xff]  ;;  %v607_v33 = vld [vmem:[#allocation4 + $0x510] sm:$0xff]  ;;  %v626_v36 = vld [vmem:[#allocation4 + $0x788] sm:$0xff] }
 0x144   : > { %v617_v34 = vld [vmem:[#allocation4 + $0x650] sm:$0xff]  ;;  %7675 = vmatpush1.bf16.msra.mxu0 %v7674_v22  ;;  %v7678_v35 = vpack.c.bf16 %v615_v32, %v605_v30  ;;  %v636_v37 = vld [vmem:[#allocation4 + $0x8c8] sm:$0xff]  ;;  %v628_v38 = vld [vmem:[#allocation4 + $0x798] sm:$0xff] }
 0x145   : > { %7707 = vmatpush1.bf16.msra.mxu1 %v7706_v26  ;;  %7677 = vmatprep.subr.bf16.mxu0 %v7676_v27  ;;  %v7710_v39 = vpack.c.bf16 %v617_v34, %v607_v33  ;;  %v7680_v40 = vpack.c.bf16 %v636_v37, %v626_v36  ;;  %v638_v41 = vld [vmem:[#allocation4 + $0x8d8] sm:$0xff]  ;;  %v625_v42 = vld [vmem:[#allocation4 + $0x780] sm:$0xff]  ;;  %v627_v45 = vld [vmem:[#allocation4 + $0x790] sm:$0xff] }
 0x146   : > { %v635_v43 = vld [vmem:[#allocation4 + $0x8c0] sm:$0xff]  ;;  %7709 = vmatprep.subr.bf16.mxu1 %v7708_v31  ;;  %v7712_v44 = vpack.c.bf16 %v638_v41, %v628_v38  ;;  %v637_v46 = vld [vmem:[#allocation4 + $0x8d0] sm:$0xff]  ;;  %v646_v47 = vld [vmem:[#allocation4 + $0xa08] sm:$0xff] }
 0x147   : > { %v656_v48 = vld [vmem:[#allocation4 + $0xb48] sm:$0xff]  ;;  %v648_v49 = vld [vmem:[#allocation4 + $0xa18] sm:$0xff]  ;;  %v7682_v51 = vpack.c.bf16 %v635_v43, %v625_v42  ;;  %v7714_v52 = vpack.c.bf16 %v637_v46, %v627_v45  ;;  %v645_v54 = vld [vmem:[#allocation4 + $0xa00] sm:$0xff] }
 0x148   : > { %v658_v50 = vld [vmem:[#allocation4 + $0xb58] sm:$0xff]  ;;  %7679 = vmatpush1.bf16.msra.mxu0 %v7678_v35  ;;  %v7684_v53 = vpack.c.bf16 %v656_v48, %v646_v47  ;;  %v655_v55 = vld [vmem:[#allocation4 + $0xb40] sm:$0xff]  ;;  %v647_v56 = vld [vmem:[#allocation4 + $0xa10] sm:$0xff] }
 0x149   : > { %7711 = vmatpush1.bf16.msra.mxu1 %v7710_v39  ;;  %7681 = vmatprep.subr.bf16.mxu0 %v7680_v40  ;;  %v7716_v57 = vpack.c.bf16 %v658_v50, %v648_v49  ;;  %v657_v58 = vld [vmem:[#allocation4 + $0xb50] sm:$0xff]  ;;  %v666_v59 = vld [vmem:[#allocation4 + $0xc88] sm:$0xff]  ;;  %v668_v61 = vld [vmem:[#allocation4 + $0xc98] sm:$0xff]  ;;  %v7686_v63 = vpack.c.bf16 %v655_v55, %v645_v54 }
 0x14a   : > { %7713 = vmatprep.subr.bf16.mxu1 %v7712_v44  ;;  %v676_v60 = vld [vmem:[#allocation4 + $0xdc8] sm:$0xff]  ;;  %v678_v62 = vld [vmem:[#allocation4 + $0xdd8] sm:$0xff]  ;;  %v7718_v0 = vpack.c.bf16 %v657_v58, %v647_v56  ;;  %v665_v2 = vld [vmem:[#allocation4 + $0xc80] sm:$0xff] }
 0x14b   : > { %v7688_v1 = vpack.c.bf16 %v676_v60, %v666_v59  ;;  %v675_v3 = vld [vmem:[#allocation4 + $0xdc0] sm:$0xff]  ;;  %v667_v4 = vld [vmem:[#allocation4 + $0xc90] sm:$0xff]  ;;  %v7720_v5 = vpack.c.bf16 %v678_v62, %v668_v61  ;;  %v686_v8 = vld [vmem:[#allocation4 + $0xf08] sm:$0xff] }
 0x14c   : > { %7683 = vmatpush1.bf16.msra.mxu0 %v7682_v51  ;;  %v677_v6 = vld [vmem:[#allocation4 + $0xdd0] sm:$0xff]  ;;  %v696_v9 = vld [vmem:[#allocation4 + $0x1048] sm:$0xff]  ;;  %v688_v10 = vld [vmem:[#allocation4 + $0xf18] sm:$0xff]  ;;  %v7690_v12 = vpack.c.bf16 %v675_v3, %v665_v2 }
 0x14d   : > { %7715 = vmatpush1.bf16.msra.mxu1 %v7714_v52  ;;  %7685 = vmatprep.subr.bf16.mxu0 %v7684_v53  ;;  %v698_v11 = vld [vmem:[#allocation4 + $0x1058] sm:$0xff]  ;;  %v7722_v13 = vpack.c.bf16 %v677_v6, %v667_v4  ;;  %v7692_v14 = vpack.c.bf16 %v696_v9, %v686_v8  ;;  %v685_v15 = vld [vmem:[#allocation4 + $0xf00] sm:$0xff]  ;;  %v687_v17 = vld [vmem:[#allocation4 + $0xf10] sm:$0xff] }
 0x14e   : > { %7717 = vmatprep.subr.bf16.mxu1 %v7716_v57  ;;  %v695_v16 = vld [vmem:[#allocation4 + $0x1040] sm:$0xff]  ;;  %v7724_v18 = vpack.c.bf16 %v698_v11, %v688_v10  ;;  %v697_v19 = vld [vmem:[#allocation4 + $0x1050] sm:$0xff]  ;;  %v706_v20 = vld [vmem:[#allocation4 + $0x1188] sm:$0xff] }
 0x14f   : > { %v716_v21 = vld [vmem:[#allocation4 + $0x12c8] sm:$0xff]  ;;  %v708_v22 = vld [vmem:[#allocation4 + $0x1198] sm:$0xff]  ;;  %v7694_v24 = vpack.c.bf16 %v695_v16, %v685_v15  ;;  %v7726_v25 = vpack.c.bf16 %v697_v19, %v687_v17  ;;  %v705_v27 = vld [vmem:[#allocation4 + $0x1180] sm:$0xff] }
 0x150   : > { %7687 = vmatpush1.bf16.msra.mxu0 %v7686_v63  ;;  %v718_v23 = vld [vmem:[#allocation4 + $0x12d8] sm:$0xff]  ;;  %v7696_v26 = vpack.c.bf16 %v716_v21, %v706_v20  ;;  %v715_v28 = vld [vmem:[#allocation4 + $0x12c0] sm:$0xff]  ;;  %v707_v29 = vld [vmem:[#allocation4 + $0x1190] sm:$0xff] }
 0x151   : > { %7719 = vmatpush1.bf16.msra.mxu1 %v7718_v0  ;;  %7689 = vmatprep.subr.bf16.mxu0 %v7688_v1  ;;  %v7728_v30 = vpack.c.bf16 %v718_v23, %v708_v22  ;;  %v717_v31 = vld [vmem:[#allocation4 + $0x12d0] sm:$0xff]  ;;  %v570_v32 = vld [vmem:[#allocation4 + $0x28] sm:$0xff]  ;;  %v572_v34 = vld [vmem:[#allocation4 + $0x38] sm:$0xff]  ;;  %v7698_v36 = vpack.c.bf16 %v715_v28, %v705_v27 }
 0x152   : > { %7721 = vmatprep.subr.bf16.mxu1 %v7720_v5  ;;  %v580_v33 = vld [vmem:[#allocation4 + $0x168] sm:$0xff]  ;;  %v582_v35 = vld [vmem:[#allocation4 + $0x178] sm:$0xff]  ;;  %v7730_v37 = vpack.c.bf16 %v717_v31, %v707_v29  ;;  %v569_v39 = vld [vmem:[#allocation4 + $0x20] sm:$0xff] }
 0x153   : > { %v7732_v38 = vpack.c.bf16 %v580_v33, %v570_v32  ;;  %v579_v40 = vld [vmem:[#allocation4 + $0x160] sm:$0xff]  ;;  %v571_v41 = vld [vmem:[#allocation4 + $0x30] sm:$0xff]  ;;  %v7764_v42 = vpack.c.bf16 %v582_v35, %v572_v34  ;;  %v590_v44 = vld [vmem:[#allocation4 + $0x2a8] sm:$0xff] }
 0x154   : > { %7691 = vmatpush1.bf16.msra.mxu0 %v7690_v12  ;;  %v581_v43 = vld [vmem:[#allocation4 + $0x170] sm:$0xff]  ;;  %v600_v45 = vld [vmem:[#allocation4 + $0x3e8] sm:$0xff]  ;;  %v592_v46 = vld [vmem:[#allocation4 + $0x2b8] sm:$0xff]  ;;  %v7734_v49 = vpack.c.bf16 %v579_v40, %v569_v39 }
 0x155   : > { %7723 = vmatpush1.bf16.msra.mxu1 %v7722_v13  ;;  %7693 = vmatprep.subr.bf16.mxu0 %v7692_v14  ;;  %v602_v47 = vld [vmem:[#allocation4 + $0x3f8] sm:$0xff]  ;;  %v11068_v48 = vld [vmem:[%s12768_s16] sm:$0xff]  ;;  %v7766_v50 = vpack.c.bf16 %v581_v43, %v571_v41  ;;  %v7736_v51 = vpack.c.bf16 %v600_v45, %v590_v44  ;;  %v591_v54 = vld [vmem:[#allocation4 + $0x2b0] sm:$0xff] }
 0x156   : > { %7725 = vmatprep.subr.bf16.mxu1 %v7724_v18  ;;  %v589_v52 = vld [vmem:[#allocation4 + $0x2a0] sm:$0xff]  ;;  %v7768_v55 = vpack.c.bf16 %v602_v47, %v592_v46  ;;  %v601_v56 = vld [vmem:[#allocation4 + $0x3f0] sm:$0xff]  ;;  %v610_v57 = vld [vmem:[#allocation4 + $0x528] sm:$0xff] }
 0x157   : > { %v599_v53 = vld [vmem:[#allocation4 + $0x3e0] sm:$0xff]  ;;  %v620_v58 = vld [vmem:[#allocation4 + $0x668] sm:$0xff]  ;;  %v612_v59 = vld [vmem:[#allocation4 + $0x538] sm:$0xff]  ;;  %v7770_v62 = vpack.c.bf16 %v601_v56, %v591_v54 }
 0x158   : > { %7695 = vmatpush1.bf16.msra.mxu0 %v7694_v24  ;;  %v622_v60 = vld [vmem:[#allocation4 + $0x678] sm:$0xff]  ;;  %v7738_v61 = vpack.c.bf16 %v599_v53, %v589_v52  ;;  %v7740_v63 = vpack.c.bf16 %v620_v58, %v610_v57  ;;  %v609_v0 = vld [vmem:[#allocation4 + $0x520] sm:$0xff]  ;;  %v611_v2 = vld [vmem:[#allocation4 + $0x530] sm:$0xff] }
 0x159   : > { %7727 = vmatpush1.bf16.msra.mxu1 %v7726_v25  ;;  %7697 = vmatprep.subr.bf16.mxu0 %v7696_v26  ;;  %v619_v1 = vld [vmem:[#allocation4 + $0x660] sm:$0xff]  ;;  %v7772_v3 = vpack.c.bf16 %v622_v60, %v612_v59  ;;  %v621_v4 = vld [vmem:[#allocation4 + $0x670] sm:$0xff]  ;;  %v630_v5 = vld [vmem:[#allocation4 + $0x7a8] sm:$0xff] }
 0x15a   : > { %7729 = vmatprep.subr.bf16.mxu1 %v7728_v30  ;;  %v640_v6 = vld [vmem:[#allocation4 + $0x8e8] sm:$0xff]  ;;  %v632_v8 = vld [vmem:[#allocation4 + $0x7b8] sm:$0xff]  ;;  %v7742_v10 = vpack.c.bf16 %v619_v1, %v609_v0  ;;  %v7774_v11 = vpack.c.bf16 %v621_v4, %v611_v2  ;;  %v629_v13 = vld [vmem:[#allocation4 + $0x7a0] sm:$0xff] }
 0x15b   : > { %v642_v9 = vld [vmem:[#allocation4 + $0x8f8] sm:$0xff]  ;;  %v7744_v12 = vpack.c.bf16 %v640_v6, %v630_v5  ;;  %v639_v14 = vld [vmem:[#allocation4 + $0x8e0] sm:$0xff]  ;;  %v631_v15 = vld [vmem:[#allocation4 + $0x7b0] sm:$0xff] }
 0x15c   : > { %7699 = vmatpush1.bf16.msra.mxu0 %v7698_v36  ;;  %v7776_v16 = vpack.c.bf16 %v642_v9, %v632_v8  ;;  %v641_v17 = vld [vmem:[#allocation4 + $0x8f0] sm:$0xff]  ;;  %v650_v18 = vld [vmem:[#allocation4 + $0xa28] sm:$0xff]  ;;  %v652_v20 = vld [vmem:[#allocation4 + $0xa38] sm:$0xff]  ;;  %v7746_v22 = vpack.c.bf16 %v639_v14, %v629_v13 }
 0x15d   : > { %7731 = vmatpush1.bf16.msra.mxu1 %v7730_v37  ;;  %7733 = vmatprep.subr.bf16.mxu0 %v7732_v38  ;;  %v660_v19 = vld [vmem:[#allocation4 + $0xb68] sm:$0xff]  ;;  %v662_v21 = vld [vmem:[#allocation4 + $0xb78] sm:$0xff]  ;;  %v7778_v23 = vpack.c.bf16 %v641_v17, %v631_v15  ;;  %v649_v25 = vld [vmem:[#allocation4 + $0xa20] sm:$0xff] }
 0x15e   : > { %7765 = vmatprep.subr.bf16.mxu1 %v7764_v42  ;;  %v7748_v24 = vpack.c.bf16 %v660_v19, %v650_v18  ;;  %v659_v26 = vld [vmem:[#allocation4 + $0xb60] sm:$0xff]  ;;  %v651_v27 = vld [vmem:[#allocation4 + $0xa30] sm:$0xff]  ;;  %v7780_v28 = vpack.c.bf16 %v662_v21, %v652_v20  ;;  %v670_v30 = vld [vmem:[#allocation4 + $0xca8] sm:$0xff] }
 0x15f   : > { %790 = vmatmul.mubr.f32.vlgmr.msra.gmra.mrb[0].mxu0 %v11068_v48  ;;  %v661_v29 = vld [vmem:[#allocation4 + $0xb70] sm:$0xff]  ;;  %v680_v31 = vld [vmem:[#allocation4 + $0xde8] sm:$0xff]  ;;  %v672_v32 = vld [vmem:[#allocation4 + $0xcb8] sm:$0xff]  ;;  %v7750_v34 = vpack.c.bf16 %v659_v26, %v649_v25 }
 0x160   : > { %861 = vmatmul.mubr.f32.vlgmr.msra.gmra.mrb[0].mxu1 %v11068_v48  ;;  %7735 = vmatpush1.bf16.msra.mxu0 %v7734_v49  ;;  %v682_v33 = vld [vmem:[#allocation4 + $0xdf8] sm:$0xff]  ;;  %v7782_v35 = vpack.c.bf16 %v661_v29, %v651_v27  ;;  %v7752_v36 = vpack.c.bf16 %v680_v31, %v670_v30  ;;  %v669_v37 = vld [vmem:[#allocation4 + $0xca0] sm:$0xff]  ;;  %v671_v39 = vld [vmem:[#allocation4 + $0xcb0] sm:$0xff] }
 0x161   : > { %7767 = vmatpush1.bf16.msra.mxu1 %v7766_v50  ;;  %7737 = vmatprep.subr.bf16.mxu0 %v7736_v51  ;;  %v679_v38 = vld [vmem:[#allocation4 + $0xde0] sm:$0xff]  ;;  %v7784_v40 = vpack.c.bf16 %v682_v33, %v672_v32  ;;  %v681_v41 = vld [vmem:[#allocation4 + $0xdf0] sm:$0xff]  ;;  %v690_v42 = vld [vmem:[#allocation4 + $0xf28] sm:$0xff] }
 0x162   : > { %7769 = vmatprep.subr.bf16.mxu1 %v7768_v55  ;;  %931 = vmatprep.mubr.f32.mxu0 %v10623_v7  ;;  %v700_v43 = vld [vmem:[#allocation4 + $0x1068] sm:$0xff]  ;;  %v692_v44 = vld [vmem:[#allocation4 + $0xf38] sm:$0xff]  ;;  %v7754_v46 = vpack.c.bf16 %v679_v38, %v669_v37  ;;  %v7786_v47 = vpack.c.bf16 %v681_v41, %v671_v39  ;;  %v689_v50 = vld [vmem:[#allocation4 + $0xf20] sm:$0xff] }
 0x163   : > { %1002 = vmatprep.mubr.f32.mxu1 %v10623_v7  ;;  %v702_v45 = vld [vmem:[#allocation4 + $0x1078] sm:$0xff]  ;;  %v7756_v49 = vpack.c.bf16 %v700_v43, %v690_v42  ;;  %v699_v51 = vld [vmem:[#allocation4 + $0x1060] sm:$0xff]  ;;  %v691_v52 = vld [vmem:[#allocation4 + $0xf30] sm:$0xff] }
 0x164   : > { %7739 = vmatpush1.bf16.msra.mxu0 %v7738_v61  ;;  %v7788_v53 = vpack.c.bf16 %v702_v45, %v692_v44  ;;  %v701_v54 = vld [vmem:[#allocation4 + $0x1070] sm:$0xff]  ;;  %v710_v55 = vld [vmem:[#allocation4 + $0x11a8] sm:$0xff]  ;;  %v712_v57 = vld [vmem:[#allocation4 + $0x11b8] sm:$0xff]  ;;  %v7758_v59 = vpack.c.bf16 %v699_v51, %v689_v50 }
 0x165   : > { %7771 = vmatpush1.bf16.msra.mxu1 %v7770_v62  ;;  %7741 = vmatprep.subr.bf16.mxu0 %v7740_v63  ;;  %v720_v56 = vld [vmem:[#allocation4 + $0x12e8] sm:$0xff]  ;;  %v722_v58 = vld [vmem:[#allocation4 + $0x12f8] sm:$0xff]  ;;  %v7790_v60 = vpack.c.bf16 %v701_v54, %v691_v52  ;;  %v709_v62 = vld [vmem:[#allocation4 + $0x11a0] sm:$0xff] }
 0x166   : > { %7773 = vmatprep.subr.bf16.mxu1 %v7772_v3  ;;  %v7760_v61 = vpack.c.bf16 %v720_v56, %v710_v55  ;;  %v719_v63 = vld [vmem:[#allocation4 + $0x12e0] sm:$0xff]  ;;  %v711_v0 = vld [vmem:[#allocation4 + $0x11b0] sm:$0xff]  ;;  %v7792_v1 = vpack.c.bf16 %v722_v58, %v712_v57  ;;  %v574_v3 = vld [vmem:[#allocation4 + $0x48] sm:$0xff] }
 0x167   : > { %v721_v2 = vld [vmem:[#allocation4 + $0x12f0] sm:$0xff]  ;;  %v584_v4 = vld [vmem:[#allocation4 + $0x188] sm:$0xff]  ;;  %v1230_v5 = vld [vmem:[#allocation4 + $0x58] sm:$0xff]  ;;  %v7762_v8 = vpack.c.bf16 %v719_v63, %v709_v62 }
 0x168   : > { %7743 = vmatpush1.bf16.msra.mxu0 %v7742_v10  ;;  %v1240_v6 = vld [vmem:[#allocation4 + $0x198] sm:$0xff]  ;;  %v7794_v9 = vpack.c.bf16 %v721_v2, %v711_v0  ;;  %v7796_v10 = vpack.c.bf16 %v584_v4, %v574_v3  ;;  %v1229_v13 = vld [vmem:[#allocation4 + $0x50] sm:$0xff]  ;;  %v604_v17 = vld [vmem:[#allocation4 + $0x408] sm:$0xff] }
 0x169   : > { %7775 = vmatpush1.bf16.msra.mxu1 %v7774_v11  ;;  %7745 = vmatprep.subr.bf16.mxu0 %v7744_v12  ;;  %v573_v11 = vld [vmem:[#allocation4 + $0x40] sm:$0xff]  ;;  %v7828_v14 = vpack.c.bf16 %v1240_v6, %v1230_v5  ;;  %v1239_v15 = vld [vmem:[#allocation4 + $0x190] sm:$0xff]  ;;  %v1250_v18 = vld [vmem:[#allocation4 + $0x2d8] sm:$0xff] }
 0x16a   : > { %7777 = vmatprep.subr.bf16.mxu1 %v7776_v16  ;;  %v583_v12 = vld [vmem:[#allocation4 + $0x180] sm:$0xff]  ;;  %v594_v16 = vld [vmem:[#allocation4 + $0x2c8] sm:$0xff]  ;;  %v1260_v19 = vld [vmem:[#allocation4 + $0x418] sm:$0xff]  ;;  %v7830_v21 = vpack.c.bf16 %v1239_v15, %v1229_v13 }
 0x16b   : > { %v7798_v20 = vpack.c.bf16 %v583_v12, %v573_v11  ;;  %v1249_v25 = vld [vmem:[#allocation4 + $0x2d0] sm:$0xff]  ;;  %v7832_v26 = vpack.c.bf16 %v1260_v19, %v1250_v18  ;;  %v624_v29 = vld [vmem:[#allocation4 + $0x688] sm:$0xff]  ;;  %v1270_v30 = vld [vmem:[#allocation4 + $0x558] sm:$0xff] }
 0x16c   : > { %7747 = vmatpush1.bf16.msra.mxu0 %v7746_v22  ;;  %v7800_v22 = vpack.c.bf16 %v604_v17, %v594_v16  ;;  %v1259_v27 = vld [vmem:[#allocation4 + $0x410] sm:$0xff]  ;;  %v1280_v31 = vld [vmem:[#allocation4 + $0x698] sm:$0xff]  ;;  %v644_v41 = vld [vmem:[#allocation4 + $0x908] sm:$0xff] }
 0x16d   : > { %7779 = vmatpush1.bf16.msra.mxu1 %v7778_v23  ;;  %7749 = vmatprep.subr.bf16.mxu0 %v7748_v24  ;;  %v593_v23 = vld [vmem:[#allocation4 + $0x2c0] sm:$0xff]  ;;  %v7834_v33 = vpack.c.bf16 %v1259_v27, %v1249_v25  ;;  %v1269_v37 = vld [vmem:[#allocation4 + $0x550] sm:$0xff]  ;;  %v7836_v38 = vpack.c.bf16 %v1280_v31, %v1270_v30  ;;  %v1290_v42 = vld [vmem:[#allocation4 + $0x7d8] sm:$0xff] }
 0x16e   : > { %7781 = vmatprep.subr.bf16.mxu1 %v7780_v28  ;;  %v603_v24 = vld [vmem:[#allocation4 + $0x400] sm:$0xff]  ;;  %v614_v28 = vld [vmem:[#allocation4 + $0x548] sm:$0xff]  ;;  %v1279_v39 = vld [vmem:[#allocation4 + $0x690] sm:$0xff] }
 0x16f   : > { %v7802_v32 = vpack.c.bf16 %v603_v24, %v593_v23  ;;  %v1300_v43 = vld [vmem:[#allocation4 + $0x918] sm:$0xff]  ;;  %v7838_v45 = vpack.c.bf16 %v1279_v39, %v1269_v37  ;;  %v1289_v50 = vld [vmem:[#allocation4 + $0x7d0] sm:$0xff]  ;;  %v664_v54 = vld [vmem:[#allocation4 + $0xb88] sm:$0xff] }
 0x170   : > { %7751 = vmatpush1.bf16.msra.mxu0 %v7750_v34  ;;  %v7804_v34 = vpack.c.bf16 %v624_v29, %v614_v28  ;;  %v7840_v51 = vpack.c.bf16 %v1300_v43, %v1290_v42  ;;  %v1299_v52 = vld [vmem:[#allocation4 + $0x910] sm:$0xff]  ;;  %v1310_v55 = vld [vmem:[#allocation4 + $0xa58] sm:$0xff]  ;;  %v684_v2 = vld [vmem:[#allocation4 + $0xe08] sm:$0xff] }
 0x171   : > { %7783 = vmatpush1.bf16.msra.mxu1 %v7782_v35  ;;  %7753 = vmatprep.subr.bf16.mxu0 %v7752_v36  ;;  %v613_v35 = vld [vmem:[#allocation4 + $0x540] sm:$0xff]  ;;  %v1320_v56 = vld [vmem:[#allocation4 + $0xb98] sm:$0xff]  ;;  %v7842_v58 = vpack.c.bf16 %v1299_v52, %v1289_v50  ;;  %v1309_v62 = vld [vmem:[#allocation4 + $0xa50] sm:$0xff] }
 0x172   : > { %7785 = vmatprep.subr.bf16.mxu1 %v7784_v40  ;;  %v623_v36 = vld [vmem:[#allocation4 + $0x680] sm:$0xff]  ;;  %v634_v40 = vld [vmem:[#allocation4 + $0x7c8] sm:$0xff]  ;;  %v7844_v63 = vpack.c.bf16 %v1320_v56, %v1310_v55  ;;  %v1319_v0 = vld [vmem:[#allocation4 + $0xb90] sm:$0xff] }
 0x173   : > { %v7806_v44 = vpack.c.bf16 %v623_v36, %v613_v35  ;;  %v1330_v3 = vld [vmem:[#allocation4 + $0xcd8] sm:$0xff]  ;;  %v7846_v6 = vpack.c.bf16 %v1319_v0, %v1309_v62  ;;  %v1329_v11 = vld [vmem:[#allocation4 + $0xcd0] sm:$0xff]  ;;  %v704_v15 = vld [vmem:[#allocation4 + $0x1088] sm:$0xff] }
 0x174   : > { %7755 = vmatpush1.bf16.msra.mxu0 %v7754_v46  ;;  %v7808_v46 = vpack.c.bf16 %v644_v41, %v634_v40  ;;  %v1340_v4 = vld [vmem:[#allocation4 + $0xe18] sm:$0xff]  ;;  %v1339_v13 = vld [vmem:[#allocation4 + $0xe10] sm:$0xff]  ;;  %v724_v27 = vld [vmem:[#allocation4 + $0x1308] sm:$0xff] }
 0x175   : > { %7787 = vmatpush1.bf16.msra.mxu1 %v7786_v47  ;;  %7757 = vmatprep.subr.bf16.mxu0 %v7756_v49  ;;  %v633_v47 = vld [vmem:[#allocation4 + $0x7c0] sm:$0xff]  ;;  %v7848_v12 = vpack.c.bf16 %v1340_v4, %v1330_v3  ;;  %v1350_v16 = vld [vmem:[#allocation4 + $0xf58] sm:$0xff]  ;;  %v7850_v19 = vpack.c.bf16 %v1339_v13, %v1329_v11  ;;  %v1349_v23 = vld [vmem:[#allocation4 + $0xf50] sm:$0xff] }
 0x176   : > { %7789 = vmatprep.subr.bf16.mxu1 %v7788_v53  ;;  %v643_v49 = vld [vmem:[#allocation4 + $0x900] sm:$0xff]  ;;  %v654_v53 = vld [vmem:[#allocation4 + $0xa48] sm:$0xff]  ;;  %v1360_v17 = vld [vmem:[#allocation4 + $0x1098] sm:$0xff] }
 0x177   : > { %v7810_v57 = vpack.c.bf16 %v643_v49, %v633_v47  ;;  %v7852_v24 = vpack.c.bf16 %v1360_v17, %v1350_v16  ;;  %v1359_v25 = vld [vmem:[#allocation4 + $0x1090] sm:$0xff]  ;;  %v1370_v28 = vld [vmem:[#allocation4 + $0x11d8] sm:$0xff]  ;;  %v1242_v39 = vld [vmem:[#allocation4 + $0x1a8] sm:$0xff] }
 0x178   : > { %7759 = vmatpush1.bf16.msra.mxu0 %v7758_v59  ;;  %v7812_v59 = vpack.c.bf16 %v664_v54, %v654_v53  ;;  %v1380_v29 = vld [vmem:[#allocation4 + $0x1318] sm:$0xff]  ;;  %v7854_v31 = vpack.c.bf16 %v1359_v25, %v1349_v23  ;;  %v1369_v35 = vld [vmem:[#allocation4 + $0x11d0] sm:$0xff]  ;;  %v1262_v52 = vld [vmem:[#allocation4 + $0x428] sm:$0xff] }
 0x179   : > { %7791 = vmatpush1.bf16.msra.mxu1 %v7790_v60  ;;  %7761 = vmatprep.subr.bf16.mxu0 %v7760_v61  ;;  %v653_v60 = vld [vmem:[#allocation4 + $0xa40] sm:$0xff]  ;;  %v7856_v36 = vpack.c.bf16 %v1380_v29, %v1370_v28  ;;  %v1379_v37 = vld [vmem:[#allocation4 + $0x1310] sm:$0xff]  ;;  %v1234_v40 = vld [vmem:[#allocation4 + $0x78] sm:$0xff] }
 0x17a   : > { %7793 = vmatprep.subr.bf16.mxu1 %v7792_v1  ;;  %v663_v61 = vld [vmem:[#allocation4 + $0xb80] sm:$0xff]  ;;  %v674_v1 = vld [vmem:[#allocation4 + $0xcc8] sm:$0xff]  ;;  %v1244_v41 = vld [vmem:[#allocation4 + $0x1b8] sm:$0xff]  ;;  %v7858_v43 = vpack.c.bf16 %v1379_v37, %v1369_v35 }
 0x17b   : > { %v7814_v5 = vpack.c.bf16 %v663_v61, %v653_v60  ;;  %v1233_v47 = vld [vmem:[#allocation4 + $0x70] sm:$0xff]  ;;  %v7892_v49 = vpack.c.bf16 %v1244_v41, %v1234_v40  ;;  %v1254_v53 = vld [vmem:[#allocation4 + $0x2f8] sm:$0xff]  ;;  %v1282_v0 = vld [vmem:[#allocation4 + $0x6a8] sm:$0xff] }
 0x17c   : > { %7763 = vmatpush1.bf16.msra.mxu0 %v7762_v8  ;;  %v7816_v8 = vpack.c.bf16 %v684_v2, %v674_v1  ;;  %v1243_v50 = vld [vmem:[#allocation4 + $0x1b0] sm:$0xff]  ;;  %v1264_v54 = vld [vmem:[#allocation4 + $0x438] sm:$0xff]  ;;  %v1302_v13 = vld [vmem:[#allocation4 + $0x928] sm:$0xff] }
 0x17d   : > { %7795 = vmatpush1.bf16.msra.mxu1 %v7794_v9  ;;  %7797 = vmatprep.subr.bf16.mxu0 %v7796_v10  ;;  %v673_v9 = vld [vmem:[#allocation4 + $0xcc0] sm:$0xff]  ;;  %v7894_v56 = vpack.c.bf16 %v1243_v50, %v1233_v47  ;;  %v1253_v60 = vld [vmem:[#allocation4 + $0x2f0] sm:$0xff]  ;;  %v7896_v61 = vpack.c.bf16 %v1264_v54, %v1254_v53  ;;  %v1274_v1 = vld [vmem:[#allocation4 + $0x578] sm:$0xff] }
 0x17e   : > { %7829 = vmatprep.subr.bf16.mxu1 %v7828_v14  ;;  %v683_v10 = vld [vmem:[#allocation4 + $0xe00] sm:$0xff]  ;;  %v694_v14 = vld [vmem:[#allocation4 + $0xf48] sm:$0xff]  ;;  %v1263_v62 = vld [vmem:[#allocation4 + $0x430] sm:$0xff] }
 0x17f   : > { %932 = vmatmul.mubr.f32.vlgmr.msra.gmra.mrb[2].mxu0 %v11068_v48  ;;  %v7818_v18 = vpack.c.bf16 %v683_v10, %v673_v9  ;;  %v1284_v2 = vld [vmem:[#allocation4 + $0x6b8] sm:$0xff]  ;;  %v7898_v4 = vpack.c.bf16 %v1263_v62, %v1253_v60  ;;  %v1273_v9 = vld [vmem:[#allocation4 + $0x570] sm:$0xff]  ;;  %v1322_v25 = vld [vmem:[#allocation4 + $0xba8] sm:$0xff] }
 0x180   : > { %1003 = vmatmul.mubr.f32.vlgmr.msra.gmra.mrb[2].mxu1 %v11068_v48  ;;  %7799 = vmatpush1.bf16.msra.mxu0 %v7798_v20  ;;  %v7820_v20 = vpack.c.bf16 %v704_v15, %v694_v14  ;;  %v7900_v10 = vpack.c.bf16 %v1284_v2, %v1274_v1  ;;  %v1283_v11 = vld [vmem:[#allocation4 + $0x6b0] sm:$0xff]  ;;  %v1294_v14 = vld [vmem:[#allocation4 + $0x7f8] sm:$0xff]  ;;  %v1332_v35 = vld [vmem:[#allocation4 + $0xce8] sm:$0xff] }
 0x181   : > { %7831 = vmatpush1.bf16.msra.mxu1 %v7830_v21  ;;  %7801 = vmatprep.subr.bf16.mxu0 %v7800_v22  ;;  %v693_v21 = vld [vmem:[#allocation4 + $0xf40] sm:$0xff]  ;;  %v1304_v15 = vld [vmem:[#allocation4 + $0x938] sm:$0xff]  ;;  %v7902_v17 = vpack.c.bf16 %v1283_v11, %v1273_v9  ;;  %v1303_v23 = vld [vmem:[#allocation4 + $0x930] sm:$0xff] }
 0x182   : > { %7833 = vmatprep.subr.bf16.mxu1 %v7832_v26  ;;  %1073 = vmatprep.mubr.f32.mxu0 %v10623_v7  ;;  %v703_v22 = vld [vmem:[#allocation4 + $0x1080] sm:$0xff]  ;;  %v714_v26 = vld [vmem:[#allocation4 + $0x11c8] sm:$0xff]  ;;  %v1334_v37 = vld [vmem:[#allocation4 + $0xcf8] sm:$0xff] }
 0x183   : > { %1453 = vmatprep.mubr.f32.mxu1 %v10623_v7  ;;  %v7822_v30 = vpack.c.bf16 %v703_v22, %v693_v21  ;;  %v1293_v21 = vld [vmem:[#allocation4 + $0x7f0] sm:$0xff]  ;;  %v7904_v22 = vpack.c.bf16 %v1304_v15, %v1294_v14  ;;  %v1352_v47 = vld [vmem:[#allocation4 + $0xf68] sm:$0xff]  ;;  %v1354_v50 = vld [vmem:[#allocation4 + $0xf78] sm:$0xff] }
 0x184   : > { %7803 = vmatpush1.bf16.msra.mxu0 %v7802_v32  ;;  %v7824_v32 = vpack.c.bf16 %v724_v27, %v714_v26  ;;  %v1314_v26 = vld [vmem:[#allocation4 + $0xa78] sm:$0xff]  ;;  %v1372_v60 = vld [vmem:[#allocation4 + $0x11e8] sm:$0xff] }
 0x185   : > { %7835 = vmatpush1.bf16.msra.mxu1 %v7834_v33  ;;  %7805 = vmatprep.subr.bf16.mxu0 %v7804_v34  ;;  %v713_v33 = vld [vmem:[#allocation4 + $0x11c0] sm:$0xff]  ;;  %v1324_v27 = vld [vmem:[#allocation4 + $0xbb8] sm:$0xff]  ;;  %v1236_v9 = vld [vmem:[#allocation4 + $0x88] sm:$0xff] }
 0x186   : > { %7837 = vmatprep.subr.bf16.mxu1 %v7836_v38  ;;  %v723_v34 = vld [vmem:[#allocation4 + $0x1300] sm:$0xff]  ;;  %v1232_v38 = vld [vmem:[#allocation4 + $0x68] sm:$0xff]  ;;  %v1374_v62 = vld [vmem:[#allocation4 + $0x11f8] sm:$0xff] }
 0x187   : > { %v7826_v42 = vpack.c.bf16 %v723_v34, %v713_v33  ;;  %v7908_v33 = vpack.c.bf16 %v1324_v27, %v1314_v26  ;;  %v1323_v34 = vld [vmem:[#allocation4 + $0xbb0] sm:$0xff]  ;;  %v1238_v11 = vld [vmem:[#allocation4 + $0x98] sm:$0xff] }
 0x188   : > { %7807 = vmatpush1.bf16.msra.mxu0 %v7806_v44  ;;  %v7860_v44 = vpack.c.bf16 %v1242_v39, %v1232_v38  ;;  %v1344_v38 = vld [vmem:[#allocation4 + $0xe38] sm:$0xff] }
 0x189   : > { %7839 = vmatpush1.bf16.msra.mxu1 %v7838_v45  ;;  %7809 = vmatprep.subr.bf16.mxu0 %v7808_v46  ;;  %v1231_v45 = vld [vmem:[#allocation4 + $0x60] sm:$0xff] }
 0x18a   : > { %7841 = vmatprep.subr.bf16.mxu1 %v7840_v51  ;;  %v1241_v46 = vld [vmem:[#allocation4 + $0x1a0] sm:$0xff]  ;;  %v1252_v51 = vld [vmem:[#allocation4 + $0x2e8] sm:$0xff] }
 0x18b   : > { %v7862_v55 = vpack.c.bf16 %v1241_v46, %v1231_v45  ;;  %v7912_v45 = vpack.c.bf16 %v1344_v38, %v1334_v37  ;;  %v1343_v46 = vld [vmem:[#allocation4 + $0xe30] sm:$0xff] }
 0x18c   : > { %7811 = vmatpush1.bf16.msra.mxu0 %v7810_v57  ;;  %v7864_v57 = vpack.c.bf16 %v1262_v52, %v1252_v51  ;;  %v1364_v51 = vld [vmem:[#allocation4 + $0x10b8] sm:$0xff] }
 0x18d   : > { %7843 = vmatpush1.bf16.msra.mxu1 %v7842_v58  ;;  %7813 = vmatprep.subr.bf16.mxu0 %v7812_v59  ;;  %v1251_v58 = vld [vmem:[#allocation4 + $0x2e0] sm:$0xff] }
 0x18e   : > { %7845 = vmatprep.subr.bf16.mxu1 %v7844_v63  ;;  %v1261_v59 = vld [vmem:[#allocation4 + $0x420] sm:$0xff]  ;;  %v1272_v63 = vld [vmem:[#allocation4 + $0x568] sm:$0xff] }
 0x18f   : > { %v7866_v3 = vpack.c.bf16 %v1261_v59, %v1251_v58  ;;  %v7916_v58 = vpack.c.bf16 %v1364_v51, %v1354_v50  ;;  %v1363_v59 = vld [vmem:[#allocation4 + $0x10b0] sm:$0xff] }
 0x190   : > { %7815 = vmatpush1.bf16.msra.mxu0 %v7814_v5  ;;  %v7868_v5 = vpack.c.bf16 %v1282_v0, %v1272_v63  ;;  %v1384_v63 = vld [vmem:[#allocation4 + $0x1338] sm:$0xff] }
 0x191   : > { %7847 = vmatpush1.bf16.msra.mxu1 %v7846_v6  ;;  %7817 = vmatprep.subr.bf16.mxu0 %v7816_v8  ;;  %v1271_v6 = vld [vmem:[#allocation4 + $0x560] sm:$0xff] }
 0x192   : > { %7849 = vmatprep.subr.bf16.mxu1 %v7848_v12  ;;  %v1281_v8 = vld [vmem:[#allocation4 + $0x6a0] sm:$0xff]  ;;  %v1292_v12 = vld [vmem:[#allocation4 + $0x7e8] sm:$0xff] }
 0x193   : > { %v7870_v16 = vpack.c.bf16 %v1281_v8, %v1271_v6  ;;  %v7920_v6 = vpack.c.bf16 %v1384_v63, %v1374_v62  ;;  %v1383_v8 = vld [vmem:[#allocation4 + $0x1330] sm:$0xff] }
 0x194   : > { %7819 = vmatpush1.bf16.msra.mxu0 %v7818_v18  ;;  %v7872_v18 = vpack.c.bf16 %v1302_v13, %v1292_v12  ;;  %v1248_v12 = vld [vmem:[#allocation4 + $0x1d8] sm:$0xff] }
 0x195   : > { %7851 = vmatpush1.bf16.msra.mxu1 %v7850_v19  ;;  %7821 = vmatprep.subr.bf16.mxu0 %v7820_v20  ;;  %v1291_v19 = vld [vmem:[#allocation4 + $0x7e0] sm:$0xff] }
 0x196   : > { %7853 = vmatprep.subr.bf16.mxu1 %v7852_v24  ;;  %v1301_v20 = vld [vmem:[#allocation4 + $0x920] sm:$0xff]  ;;  %v1312_v24 = vld [vmem:[#allocation4 + $0xa68] sm:$0xff] }
 0x197   : > { %v7874_v28 = vpack.c.bf16 %v1301_v20, %v1291_v19  ;;  %v7876_v29 = vpack.c.bf16 %v1322_v25, %v1312_v24  ;;  %v7956_v19 = vpack.c.bf16 %v1248_v12, %v1238_v11  ;;  %v1247_v20 = vld [vmem:[#allocation4 + $0x1d0] sm:$0xff]  ;;  %v1268_v24 = vld [vmem:[#allocation4 + $0x458] sm:$0xff] }
 0x198   : > { %7823 = vmatpush1.bf16.msra.mxu0 %v7822_v30  ;;  %v1311_v30 = vld [vmem:[#allocation4 + $0xa60] sm:$0xff] }
 0x199   : > { %7855 = vmatpush1.bf16.msra.mxu1 %v7854_v31  ;;  %7825 = vmatprep.subr.bf16.mxu0 %v7824_v32  ;;  %v1321_v31 = vld [vmem:[#allocation4 + $0xba0] sm:$0xff]  ;;  %v1313_v32 = vld [vmem:[#allocation4 + $0xa70] sm:$0xff] }
 0x19a   : > { %7857 = vmatprep.subr.bf16.mxu1 %v7856_v36  ;;  %v1342_v36 = vld [vmem:[#allocation4 + $0xe28] sm:$0xff]  ;;  %v7878_v39 = vpack.c.bf16 %v1321_v31, %v1311_v30  ;;  %v7910_v40 = vpack.c.bf16 %v1323_v34, %v1313_v32  ;;  %v1267_v31 = vld [vmem:[#allocation4 + $0x450] sm:$0xff]  ;;  %v1278_v34 = vld [vmem:[#allocation4 + $0x598] sm:$0xff] }
 0x19b   : > { %v7880_v41 = vpack.c.bf16 %v1342_v36, %v1332_v35  ;;  %v1276_v32 = vld [vmem:[#allocation4 + $0x588] sm:$0xff]  ;;  %v1288_v35 = vld [vmem:[#allocation4 + $0x6d8] sm:$0xff] }
 0x19c   : > { %7827 = vmatpush1.bf16.msra.mxu0 %v7826_v42  ;;  %v1331_v42 = vld [vmem:[#allocation4 + $0xce0] sm:$0xff] }
 0x19d   : > { %7859 = vmatpush1.bf16.msra.mxu1 %v7858_v43  ;;  %7861 = vmatprep.subr.bf16.mxu0 %v7860_v44  ;;  %v1341_v43 = vld [vmem:[#allocation4 + $0xe20] sm:$0xff]  ;;  %v1333_v44 = vld [vmem:[#allocation4 + $0xcf0] sm:$0xff] }
 0x19e   : > { %7893 = vmatprep.subr.bf16.mxu1 %v7892_v49  ;;  %v1362_v49 = vld [vmem:[#allocation4 + $0x10a8] sm:$0xff]  ;;  %v7882_v52 = vpack.c.bf16 %v1341_v43, %v1331_v42  ;;  %v7914_v53 = vpack.c.bf16 %v1343_v46, %v1333_v44  ;;  %v7964_v42 = vpack.c.bf16 %v1288_v35, %v1278_v34  ;;  %v1287_v43 = vld [vmem:[#allocation4 + $0x6d0] sm:$0xff]  ;;  %v11084_v46 = vld [vmem:[#allocation3] sm:$0xff] }
 0x19f   : > { %1074 = vmatmul.mubr.f32.vlgmr.msra.gmra.mrb[4].mxu0 %v11068_v48  ;;  %v7884_v54 = vpack.c.bf16 %v1362_v49, %v1352_v47  ;;  %v1296_v44 = vld [vmem:[#allocation4 + $0x808] sm:$0xff]  ;;  %v1298_v47 = vld [vmem:[#allocation4 + $0x818] sm:$0xff] }
 0x1a0   : > { %1454 = vmatmul.mubr.f32.vlgmr.msra.gmra.mrb[4].mxu1 %v11068_v48  ;;  %7863 = vmatpush1.bf16.msra.mxu0 %v7862_v55  ;;  %v1351_v55 = vld [vmem:[#allocation4 + $0xf60] sm:$0xff] }
 0x1a1   : > { %7895 = vmatpush1.bf16.msra.mxu1 %v7894_v56  ;;  %7865 = vmatprep.subr.bf16.mxu0 %v7864_v57  ;;  %v1361_v56 = vld [vmem:[#allocation4 + $0x10a0] sm:$0xff]  ;;  %v1353_v57 = vld [vmem:[#allocation4 + $0xf70] sm:$0xff] }
 0x1a2   : > { %7897 = vmatprep.subr.bf16.mxu1 %v7896_v61  ;;  %1524 = vmatprep.mubr.f32.mxu0 %v10623_v7  ;;  %v1382_v61 = vld [vmem:[#allocation4 + $0x1328] sm:$0xff]  ;;  %v7886_v0 = vpack.c.bf16 %v1361_v56, %v1351_v55  ;;  %v7918_v1 = vpack.c.bf16 %v1363_v59, %v1353_v57  ;;  %v1307_v56 = vld [vmem:[#allocation4 + $0x950] sm:$0xff]  ;;  %v1318_v59 = vld [vmem:[#allocation4 + $0xa98] sm:$0xff] }
 0x1a3   : > { %1595 = vmatprep.mubr.f32.mxu1 %v10623_v7  ;;  %v7906_v7 = vpack.c.bf16 %v1303_v23, %v1293_v21  ;;  %v7888_v2 = vpack.c.bf16 %v1382_v61, %v1372_v60  ;;  %v1256_v21 = vld [vmem:[#allocation4 + $0x308] sm:$0xff]  ;;  %v1258_v23 = vld [vmem:[#allocation4 + $0x318] sm:$0xff] }
 0x1a4   : > { %7867 = vmatpush1.bf16.msra.mxu0 %v7866_v3  ;;  %v1371_v3 = vld [vmem:[#allocation4 + $0x11e0] sm:$0xff]  ;;  %v7960_v30 = vpack.c.bf16 %v1268_v24, %v1258_v23  ;;  %v1316_v57 = vld [vmem:[#allocation4 + $0xa88] sm:$0xff]  ;;  %v1328_v60 = vld [vmem:[#allocation4 + $0xbd8] sm:$0xff] }
 0x1a5   : > { %7899 = vmatpush1.bf16.msra.mxu1 %v7898_v4  ;;  %7869 = vmatprep.subr.bf16.mxu0 %v7868_v5  ;;  %v1381_v4 = vld [vmem:[#allocation4 + $0x1320] sm:$0xff]  ;;  %v1373_v5 = vld [vmem:[#allocation4 + $0x11f0] sm:$0xff] }
 0x1a6   : > { %7901 = vmatprep.subr.bf16.mxu1 %v7900_v10  ;;  %v1246_v10 = vld [vmem:[#allocation4 + $0x1c8] sm:$0xff]  ;;  %v7890_v13 = vpack.c.bf16 %v1381_v4, %v1371_v3  ;;  %v7922_v14 = vpack.c.bf16 %v1383_v8, %v1373_v5  ;;  %v7972_v3 = vpack.c.bf16 %v1328_v60, %v1318_v59  ;;  %v1327_v4 = vld [vmem:[#allocation4 + $0xbd0] sm:$0xff]  ;;  %v1338_v8 = vld [vmem:[#allocation4 + $0xd18] sm:$0xff] }
 0x1a7   : > { %v7924_v15 = vpack.c.bf16 %v1246_v10, %v1236_v9  ;;  %v1336_v5 = vld [vmem:[#allocation4 + $0xd08] sm:$0xff]  ;;  %v1348_v9 = vld [vmem:[#allocation4 + $0xe58] sm:$0xff] }
 0x1a8   : > { %7871 = vmatpush1.bf16.msra.mxu0 %v7870_v16  ;;  %v1235_v16 = vld [vmem:[#allocation4 + $0x80] sm:$0xff] }
 0x1a9   : > { %7903 = vmatpush1.bf16.msra.mxu1 %v7902_v17  ;;  %7873 = vmatprep.subr.bf16.mxu0 %v7872_v18  ;;  %v1245_v17 = vld [vmem:[#allocation4 + $0x1c0] sm:$0xff]  ;;  %v1237_v18 = vld [vmem:[#allocation4 + $0x90] sm:$0xff] }
 0x1aa   : > { %7905 = vmatprep.subr.bf16.mxu1 %v7904_v22  ;;  %v1266_v22 = vld [vmem:[#allocation4 + $0x448] sm:$0xff]  ;;  %v7926_v25 = vpack.c.bf16 %v1245_v17, %v1235_v16  ;;  %v7958_v26 = vpack.c.bf16 %v1247_v20, %v1237_v18  ;;  %v7976_v16 = vpack.c.bf16 %v1348_v9, %v1338_v8  ;;  %v1347_v17 = vld [vmem:[#allocation4 + $0xe50] sm:$0xff]  ;;  %v1358_v20 = vld [vmem:[#allocation4 + $0xf98] sm:$0xff] }
 0x1ab   : > { %v7928_v27 = vpack.c.bf16 %v1266_v22, %v1256_v21  ;;  %v1356_v18 = vld [vmem:[#allocation4 + $0xf88] sm:$0xff]  ;;  %v1368_v21 = vld [vmem:[#allocation4 + $0x10d8] sm:$0xff] }
 0x1ac   : > { %7875 = vmatpush1.bf16.msra.mxu0 %v7874_v28  ;;  %v1255_v28 = vld [vmem:[#allocation4 + $0x300] sm:$0xff] }
 0x1ad   : > { %7907 = vmatpush1.bf16.msra.mxu1 %v7906_v7  ;;  %7877 = vmatprep.subr.bf16.mxu0 %v7876_v29  ;;  %v1265_v7 = vld [vmem:[#allocation4 + $0x440] sm:$0xff]  ;;  %v1257_v29 = vld [vmem:[#allocation4 + $0x310] sm:$0xff] }
 0x1ae   : > { %7909 = vmatprep.subr.bf16.mxu1 %v7908_v33  ;;  %v1286_v33 = vld [vmem:[#allocation4 + $0x6c8] sm:$0xff]  ;;  %v7930_v36 = vpack.c.bf16 %v1265_v7, %v1255_v28  ;;  %v7962_v37 = vpack.c.bf16 %v1267_v31, %v1257_v29  ;;  %v7980_v28 = vpack.c.bf16 %v1368_v21, %v1358_v20  ;;  %v1367_v7 = vld [vmem:[#allocation4 + $0x10d0] sm:$0xff]  ;;  %v1378_v31 = vld [vmem:[#allocation4 + $0x1218] sm:$0xff] }
 0x1af   : > { %v7932_v38 = vpack.c.bf16 %v1286_v33, %v1276_v32  ;;  %v1376_v29 = vld [vmem:[#allocation4 + $0x1208] sm:$0xff]  ;;  %v1388_v32 = vld [vmem:[#allocation4 + $0x1358] sm:$0xff] }
 0x1b0   : > { %7879 = vmatpush1.bf16.msra.mxu0 %v7878_v39  ;;  %v1275_v39 = vld [vmem:[#allocation4 + $0x580] sm:$0xff] }
 0x1b1   : > { %7911 = vmatpush1.bf16.msra.mxu1 %v7910_v40  ;;  %7881 = vmatprep.subr.bf16.mxu0 %v7880_v41  ;;  %v1285_v40 = vld [vmem:[#allocation4 + $0x6c0] sm:$0xff]  ;;  %v1277_v41 = vld [vmem:[#allocation4 + $0x590] sm:$0xff] }
 0x1b2   : > { %7913 = vmatprep.subr.bf16.mxu1 %v7912_v45  ;;  %v1306_v45 = vld [vmem:[#allocation4 + $0x948] sm:$0xff]  ;;  %v7934_v49 = vpack.c.bf16 %v1285_v40, %v1275_v39  ;;  %v7966_v50 = vpack.c.bf16 %v1287_v43, %v1277_v41  ;;  %v7984_v39 = vpack.c.bf16 %v1388_v32, %v1378_v31  ;;  %v1387_v40 = vld [vmem:[#allocation4 + $0x1350] sm:$0xff]  ;;  %v1897_v43 = vld [vmem:[#allocation4 + $0xb8] sm:$0xff] }
 0x1b3   : > { %v7936_v51 = vpack.c.bf16 %v1306_v45, %v1296_v44  ;;  %v1895_v41 = vld [vmem:[#allocation4 + $0xa8] sm:$0xff]  ;;  %v1907_v44 = vld [vmem:[#allocation4 + $0x1f8] sm:$0xff] }
 0x1b4   : > { %7883 = vmatpush1.bf16.msra.mxu0 %v7882_v52  ;;  %v1295_v52 = vld [vmem:[#allocation4 + $0x800] sm:$0xff] }
 0x1b5   : > { %7915 = vmatpush1.bf16.msra.mxu1 %v7914_v53  ;;  %7885 = vmatprep.subr.bf16.mxu0 %v7884_v54  ;;  %v1305_v53 = vld [vmem:[#allocation4 + $0x940] sm:$0xff]  ;;  %v1297_v54 = vld [vmem:[#allocation4 + $0x810] sm:$0xff] }
 0x1b6   : > { %7917 = vmatprep.subr.bf16.mxu1 %v7916_v58  ;;  %v1326_v58 = vld [vmem:[#allocation4 + $0xbc8] sm:$0xff]  ;;  %v7938_v61 = vpack.c.bf16 %v1305_v53, %v1295_v52  ;;  %v7970_v62 = vpack.c.bf16 %v1307_v56, %v1297_v54  ;;  %v8020_v52 = vpack.c.bf16 %v1907_v44, %v1897_v43  ;;  %v1906_v53 = vld [vmem:[#allocation4 + $0x1f0] sm:$0xff]  ;;  %v1917_v56 = vld [vmem:[#allocation4 + $0x338] sm:$0xff] }
 0x1b7   : > { %v7940_v63 = vpack.c.bf16 %v1326_v58, %v1316_v57  ;;  %v1915_v54 = vld [vmem:[#allocation4 + $0x328] sm:$0xff]  ;;  %v1927_v57 = vld [vmem:[#allocation4 + $0x478] sm:$0xff] }
 0x1b8   : > { %7887 = vmatpush1.bf16.msra.mxu0 %v7886_v0  ;;  %v1315_v0 = vld [vmem:[#allocation4 + $0xa80] sm:$0xff] }
 0x1b9   : > { %7919 = vmatpush1.bf16.msra.mxu1 %v7918_v1  ;;  %7889 = vmatprep.subr.bf16.mxu0 %v7888_v2  ;;  %v1325_v1 = vld [vmem:[#allocation4 + $0xbc0] sm:$0xff]  ;;  %v1317_v2 = vld [vmem:[#allocation4 + $0xa90] sm:$0xff] }
 0x1ba   : > { %7921 = vmatprep.subr.bf16.mxu1 %v7920_v6  ;;  %v1346_v6 = vld [vmem:[#allocation4 + $0xe48] sm:$0xff]  ;;  %v7942_v10 = vpack.c.bf16 %v1325_v1, %v1315_v0  ;;  %v7974_v11 = vpack.c.bf16 %v1327_v4, %v1317_v2  ;;  %v8024_v0 = vpack.c.bf16 %v1927_v57, %v1917_v56  ;;  %v1926_v1 = vld [vmem:[#allocation4 + $0x470] sm:$0xff]  ;;  %v10221_v4 = vld [vmem:[%s12768_s16] sm:$0xff] }
 0x1bb   : > { %v7944_v12 = vpack.c.bf16 %v1346_v6, %v1336_v5  ;;  %v1935_v2 = vld [vmem:[#allocation4 + $0x5a8] sm:$0xff]  ;;  %v1937_v5 = vld [vmem:[#allocation4 + $0x5b8] sm:$0xff] }
 0x1bc   : > { %7891 = vmatpush1.bf16.msra.mxu0 %v7890_v13  ;;  %v1335_v13 = vld [vmem:[#allocation4 + $0xd00] sm:$0xff]  ;;  %v1947_v6 = vld [vmem:[#allocation4 + $0x6f8] sm:$0xff] }
 0x1bd   : > { %7923 = vmatpush1.bf16.msra.mxu1 %v7922_v14  ;;  %7925 = vmatprep.subr.bf16.mxu0 %v7924_v15  ;;  %v1345_v14 = vld [vmem:[#allocation4 + $0xe40] sm:$0xff]  ;;  %v1337_v15 = vld [vmem:[#allocation4 + $0xd10] sm:$0xff] }
 0x1be   : > { %7957 = vmatprep.subr.bf16.mxu1 %v7956_v19  ;;  %v1366_v19 = vld [vmem:[#allocation4 + $0x10c8] sm:$0xff]  ;;  %v7946_v22 = vpack.c.bf16 %v1345_v14, %v1335_v13  ;;  %v7978_v23 = vpack.c.bf16 %v1347_v17, %v1337_v15  ;;  %v1936_v13 = vld [vmem:[#allocation4 + $0x5b0] sm:$0xff]  ;;  %v8028_v14 = vpack.c.bf16 %v1947_v6, %v1937_v5 }
 0x1bf   : > { %1525 = vmatmul.mubr.f32.vlgmr.msra.gmra.mrb[6].mxu0 %v11068_v48  ;;  %v7948_v24 = vpack.c.bf16 %v1366_v19, %v1356_v18  ;;  %v1946_v15 = vld [vmem:[#allocation4 + $0x6f0] sm:$0xff]  ;;  %v1965_v17 = vld [vmem:[#allocation4 + $0x968] sm:$0xff]  ;;  %v1957_v18 = vld [vmem:[#allocation4 + $0x838] sm:$0xff] }
 0x1c0   : > { %1596 = vmatmul.mubr.f32.vlgmr.msra.gmra.mrb[6].mxu1 %v11068_v48  ;;  %7927 = vmatpush1.bf16.msra.mxu0 %v7926_v25  ;;  %v1308_v48 = vld [vmem:[#allocation4 + $0x958] sm:$0xff]  ;;  %v1355_v25 = vld [vmem:[#allocation4 + $0xf80] sm:$0xff]  ;;  %v8030_v21 = vpack.c.bf16 %v1946_v15, %v1936_v13  ;;  %v1899_v13 = vld [vmem:[#allocation4 + $0xc8] sm:$0xff] }
 0x1c1   : > { %7959 = vmatpush1.bf16.msra.mxu1 %v7958_v26  ;;  %7929 = vmatprep.subr.bf16.mxu0 %v7928_v27  ;;  %v7968_v55 = vpack.c.bf16 %v1308_v48, %v1298_v47  ;;  %v1365_v26 = vld [vmem:[#allocation4 + $0x10c0] sm:$0xff]  ;;  %v1357_v27 = vld [vmem:[#allocation4 + $0xf90] sm:$0xff]  ;;  %v1967_v19 = vld [vmem:[#allocation4 + $0x978] sm:$0xff] }
 0x1c2   : > { %7961 = vmatprep.subr.bf16.mxu1 %v7960_v30  ;;  %1666 = vmatprep.mubr.f32.mxu0 %v11084_v46  ;;  %v1386_v30 = vld [vmem:[#allocation4 + $0x1348] sm:$0xff]  ;;  %v7950_v33 = vpack.c.bf16 %v1365_v26, %v1355_v25  ;;  %v7982_v34 = vpack.c.bf16 %v1367_v7, %v1357_v27  ;;  %v1956_v25 = vld [vmem:[#allocation4 + $0x830] sm:$0xff]  ;;  %v8032_v26 = vpack.c.bf16 %v1967_v19, %v1957_v18  ;;  %v1901_v15 = vld [vmem:[#allocation4 + $0xd8] sm:$0xff] }
 0x1c3   : > { %1737 = vmatprep.mubr.f32.mxu1 %v11084_v46  ;;  %v7952_v35 = vpack.c.bf16 %v1386_v30, %v1376_v29  ;;  %v1966_v27 = vld [vmem:[#allocation4 + $0x970] sm:$0xff]  ;;  %v1985_v7 = vld [vmem:[#allocation4 + $0xbe8] sm:$0xff]  ;;  %v1977_v29 = vld [vmem:[#allocation4 + $0xab8] sm:$0xff] }
 0x1c4   : > { %7931 = vmatpush1.bf16.msra.mxu0 %v7930_v36  ;;  %v1375_v36 = vld [vmem:[#allocation4 + $0x1200] sm:$0xff]  ;;  %v1987_v30 = vld [vmem:[#allocation4 + $0xbf8] sm:$0xff]  ;;  %v8034_v32 = vpack.c.bf16 %v1966_v27, %v1956_v25  ;;  %v1919_v25 = vld [vmem:[#allocation4 + $0x348] sm:$0xff] }
 0x1c5   : > { %7963 = vmatpush1.bf16.msra.mxu1 %v7962_v37  ;;  %7933 = vmatprep.subr.bf16.mxu0 %v7932_v38  ;;  %v1385_v37 = vld [vmem:[#allocation4 + $0x1340] sm:$0xff]  ;;  %v1377_v38 = vld [vmem:[#allocation4 + $0x1210] sm:$0xff]  ;;  %v1921_v27 = vld [vmem:[#allocation4 + $0x358] sm:$0xff] }
 0x1c6   : > { %7965 = vmatprep.subr.bf16.mxu1 %v7964_v42  ;;  %v1905_v42 = vld [vmem:[#allocation4 + $0x1e8] sm:$0xff]  ;;  %v7954_v45 = vpack.c.bf16 %v1385_v37, %v1375_v36  ;;  %v7986_v47 = vpack.c.bf16 %v1387_v40, %v1377_v38  ;;  %v1976_v36 = vld [vmem:[#allocation4 + $0xab0] sm:$0xff]  ;;  %v8036_v37 = vpack.c.bf16 %v1987_v30, %v1977_v29 }
 0x1c7   : > { %v7988_v48 = vpack.c.bf16 %v1905_v42, %v1895_v41  ;;  %v1986_v38 = vld [vmem:[#allocation4 + $0xbf0] sm:$0xff]  ;;  %v2005_v40 = vld [vmem:[#allocation4 + $0xe68] sm:$0xff]  ;;  %v1997_v41 = vld [vmem:[#allocation4 + $0xd38] sm:$0xff] }
 0x1c8   : > { %7935 = vmatpush1.bf16.msra.mxu0 %v7934_v49  ;;  %v1894_v49 = vld [vmem:[#allocation4 + $0xa0] sm:$0xff]  ;;  %v2007_v42 = vld [vmem:[#allocation4 + $0xe78] sm:$0xff]  ;;  %v8038_v44 = vpack.c.bf16 %v1986_v38, %v1976_v36  ;;  %v1930_v36 = vld [vmem:[#allocation4 + $0x490] sm:$0xff] }
 0x1c9   : > { %7967 = vmatpush1.bf16.msra.mxu1 %v7966_v50  ;;  %7937 = vmatprep.subr.bf16.mxu0 %v7936_v51  ;;  %v1904_v50 = vld [vmem:[#allocation4 + $0x1e0] sm:$0xff]  ;;  %v1896_v51 = vld [vmem:[#allocation4 + $0xb0] sm:$0xff]  ;;  %v1949_v38 = vld [vmem:[#allocation4 + $0x708] sm:$0xff] }
 0x1ca   : > { %7969 = vmatprep.subr.bf16.mxu1 %v7968_v55  ;;  %v1925_v55 = vld [vmem:[#allocation4 + $0x468] sm:$0xff]  ;;  %v7990_v58 = vpack.c.bf16 %v1904_v50, %v1894_v49  ;;  %v8022_v59 = vpack.c.bf16 %v1906_v53, %v1896_v51  ;;  %v1996_v49 = vld [vmem:[#allocation4 + $0xd30] sm:$0xff]  ;;  %v8040_v50 = vpack.c.bf16 %v2007_v42, %v1997_v41 }
 0x1cb   : > { %v7992_v60 = vpack.c.bf16 %v1925_v55, %v1915_v54  ;;  %v2006_v51 = vld [vmem:[#allocation4 + $0xe70] sm:$0xff]  ;;  %v2025_v53 = vld [vmem:[#allocation4 + $0x10e8] sm:$0xff]  ;;  %v2017_v54 = vld [vmem:[#allocation4 + $0xfb8] sm:$0xff] }
 0x1cc   : > { %7939 = vmatpush1.bf16.msra.mxu0 %v7938_v61  ;;  %v1914_v61 = vld [vmem:[#allocation4 + $0x320] sm:$0xff]  ;;  %v2027_v55 = vld [vmem:[#allocation4 + $0x10f8] sm:$0xff]  ;;  %v8042_v57 = vpack.c.bf16 %v2006_v51, %v1996_v49  ;;  %v1950_v49 = vld [vmem:[#allocation4 + $0x710] sm:$0xff] }
 0x1cd   : > { %7971 = vmatpush1.bf16.msra.mxu1 %v7970_v62  ;;  %7941 = vmatprep.subr.bf16.mxu0 %v7940_v63  ;;  %v1924_v62 = vld [vmem:[#allocation4 + $0x460] sm:$0xff]  ;;  %v1916_v63 = vld [vmem:[#allocation4 + $0x330] sm:$0xff]  ;;  %v1969_v51 = vld [vmem:[#allocation4 + $0x988] sm:$0xff] }
 0x1ce   : > { %7973 = vmatprep.subr.bf16.mxu1 %v7972_v3  ;;  %v1945_v3 = vld [vmem:[#allocation4 + $0x6e8] sm:$0xff]  ;;  %v7994_v8 = vpack.c.bf16 %v1924_v62, %v1914_v61  ;;  %v8026_v9 = vpack.c.bf16 %v1926_v1, %v1916_v63  ;;  %v2016_v61 = vld [vmem:[#allocation4 + $0xfb0] sm:$0xff]  ;;  %v8044_v62 = vpack.c.bf16 %v2027_v55, %v2017_v54 }
 0x1cf   : > { %v2026_v63 = vld [vmem:[#allocation4 + $0x10f0] sm:$0xff]  ;;  %v2045_v1 = vld [vmem:[#allocation4 + $0x1368] sm:$0xff] }
 0x1d0   : > { %7943 = vmatpush1.bf16.msra.mxu0 %v7942_v10  ;;  %v7996_v10 = vpack.c.bf16 %v1945_v3, %v1935_v2  ;;  %v2037_v2 = vld [vmem:[#allocation4 + $0x1238] sm:$0xff]  ;;  %v8046_v5 = vpack.c.bf16 %v2026_v63, %v2016_v61  ;;  %v1970_v61 = vld [vmem:[#allocation4 + $0x990] sm:$0xff]  ;;  %v1989_v63 = vld [vmem:[#allocation4 + $0xc08] sm:$0xff] }
 0x1d1   : > { %7975 = vmatpush1.bf16.msra.mxu1 %v7974_v11  ;;  %7945 = vmatprep.subr.bf16.mxu0 %v7944_v12  ;;  %v1934_v11 = vld [vmem:[#allocation4 + $0x5a0] sm:$0xff]  ;;  %v2047_v3 = vld [vmem:[#allocation4 + $0x1378] sm:$0xff] }
 0x1d2   : > { %7977 = vmatprep.subr.bf16.mxu1 %v7976_v16  ;;  %v1944_v12 = vld [vmem:[#allocation4 + $0x6e0] sm:$0xff]  ;;  %v1955_v16 = vld [vmem:[#allocation4 + $0x828] sm:$0xff] }
 0x1d3   : > { %v7998_v20 = vpack.c.bf16 %v1944_v12, %v1934_v11  ;;  %v8048_v11 = vpack.c.bf16 %v2047_v3, %v2037_v2  ;;  %v2046_v12 = vld [vmem:[#allocation4 + $0x1370] sm:$0xff] }
 0x1d4   : > { %7947 = vmatpush1.bf16.msra.mxu0 %v7946_v22  ;;  %v8000_v22 = vpack.c.bf16 %v1965_v17, %v1955_v16  ;;  %v1911_v16 = vld [vmem:[#allocation4 + $0x218] sm:$0xff] }
 0x1d5   : > { %7979 = vmatpush1.bf16.msra.mxu1 %v7978_v23  ;;  %7949 = vmatprep.subr.bf16.mxu0 %v7948_v24  ;;  %v1954_v23 = vld [vmem:[#allocation4 + $0x820] sm:$0xff] }
 0x1d6   : > { %7981 = vmatprep.subr.bf16.mxu1 %v7980_v28  ;;  %v1964_v24 = vld [vmem:[#allocation4 + $0x960] sm:$0xff]  ;;  %v1975_v28 = vld [vmem:[#allocation4 + $0xaa8] sm:$0xff] }
 0x1d7   : > { %v8002_v31 = vpack.c.bf16 %v1964_v24, %v1954_v23  ;;  %v8084_v23 = vpack.c.bf16 %v1911_v16, %v1901_v15  ;;  %v1910_v24 = vld [vmem:[#allocation4 + $0x210] sm:$0xff] }
 0x1d8   : > { %7951 = vmatpush1.bf16.msra.mxu0 %v7950_v33  ;;  %v8004_v33 = vpack.c.bf16 %v1985_v7, %v1975_v28  ;;  %v1931_v28 = vld [vmem:[#allocation4 + $0x498] sm:$0xff]  ;;  %v11096_v7 = vld [vmem:[%s12768_s16] sm:$0xff] }
 0x1d9   : > { %7983 = vmatpush1.bf16.msra.mxu1 %v7982_v34  ;;  %7953 = vmatprep.subr.bf16.mxu0 %v7952_v35  ;;  %v1974_v34 = vld [vmem:[#allocation4 + $0xaa0] sm:$0xff] }
 0x1da   : > { %7985 = vmatprep.subr.bf16.mxu1 %v7984_v39  ;;  %v1984_v35 = vld [vmem:[#allocation4 + $0xbe0] sm:$0xff]  ;;  %v1995_v39 = vld [vmem:[#allocation4 + $0xd28] sm:$0xff] }
 0x1db   : > { %v8006_v43 = vpack.c.bf16 %v1984_v35, %v1974_v34  ;;  %v1920_v34 = vld [vmem:[#allocation4 + $0x350] sm:$0xff]  ;;  %v8088_v35 = vpack.c.bf16 %v1931_v28, %v1921_v27 }
 0x1dc   : > { %7955 = vmatpush1.bf16.msra.mxu0 %v7954_v45  ;;  %v8008_v45 = vpack.c.bf16 %v2005_v40, %v1995_v39  ;;  %v1941_v39 = vld [vmem:[#allocation4 + $0x5d8] sm:$0xff]  ;;  %v8090_v42 = vpack.c.bf16 %v1930_v36, %v1920_v34  ;;  %v2030_v34 = vld [vmem:[#allocation4 + $0x1110] sm:$0xff]  ;;  %v2049_v36 = vld [vmem:[#allocation4 + $0x1388] sm:$0xff] }
 0x1dd   : > { %7987 = vmatpush1.bf16.msra.mxu1 %v7986_v47  ;;  %7989 = vmatprep.subr.bf16.mxu0 %v7988_v48  ;;  %v1994_v47 = vld [vmem:[#allocation4 + $0xd20] sm:$0xff]  ;;  %v1951_v40 = vld [vmem:[#allocation4 + $0x718] sm:$0xff] }
 0x1de   : > { %8021 = vmatprep.subr.bf16.mxu1 %v8020_v52  ;;  %v2004_v48 = vld [vmem:[#allocation4 + $0xe60] sm:$0xff]  ;;  %v2015_v52 = vld [vmem:[#allocation4 + $0xfa8] sm:$0xff] }
 0x1df   : > { %1667 = vmatmul.mubr.f32.vlgmr.msra.gmra.mrb[8].mxu0 %v10221_v4  ;;  %v8010_v56 = vpack.c.bf16 %v2004_v48, %v1994_v47  ;;  %v1940_v47 = vld [vmem:[#allocation4 + $0x5d0] sm:$0xff]  ;;  %v8092_v48 = vpack.c.bf16 %v1951_v40, %v1941_v39 }
 0x1e0   : > { %1738 = vmatmul.mubr.f32.vlgmr.msra.gmra.mrb[8].mxu1 %v10221_v4  ;;  %7991 = vmatpush1.bf16.msra.mxu0 %v7990_v58  ;;  %v8012_v58 = vpack.c.bf16 %v2025_v53, %v2015_v52  ;;  %v1961_v52 = vld [vmem:[#allocation4 + $0x858] sm:$0xff]  ;;  %v8094_v55 = vpack.c.bf16 %v1950_v49, %v1940_v47  ;;  %v2050_v47 = vld [vmem:[#allocation4 + $0x1390] sm:$0xff]  ;;  %v1913_v49 = vld [vmem:[#allocation4 + $0x228] sm:$0xff] }
 0x1e1   : > { %8023 = vmatpush1.bf16.msra.mxu1 %v8022_v59  ;;  %7993 = vmatprep.subr.bf16.mxu0 %v7992_v60  ;;  %v2014_v59 = vld [vmem:[#allocation4 + $0xfa0] sm:$0xff]  ;;  %v1971_v53 = vld [vmem:[#allocation4 + $0x998] sm:$0xff] }
 0x1e2   : > { %8025 = vmatprep.subr.bf16.mxu1 %v8024_v0  ;;  %2118 = vmatprep.mubr.f32.mxu0 %v11084_v46  ;;  %v2024_v60 = vld [vmem:[#allocation4 + $0x10e0] sm:$0xff]  ;;  %v2035_v0 = vld [vmem:[#allocation4 + $0x1228] sm:$0xff] }
 0x1e3   : > { %2189 = vmatprep.mubr.f32.mxu1 %v11084_v46  ;;  %v8014_v4 = vpack.c.bf16 %v2024_v60, %v2014_v59  ;;  %v8016_v6 = vpack.c.bf16 %v2045_v1, %v2035_v0  ;;  %v1960_v59 = vld [vmem:[#allocation4 + $0x850] sm:$0xff]  ;;  %v8096_v60 = vpack.c.bf16 %v1971_v53, %v1961_v52  ;;  %v1981_v0 = vld [vmem:[#allocation4 + $0xad8] sm:$0xff] }
 0x1e4   : > { %7995 = vmatpush1.bf16.msra.mxu0 %v7994_v8  ;;  %v2034_v8 = vld [vmem:[#allocation4 + $0x1220] sm:$0xff]  ;;  %v1991_v1 = vld [vmem:[#allocation4 + $0xc18] sm:$0xff]  ;;  %v8098_v3 = vpack.c.bf16 %v1970_v61, %v1960_v59  ;;  %v2569_v59 = vld [vmem:[#allocation4 + $0x230] sm:$0xff] }
 0x1e5   : > { %8027 = vmatpush1.bf16.msra.mxu1 %v8026_v9  ;;  %7997 = vmatprep.subr.bf16.mxu0 %v7996_v10  ;;  %v2044_v9 = vld [vmem:[#allocation4 + $0x1360] sm:$0xff]  ;;  %v2036_v10 = vld [vmem:[#allocation4 + $0x1230] sm:$0xff]  ;;  %v1933_v61 = vld [vmem:[#allocation4 + $0x4a8] sm:$0xff] }
 0x1e6   : > { %8029 = vmatprep.subr.bf16.mxu1 %v8028_v14  ;;  %v1909_v14 = vld [vmem:[#allocation4 + $0x208] sm:$0xff]  ;;  %v8018_v17 = vpack.c.bf16 %v2044_v9, %v2034_v8  ;;  %v8050_v18 = vpack.c.bf16 %v2046_v12, %v2036_v10  ;;  %v1980_v8 = vld [vmem:[#allocation4 + $0xad0] sm:$0xff]  ;;  %v8100_v9 = vpack.c.bf16 %v1991_v1, %v1981_v0 }
 0x1e7   : > { %v8052_v19 = vpack.c.bf16 %v1909_v14, %v1899_v13  ;;  %v1990_v10 = vld [vmem:[#allocation4 + $0xc10] sm:$0xff]  ;;  %v2009_v12 = vld [vmem:[#allocation4 + $0xe88] sm:$0xff]  ;;  %v2001_v13 = vld [vmem:[#allocation4 + $0xd58] sm:$0xff] }
 0x1e8   : > { %7999 = vmatpush1.bf16.msra.mxu0 %v7998_v20  ;;  %v1898_v20 = vld [vmem:[#allocation4 + $0xc0] sm:$0xff]  ;;  %v2011_v14 = vld [vmem:[#allocation4 + $0xe98] sm:$0xff]  ;;  %v8102_v16 = vpack.c.bf16 %v1990_v10, %v1980_v8  ;;  %v2589_v8 = vld [vmem:[#allocation4 + $0x4b0] sm:$0xff] }
 0x1e9   : > { %8031 = vmatpush1.bf16.msra.mxu1 %v8030_v21  ;;  %8001 = vmatprep.subr.bf16.mxu0 %v8000_v22  ;;  %v1908_v21 = vld [vmem:[#allocation4 + $0x200] sm:$0xff]  ;;  %v1900_v22 = vld [vmem:[#allocation4 + $0xd0] sm:$0xff]  ;;  %v1953_v10 = vld [vmem:[#allocation4 + $0x728] sm:$0xff] }
 0x1ea   : > { %8033 = vmatprep.subr.bf16.mxu1 %v8032_v26  ;;  %v1929_v26 = vld [vmem:[#allocation4 + $0x488] sm:$0xff]  ;;  %v8054_v29 = vpack.c.bf16 %v1908_v21, %v1898_v20  ;;  %v8086_v30 = vpack.c.bf16 %v1910_v24, %v1900_v22  ;;  %v2000_v20 = vld [vmem:[#allocation4 + $0xd50] sm:$0xff]  ;;  %v8104_v21 = vpack.c.bf16 %v2011_v14, %v2001_v13 }
 0x1eb   : > { %v2010_v22 = vld [vmem:[#allocation4 + $0xe90] sm:$0xff]  ;;  %v2029_v24 = vld [vmem:[#allocation4 + $0x1108] sm:$0xff] }
 0x1ec   : > { %8003 = vmatpush1.bf16.msra.mxu0 %v8002_v31  ;;  %v8056_v31 = vpack.c.bf16 %v1929_v26, %v1919_v25  ;;  %v2021_v25 = vld [vmem:[#allocation4 + $0xfd8] sm:$0xff]  ;;  %v8106_v28 = vpack.c.bf16 %v2010_v22, %v2000_v20  ;;  %v2609_v20 = vld [vmem:[#allocation4 + $0x730] sm:$0xff]  ;;  %v1973_v22 = vld [vmem:[#allocation4 + $0x9a8] sm:$0xff] }
 0x1ed   : > { %8035 = vmatpush1.bf16.msra.mxu1 %v8034_v32  ;;  %8005 = vmatprep.subr.bf16.mxu0 %v8004_v33  ;;  %v1918_v32 = vld [vmem:[#allocation4 + $0x340] sm:$0xff]  ;;  %v2031_v26 = vld [vmem:[#allocation4 + $0x1118] sm:$0xff] }
 0x1ee   : > { %8037 = vmatprep.subr.bf16.mxu1 %v8036_v37  ;;  %v1928_v33 = vld [vmem:[#allocation4 + $0x480] sm:$0xff]  ;;  %v1939_v37 = vld [vmem:[#allocation4 + $0x5c8] sm:$0xff] }
 0x1ef   : > { %v8058_v41 = vpack.c.bf16 %v1928_v33, %v1918_v32  ;;  %v2020_v32 = vld [vmem:[#allocation4 + $0xfd0] sm:$0xff]  ;;  %v8108_v33 = vpack.c.bf16 %v2031_v26, %v2021_v25  ;;  %v1084_v25 = vlaneseq }
 0x1f0   : > { %8007 = vmatpush1.bf16.msra.mxu0 %v8006_v43  ;;  %v8060_v43 = vpack.c.bf16 %v1949_v38, %v1939_v37  ;;  %v2041_v37 = vld [vmem:[#allocation4 + $0x1258] sm:$0xff]  ;;  %v8110_v40 = vpack.c.bf16 %v2030_v34, %v2020_v32  ;;  %v1983_v34 = vld [vmem:[#allocation4 + $0xae8] sm:$0xff] }
 0x1f1   : > { %8039 = vmatpush1.bf16.msra.mxu1 %v8038_v44  ;;  %8009 = vmatprep.subr.bf16.mxu0 %v8008_v45  ;;  %v1938_v44 = vld [vmem:[#allocation4 + $0x5c0] sm:$0xff]  ;;  %v2051_v38 = vld [vmem:[#allocation4 + $0x1398] sm:$0xff] }
 0x1f2   : > { %8041 = vmatprep.subr.bf16.mxu1 %v8040_v50  ;;  %v1948_v45 = vld [vmem:[#allocation4 + $0x700] sm:$0xff]  ;;  %v1959_v50 = vld [vmem:[#allocation4 + $0x848] sm:$0xff] }
 0x1f3   : > { %v8062_v54 = vpack.c.bf16 %v1948_v45, %v1938_v44  ;;  %v2040_v44 = vld [vmem:[#allocation4 + $0x1250] sm:$0xff]  ;;  %v8112_v45 = vpack.c.bf16 %v2051_v38, %v2041_v37  ;;  %v2650_v37 = vld [vmem:[#allocation4 + $0xc38] sm:$0xff]  ;;  %v11106_v38 = vshrl.u32 %v1084_v25, 7 }
 0x1f4   : > { %8011 = vmatpush1.bf16.msra.mxu0 %v8010_v56  ;;  %v8064_v56 = vpack.c.bf16 %v1969_v51, %v1959_v50  ;;  %v2560_v50 = vld [vmem:[#allocation4 + $0xf8] sm:$0xff]  ;;  %v8114_v53 = vpack.c.bf16 %v2050_v47, %v2040_v44  ;;  %v2003_v47 = vld [vmem:[#allocation4 + $0xd68] sm:$0xff] }
 0x1f5   : > { %8043 = vmatpush1.bf16.msra.mxu1 %v8042_v57  ;;  %8013 = vmatprep.subr.bf16.mxu0 %v8012_v58  ;;  %v1958_v57 = vld [vmem:[#allocation4 + $0x840] sm:$0xff]  ;;  %v2570_v51 = vld [vmem:[#allocation4 + $0x238] sm:$0xff] }
 0x1f6   : > { %8045 = vmatprep.subr.bf16.mxu1 %v8044_v62  ;;  %v1968_v58 = vld [vmem:[#allocation4 + $0x980] sm:$0xff]  ;;  %v1979_v62 = vld [vmem:[#allocation4 + $0xac8] sm:$0xff] }
 0x1f7   : > { %v8066_v2 = vpack.c.bf16 %v1968_v58, %v1958_v57  ;;  %v2559_v57 = vld [vmem:[#allocation4 + $0xf0] sm:$0xff]  ;;  %v8148_v58 = vpack.c.bf16 %v2570_v51, %v2560_v50  ;;  %v2660_v50 = vld [vmem:[#allocation4 + $0xd78] sm:$0xff] }
 0x1f8   : > { %8015 = vmatpush1.bf16.msra.mxu0 %v8014_v4  ;;  %v8068_v4 = vpack.c.bf16 %v1989_v63, %v1979_v62  ;;  %v2580_v62 = vld [vmem:[#allocation4 + $0x378] sm:$0xff]  ;;  %v8150_v1 = vpack.c.bf16 %v2569_v59, %v2559_v57 }
 0x1f9   : > { %8047 = vmatpush1.bf16.msra.mxu1 %v8046_v5  ;;  %8017 = vmatprep.subr.bf16.mxu0 %v8016_v6  ;;  %v1978_v5 = vld [vmem:[#allocation4 + $0xac0] sm:$0xff]  ;;  %v2590_v63 = vld [vmem:[#allocation4 + $0x4b8] sm:$0xff] }
 0x1fa   : > { %8049 = vmatprep.subr.bf16.mxu1 %v8048_v11  ;;  %v1988_v6 = vld [vmem:[#allocation4 + $0xc00] sm:$0xff]  ;;  %v1999_v11 = vld [vmem:[#allocation4 + $0xd48] sm:$0xff]  ;;  %v2670_v51 = vld [vmem:[#allocation4 + $0xeb8] sm:$0xff] }
 0x1fb   : > { %v8070_v15 = vpack.c.bf16 %v1988_v6, %v1978_v5  ;;  %v2579_v5 = vld [vmem:[#allocation4 + $0x370] sm:$0xff]  ;;  %v8152_v6 = vpack.c.bf16 %v2590_v63, %v2580_v62  ;;  %v8168_v63 = vpack.c.bf16 %v2670_v51, %v2660_v50  ;;  %v2564_v51 = vld [vmem:[#allocation4 + $0x118] sm:$0xff] }
 0x1fc   : > { %8019 = vmatpush1.bf16.msra.mxu0 %v8018_v17  ;;  %v8072_v17 = vpack.c.bf16 %v2009_v12, %v1999_v11  ;;  %v2600_v11 = vld [vmem:[#allocation4 + $0x5f8] sm:$0xff]  ;;  %v8154_v14 = vpack.c.bf16 %v2589_v8, %v2579_v5  ;;  %v2659_v62 = vld [vmem:[#allocation4 + $0xd70] sm:$0xff] }
 0x1fd   : > { %8051 = vmatpush1.bf16.msra.mxu1 %v8050_v18  ;;  %8053 = vmatprep.subr.bf16.mxu0 %v8052_v19  ;;  %v1998_v18 = vld [vmem:[#allocation4 + $0xd40] sm:$0xff]  ;;  %v2610_v12 = vld [vmem:[#allocation4 + $0x738] sm:$0xff] }
 0x1fe   : > { %8085 = vmatprep.subr.bf16.mxu1 %v8084_v23  ;;  %v2008_v19 = vld [vmem:[#allocation4 + $0xe80] sm:$0xff]  ;;  %v2019_v23 = vld [vmem:[#allocation4 + $0xfc8] sm:$0xff]  ;;  %v2690_v5 = vld [vmem:[#allocation4 + $0x1138] sm:$0xff] }
 0x1ff   : > { %2119 = vmatmul.mubr.f32.vlgmr.msra.gmra.mrb[10].mxu0 %v11096_v7  ;;  %v8074_v27 = vpack.c.bf16 %v2008_v19, %v1998_v18  ;;  %v2599_v18 = vld [vmem:[#allocation4 + $0x5f0] sm:$0xff]  ;;  %v8156_v19 = vpack.c.bf16 %v2610_v12, %v2600_v11  ;;  %v2022_v11 = vld [vmem:[#allocation4 + $0xfe0] sm:$0xff] }
 0x200   : > { %2190 = vmatmul.mubr.f32.vlgmr.msra.gmra.mrb[10].mxu1 %v11096_v7  ;;  %8055 = vmatpush1.bf16.msra.mxu0 %v8054_v29  ;;  %v8076_v29 = vpack.c.bf16 %v2029_v24, %v2019_v23  ;;  %v2620_v23 = vld [vmem:[#allocation4 + $0x878] sm:$0xff] }
 0x201   : > { %8087 = vmatpush1.bf16.msra.mxu1 %v8086_v30  ;;  %8057 = vmatprep.subr.bf16.mxu0 %v8056_v31  ;;  %v2018_v30 = vld [vmem:[#allocation4 + $0xfc0] sm:$0xff]  ;;  %v2630_v24 = vld [vmem:[#allocation4 + $0x9b8] sm:$0xff] }
 0x202   : > { %8089 = vmatprep.subr.bf16.mxu1 %v8088_v35  ;;  %2260 = vmatprep.mubr.f32.mxu0 %v11084_v46  ;;  %v2028_v31 = vld [vmem:[#allocation4 + $0x1100] sm:$0xff]  ;;  %v2039_v35 = vld [vmem:[#allocation4 + $0x1248] sm:$0xff]  ;;  %v8160_v32 = vpack.c.bf16 %v2630_v24, %v2620_v23 }
 0x203   : > { %2331 = vmatprep.mubr.f32.mxu1 %v11084_v46  ;;  %v8078_v39 = vpack.c.bf16 %v2028_v31, %v2018_v30  ;;  %v1972_v30 = vld [vmem:[#allocation4 + $0x9a0] sm:$0xff]  ;;  %v2619_v31 = vld [vmem:[#allocation4 + $0x870] sm:$0xff]  ;;  %v2053_v23 = vld [vmem:[#allocation4 + $0x13a8] sm:$0xff] }
 0x204   : > { %8059 = vmatpush1.bf16.msra.mxu0 %v8058_v41  ;;  %v8080_v41 = vpack.c.bf16 %v2049_v36, %v2039_v35  ;;  %v1993_v35 = vld [vmem:[#allocation4 + $0xc28] sm:$0xff]  ;;  %v2640_v36 = vld [vmem:[#allocation4 + $0xaf8] sm:$0xff] }
 0x205   : > { %8091 = vmatpush1.bf16.msra.mxu1 %v8090_v42  ;;  %8061 = vmatprep.subr.bf16.mxu0 %v8060_v43  ;;  %v2038_v42 = vld [vmem:[#allocation4 + $0x1240] sm:$0xff]  ;;  %v8164_v44 = vpack.c.bf16 %v2650_v37, %v2640_v36 }
 0x206   : > { %8093 = vmatprep.subr.bf16.mxu1 %v8092_v48  ;;  %v2048_v43 = vld [vmem:[#allocation4 + $0x1380] sm:$0xff]  ;;  %v1903_v48 = vld [vmem:[#allocation4 + $0xe8] sm:$0xff] }
 0x207   : > { %v8082_v52 = vpack.c.bf16 %v2048_v43, %v2038_v42  ;;  %v1992_v42 = vld [vmem:[#allocation4 + $0xc20] sm:$0xff]  ;;  %v2639_v43 = vld [vmem:[#allocation4 + $0xaf0] sm:$0xff] }
 0x208   : > { %8063 = vmatpush1.bf16.msra.mxu0 %v8062_v54  ;;  %v8116_v54 = vpack.c.bf16 %v1913_v49, %v1903_v48  ;;  %v2013_v48 = vld [vmem:[#allocation4 + $0xea8] sm:$0xff]  ;;  %v11109_v49 = vsub.s32 0, %v11106_v38 }
 0x209   : > { %8095 = vmatpush1.bf16.msra.mxu1 %v8094_v55  ;;  %8065 = vmatprep.subr.bf16.mxu0 %v8064_v56  ;;  %v1902_v55 = vld [vmem:[#allocation4 + $0xe0] sm:$0xff]  ;;  %v8136_v59 = vpack.c.bf16 %v2013_v48, %v2003_v47  ;;  %v2572_v47 = vld [vmem:[#allocation4 + $0x248] sm:$0xff] }
 0x20a   : > { %8097 = vmatprep.subr.bf16.mxu1 %v8096_v60  ;;  %v1912_v56 = vld [vmem:[#allocation4 + $0x220] sm:$0xff]  ;;  %v1923_v60 = vld [vmem:[#allocation4 + $0x368] sm:$0xff] }
 0x20b   : > { %v8118_v0 = vpack.c.bf16 %v1912_v56, %v1902_v55  ;;  %v11116_v55 = vsub.s32 2, %v11106_v38  ;;  %v11119_v56 = vsub.s32 1, %v11106_v38 }
 0x20c   : > { %8067 = vmatpush1.bf16.msra.mxu0 %v8066_v2  ;;  %v8120_v2 = vpack.c.bf16 %v1933_v61, %v1923_v60  ;;  %v2002_v60 = vld [vmem:[#allocation4 + $0xd60] sm:$0xff] }
 0x20d   : > { %8099 = vmatpush1.bf16.msra.mxu1 %v8098_v3  ;;  %8069 = vmatprep.subr.bf16.mxu0 %v8068_v4  ;;  %v1922_v3 = vld [vmem:[#allocation4 + $0x360] sm:$0xff] }
 0x20e   : > { %8101 = vmatprep.subr.bf16.mxu1 %v8100_v9  ;;  %v1932_v4 = vld [vmem:[#allocation4 + $0x4a0] sm:$0xff]  ;;  %v1943_v9 = vld [vmem:[#allocation4 + $0x5e8] sm:$0xff] }
 0x20f   : > { %v8122_v13 = vpack.c.bf16 %v1932_v4, %v1922_v3  ;;  %v2012_v61 = vld [vmem:[#allocation4 + $0xea0] sm:$0xff]  ;;  %v2680_v4 = vld [vmem:[#allocation4 + $0xff8] sm:$0xff] }
 0x210   : > { %8071 = vmatpush1.bf16.msra.mxu0 %v8070_v15  ;;  %v8124_v15 = vpack.c.bf16 %v1953_v10, %v1943_v9  ;;  %v8138_v10 = vpack.c.bf16 %v2012_v61, %v2002_v60 }
 0x211   : > { %8103 = vmatpush1.bf16.msra.mxu1 %v8102_v16  ;;  %8073 = vmatprep.subr.bf16.mxu0 %v8072_v17  ;;  %v1942_v16 = vld [vmem:[#allocation4 + $0x5e0] sm:$0xff] }
 0x212   : > { %8105 = vmatprep.subr.bf16.mxu1 %v8104_v21  ;;  %v1952_v17 = vld [vmem:[#allocation4 + $0x720] sm:$0xff]  ;;  %v1963_v21 = vld [vmem:[#allocation4 + $0x868] sm:$0xff] }
 0x213   : > { %v8126_v26 = vpack.c.bf16 %v1952_v17, %v1942_v16  ;;  %v2679_v16 = vld [vmem:[#allocation4 + $0xff0] sm:$0xff] }
 0x214   : > { %8075 = vmatpush1.bf16.msra.mxu0 %v8074_v27  ;;  %v8158_v27 = vpack.c.bf16 %v2609_v20, %v2599_v18  ;;  %v2689_v17 = vld [vmem:[#allocation4 + $0x1130] sm:$0xff] }
 0x215   : > { %8107 = vmatpush1.bf16.msra.mxu1 %v8106_v28  ;;  %8077 = vmatprep.subr.bf16.mxu0 %v8076_v29  ;;  %v8128_v28 = vpack.c.bf16 %v1973_v22, %v1963_v21  ;;  %v1962_v29 = vld [vmem:[#allocation4 + $0x860] sm:$0xff]  ;;  %v8172_v21 = vpack.c.bf16 %v2690_v5, %v2680_v4  ;;  %v2043_v22 = vld [vmem:[#allocation4 + $0x1268] sm:$0xff]  ;;  %v2573_v4 = vld [vmem:[#allocation4 + $0x250] sm:$0xff] }
 0x216   : > { %8109 = vmatprep.subr.bf16.mxu1 %v8108_v33  ;;  %v2629_v33 = vld [vmem:[#allocation4 + $0x9b0] sm:$0xff]  ;;  %v8144_v37 = vpack.c.bf16 %v2053_v23, %v2043_v22  ;;  %v2582_v5 = vld [vmem:[#allocation4 + $0x388] sm:$0xff] }
 0x218   : > { %8079 = vmatpush1.bf16.msra.mxu0 %v8078_v39  ;;  %v8162_v39 = vpack.c.bf16 %v2629_v33, %v2619_v31 }
 0x219   : > { %8111 = vmatpush1.bf16.msra.mxu1 %v8110_v40  ;;  %8081 = vmatprep.subr.bf16.mxu0 %v8080_v41  ;;  %v8132_v40 = vpack.c.bf16 %v1993_v35, %v1983_v34  ;;  %v1982_v41 = vld [vmem:[#allocation4 + $0xae0] sm:$0xff]  ;;  %v8174_v34 = vpack.c.bf16 %v2689_v17, %v2679_v16  ;;  %v2593_v17 = vld [vmem:[#allocation4 + $0x4d0] sm:$0xff] }
 0x21a   : > { %8113 = vmatprep.subr.bf16.mxu1 %v8112_v45  ;;  %v2649_v45 = vld [vmem:[#allocation4 + $0xc30] sm:$0xff] }
 0x21b   : > { %v8166_v57 = vpack.c.bf16 %v2649_v45, %v2639_v43  ;;  %v2562_v45 = vld [vmem:[#allocation4 + $0x108] sm:$0xff] }
 0x21c   : > { %8083 = vmatpush1.bf16.msra.mxu0 %v8082_v52  ;;  %v8134_v52 = vpack.c.bf16 %v1992_v42, %v1982_v41 }
 0x21d   : > { %8115 = vmatpush1.bf16.msra.mxu1 %v8114_v53  ;;  %8117 = vmatprep.subr.bf16.mxu0 %v8116_v54  ;;  %v11111_v53 = vld [vmem:[#allocation6] sm:$0xff]  ;;  %v11113_v54 = vld [vmem:[#allocation8] sm:$0xff] }
 0x21e   : > { %8149 = vmatprep.subr.bf16.mxu1 %v8148_v58  ;;  %v11122_v58 = vsub.s32 3, %v11106_v38  ;;  %v1087_v3 = vrot.slane %v11111_v53, %v11109_v49  ;;  %v1095_v8 = vrot.slane %v11111_v53, %v11116_v55  ;;  %v1091_v9 = vrot.slane %v11111_v53, %v11119_v56 }
 0x21f   : > { %2261 = vmatmul.mubr.f32.vlgmr.msra.gmra.mrb[12].mxu0 %v11096_v7  ;;  %v1155_v20 = vrot.slane %v11113_v54, %v11119_v56 }
 0x220   : > { %2332 = vmatmul.mubr.f32.vlgmr.msra.gmra.mrb[12].mxu1 %v11096_v7  ;;  %8119 = vmatpush1.bf16.msra.mxu0 %v8118_v0  ;;  %v2669_v0 = vld [vmem:[#allocation4 + $0xeb0] sm:$0xff]  ;;  %v1099_v12 = vrot.slane %v11111_v53, %v11122_v58 }
 0x221   : > { %8151 = vmatpush1.bf16.msra.mxu1 %v8150_v1  ;;  %8121 = vmatprep.subr.bf16.mxu0 %v8120_v2  ;;  %v2023_v1 = vld [vmem:[#allocation4 + $0xfe8] sm:$0xff] }
 0x222   : > { %8153 = vmatprep.subr.bf16.mxu1 %v8152_v6  ;;  %2402 = vmatprep.mubr.f32.mxu0 %v11084_v46  ;;  %v2033_v2 = vld [vmem:[#allocation4 + $0x1128] sm:$0xff]  ;;  %v1151_v6 = vrot.slane %v11113_v54, %v11109_v49 }
 0x223   : > { %2783 = vmatprep.mubr.f32.mxu1 %v11084_v46  ;;  %v8130_v46 = vpack.c.bf16 %v1972_v30, %v1962_v29  ;;  %v2710_v29 = vld [vmem:[#allocation4 + $0x13b8] sm:$0xff] }
 0x224   : > { %8123 = vmatpush1.bf16.msra.mxu0 %v8122_v13  ;;  %v8170_v13 = vpack.c.bf16 %v2669_v0, %v2659_v62  ;;  %v2561_v0 = vld [vmem:[#allocation4 + $0x100] sm:$0xff] }
 0x225   : > { %8155 = vmatpush1.bf16.msra.mxu1 %v8154_v14  ;;  %8125 = vmatprep.subr.bf16.mxu0 %v8124_v15  ;;  %v8140_v14 = vpack.c.bf16 %v2033_v2, %v2023_v1  ;;  %v2032_v15 = vld [vmem:[#allocation4 + $0x1120] sm:$0xff]  ;;  %v2563_v2 = vld [vmem:[#allocation4 + $0x110] sm:$0xff] }
 0x226   : > { %8157 = vmatprep.subr.bf16.mxu1 %v8156_v19  ;;  %v1159_v19 = vrot.slane %v11113_v54, %v11116_v55  ;;  %v8142_v33 = vpack.c.bf16 %v2032_v15, %v2022_v11  ;;  %v2571_v1 = vld [vmem:[#allocation4 + $0x240] sm:$0xff]  ;;  %v8214_v11 = vpack.c.bf16 %v2573_v4, %v2563_v2  ;;  %v2583_v15 = vld [vmem:[#allocation4 + $0x390] sm:$0xff]  ;;  %v2674_v2 = vld [vmem:[#allocation4 + $0xed8] sm:$0xff]  ;;  %v11150_v4 = vsub.s32 6, %v11106_v38 }
 0x227   : > { %v8218_v23 = vpack.c.bf16 %v2593_v17, %v2583_v15  ;;  %v2682_v15 = vld [vmem:[#allocation4 + $0x1008] sm:$0xff] }
 0x228   : > { %8127 = vmatpush1.bf16.msra.mxu0 %v8126_v26 }
 0x229   : > { %8159 = vmatpush1.bf16.msra.mxu1 %v8158_v27  ;;  %8129 = vmatprep.subr.bf16.mxu0 %v8128_v28  ;;  %v1163_v27 = vrot.slane %v11113_v54, %v11122_v58  ;;  %v2700_v28 = vld [vmem:[#allocation4 + $0x1278] sm:$0xff] }
 0x22a   : > { %8161 = vmatprep.subr.bf16.mxu1 %v8160_v32  ;;  %v8176_v43 = vpack.c.bf16 %v2710_v29, %v2700_v28  ;;  %v2613_v29 = vld [vmem:[#allocation4 + $0x750] sm:$0xff] }
 0x22c   : > { %8131 = vmatpush1.bf16.msra.mxu0 %v8130_v46  ;;  %v2042_v46 = vld [vmem:[#allocation4 + $0x1260] sm:$0xff] }
 0x22d   : > { %8163 = vmatpush1.bf16.msra.mxu1 %v8162_v39  ;;  %8133 = vmatprep.subr.bf16.mxu0 %v8132_v40  ;;  %v2052_v39 = vld [vmem:[#allocation4 + $0x13a0] sm:$0xff]  ;;  %v2699_v40 = vld [vmem:[#allocation4 + $0x1270] sm:$0xff] }
 0x22e   : > { %8165 = vmatprep.subr.bf16.mxu1 %v8164_v44  ;;  %v2709_v44 = vld [vmem:[#allocation4 + $0x13b0] sm:$0xff]  ;;  %v8146_v60 = vpack.c.bf16 %v2052_v39, %v2042_v46  ;;  %v2621_v46 = vld [vmem:[#allocation4 + $0x880] sm:$0xff] }
 0x22f   : > { %v8178_v62 = vpack.c.bf16 %v2709_v44, %v2699_v40  ;;  %v2631_v39 = vld [vmem:[#allocation4 + $0x9c0] sm:$0xff]  ;;  %v2623_v40 = vld [vmem:[#allocation4 + $0x890] sm:$0xff]  ;;  %v2652_v44 = vld [vmem:[#allocation4 + $0xc48] sm:$0xff] }
 0x230   : > { %8135 = vmatpush1.bf16.msra.mxu0 %v8134_v52  ;;  %v2574_v52 = vld [vmem:[#allocation4 + $0x258] sm:$0xff] }
 0x231   : > { %8167 = vmatpush1.bf16.msra.mxu1 %v8166_v57  ;;  %8137 = vmatprep.subr.bf16.mxu0 %v8136_v59 }
 0x232   : > { %v791_v18 = vpop.f32.mrb[0].mxu0  ;;  %8169 = vmatprep.subr.bf16.mxu1 %v8168_v63  ;;  %v8180_v63 = vpack.c.bf16 %v2572_v47, %v2562_v45  ;;  %v2644_v45 = vld [vmem:[#allocation4 + $0xb18] sm:$0xff] }
 0x233   : > { %v1134_v24 = vmul.f32 %v1087_v3, %v791_v18  ;;  %v862_v25 = vpop.f32.mrb[0].mxu1  ;;  %v793_v26 = vpop.f32.mrb[1].mxu0  ;;  %v8212_v3 = vpack.c.bf16 %v2574_v52, %v2564_v51  ;;  %v2602_v18 = vld [vmem:[#allocation4 + $0x608] sm:$0xff]  ;;  %v2654_v47 = vld [vmem:[#allocation4 + $0xc58] sm:$0xff]  ;;  %v2641_v52 = vld [vmem:[#allocation4 + $0xb00] sm:$0xff] }
 0x234   : > { %v1136_v30 = vmul.f32 %v1095_v8, %v862_v25  ;;  %v1135_v31 = vmul.f32 %v1091_v9, %v793_v26  ;;  %v864_v32 = vpop.f32.mrb[1].mxu1  ;;  %8139 = vmatpush1.bf16.msra.mxu0 %v8138_v10  ;;  %v2584_v8 = vld [vmem:[#allocation4 + $0x398] sm:$0xff]  ;;  %v8182_v10 = vpack.c.bf16 %v2571_v1, %v2561_v0  ;;  %v2601_v25 = vld [vmem:[#allocation4 + $0x600] sm:$0xff]  ;;  %v11147_v0 = vsub.s32 4, %v11106_v38 }
 0x235   : > { %v1198_v35 = vadd.f32 %v1151_v6, %v1134_v24  ;;  %v1137_v36 = vmul.f32 %v1099_v12, %v864_v32  ;;  %8171 = vmatpush1.bf16.msra.mxu1 %v8170_v13  ;;  %8141 = vmatprep.subr.bf16.mxu0 %v8140_v14  ;;  %v2592_v6 = vld [vmem:[#allocation4 + $0x4c8] sm:$0xff]  ;;  %v2594_v9 = vld [vmem:[#allocation4 + $0x4d8] sm:$0xff]  ;;  %v2581_v13 = vld [vmem:[#allocation4 + $0x380] sm:$0xff] }
 0x236   : > { %v1200_v41 = vadd.f32 %v1159_v19, %v1136_v30  ;;  %v1199_v42 = vadd.f32 %v1155_v20, %v1135_v31  ;;  %8173 = vmatprep.subr.bf16.mxu1 %v8172_v21  ;;  %v8184_v12 = vpack.c.bf16 %v2592_v6, %v2582_v5  ;;  %v2591_v14 = vld [vmem:[#allocation4 + $0x4c0] sm:$0xff]  ;;  %v8216_v16 = vpack.c.bf16 %v2594_v9, %v2584_v8  ;;  %v2612_v19 = vld [vmem:[#allocation4 + $0x748] sm:$0xff]  ;;  %v2604_v20 = vld [vmem:[#allocation4 + $0x618] sm:$0xff] }
 0x237   : > { %v1208_v48 = vmax.f32 %v1198_v35, 0.0  ;;  %v1201_v50 = vadd.f32 %v1163_v27, %v1137_v36  ;;  %v2614_v21 = vld [vmem:[#allocation4 + $0x758] sm:$0xff]  ;;  %v8186_v22 = vpack.c.bf16 %v2591_v14, %v2581_v13  ;;  %v8188_v24 = vpack.c.bf16 %v2612_v19, %v2602_v18  ;;  %v2611_v26 = vld [vmem:[#allocation4 + $0x740] sm:$0xff]  ;;  %v2603_v27 = vld [vmem:[#allocation4 + $0x610] sm:$0xff] }
 0x238   : > { %v1210_v57 = vmax.f32 %v1200_v41, 0.0  ;;  %v1209_v59 = vmax.f32 %v1199_v42, 0.0  ;;  %8143 = vmatpush1.bf16.msra.mxu0 %v8142_v33  ;;  %v8220_v28 = vpack.c.bf16 %v2614_v21, %v2604_v20  ;;  %v2622_v30 = vld [vmem:[#allocation4 + $0x888] sm:$0xff]  ;;  %v11142_v32 = vld [vmem:[#allocation3] sm:$0xff]  ;;  %v2624_v33 = vld [vmem:[#allocation4 + $0x898] sm:$0xff]  ;;  %v8190_v35 = vpack.c.bf16 %v2611_v26, %v2601_v25 }
 0x239   : > { %1218 = vst [vmem:[#allocation2] sm:$0xff] %v1208_v48  ;;  %v1211_v61 = vmax.f32 %v1201_v50, 0.0  ;;  %8175 = vmatpush1.bf16.msra.mxu1 %v8174_v34  ;;  %8145 = vmatprep.subr.bf16.mxu0 %v8144_v37  ;;  %v2632_v31 = vld [vmem:[#allocation4 + $0x9c8] sm:$0xff]  ;;  %v2634_v34 = vld [vmem:[#allocation4 + $0x9d8] sm:$0xff]  ;;  %v8222_v36 = vpack.c.bf16 %v2613_v29, %v2603_v27  ;;  %v2633_v42 = vld [vmem:[#allocation4 + $0x9d0] sm:$0xff]  ;;  %v8194_v48 = vpack.c.bf16 %v2631_v39, %v2621_v46  ;;  %v11153_v5 = vsub.s32 5, %v11106_v38 }
 0x23a   : > { %1220 = vst [vmem:[#allocation2 + $0x10] sm:$0xff] %v1210_v57  ;;  %1219 = vst [vmem:[#allocation2 + $0x8] sm:$0xff] %v1209_v59  ;;  %8177 = vmatprep.subr.bf16.mxu1 %v8176_v43  ;;  %v8192_v37 = vpack.c.bf16 %v2632_v31, %v2622_v30  ;;  %v8224_v41 = vpack.c.bf16 %v2634_v34, %v2624_v33  ;;  %v2642_v43 = vld [vmem:[#allocation4 + $0xb08] sm:$0xff]  ;;  %v8226_v50 = vpack.c.bf16 %v2633_v42, %v2623_v40  ;;  %v2651_v57 = vld [vmem:[#allocation4 + $0xc40] sm:$0xff] }
 0x23b   : > { %1221 = vst [vmem:[#allocation2 + $0x18] sm:$0xff] %v1211_v61  ;;  %v8196_v51 = vpack.c.bf16 %v2652_v44, %v2642_v43  ;;  %v2643_v59 = vld [vmem:[#allocation4 + $0xb10] sm:$0xff]  ;;  %v2664_v1 = vld [vmem:[#allocation4 + $0xd98] sm:$0xff]  ;;  %v11156_v8 = vsub.s32 7, %v11106_v38  ;;  %v1103_v17 = vrot.slane %v11111_v53, %v11147_v0  ;;  %v1167_v20 = vrot.slane %v11113_v54, %v11147_v0  ;;  %v2691_v27 = vld [vmem:[#allocation4 + $0x1140] sm:$0xff] }
 0x23c   : > { %8147 = vmatpush1.bf16.msra.mxu0 %v8146_v60  ;;  %v8228_v60 = vpack.c.bf16 %v2654_v47, %v2644_v45  ;;  %v2653_v61 = vld [vmem:[#allocation4 + $0xc50] sm:$0xff]  ;;  %v8232_v13 = vpack.c.bf16 %v2674_v2, %v2664_v1  ;;  %v2684_v18 = vld [vmem:[#allocation4 + $0x1018] sm:$0xff]  ;;  %v1111_v38 = vrot.slane %v11111_v53, %v11150_v4  ;;  %v1107_v21 = vrot.slane %v11111_v53, %v11153_v5  ;;  %v2576_v1 = vld [vmem:[#allocation4 + $0x268] sm:$0xff] }
 0x23d   : > { %8179 = vmatpush1.bf16.msra.mxu1 %v8178_v62  ;;  %8181 = vmatprep.subr.bf16.mxu0 %v8180_v63  ;;  %v2662_v62 = vld [vmem:[#allocation4 + $0xd88] sm:$0xff]  ;;  %v8230_v6 = vpack.c.bf16 %v2653_v61, %v2643_v59  ;;  %v2673_v14 = vld [vmem:[#allocation4 + $0xed0] sm:$0xff]  ;;  %v2694_v19 = vld [vmem:[#allocation4 + $0x1158] sm:$0xff]  ;;  %v1175_v31 = vrot.slane %v11113_v54, %v11150_v4  ;;  %v1171_v33 = vrot.slane %v11113_v54, %v11153_v5 }
 0x23e   : > { %8213 = vmatprep.subr.bf16.mxu1 %v8212_v3  ;;  %v2672_v63 = vld [vmem:[#allocation4 + $0xec8] sm:$0xff]  ;;  %v8198_v3 = vpack.c.bf16 %v2651_v57, %v2641_v52  ;;  %v2693_v29 = vld [vmem:[#allocation4 + $0x1150] sm:$0xff]  ;;  %v8236_v34 = vpack.c.bf16 %v2694_v19, %v2684_v18  ;;  %v1179_v39 = vrot.slane %v11113_v54, %v11156_v8  ;;  %v2704_v40 = vld [vmem:[#allocation4 + $0x1298] sm:$0xff] }
 0x23f   : > { %2403 = vmatmul.mubr.f32.vlgmr.msra.gmra.mrb[14].mxu0 %v11096_v7  ;;  %v8200_v9 = vpack.c.bf16 %v2672_v63, %v2662_v62  ;;  %v2701_v52 = vld [vmem:[#allocation4 + $0x1280] sm:$0xff]  ;;  %v2703_v59 = vld [vmem:[#allocation4 + $0x1290] sm:$0xff]  ;;  %v2566_v63 = vld [vmem:[#allocation4 + $0x128] sm:$0xff] }
 0x240   : > { %2784 = vmatmul.mubr.f32.vlgmr.msra.gmra.mrb[14].mxu1 %v11096_v7  ;;  %8183 = vmatpush1.bf16.msra.mxu0 %v8182_v10  ;;  %v2661_v10 = vld [vmem:[#allocation4 + $0xd80] sm:$0xff]  ;;  %v2713_v62 = vld [vmem:[#allocation4 + $0x13d0] sm:$0xff] }
 0x241   : > { %8215 = vmatpush1.bf16.msra.mxu1 %v8214_v11  ;;  %8185 = vmatprep.subr.bf16.mxu0 %v8184_v12  ;;  %v2671_v11 = vld [vmem:[#allocation4 + $0xec0] sm:$0xff]  ;;  %v2663_v12 = vld [vmem:[#allocation4 + $0xd90] sm:$0xff] }
 0x242   : > { %8217 = vmatprep.subr.bf16.mxu1 %v8216_v16  ;;  %2854 = vmatprep.mubr.f32.mxu0 %v11142_v32  ;;  %v2692_v16 = vld [vmem:[#allocation4 + $0x1148] sm:$0xff]  ;;  %v8234_v25 = vpack.c.bf16 %v2673_v14, %v2663_v12  ;;  %v2711_v57 = vld [vmem:[#allocation4 + $0x13c0] sm:$0xff]  ;;  %v8242_v14 = vpack.c.bf16 %v2713_v62, %v2703_v59  ;;  %v2567_v18 = vld [vmem:[#allocation4 + $0x130] sm:$0xff] }
 0x243   : > { %2925 = vmatprep.mubr.f32.mxu1 %v11142_v32  ;;  %v8204_v26 = vpack.c.bf16 %v2692_v16, %v2682_v15  ;;  %v8210_v12 = vpack.c.bf16 %v2711_v57, %v2701_v52  ;;  %v8244_v15 = vpack.c.bf16 %v2576_v1, %v2566_v63  ;;  %v2565_v16 = vld [vmem:[#allocation4 + $0x120] sm:$0xff]  ;;  %v2627_v59 = vld [vmem:[#allocation4 + $0x8b0] sm:$0xff]  ;;  %v2656_v62 = vld [vmem:[#allocation4 + $0xc68] sm:$0xff] }
 0x244   : > { %8187 = vmatpush1.bf16.msra.mxu0 %v8186_v22  ;;  %v8202_v22 = vpack.c.bf16 %v2671_v11, %v2661_v10  ;;  %v2625_v52 = vld [vmem:[#allocation4 + $0x8a0] sm:$0xff]  ;;  %v2648_v63 = vld [vmem:[#allocation4 + $0xb38] sm:$0xff] }
 0x245   : > { %8219 = vmatpush1.bf16.msra.mxu1 %v8218_v23  ;;  %8189 = vmatprep.subr.bf16.mxu0 %v8188_v24  ;;  %v2681_v23 = vld [vmem:[#allocation4 + $0x1000] sm:$0xff]  ;;  %v1115_v24 = vrot.slane %v11111_v53, %v11156_v8  ;;  %v2658_v1 = vld [vmem:[#allocation4 + $0xc78] sm:$0xff] }
 0x246   : > { %8221 = vmatprep.subr.bf16.mxu1 %v8220_v28  ;;  %v2683_v28 = vld [vmem:[#allocation4 + $0x1010] sm:$0xff]  ;;  %v8206_v45 = vpack.c.bf16 %v2691_v27, %v2681_v23  ;;  %v2598_v23 = vld [vmem:[#allocation4 + $0x4f8] sm:$0xff]  ;;  %v2585_v27 = vld [vmem:[#allocation4 + $0x3a0] sm:$0xff] }
 0x247   : > { %v8238_v47 = vpack.c.bf16 %v2693_v29, %v2683_v28  ;;  %v2595_v28 = vld [vmem:[#allocation4 + $0x4e0] sm:$0xff]  ;;  %v2587_v29 = vld [vmem:[#allocation4 + $0x3b0] sm:$0xff] }
 0x248   : > { %8191 = vmatpush1.bf16.msra.mxu0 %v8190_v35  ;;  %v2702_v35 = vld [vmem:[#allocation4 + $0x1288] sm:$0xff]  ;;  %v2635_v57 = vld [vmem:[#allocation4 + $0x9e0] sm:$0xff] }
 0x249   : > { %8223 = vmatpush1.bf16.msra.mxu1 %v8222_v36  ;;  %8193 = vmatprep.subr.bf16.mxu0 %v8192_v37  ;;  %v2712_v36 = vld [vmem:[#allocation4 + $0x13c8] sm:$0xff] }
 0x24a   : > { %8225 = vmatprep.subr.bf16.mxu1 %v8224_v41  ;;  %v2714_v41 = vld [vmem:[#allocation4 + $0x13d8] sm:$0xff] }
 0x24b   : > { %v8240_v54 = vpack.c.bf16 %v2714_v41, %v2704_v40  ;;  %v2615_v40 = vld [vmem:[#allocation4 + $0x760] sm:$0xff]  ;;  %v2607_v41 = vld [vmem:[#allocation4 + $0x630] sm:$0xff] }
 0x24c   : > { %8195 = vmatpush1.bf16.msra.mxu0 %v8194_v48 }
 0x24d   : > { %8227 = vmatpush1.bf16.msra.mxu1 %v8226_v50  ;;  %8197 = vmatprep.subr.bf16.mxu0 %v8196_v51  ;;  %v8208_v51 = vpack.c.bf16 %v2712_v36, %v2702_v35  ;;  %v2608_v35 = vld [vmem:[#allocation4 + $0x638] sm:$0xff] }
 0x24e   : > { %8229 = vmatprep.subr.bf16.mxu1 %v8228_v60  ;;  %v2618_v36 = vld [vmem:[#allocation4 + $0x778] sm:$0xff] }
 0x250   : > { %8199 = vmatpush1.bf16.msra.mxu0 %v8198_v3 }
 0x251   : > { %8231 = vmatpush1.bf16.msra.mxu1 %v8230_v6  ;;  %8201 = vmatprep.subr.bf16.mxu0 %v8200_v9  ;;  %v2568_v6 = vld [vmem:[#allocation4 + $0x138] sm:$0xff] }
 0x252   : > { %v933_v30 = vpop.f32.mrb[2].mxu0  ;;  %8233 = vmatprep.subr.bf16.mxu1 %v8232_v13  ;;  %v2578_v9 = vld [vmem:[#allocation4 + $0x278] sm:$0xff] }
 0x253   : > { %v1138_v37 = vmul.f32 %v1103_v17, %v933_v30  ;;  %v1004_v46 = vpop.f32.mrb[2].mxu1  ;;  %v935_v53 = vpop.f32.mrb[3].mxu0  ;;  %v2575_v17 = vld [vmem:[#allocation4 + $0x260] sm:$0xff]  ;;  %v8276_v19 = vpack.c.bf16 %v2578_v9, %v2568_v6 }
 0x254   : > { %v1140_v42 = vmul.f32 %v1111_v38, %v1004_v46  ;;  %v1139_v43 = vmul.f32 %v1107_v21, %v935_v53  ;;  %v1006_v44 = vpop.f32.mrb[3].mxu1  ;;  %8203 = vmatpush1.bf16.msra.mxu0 %v8202_v22  ;;  %v2586_v38 = vld [vmem:[#allocation4 + $0x3a8] sm:$0xff]  ;;  %v2588_v22 = vld [vmem:[#allocation4 + $0x3b8] sm:$0xff]  ;;  %v2645_v6 = vld [vmem:[#allocation4 + $0xb20] sm:$0xff] }
 0x255   : > { %v1202_v48 = vadd.f32 %v1167_v20, %v1138_v37  ;;  %v1141_v50 = vmul.f32 %v1115_v24, %v1006_v44  ;;  %8235 = vmatpush1.bf16.msra.mxu1 %v8234_v25  ;;  %8205 = vmatprep.subr.bf16.mxu0 %v8204_v26  ;;  %v2577_v20 = vld [vmem:[#allocation4 + $0x270] sm:$0xff]  ;;  %v2596_v21 = vld [vmem:[#allocation4 + $0x4e8] sm:$0xff]  ;;  %v8246_v24 = vpack.c.bf16 %v2575_v17, %v2565_v16  ;;  %v2655_v9 = vld [vmem:[#allocation4 + $0xc60] sm:$0xff] }
 0x256   : > { %v1204_v60 = vadd.f32 %v1175_v31, %v1140_v42  ;;  %v1203_v61 = vadd.f32 %v1171_v33, %v1139_v43  ;;  %8237 = vmatprep.subr.bf16.mxu1 %v8236_v34  ;;  %v8278_v25 = vpack.c.bf16 %v2577_v20, %v2567_v18  ;;  %v8248_v26 = vpack.c.bf16 %v2596_v21, %v2586_v38  ;;  %v2597_v31 = vld [vmem:[#allocation4 + $0x4f0] sm:$0xff]  ;;  %v2606_v33 = vld [vmem:[#allocation4 + $0x628] sm:$0xff]  ;;  %v2678_v16 = vld [vmem:[#allocation4 + $0xef8] sm:$0xff] }
 0x257   : > { %v1212_v2 = vmax.f32 %v1202_v48, 0.0  ;;  %v1205_v3 = vadd.f32 %v1179_v39, %v1141_v50  ;;  %v8280_v30 = vpack.c.bf16 %v2598_v23, %v2588_v22  ;;  %v2616_v34 = vld [vmem:[#allocation4 + $0x768] sm:$0xff]  ;;  %v8250_v37 = vpack.c.bf16 %v2595_v28, %v2585_v27  ;;  %v2605_v39 = vld [vmem:[#allocation4 + $0x620] sm:$0xff]  ;;  %v2617_v43 = vld [vmem:[#allocation4 + $0x770] sm:$0xff] }
 0x258   : > { %v1214_v10 = vmax.f32 %v1204_v60, 0.0  ;;  %v1213_v11 = vmax.f32 %v1203_v61, 0.0  ;;  %8207 = vmatpush1.bf16.msra.mxu0 %v8206_v45  ;;  %v8282_v46 = vpack.c.bf16 %v2597_v31, %v2587_v29  ;;  %v8252_v53 = vpack.c.bf16 %v2616_v34, %v2606_v33  ;;  %v2626_v44 = vld [vmem:[#allocation4 + $0x8a8] sm:$0xff]  ;;  %v2638_v48 = vld [vmem:[#allocation4 + $0x9f8] sm:$0xff]  ;;  %v2637_v61 = vld [vmem:[#allocation4 + $0x9f0] sm:$0xff] }
 0x259   : > { %1222 = vst [vmem:[#allocation2 + $0x20] sm:$0xff] %v1212_v2  ;;  %v1215_v13 = vmax.f32 %v1205_v3, 0.0  ;;  %8239 = vmatpush1.bf16.msra.mxu1 %v8238_v47  ;;  %8209 = vmatprep.subr.bf16.mxu0 %v8208_v51  ;;  %v8284_v42 = vpack.c.bf16 %v2618_v36, %v2608_v35  ;;  %v2636_v45 = vld [vmem:[#allocation4 + $0x9e8] sm:$0xff]  ;;  %v2628_v47 = vld [vmem:[#allocation4 + $0x8b8] sm:$0xff]  ;;  %v8286_v50 = vpack.c.bf16 %v2617_v43, %v2607_v41  ;;  %v2665_v22 = vld [vmem:[#allocation4 + $0xda0] sm:$0xff] }
 0x25a   : > { %1224 = vst [vmem:[#allocation2 + $0x30] sm:$0xff] %v1214_v10  ;;  %1223 = vst [vmem:[#allocation2 + $0x28] sm:$0xff] %v1213_v11  ;;  %8241 = vmatprep.subr.bf16.mxu1 %v8240_v54  ;;  %v8256_v51 = vpack.c.bf16 %v2636_v45, %v2626_v44  ;;  %v8288_v60 = vpack.c.bf16 %v2638_v48, %v2628_v47  ;;  %v2646_v54 = vld [vmem:[#allocation4 + $0xb28] sm:$0xff]  ;;  %v8258_v2 = vpack.c.bf16 %v2635_v57, %v2625_v52  ;;  %v2647_v10 = vld [vmem:[#allocation4 + $0xb30] sm:$0xff] }
 0x25b   : > { %1225 = vst [vmem:[#allocation2 + $0x38] sm:$0xff] %v1215_v13  ;;  %v8260_v3 = vpack.c.bf16 %v2656_v62, %v2646_v54  ;;  %v8292_v11 = vpack.c.bf16 %v2658_v1, %v2648_v63  ;;  %v2666_v13 = vld [vmem:[#allocation4 + $0xda8] sm:$0xff]  ;;  %v8262_v17 = vpack.c.bf16 %v2655_v9, %v2645_v6  ;;  %v2675_v23 = vld [vmem:[#allocation4 + $0xee0] sm:$0xff]  ;;  %v2688_v31 = vld [vmem:[#allocation4 + $0x1038] sm:$0xff] }
 0x25c   : > { %8211 = vmatpush1.bf16.msra.mxu0 %v8210_v12  ;;  %v2657_v12 = vld [vmem:[#allocation4 + $0xc70] sm:$0xff]  ;;  %v1081_v18 = vld [vmem:[#allocation6 + $0x8] sm:$0x3]  ;;  %v2698_v33 = vld [vmem:[#allocation4 + $0x1178] sm:$0xff] }
 0x25d   : > { %8243 = vmatpush1.bf16.msra.mxu1 %v8242_v14  ;;  %8245 = vmatprep.subr.bf16.mxu0 %v8244_v15  ;;  %v2676_v14 = vld [vmem:[#allocation4 + $0xee8] sm:$0xff]  ;;  %v2668_v15 = vld [vmem:[#allocation4 + $0xdb8] sm:$0xff]  ;;  %v8294_v38 = vpack.c.bf16 %v2657_v12, %v2647_v10  ;;  %v1119_v29 = vrot.slane %v1081_v18, %v11109_v49  ;;  %v1123_v36 = vrot.slane %v1081_v18, %v11119_v56  ;;  %v2695_v41 = vld [vmem:[#allocation4 + $0x1160] sm:$0xff] }
 0x25e   : > { %8277 = vmatprep.subr.bf16.mxu1 %v8276_v19  ;;  %v1145_v19 = vld [vmem:[#allocation8 + $0x8] sm:$0x3]  ;;  %v8264_v21 = vpack.c.bf16 %v2676_v14, %v2666_v13  ;;  %v2686_v27 = vld [vmem:[#allocation4 + $0x1028] sm:$0xff]  ;;  %v8300_v48 = vpack.c.bf16 %v2698_v33, %v2688_v31  ;;  %v2705_v9 = vld [vmem:[#allocation4 + $0x12a0] sm:$0xff] }
 0x25f   : > { %2855 = vmatmul.mubr.f32.vlgmr.msra.gmra.mrb[16].mxu0 %v11096_v7  ;;  %v11178_v20 = vld [vmem:[#allocation6 + $0xa] sm:$0xff]  ;;  %v1183_v34 = vrot.slane %v1145_v19, %v11109_v49  ;;  %v1187_v47 = vrot.slane %v1145_v19, %v11119_v56  ;;  %v2715_v10 = vld [vmem:[#allocation4 + $0x13e0] sm:$0xff] }
 0x260   : > { %2926 = vmatmul.mubr.f32.vlgmr.msra.gmra.mrb[16].mxu1 %v11096_v7  ;;  %8247 = vmatpush1.bf16.msra.mxu0 %v8246_v24  ;;  %v8254_v7 = vpack.c.bf16 %v2615_v40, %v2605_v39  ;;  %v2667_v24 = vld [vmem:[#allocation4 + $0xdb0] sm:$0xff]  ;;  %v2696_v28 = vld [vmem:[#allocation4 + $0x1168] sm:$0xff]  ;;  %v1751_v35 = vrot.slane %v11178_v20, %v11109_v49 }
 0x261   : > { %8279 = vmatpush1.bf16.msra.mxu1 %v8278_v25  ;;  %8249 = vmatprep.subr.bf16.mxu0 %v8248_v26  ;;  %v8296_v25 = vpack.c.bf16 %v2678_v16, %v2668_v15  ;;  %v2677_v26 = vld [vmem:[#allocation4 + $0xef0] sm:$0xff]  ;;  %v8268_v40 = vpack.c.bf16 %v2696_v28, %v2686_v27  ;;  %v1771_v28 = vrot.slane %v11178_v20, %v11153_v5 }
 0x262   : > { %8281 = vmatprep.subr.bf16.mxu1 %v8280_v30  ;;  %2996 = vmatprep.mubr.f32.mxu0 %v11142_v32  ;;  %v11181_v30 = vld [vmem:[#allocation8 + $0xa] sm:$0xff]  ;;  %v8298_v39 = vpack.c.bf16 %v2677_v26, %v2667_v24  ;;  %v1759_v24 = vrot.slane %v11178_v20, %v11116_v55  ;;  %v1763_v26 = vrot.slane %v11178_v20, %v11122_v58 }
 0x263   : > { %3067 = vmatprep.mubr.f32.mxu1 %v11142_v32  ;;  %v8290_v32 = vpack.c.bf16 %v2637_v61, %v2627_v59  ;;  %v2697_v43 = vld [vmem:[#allocation4 + $0x1170] sm:$0xff]  ;;  %v1815_v45 = vrot.slane %v11181_v30, %v11109_v49  ;;  %v1819_v59 = vrot.slane %v11181_v30, %v11119_v56  ;;  %v2718_v61 = vld [vmem:[#allocation4 + $0x13f8] sm:$0xff]  ;;  %v1823_v27 = vrot.slane %v11181_v30, %v11116_v55 }
 0x264   : > { %8251 = vmatpush1.bf16.msra.mxu0 %v8250_v37  ;;  %v8266_v37 = vpack.c.bf16 %v2675_v23, %v2665_v22  ;;  %v2707_v14 = vld [vmem:[#allocation4 + $0x12b0] sm:$0xff]  ;;  %v10223_v23 = vld [vmem:[%s12768_s16] sm:$0xff]  ;;  %v1831_v31 = vrot.slane %v11181_v30, %v11147_v0  ;;  %v1827_v33 = vrot.slane %v11181_v30, %v11122_v58 }
 0x265   : > { %8283 = vmatpush1.bf16.msra.mxu1 %v8282_v46  ;;  %8253 = vmatprep.subr.bf16.mxu0 %v8252_v53  ;;  %v2685_v46 = vld [vmem:[#allocation4 + $0x1020] sm:$0xff]  ;;  %v1755_v53 = vrot.slane %v11178_v20, %v11119_v56  ;;  %v2717_v15 = vld [vmem:[#allocation4 + $0x13f0] sm:$0xff] }
 0x266   : > { %8285 = vmatprep.subr.bf16.mxu1 %v8284_v42  ;;  %v2687_v42 = vld [vmem:[#allocation4 + $0x1030] sm:$0xff]  ;;  %v8270_v1 = vpack.c.bf16 %v2695_v41, %v2685_v46  ;;  %v8306_v22 = vpack.c.bf16 %v2717_v15, %v2707_v14 }
 0x268   : > { %8255 = vmatpush1.bf16.msra.mxu0 %v8254_v7  ;;  %v2706_v7 = vld [vmem:[#allocation4 + $0x12a8] sm:$0xff] }
 0x269   : > { %8287 = vmatpush1.bf16.msra.mxu1 %v8286_v50  ;;  %8257 = vmatprep.subr.bf16.mxu0 %v8256_v51  ;;  %v2716_v50 = vld [vmem:[#allocation4 + $0x13e8] sm:$0xff] }
 0x26a   : > { %8289 = vmatprep.subr.bf16.mxu1 %v8288_v60  ;;  %v2708_v60 = vld [vmem:[#allocation4 + $0x12b8] sm:$0xff]  ;;  %v8272_v6 = vpack.c.bf16 %v2716_v50, %v2706_v7  ;;  %v1745_v50 = vld [vmem:[#allocation6 + $0x12] sm:$0x3] }
 0x26b   : > { %v8304_v13 = vpack.c.bf16 %v2718_v61, %v2708_v60  ;;  %v1839_v60 = vrot.slane %v11181_v30, %v11150_v4  ;;  %v1787_v61 = vrot.slane %v1745_v50, %v11119_v56 }
 0x26c   : > { %8259 = vmatpush1.bf16.msra.mxu0 %v8258_v2  ;;  %v8302_v2 = vpack.c.bf16 %v2697_v43, %v2687_v42 }
 0x26d   : > { %8291 = vmatpush1.bf16.msra.mxu1 %v8290_v32  ;;  %8261 = vmatprep.subr.bf16.mxu0 %v8260_v3 }
 0x26e   : > { %8293 = vmatprep.subr.bf16.mxu1 %v8292_v11 }
 0x270   : > { %8263 = vmatpush1.bf16.msra.mxu0 %v8262_v17 }
 0x271   : > { %8295 = vmatpush1.bf16.msra.mxu1 %v8294_v38  ;;  %8265 = vmatprep.subr.bf16.mxu0 %v8264_v21  ;;  %v8274_v38 = vpack.c.bf16 %v2715_v10, %v2705_v9 }
 0x272   : > { %v1075_v44 = vpop.f32.mrb[4].mxu0  ;;  %8297 = vmatprep.subr.bf16.mxu1 %v8296_v25  ;;  %v1767_v25 = vrot.slane %v11178_v20, %v11147_v0 }
 0x273   : > { %v1142_v51 = vmul.f32 %v1119_v29, %v1075_v44  ;;  %v1455_v52 = vpop.f32.mrb[4].mxu1  ;;  %v1077_v57 = vpop.f32.mrb[5].mxu0 }
 0x274   : > { %v1798_v54 = vmul.f32 %v1751_v35, %v1455_v52  ;;  %v1143_v62 = vmul.f32 %v1123_v36, %v1077_v57  ;;  %v1457_v63 = vpop.f32.mrb[5].mxu1  ;;  %8267 = vmatpush1.bf16.msra.mxu0 %v8266_v37  ;;  %v1835_v37 = vrot.slane %v11181_v30, %v11153_v5  ;;  %v1809_v52 = vld [vmem:[#allocation8 + $0x12] sm:$0x3]  ;;  %v1783_v57 = vrot.slane %v1745_v50, %v11109_v49 }
 0x275   : > { %v1206_v32 = vadd.f32 %v1183_v34, %v1142_v51  ;;  %v1799_v3 = vmul.f32 %v1755_v53, %v1457_v63  ;;  %8299 = vmatpush1.bf16.msra.mxu1 %v8298_v39  ;;  %8269 = vmatprep.subr.bf16.mxu0 %v8268_v40  ;;  %v1775_v51 = vrot.slane %v11178_v20, %v11150_v4 }
 0x276   : > { %v1862_v11 = vadd.f32 %v1815_v45, %v1798_v54  ;;  %v1207_v12 = vadd.f32 %v1187_v47, %v1143_v62  ;;  %8301 = vmatprep.subr.bf16.mxu1 %v8300_v48  ;;  %v1847_v62 = vrot.slane %v1809_v52, %v11109_v49  ;;  %v1843_v63 = vrot.slane %v11181_v30, %v11156_v8  ;;  %v2409_v30 = vld [vmem:[#allocation6 + $0x14] sm:$0xff] }
 0x277   : > { %v1216_v16 = vmax.f32 %v1206_v32, 0.0  ;;  %v1863_v17 = vadd.f32 %v1819_v59, %v1799_v3  ;;  %v1779_v59 = vrot.slane %v11178_v20, %v11156_v8  ;;  %v1851_v3 = vrot.slane %v1809_v52, %v11119_v56 }
 0x278   : > { %v1872_v18 = vmax.f32 %v1862_v11, 0.0  ;;  %v1217_v19 = vmax.f32 %v1207_v12, 0.0  ;;  %8271 = vmatpush1.bf16.msra.mxu0 %v8270_v1  ;;  %v2444_v50 = vrot.slane %v2409_v30, %v11156_v8 }
 0x279   : > { %1226 = vst [vmem:[#allocation2 + $0x40] sm:$0xff] %v1216_v16  ;;  %v1873_v21 = vmax.f32 %v1863_v17, 0.0  ;;  %8303 = vmatpush1.bf16.msra.mxu1 %v8302_v2  ;;  %8273 = vmatprep.subr.bf16.mxu0 %v8272_v6 }
 0x27a   : > { %1883 = vst [vmem:[#allocation2 + $0x50] sm:$0xff] %v1872_v18  ;;  %1227 = vst [vmem:[#allocation2 + $0x48] sm:$0xff] %v1217_v19  ;;  %8305 = vmatprep.subr.bf16.mxu1 %v8304_v13  ;;  %v2473_v19 = vld [vmem:[#allocation8 + $0x14] sm:$0xff] }
 0x27b   : > { %1884 = vst [vmem:[#allocation2 + $0x58] sm:$0xff] %v1873_v21  ;;  %v2424_v21 = vrot.slane %v2409_v30, %v11116_v55  ;;  %v2504_v52 = vrot.slane %v2473_v19, %v11150_v4 }
 0x27c   : > { %8275 = vmatpush1.bf16.msra.mxu0 %v8274_v38  ;;  %v2416_v38 = vrot.slane %v2409_v30, %v11109_v49 }
 0x27d   : > { %8307 = vmatpush1.bf16.msra.mxu1 %v8306_v22  ;;  %v2420_v22 = vrot.slane %v2409_v30, %v11119_v56 }
 0x27f   : > { %2997 = vmatmul.mubr.f32.vlgmr.msra.gmra.mrb[18].mxu0 %v10223_v23 }
 0x280   : > { %3068 = vmatmul.mubr.f32.vlgmr.msra.gmra.mrb[18].mxu1 %v10223_v23  ;;  %v2480_v23 = vrot.slane %v2473_v19, %v11109_v49 }
 0x292   : > { %v1526_v29 = vpop.f32.mrb[6].mxu0 }
 0x293   : > { %v1800_v34 = vmul.f32 %v1759_v24, %v1526_v29  ;;  %v1597_v35 = vpop.f32.mrb[6].mxu1  ;;  %v1528_v36 = vpop.f32.mrb[7].mxu0  ;;  %v2428_v24 = vrot.slane %v2409_v30, %v11122_v58 }
 0x294   : > { %v1802_v46 = vmul.f32 %v1767_v25, %v1597_v35  ;;  %v1801_v53 = vmul.f32 %v1763_v26, %v1528_v36  ;;  %v1599_v39 = vpop.f32.mrb[7].mxu1  ;;  %v2488_v26 = vrot.slane %v2473_v19, %v11116_v55 }
 0x295   : > { %v1864_v40 = vadd.f32 %v1823_v27, %v1800_v34  ;;  %v1803_v41 = vmul.f32 %v1771_v28, %v1599_v39  ;;  %v2484_v27 = vrot.slane %v2473_v19, %v11119_v56 }
 0x296   : > { %v1866_v42 = vadd.f32 %v1831_v31, %v1802_v46  ;;  %v1865_v43 = vadd.f32 %v1827_v33, %v1801_v53  ;;  %v2492_v33 = vrot.slane %v2473_v19, %v11122_v58 }
 0x297   : > { %v1874_v44 = vmax.f32 %v1864_v40, 0.0  ;;  %v1867_v45 = vadd.f32 %v1835_v37, %v1803_v41 }
 0x298   : > { %v1876_v47 = vmax.f32 %v1866_v42, 0.0  ;;  %v1875_v48 = vmax.f32 %v1865_v43, 0.0 }
 0x299   : > { %1885 = vst [vmem:[#allocation2 + $0x60] sm:$0xff] %v1874_v44  ;;  %v1877_v7 = vmax.f32 %v1867_v45, 0.0  ;;  %v2432_v45 = vrot.slane %v2409_v30, %v11147_v0 }
 0x29a   : > { %1887 = vst [vmem:[#allocation2 + $0x70] sm:$0xff] %v1876_v47  ;;  %1886 = vst [vmem:[#allocation2 + $0x68] sm:$0xff] %v1875_v48  ;;  %v2440_v47 = vrot.slane %v2409_v30, %v11150_v4  ;;  %v2436_v48 = vrot.slane %v2409_v30, %v11153_v5 }
 0x29b   : > { %1888 = vst [vmem:[#allocation2 + $0x78] sm:$0xff] %v1877_v7  ;;  %v2496_v7 = vrot.slane %v2473_v19, %v11147_v0 }
 0x2b2   : > { %v1668_v54 = vpop.f32.mrb[8].mxu0 }
 0x2b3   : > { %v1804_v1 = vmul.f32 %v1775_v51, %v1668_v54  ;;  %v1739_v2 = vpop.f32.mrb[8].mxu1  ;;  %v1670_v32 = vpop.f32.mrb[9].mxu0  ;;  %v2508_v54 = vrot.slane %v2473_v19, %v11156_v8 }
 0x2b4   : > { %v1806_v6 = vmul.f32 %v1783_v57, %v1739_v2  ;;  %v1805_v9 = vmul.f32 %v1779_v59, %v1670_v32  ;;  %v1741_v10 = vpop.f32.mrb[9].mxu1  ;;  %v2500_v57 = vrot.slane %v2473_v19, %v11153_v5 }
 0x2b5   : > { %v1868_v20 = vadd.f32 %v1839_v60, %v1804_v1  ;;  %v1807_v11 = vmul.f32 %v1787_v61, %v1741_v10 }
 0x2b6   : > { %v1870_v12 = vadd.f32 %v1847_v62, %v1806_v6  ;;  %v1869_v13 = vadd.f32 %v1843_v63, %v1805_v9 }
 0x2b7   : > { %v1878_v14 = vmax.f32 %v1868_v20, 0.0  ;;  %v1871_v15 = vadd.f32 %v1851_v3, %v1807_v11 }
 0x2b8   : > { %v1880_v16 = vmax.f32 %v1870_v12, 0.0  ;;  %v1879_v17 = vmax.f32 %v1869_v13, 0.0  ;;  %v2410_v13 = vld [vmem:[#allocation6 + $0x1c] sm:$0x3] }
 0x2b9   : > { %1889 = vst [vmem:[#allocation2 + $0x80] sm:$0xff] %v1878_v14  ;;  %v1881_v18 = vmax.f32 %v1871_v15, 0.0  ;;  %v11241_v14 = vld [vmem:[#allocation6 + $0x1e] sm:$0xff]  ;;  %v2452_v30 = vrot.slane %v2410_v13, %v11119_v56 }
 0x2ba   : > { %1891 = vst [vmem:[#allocation2 + $0x90] sm:$0xff] %v1880_v16  ;;  %1890 = vst [vmem:[#allocation2 + $0x88] sm:$0xff] %v1879_v17  ;;  %v2474_v15 = vld [vmem:[#allocation8 + $0x1c] sm:$0x3]  ;;  %v2448_v16 = vrot.slane %v2410_v13, %v11109_v49  ;;  %v11244_v17 = vld [vmem:[#allocation8 + $0x1e] sm:$0xff] }
 0x2bb   : > { %1892 = vst [vmem:[#allocation2 + $0x98] sm:$0xff] %v1881_v18  ;;  %v3081_v18 = vrot.slane %v11241_v14, %v11109_v49  ;;  %v2512_v19 = vrot.slane %v2474_v15, %v11109_v49 }
 0x2d2   : > { %v2120_v25 = vpop.f32.mrb[10].mxu0 }
 0x2d3   : > { %v2463_v28 = vmul.f32 %v2416_v38, %v2120_v25  ;;  %v2191_v29 = vpop.f32.mrb[10].mxu1  ;;  %v2122_v31 = vpop.f32.mrb[11].mxu0  ;;  %v3085_v38 = vrot.slane %v11241_v14, %v11119_v56 }
 0x2d4   : > { %v2465_v34 = vmul.f32 %v2424_v21, %v2191_v29  ;;  %v2464_v35 = vmul.f32 %v2420_v22, %v2122_v31  ;;  %v2193_v36 = vpop.f32.mrb[11].mxu1  ;;  %v3145_v22 = vrot.slane %v11244_v17, %v11109_v49 }
 0x2d5   : > { %v2527_v37 = vadd.f32 %v2480_v23, %v2463_v28  ;;  %v2466_v46 = vmul.f32 %v2428_v24, %v2193_v36  ;;  %v2516_v23 = vrot.slane %v2474_v15, %v11119_v56  ;;  %v3173_v15 = vrot.slane %v11244_v17, %v11156_v8 }
 0x2d6   : > { %v2529_v53 = vadd.f32 %v2488_v26, %v2465_v34  ;;  %v2528_v39 = vadd.f32 %v2484_v27, %v2464_v35  ;;  %v3149_v27 = vrot.slane %v11244_v17, %v11119_v56 }
 0x2d7   : > { %v2537_v40 = vmax.f32 %v2527_v37, 0.0  ;;  %v2530_v41 = vadd.f32 %v2492_v33, %v2466_v46 }
 0x2d8   : > { %v2539_v42 = vmax.f32 %v2529_v53, 0.0  ;;  %v2538_v43 = vmax.f32 %v2528_v39, 0.0 }
 0x2d9   : > { %2548 = vst [vmem:[#allocation2 + $0xa0] sm:$0xff] %v2537_v40  ;;  %v2540_v44 = vmax.f32 %v2530_v41, 0.0  ;;  %v3089_v41 = vrot.slane %v11241_v14, %v11116_v55 }
 0x2da   : > { %2550 = vst [vmem:[#allocation2 + $0xb0] sm:$0xff] %v2539_v42  ;;  %2549 = vst [vmem:[#allocation2 + $0xa8] sm:$0xff] %v2538_v43  ;;  %v3097_v42 = vrot.slane %v11241_v14, %v11147_v0  ;;  %v3093_v43 = vrot.slane %v11241_v14, %v11122_v58 }
 0x2db   : > { %2551 = vst [vmem:[#allocation2 + $0xb8] sm:$0xff] %v2540_v44  ;;  %v3153_v44 = vrot.slane %v11244_v17, %v11116_v55 }
 0x2f2   : > { %v2262_v51 = vpop.f32.mrb[12].mxu0 }
 0x2f3   : > { %v2467_v59 = vmul.f32 %v2432_v45, %v2262_v51  ;;  %v2333_v60 = vpop.f32.mrb[12].mxu1  ;;  %v2264_v61 = vpop.f32.mrb[13].mxu0  ;;  %v3101_v45 = vrot.slane %v11241_v14, %v11153_v5 }
 0x2f4   : > { %v2469_v62 = vmul.f32 %v2440_v47, %v2333_v60  ;;  %v2468_v63 = vmul.f32 %v2436_v48, %v2264_v61  ;;  %v2335_v1 = vpop.f32.mrb[13].mxu1  ;;  %v3161_v48 = vrot.slane %v11244_v17, %v11147_v0 }
 0x2f5   : > { %v2531_v2 = vadd.f32 %v2496_v7, %v2467_v59  ;;  %v2470_v32 = vmul.f32 %v2444_v50, %v2335_v1  ;;  %v3157_v7 = vrot.slane %v11244_v17, %v11122_v58  ;;  %v3075_v58 = vld [vmem:[#allocation6 + $0x26] sm:$0x3] }
 0x2f6   : > { %v2533_v3 = vadd.f32 %v2504_v52, %v2469_v62  ;;  %v2532_v6 = vadd.f32 %v2500_v57, %v2468_v63  ;;  %v3165_v57 = vrot.slane %v11244_v17, %v11153_v5  ;;  %v3105_v5 = vrot.slane %v11241_v14, %v11150_v4 }
 0x2f7   : > { %v2541_v9 = vmax.f32 %v2531_v2, 0.0  ;;  %v2534_v10 = vadd.f32 %v2508_v54, %v2470_v32 }
 0x2f8   : > { %v2543_v20 = vmax.f32 %v2533_v3, 0.0  ;;  %v2542_v11 = vmax.f32 %v2532_v6, 0.0  ;;  %v3139_v6 = vld [vmem:[#allocation8 + $0x26] sm:$0x3] }
 0x2f9   : > { %2552 = vst [vmem:[#allocation2 + $0xc0] sm:$0xff] %v2541_v9  ;;  %v2544_v12 = vmax.f32 %v2534_v10, 0.0  ;;  %v3113_v9 = vrot.slane %v3075_v58, %v11109_v49  ;;  %v3109_v10 = vrot.slane %v11241_v14, %v11156_v8  ;;  %v3177_v13 = vrot.slane %v3139_v6, %v11109_v49 }
 0x2fa   : > { %2554 = vst [vmem:[#allocation2 + $0xd0] sm:$0xff] %v2543_v20  ;;  %2553 = vst [vmem:[#allocation2 + $0xc8] sm:$0xff] %v2542_v11  ;;  %v3169_v20 = vrot.slane %v11244_v17, %v11150_v4  ;;  %v3117_v11 = vrot.slane %v3075_v58, %v11119_v56 }
 0x2fb   : > { %2555 = vst [vmem:[#allocation2 + $0xd8] sm:$0xff] %v2544_v12 }
 0x312   : > { %v2404_v21 = vpop.f32.mrb[14].mxu0 }
 0x313   : > { %v2471_v24 = vmul.f32 %v2448_v16, %v2404_v21  ;;  %v2785_v25 = vpop.f32.mrb[14].mxu1  ;;  %v2406_v26 = vpop.f32.mrb[15].mxu0 }
 0x314   : > { %v3128_v28 = vmul.f32 %v3081_v18, %v2785_v25  ;;  %v2472_v29 = vmul.f32 %v2452_v30, %v2406_v26  ;;  %v2787_v31 = vpop.f32.mrb[15].mxu1 }
 0x315   : > { %v2535_v33 = vadd.f32 %v2512_v19, %v2471_v24  ;;  %v3129_v34 = vmul.f32 %v3085_v38, %v2787_v31  ;;  %v3181_v19 = vrot.slane %v3139_v6, %v11119_v56 }
 0x316   : > { %v3192_v35 = vadd.f32 %v3145_v22, %v3128_v28  ;;  %v2536_v36 = vadd.f32 %v2516_v23, %v2472_v29 }
 0x317   : > { %v2545_v37 = vmax.f32 %v2535_v33, 0.0  ;;  %v3193_v46 = vadd.f32 %v3149_v27, %v3129_v34 }
 0x318   : > { %v3202_v53 = vmax.f32 %v3192_v35, 0.0  ;;  %v2546_v39 = vmax.f32 %v2536_v36, 0.0 }
 0x319   : > { %2556 = vst [vmem:[#allocation2 + $0xe0] sm:$0xff] %v2545_v37  ;;  %v3203_v40 = vmax.f32 %v3193_v46, 0.0 }
 0x31a   : > { %3213 = vst [vmem:[#allocation2 + $0xf0] sm:$0xff] %v3202_v53  ;;  %2557 = vst [vmem:[#allocation2 + $0xe8] sm:$0xff] %v2546_v39 }
 0x31b   : > { %3214 = vst [vmem:[#allocation2 + $0xf8] sm:$0xff] %v3203_v40 }
 0x332   : > { %v2856_v47 = vpop.f32.mrb[16].mxu0 }
 0x333   : > { %v3130_v50 = vmul.f32 %v3089_v41, %v2856_v47  ;;  %v2927_v51 = vpop.f32.mrb[16].mxu1  ;;  %v2858_v52 = vpop.f32.mrb[17].mxu0 }
 0x334   : > { %v3132_v59 = vmul.f32 %v3097_v42, %v2927_v51  ;;  %v3131_v60 = vmul.f32 %v3093_v43, %v2858_v52  ;;  %v2929_v61 = vpop.f32.mrb[17].mxu1 }
 0x335   : > { %v3194_v55 = vadd.f32 %v3153_v44, %v3130_v50  ;;  %v3133_v54 = vmul.f32 %v3101_v45, %v2929_v61 }
 0x336   : > { %v3196_v62 = vadd.f32 %v3161_v48, %v3132_v59  ;;  %v3195_v63 = vadd.f32 %v3157_v7, %v3131_v60 }
 0x337   : > { %v3204_v1 = vmax.f32 %v3194_v55, 0.0  ;;  %v3197_v2 = vadd.f32 %v3165_v57, %v3133_v54 }
 0x338   : > { %v3206_v32 = vmax.f32 %v3196_v62, 0.0  ;;  %v3205_v0 = vmax.f32 %v3195_v63, 0.0 }
 0x339   : > { %3215 = vst [vmem:[#allocation2 + $0x100] sm:$0xff] %v3204_v1  ;;  %v3207_v3 = vmax.f32 %v3197_v2, 0.0 }
 0x33a   : > { %3217 = vst [vmem:[#allocation2 + $0x110] sm:$0xff] %v3206_v32  ;;  %3216 = vst [vmem:[#allocation2 + $0x108] sm:$0xff] %v3205_v0 }
 0x33b   : > { %3218 = vst [vmem:[#allocation2 + $0x118] sm:$0xff] %v3207_v3 }
 0x352   : > { %v2998_v12 = vpop.f32.mrb[18].mxu0 }
 0x353   : > { %v3134_v16 = vmul.f32 %v3105_v5, %v2998_v12  ;;  %v3069_v18 = vpop.f32.mrb[18].mxu1  ;;  %v3000_v30 = vpop.f32.mrb[19].mxu0 }
 0x354   : > { %v3136_v38 = vmul.f32 %v3113_v9, %v3069_v18  ;;  %v3135_v21 = vmul.f32 %v3109_v10, %v3000_v30  ;;  %v3071_v22 = vpop.f32.mrb[19].mxu1 }
 0x355   : > { %v3198_v14 = vadd.f32 %v3169_v20, %v3134_v16  ;;  %v3137_v23 = vmul.f32 %v3117_v11, %v3071_v22 }
 0x356   : > { %v3200_v24 = vadd.f32 %v3177_v13, %v3136_v38  ;;  %v3199_v4 = vadd.f32 %v3173_v15, %v3135_v21 }
 0x357   : > { %v3208_v25 = vmax.f32 %v3198_v14, 0.0  ;;  %v3201_v26 = vadd.f32 %v3181_v19, %v3137_v23 }
 0x358   : > { %v3210_v27 = vmax.f32 %v3200_v24, 0.0  ;;  %v3209_v28 = vmax.f32 %v3199_v4, 0.0 }
 0x359   : > { %3219 = vst [vmem:[#allocation2 + $0x120] sm:$0xff] %v3208_v25  ;;  %v3211_v49 = vmax.f32 %v3201_v26, 0.0 }
 0x35a   : > { %3221 = vst [vmem:[#allocation2 + $0x130] sm:$0xff] %v3210_v27  ;;  %3220 = vst [vmem:[#allocation2 + $0x128] sm:$0xff] %v3209_v28 }
 0x35b   : > { %3222 = vst [vmem:[#allocation2 + $0x138] sm:$0xff] %v3211_v49 }
 0x35c PF: > { %v3245_v56 = vld [vmem:[%s11031_s13 + $0x8] sm:$0xff]  ;;  %v3247_v17 = vld [vmem:[%s11031_s13 + $0x18] sm:$0xff]  ;;  %v3244_v33 = vld [vmem:[%s11031_s13] sm:$0xff]  ;;  %s7439_s2 = smul.u32 80, %s10713_s27  ;;  %p7433_p10 = scmp.ne.s32.totalorder %s10713_s27, 3 }
 0x35d   : > { %v3253_v8 = vld [vmem:[%s11031_s13 + $0x48] sm:$0xff]  ;;  %v3255_v31 = vld [vmem:[%s11031_s13 + $0x58] sm:$0xff]  ;;  %v3252_v34 = vld [vmem:[%s11031_s13 + $0x40] sm:$0xff]  ;;  %vm10625_vm0 = vmmov (!%p7433_p10), 0   ;;  %s12769_s21 = sld [smem:[#allocation31_spill]] (!%p7433_p10) }
 0x35e   : > { %v8308_v29 = vpack.c.bf16 %v3253_v8, %v3245_v56  ;;  %v8628_v35 = vpack.c.bf16 %v3255_v31, %v3247_v17  ;;  %v8310_v36 = vpack.c.bf16 %v3252_v34, %v3244_v33  ;;  %v3246_v37 = vld [vmem:[%s11031_s13 + $0x10] sm:$0xff]  ;;  %v3261_v53 = vld [vmem:[%s11031_s13 + $0x88] sm:$0xff]  ;;  %v3263_v41 = vld [vmem:[%s11031_s13 + $0x98] sm:$0xff]  ;;  %s11386_s20 = scalar_lea.vmem [#allocation2], %s7439_s2 }
 0x35f   : > { %v3254_v46 = vld [vmem:[%s11031_s13 + $0x50] sm:$0xff]  ;;  %v3269_v40 = vld [vmem:[%s11031_s13 + $0xc8] sm:$0xff]  ;;  %v3271_v42 = vld [vmem:[%s11031_s13 + $0xd8] sm:$0xff] }
 0x360   : > { %8309 = vmatprep.subr.bf16.mxu0 %v8308_v29  ;;  %v8630_v39 = vpack.c.bf16 %v3254_v46, %v3246_v37  ;;  %8629 = vmatprep.subr.bf16.mxu1 %v8628_v35  ;;  %v8312_v43 = vpack.c.bf16 %v3269_v40, %v3261_v53  ;;  %v8632_v44 = vpack.c.bf16 %v3271_v42, %v3263_v41  ;;  %v3260_v45 = vld [vmem:[%s11031_s13 + $0x80] sm:$0xff]  ;;  %v3262_v48 = vld [vmem:[%s11031_s13 + $0x90] sm:$0xff]  ;;  %v3277_v51 = vld [vmem:[%s11031_s13 + $0x108] sm:$0xff] }
 0x361   : > { %8311 = vmatpush1.bf16.msra.mxu0 %v8310_v36  ;;  %v3268_v47 = vld [vmem:[%s11031_s13 + $0xc0] sm:$0xff]  ;;  %v3270_v50 = vld [vmem:[%s11031_s13 + $0xd0] sm:$0xff]  ;;  %v3285_v52 = vld [vmem:[%s11031_s13 + $0x148] sm:$0xff] }
 0x362   : > { %8631 = vmatpush1.bf16.msra.mxu1 %v8630_v39  ;;  %v8314_v7 = vpack.c.bf16 %v3268_v47, %v3260_v45  ;;  %8313 = vmatprep.subr.bf16.mxu0 %v8312_v43  ;;  %v8634_v57 = vpack.c.bf16 %v3270_v50, %v3262_v48  ;;  %v8316_v59 = vpack.c.bf16 %v3285_v52, %v3277_v51  ;;  %v3279_v60 = vld [vmem:[%s11031_s13 + $0x118] sm:$0xff]  ;;  %v3276_v55 = vld [vmem:[%s11031_s13 + $0x100] sm:$0xff]  ;;  %v3278_v63 = vld [vmem:[%s11031_s13 + $0x110] sm:$0xff] }
 0x363   : > { %8633 = vmatprep.subr.bf16.mxu1 %v8632_v44  ;;  %v3287_v61 = vld [vmem:[%s11031_s13 + $0x158] sm:$0xff]  ;;  %v3284_v62 = vld [vmem:[%s11031_s13 + $0x140] sm:$0xff]  ;;  %v3286_v1 = vld [vmem:[%s11031_s13 + $0x150] sm:$0xff] }
 0x364   : > { %v8636_v54 = vpack.c.bf16 %v3287_v61, %v3279_v60  ;;  %v8318_v2 = vpack.c.bf16 %v3284_v62, %v3276_v55  ;;  %v3293_v32 = vld [vmem:[%s11031_s13 + $0x188] sm:$0xff]  ;;  %v3295_v3 = vld [vmem:[%s11031_s13 + $0x198] sm:$0xff]  ;;  %v8638_v58 = vpack.c.bf16 %v3286_v1, %v3278_v63  ;;  %v3292_v9 = vld [vmem:[%s11031_s13 + $0x180] sm:$0xff] }
 0x365   : > { %8315 = vmatpush1.bf16.msra.mxu0 %v8314_v7  ;;  %v3301_v0 = vld [vmem:[%s11031_s13 + $0x1c8] sm:$0xff]  ;;  %v3303_v6 = vld [vmem:[%s11031_s13 + $0x1d8] sm:$0xff]  ;;  %v3300_v10 = vld [vmem:[%s11031_s13 + $0x1c0] sm:$0xff] }
 0x366   : > { %8635 = vmatpush1.bf16.msra.mxu1 %v8634_v57  ;;  %8317 = vmatprep.subr.bf16.mxu0 %v8316_v59  ;;  %v8320_v5 = vpack.c.bf16 %v3301_v0, %v3293_v32  ;;  %v8640_v20 = vpack.c.bf16 %v3303_v6, %v3295_v3  ;;  %v3294_v11 = vld [vmem:[%s11031_s13 + $0x190] sm:$0xff]  ;;  %v3309_v13 = vld [vmem:[%s11031_s13 + $0x208] sm:$0xff]  ;;  %v3311_v16 = vld [vmem:[%s11031_s13 + $0x218] sm:$0xff]  ;;  %v8322_v30 = vpack.c.bf16 %v3300_v10, %v3292_v9 }
 0x367   : > { %8637 = vmatprep.subr.bf16.mxu1 %v8636_v54  ;;  %v3302_v12 = vld [vmem:[%s11031_s13 + $0x1d0] sm:$0xff]  ;;  %v3317_v15 = vld [vmem:[%s11031_s13 + $0x248] sm:$0xff]  ;;  %v3319_v18 = vld [vmem:[%s11031_s13 + $0x258] sm:$0xff] }
 0x368   : > { %v8642_v19 = vpack.c.bf16 %v3302_v12, %v3294_v11  ;;  %v8324_v38 = vpack.c.bf16 %v3317_v15, %v3309_v13  ;;  %v3308_v21 = vld [vmem:[%s11031_s13 + $0x200] sm:$0xff]  ;;  %v3310_v14 = vld [vmem:[%s11031_s13 + $0x210] sm:$0xff]  ;;  %v8644_v23 = vpack.c.bf16 %v3319_v18, %v3311_v16  ;;  %v3325_v4 = vld [vmem:[%s11031_s13 + $0x288] sm:$0xff] }
 0x369   : > { %8319 = vmatpush1.bf16.msra.mxu0 %v8318_v2  ;;  %v3316_v22 = vld [vmem:[%s11031_s13 + $0x240] sm:$0xff]  ;;  %v3318_v24 = vld [vmem:[%s11031_s13 + $0x250] sm:$0xff]  ;;  %v3333_v25 = vld [vmem:[%s11031_s13 + $0x2c8] sm:$0xff] }
 0x36a   : > { %8639 = vmatpush1.bf16.msra.mxu1 %v8638_v58  ;;  %8321 = vmatprep.subr.bf16.mxu0 %v8320_v5  ;;  %v3327_v26 = vld [vmem:[%s11031_s13 + $0x298] sm:$0xff]  ;;  %v8326_v28 = vpack.c.bf16 %v3316_v22, %v3308_v21  ;;  %v8646_v49 = vpack.c.bf16 %v3318_v24, %v3310_v14  ;;  %v8328_v56 = vpack.c.bf16 %v3333_v25, %v3325_v4  ;;  %v3324_v8 = vld [vmem:[%s11031_s13 + $0x280] sm:$0xff]  ;;  %v3326_v29 = vld [vmem:[%s11031_s13 + $0x290] sm:$0xff] }
 0x36b   : > { %8641 = vmatprep.subr.bf16.mxu1 %v8640_v20  ;;  %v3335_v27 = vld [vmem:[%s11031_s13 + $0x2d8] sm:$0xff]  ;;  %v3332_v17 = vld [vmem:[%s11031_s13 + $0x2c0] sm:$0xff]  ;;  %v3334_v33 = vld [vmem:[%s11031_s13 + $0x2d0] sm:$0xff] }
 0x36c   : > { %v8648_v31 = vpack.c.bf16 %v3335_v27, %v3327_v26  ;;  %v3341_v34 = vld [vmem:[%s11031_s13 + $0x308] sm:$0xff]  ;;  %v3343_v36 = vld [vmem:[%s11031_s13 + $0x318] sm:$0xff]  ;;  %v8330_v46 = vpack.c.bf16 %v3332_v17, %v3324_v8  ;;  %v8650_v53 = vpack.c.bf16 %v3334_v33, %v3326_v29  ;;  %v3340_v40 = vld [vmem:[%s11031_s13 + $0x300] sm:$0xff] }
 0x36d   : > { %8323 = vmatpush1.bf16.msra.mxu0 %v8322_v30  ;;  %v3349_v35 = vld [vmem:[%s11031_s13 + $0x348] sm:$0xff]  ;;  %v3351_v37 = vld [vmem:[%s11031_s13 + $0x358] sm:$0xff]  ;;  %v3348_v41 = vld [vmem:[%s11031_s13 + $0x340] sm:$0xff] }
 0x36e   : > { %8643 = vmatpush1.bf16.msra.mxu1 %v8642_v19  ;;  %8325 = vmatprep.subr.bf16.mxu0 %v8324_v38  ;;  %v8332_v39 = vpack.c.bf16 %v3349_v35, %v3341_v34  ;;  %v3342_v42 = vld [vmem:[%s11031_s13 + $0x310] sm:$0xff]  ;;  %v8652_v43 = vpack.c.bf16 %v3351_v37, %v3343_v36  ;;  %v3357_v45 = vld [vmem:[%s11031_s13 + $0x388] sm:$0xff]  ;;  %v3359_v48 = vld [vmem:[%s11031_s13 + $0x398] sm:$0xff]  ;;  %v8334_v50 = vpack.c.bf16 %v3348_v41, %v3340_v40 }
 0x36f   : > { %8645 = vmatprep.subr.bf16.mxu1 %v8644_v23  ;;  %v3350_v44 = vld [vmem:[%s11031_s13 + $0x350] sm:$0xff]  ;;  %v3365_v47 = vld [vmem:[%s11031_s13 + $0x3c8] sm:$0xff]  ;;  %v3367_v7 = vld [vmem:[%s11031_s13 + $0x3d8] sm:$0xff] }
 0x370   : > { %v8654_v51 = vpack.c.bf16 %v3350_v44, %v3342_v42  ;;  %v8336_v52 = vpack.c.bf16 %v3365_v47, %v3357_v45  ;;  %v3356_v57 = vld [vmem:[%s11031_s13 + $0x380] sm:$0xff]  ;;  %v3358_v60 = vld [vmem:[%s11031_s13 + $0x390] sm:$0xff]  ;;  %v8656_v61 = vpack.c.bf16 %v3367_v7, %v3359_v48  ;;  %v3373_v54 = vld [vmem:[%s11031_s13 + $0x408] sm:$0xff] }
 0x371   : > { %8327 = vmatpush1.bf16.msra.mxu0 %v8326_v28  ;;  %v3364_v59 = vld [vmem:[%s11031_s13 + $0x3c0] sm:$0xff]  ;;  %v3366_v55 = vld [vmem:[%s11031_s13 + $0x3d0] sm:$0xff]  ;;  %v3381_v62 = vld [vmem:[%s11031_s13 + $0x448] sm:$0xff] }
 0x372   : > { %8647 = vmatpush1.bf16.msra.mxu1 %v8646_v49  ;;  %8329 = vmatprep.subr.bf16.mxu0 %v8328_v56  ;;  %v3375_v63 = vld [vmem:[%s11031_s13 + $0x418] sm:$0xff]  ;;  %v8338_v2 = vpack.c.bf16 %v3364_v59, %v3356_v57  ;;  %v8658_v32 = vpack.c.bf16 %v3366_v55, %v3358_v60  ;;  %v8340_v0 = vpack.c.bf16 %v3381_v62, %v3373_v54  ;;  %v3372_v3 = vld [vmem:[%s11031_s13 + $0x400] sm:$0xff]  ;;  %v3374_v5 = vld [vmem:[%s11031_s13 + $0x410] sm:$0xff] }
 0x373   : > { %8649 = vmatprep.subr.bf16.mxu1 %v8648_v31  ;;  %v3383_v1 = vld [vmem:[%s11031_s13 + $0x458] sm:$0xff]  ;;  %v3380_v58 = vld [vmem:[%s11031_s13 + $0x440] sm:$0xff]  ;;  %v3382_v9 = vld [vmem:[%s11031_s13 + $0x450] sm:$0xff] }
 0x374   : > { %v8660_v6 = vpack.c.bf16 %v3383_v1, %v3375_v63  ;;  %v3389_v10 = vld [vmem:[%s11031_s13 + $0x488] sm:$0xff]  ;;  %v3391_v11 = vld [vmem:[%s11031_s13 + $0x498] sm:$0xff]  ;;  %v8342_v13 = vpack.c.bf16 %v3380_v58, %v3372_v3  ;;  %v8662_v15 = vpack.c.bf16 %v3382_v9, %v3374_v5  ;;  %v3388_v18 = vld [vmem:[%s11031_s13 + $0x480] sm:$0xff] }
 0x375   : > { %8331 = vmatpush1.bf16.msra.mxu0 %v8330_v46  ;;  %v3397_v20 = vld [vmem:[%s11031_s13 + $0x4c8] sm:$0xff]  ;;  %v3399_v12 = vld [vmem:[%s11031_s13 + $0x4d8] sm:$0xff]  ;;  %v3396_v30 = vld [vmem:[%s11031_s13 + $0x4c0] sm:$0xff] }
 0x376   : > { %8651 = vmatpush1.bf16.msra.mxu1 %v8650_v53  ;;  %8333 = vmatprep.subr.bf16.mxu0 %v8332_v39  ;;  %v8344_v16 = vpack.c.bf16 %v3397_v20, %v3389_v10  ;;  %v3390_v19 = vld [vmem:[%s11031_s13 + $0x490] sm:$0xff]  ;;  %v8664_v38 = vpack.c.bf16 %v3399_v12, %v3391_v11  ;;  %v3405_v22 = vld [vmem:[%s11031_s13 + $0x508] sm:$0xff]  ;;  %v3407_v23 = vld [vmem:[%s11031_s13 + $0x518] sm:$0xff]  ;;  %v8346_v4 = vpack.c.bf16 %v3396_v30, %v3388_v18 }
 0x377   : > { %8653 = vmatprep.subr.bf16.mxu1 %v8652_v43  ;;  %v3398_v21 = vld [vmem:[%s11031_s13 + $0x4d0] sm:$0xff]  ;;  %v3413_v14 = vld [vmem:[%s11031_s13 + $0x548] sm:$0xff]  ;;  %v3415_v24 = vld [vmem:[%s11031_s13 + $0x558] sm:$0xff] }
 0x378   : > { %v8666_v25 = vpack.c.bf16 %v3398_v21, %v3390_v19  ;;  %v8348_v26 = vpack.c.bf16 %v3413_v14, %v3405_v22  ;;  %v3404_v27 = vld [vmem:[%s11031_s13 + $0x500] sm:$0xff]  ;;  %v3406_v49 = vld [vmem:[%s11031_s13 + $0x510] sm:$0xff]  ;;  %v8668_v56 = vpack.c.bf16 %v3415_v24, %v3407_v23  ;;  %v3421_v17 = vld [vmem:[%s11031_s13 + $0x588] sm:$0xff] }
 0x379   : > { %8335 = vmatpush1.bf16.msra.mxu0 %v8334_v50  ;;  %v3412_v28 = vld [vmem:[%s11031_s13 + $0x540] sm:$0xff]  ;;  %v3414_v8 = vld [vmem:[%s11031_s13 + $0x550] sm:$0xff]  ;;  %v3429_v29 = vld [vmem:[%s11031_s13 + $0x5c8] sm:$0xff] }
 0x37a   : > { %8655 = vmatpush1.bf16.msra.mxu1 %v8654_v51  ;;  %8337 = vmatprep.subr.bf16.mxu0 %v8336_v52  ;;  %v3423_v31 = vld [vmem:[%s11031_s13 + $0x598] sm:$0xff]  ;;  %v8350_v34 = vpack.c.bf16 %v3412_v28, %v3404_v27  ;;  %v3420_v35 = vld [vmem:[%s11031_s13 + $0x580] sm:$0xff]  ;;  %v8670_v36 = vpack.c.bf16 %v3414_v8, %v3406_v49  ;;  %v8352_v37 = vpack.c.bf16 %v3429_v29, %v3421_v17  ;;  %v3422_v53 = vld [vmem:[%s11031_s13 + $0x590] sm:$0xff] }
 0x37b   : > { %8657 = vmatprep.subr.bf16.mxu1 %v8656_v61  ;;  %v3431_v33 = vld [vmem:[%s11031_s13 + $0x5d8] sm:$0xff]  ;;  %v3428_v46 = vld [vmem:[%s11031_s13 + $0x5c0] sm:$0xff]  ;;  %v3430_v39 = vld [vmem:[%s11031_s13 + $0x5d0] sm:$0xff] }
 0x37c   : > { %v8672_v40 = vpack.c.bf16 %v3431_v33, %v3423_v31  ;;  %v3437_v41 = vld [vmem:[%s11031_s13 + $0x608] sm:$0xff]  ;;  %v3235_v43 = vld [vmem:[%s11386_s20 + $0x8] sm:$0xff]  ;;  %v8354_v47 = vpack.c.bf16 %v3428_v46, %v3420_v35  ;;  %v8674_v48 = vpack.c.bf16 %v3430_v39, %v3422_v53  ;;  %v3436_v50 = vld [vmem:[%s11031_s13 + $0x600] sm:$0xff] }
 0x37d   : > { %8339 = vmatpush1.bf16.msra.mxu0 %v8338_v2  ;;  %v3445_v42 = vld [vmem:[%s11031_s13 + $0x648] sm:$0xff]  ;;  %v3439_v44 = vld [vmem:[%s11031_s13 + $0x618] sm:$0xff]  ;;  %4588 = vmatprep.mubr.f32.mxu0 %v3235_v43  ;;  %v3444_v51 = vld [vmem:[%s11031_s13 + $0x640] sm:$0xff] }
 0x37e   : > { %8659 = vmatpush1.bf16.msra.mxu1 %v8658_v32  ;;  %8341 = vmatprep.subr.bf16.mxu0 %v8340_v0  ;;  %v3447_v45 = vld [vmem:[%s11031_s13 + $0x658] sm:$0xff]  ;;  %v8356_v7 = vpack.c.bf16 %v3445_v42, %v3437_v41  ;;  %v3438_v52 = vld [vmem:[%s11031_s13 + $0x610] sm:$0xff]  ;;  %v3453_v60 = vld [vmem:[%s11031_s13 + $0x688] sm:$0xff]  ;;  %v8358_v62 = vpack.c.bf16 %v3444_v51, %v3436_v50 }
 0x37f   : > { %8661 = vmatprep.subr.bf16.mxu1 %v8660_v6  ;;  %4943 = vmatprep.mubr.f32.mxu1 %v3235_v43  ;;  %v8676_v57 = vpack.c.bf16 %v3447_v45, %v3439_v44  ;;  %v3446_v59 = vld [vmem:[%s11031_s13 + $0x650] sm:$0xff]  ;;  %v3461_v61 = vld [vmem:[%s11031_s13 + $0x6c8] sm:$0xff]  ;;  %v3455_v55 = vld [vmem:[%s11031_s13 + $0x698] sm:$0xff] }
 0x380   : > { %v3463_v54 = vld [vmem:[%s11031_s13 + $0x6d8] sm:$0xff]  ;;  %v8678_v63 = vpack.c.bf16 %v3446_v59, %v3438_v52  ;;  %v8360_v1 = vpack.c.bf16 %v3461_v61, %v3453_v60  ;;  %v3452_v2 = vld [vmem:[%s11031_s13 + $0x680] sm:$0xff]  ;;  %v3454_v0 = vld [vmem:[%s11031_s13 + $0x690] sm:$0xff] }
 0x381   : > { %8343 = vmatpush1.bf16.msra.mxu0 %v8342_v13  ;;  %v3460_v32 = vld [vmem:[%s11031_s13 + $0x6c0] sm:$0xff]  ;;  %v8680_v3 = vpack.c.bf16 %v3463_v54, %v3455_v55  ;;  %v3462_v58 = vld [vmem:[%s11031_s13 + $0x6d0] sm:$0xff]  ;;  %v3469_v5 = vld [vmem:[%s11031_s13 + $0x708] sm:$0xff] }
 0x382   : > { %8663 = vmatpush1.bf16.msra.mxu1 %v8662_v15  ;;  %8345 = vmatprep.subr.bf16.mxu0 %v8344_v16  ;;  %v3477_v6 = vld [vmem:[%s11031_s13 + $0x748] sm:$0xff]  ;;  %v3471_v9 = vld [vmem:[%s11031_s13 + $0x718] sm:$0xff]  ;;  %v8362_v20 = vpack.c.bf16 %v3460_v32, %v3452_v2  ;;  %v8682_v11 = vpack.c.bf16 %v3462_v58, %v3454_v0  ;;  %v3468_v13 = vld [vmem:[%s11031_s13 + $0x700] sm:$0xff] }
 0x383   : > { %8665 = vmatprep.subr.bf16.mxu1 %v8664_v38  ;;  %v3479_v10 = vld [vmem:[%s11031_s13 + $0x758] sm:$0xff]  ;;  %v8364_v12 = vpack.c.bf16 %v3477_v6, %v3469_v5  ;;  %v3476_v15 = vld [vmem:[%s11031_s13 + $0x740] sm:$0xff]  ;;  %v3470_v16 = vld [vmem:[%s11031_s13 + $0x710] sm:$0xff] }
 0x384   : > { %v8684_v18 = vpack.c.bf16 %v3479_v10, %v3471_v9  ;;  %v3478_v30 = vld [vmem:[%s11031_s13 + $0x750] sm:$0xff]  ;;  %v3485_v19 = vld [vmem:[%s11031_s13 + $0x788] sm:$0xff]  ;;  %v3487_v21 = vld [vmem:[%s11031_s13 + $0x798] sm:$0xff]  ;;  %v8366_v14 = vpack.c.bf16 %v3476_v15, %v3468_v13 }
 0x385   : > { %8347 = vmatpush1.bf16.msra.mxu0 %v8346_v4  ;;  %v3493_v38 = vld [vmem:[%s11031_s13 + $0x7c8] sm:$0xff]  ;;  %v3495_v22 = vld [vmem:[%s11031_s13 + $0x7d8] sm:$0xff]  ;;  %v8686_v23 = vpack.c.bf16 %v3478_v30, %v3470_v16  ;;  %v3484_v4 = vld [vmem:[%s11031_s13 + $0x780] sm:$0xff] }
 0x386   : > { %8667 = vmatpush1.bf16.msra.mxu1 %v8666_v25  ;;  %8349 = vmatprep.subr.bf16.mxu0 %v8348_v26  ;;  %v8368_v24 = vpack.c.bf16 %v3493_v38, %v3485_v19  ;;  %v3492_v25 = vld [vmem:[%s11031_s13 + $0x7c0] sm:$0xff]  ;;  %v3486_v26 = vld [vmem:[%s11031_s13 + $0x790] sm:$0xff]  ;;  %v8688_v27 = vpack.c.bf16 %v3495_v22, %v3487_v21  ;;  %v3501_v49 = vld [vmem:[%s11031_s13 + $0x808] sm:$0xff] }
 0x387   : > { %8669 = vmatprep.subr.bf16.mxu1 %v8668_v56  ;;  %v3494_v28 = vld [vmem:[%s11031_s13 + $0x7d0] sm:$0xff]  ;;  %v3509_v56 = vld [vmem:[%s11031_s13 + $0x848] sm:$0xff]  ;;  %v3503_v8 = vld [vmem:[%s11031_s13 + $0x818] sm:$0xff]  ;;  %v8370_v29 = vpack.c.bf16 %v3492_v25, %v3484_v4 }
 0x388   : > { %v3511_v17 = vld [vmem:[%s11031_s13 + $0x858] sm:$0xff]  ;;  %v8690_v31 = vpack.c.bf16 %v3494_v28, %v3486_v26  ;;  %v8372_v33 = vpack.c.bf16 %v3509_v56, %v3501_v49  ;;  %v3508_v35 = vld [vmem:[%s11031_s13 + $0x840] sm:$0xff]  ;;  %v3510_v46 = vld [vmem:[%s11031_s13 + $0x850] sm:$0xff] }
 0x389   : > { %8351 = vmatpush1.bf16.msra.mxu0 %v8350_v34  ;;  %v3500_v34 = vld [vmem:[%s11031_s13 + $0x800] sm:$0xff]  ;;  %v3517_v53 = vld [vmem:[%s11031_s13 + $0x888] sm:$0xff]  ;;  %v3527_v41 = vld [vmem:[%s11031_s13 + $0x8d8] sm:$0xff] }
 0x38a   : > { %8671 = vmatpush1.bf16.msra.mxu1 %v8670_v36  ;;  %8353 = vmatprep.subr.bf16.mxu0 %v8352_v37  ;;  %v3502_v36 = vld [vmem:[%s11031_s13 + $0x810] sm:$0xff]  ;;  %v8692_v37 = vpack.c.bf16 %v3511_v17, %v3503_v8  ;;  %v3525_v39 = vld [vmem:[%s11031_s13 + $0x8c8] sm:$0xff]  ;;  %v8374_v43 = vpack.c.bf16 %v3508_v35, %v3500_v34  ;;  %v3535_v59 = vld [vmem:[%s11031_s13 + $0x918] sm:$0xff] }
 0x38b   : > { %8673 = vmatprep.subr.bf16.mxu1 %v8672_v40  ;;  %v3519_v40 = vld [vmem:[%s11031_s13 + $0x898] sm:$0xff]  ;;  %v3234_v42 = vld [vmem:[%s11386_s20] sm:$0xff]  ;;  %v8694_v44 = vpack.c.bf16 %v3510_v46, %v3502_v36  ;;  %v8376_v45 = vpack.c.bf16 %v3525_v39, %v3517_v53  ;;  %v3533_v52 = vld [vmem:[%s11031_s13 + $0x908] sm:$0xff] }
 0x38c   : > { %v8696_v50 = vpack.c.bf16 %v3527_v41, %v3519_v40  ;;  %v3526_v51 = vld [vmem:[%s11031_s13 + $0x8d0] sm:$0xff]  ;;  %v3543_v60 = vld [vmem:[%s11031_s13 + $0x958] sm:$0xff]  ;;  %v3549_v0 = vld [vmem:[%s11031_s13 + $0x988] sm:$0xff] }
 0x38d   : > { %8355 = vmatpush1.bf16.msra.mxu0 %v8354_v47  ;;  %v3516_v47 = vld [vmem:[%s11031_s13 + $0x880] sm:$0xff]  ;;  %v8700_v2 = vpack.c.bf16 %v3543_v60, %v3535_v59  ;;  %v3542_v32 = vld [vmem:[%s11031_s13 + $0x950] sm:$0xff]  ;;  %v3551_v58 = vld [vmem:[%s11031_s13 + $0x998] sm:$0xff] }
 0x38e   : > { %8675 = vmatpush1.bf16.msra.mxu1 %v8674_v48  ;;  %8357 = vmatprep.subr.bf16.mxu0 %v8356_v7  ;;  %v3524_v48 = vld [vmem:[%s11031_s13 + $0x8c0] sm:$0xff]  ;;  %v3518_v7 = vld [vmem:[%s11031_s13 + $0x890] sm:$0xff]  ;;  %v3559_v5 = vld [vmem:[%s11031_s13 + $0x9d8] sm:$0xff] }
 0x38f   : > { %8677 = vmatprep.subr.bf16.mxu1 %v8676_v57  ;;  %v3541_v57 = vld [vmem:[%s11031_s13 + $0x948] sm:$0xff]  ;;  %v8378_v61 = vpack.c.bf16 %v3524_v48, %v3516_v47  ;;  %v8698_v55 = vpack.c.bf16 %v3526_v51, %v3518_v7  ;;  %v8704_v13 = vpack.c.bf16 %v3559_v5, %v3551_v58  ;;  %v3558_v15 = vld [vmem:[%s11031_s13 + $0x9d0] sm:$0xff]  ;;  %v3567_v30 = vld [vmem:[%s11031_s13 + $0xa18] sm:$0xff] }
 0x390   : > { %v8380_v54 = vpack.c.bf16 %v3541_v57, %v3533_v52  ;;  %v3565_v16 = vld [vmem:[%s11031_s13 + $0xa08] sm:$0xff]  ;;  %v3575_v19 = vld [vmem:[%s11031_s13 + $0xa58] sm:$0xff]  ;;  %v3574_v25 = vld [vmem:[%s11031_s13 + $0xa50] sm:$0xff] }
 0x391   : > { %8359 = vmatpush1.bf16.msra.mxu0 %v8358_v62  ;;  %v3532_v62 = vld [vmem:[%s11031_s13 + $0x900] sm:$0xff]  ;;  %v8708_v4 = vpack.c.bf16 %v3575_v19, %v3567_v30  ;;  %v3581_v26 = vld [vmem:[%s11031_s13 + $0xa88] sm:$0xff]  ;;  %v3583_v28 = vld [vmem:[%s11031_s13 + $0xa98] sm:$0xff] }
 0x392   : > { %8679 = vmatpush1.bf16.msra.mxu1 %v8678_v63  ;;  %8361 = vmatprep.subr.bf16.mxu0 %v8360_v1  ;;  %v3540_v63 = vld [vmem:[%s11031_s13 + $0x940] sm:$0xff]  ;;  %v3534_v1 = vld [vmem:[%s11031_s13 + $0x910] sm:$0xff]  ;;  %v3591_v49 = vld [vmem:[%s11031_s13 + $0xad8] sm:$0xff] }
 0x393   : > { %8681 = vmatprep.subr.bf16.mxu1 %v8680_v3  ;;  %v3557_v3 = vld [vmem:[%s11031_s13 + $0x9c8] sm:$0xff]  ;;  %v8382_v6 = vpack.c.bf16 %v3540_v63, %v3532_v62  ;;  %v8702_v9 = vpack.c.bf16 %v3542_v32, %v3534_v1  ;;  %v8712_v34 = vpack.c.bf16 %v3591_v49, %v3583_v28  ;;  %v3590_v35 = vld [vmem:[%s11031_s13 + $0xad0] sm:$0xff]  ;;  %v3599_v46 = vld [vmem:[%s11031_s13 + $0xb18] sm:$0xff] }
 0x394   : > { %v8384_v10 = vpack.c.bf16 %v3557_v3, %v3549_v0  ;;  %v3597_v36 = vld [vmem:[%s11031_s13 + $0xb08] sm:$0xff]  ;;  %v3607_v53 = vld [vmem:[%s11031_s13 + $0xb58] sm:$0xff]  ;;  %v3596_v40 = vld [vmem:[%s11031_s13 + $0xb00] sm:$0xff] }
 0x395   : > { %8363 = vmatpush1.bf16.msra.mxu0 %v8362_v20  ;;  %v3548_v20 = vld [vmem:[%s11031_s13 + $0x980] sm:$0xff]  ;;  %v8716_v47 = vpack.c.bf16 %v3607_v53, %v3599_v46  ;;  %v3613_v48 = vld [vmem:[%s11031_s13 + $0xb88] sm:$0xff]  ;;  %v3615_v51 = vld [vmem:[%s11031_s13 + $0xb98] sm:$0xff] }
 0x396   : > { %8683 = vmatpush1.bf16.msra.mxu1 %v8682_v11  ;;  %8365 = vmatprep.subr.bf16.mxu0 %v8364_v12  ;;  %v3556_v11 = vld [vmem:[%s11031_s13 + $0x9c0] sm:$0xff]  ;;  %v3550_v12 = vld [vmem:[%s11031_s13 + $0x990] sm:$0xff]  ;;  %v3621_v7 = vld [vmem:[%s11031_s13 + $0xbc8] sm:$0xff] }
 0x397   : > { %8685 = vmatprep.subr.bf16.mxu1 %v8684_v18  ;;  %v3573_v18 = vld [vmem:[%s11031_s13 + $0xa48] sm:$0xff]  ;;  %v8386_v38 = vpack.c.bf16 %v3556_v11, %v3548_v20  ;;  %v8706_v21 = vpack.c.bf16 %v3558_v15, %v3550_v12  ;;  %v3623_v52 = vld [vmem:[%s11031_s13 + $0xbd8] sm:$0xff]  ;;  %v8400_v60 = vpack.c.bf16 %v3621_v7, %v3613_v48  ;;  %v3622_v63 = vld [vmem:[%s11031_s13 + $0xbd0] sm:$0xff] }
 0x398   : > { %v8388_v22 = vpack.c.bf16 %v3573_v18, %v3565_v16  ;;  %v8720_v62 = vpack.c.bf16 %v3623_v52, %v3615_v51  ;;  %v3629_v1 = vld [vmem:[%s11031_s13 + $0xc08] sm:$0xff]  ;;  %v3631_v32 = vld [vmem:[%s11031_s13 + $0xc18] sm:$0xff]  ;;  %v3638_v11 = vld [vmem:[%s11031_s13 + $0xc50] sm:$0xff] }
 0x399   : > { %8367 = vmatpush1.bf16.msra.mxu0 %v8366_v14  ;;  %v3564_v14 = vld [vmem:[%s11031_s13 + $0xa00] sm:$0xff]  ;;  %v3639_v0 = vld [vmem:[%s11031_s13 + $0xc58] sm:$0xff]  ;;  %v3645_v12 = vld [vmem:[%s11031_s13 + $0xc88] sm:$0xff] }
 0x39a   : > { %8687 = vmatpush1.bf16.msra.mxu1 %v8686_v23  ;;  %8369 = vmatprep.subr.bf16.mxu0 %v8368_v24  ;;  %v3572_v23 = vld [vmem:[%s11031_s13 + $0xa40] sm:$0xff]  ;;  %v3566_v24 = vld [vmem:[%s11031_s13 + $0xa10] sm:$0xff]  ;;  %v8724_v20 = vpack.c.bf16 %v3639_v0, %v3631_v32  ;;  %v3647_v15 = vld [vmem:[%s11031_s13 + $0xc98] sm:$0xff] }
 0x39b   : > { %8689 = vmatprep.subr.bf16.mxu1 %v8688_v27  ;;  %v3589_v27 = vld [vmem:[%s11031_s13 + $0xac8] sm:$0xff]  ;;  %v8390_v56 = vpack.c.bf16 %v3572_v23, %v3564_v14  ;;  %v8710_v8 = vpack.c.bf16 %v3574_v25, %v3566_v24  ;;  %v3655_v16 = vld [vmem:[%s11031_s13 + $0xcd8] sm:$0xff]  ;;  %v3654_v23 = vld [vmem:[%s11031_s13 + $0xcd0] sm:$0xff] }
 0x39c   : > { %v8392_v17 = vpack.c.bf16 %v3589_v27, %v3581_v26  ;;  %v8728_v14 = vpack.c.bf16 %v3655_v16, %v3647_v15  ;;  %v3661_v24 = vld [vmem:[%s11031_s13 + $0xd08] sm:$0xff]  ;;  %v3663_v25 = vld [vmem:[%s11031_s13 + $0xd18] sm:$0xff]  ;;  %v3692_v52 = vld [vmem:[%s11031_s13 + $0xe00] sm:$0xff] }
 0x39d   : > { %8371 = vmatpush1.bf16.msra.mxu0 %v8370_v29  ;;  %v3580_v29 = vld [vmem:[%s11031_s13 + $0xa80] sm:$0xff]  ;;  %v3671_v26 = vld [vmem:[%s11031_s13 + $0xd58] sm:$0xff] }
 0x39e   : > { %8691 = vmatpush1.bf16.msra.mxu1 %v8690_v31  ;;  %8373 = vmatprep.subr.bf16.mxu0 %v8372_v33  ;;  %v3588_v31 = vld [vmem:[%s11031_s13 + $0xac0] sm:$0xff]  ;;  %v3582_v33 = vld [vmem:[%s11031_s13 + $0xa90] sm:$0xff]  ;;  %v3703_v48 = vld [vmem:[%s11031_s13 + $0xe58] sm:$0xff] }
 0x39f   : > { %8693 = vmatprep.subr.bf16.mxu1 %v8692_v37  ;;  %v3605_v37 = vld [vmem:[%s11031_s13 + $0xb48] sm:$0xff]  ;;  %v8394_v39 = vpack.c.bf16 %v3588_v31, %v3580_v29  ;;  %v8714_v41 = vpack.c.bf16 %v3590_v35, %v3582_v33  ;;  %v8732_v29 = vpack.c.bf16 %v3671_v26, %v3663_v25  ;;  %v3670_v31 = vld [vmem:[%s11031_s13 + $0xd50] sm:$0xff]  ;;  %v3679_v35 = vld [vmem:[%s11031_s13 + $0xd98] sm:$0xff] }
 0x3a0   : > { %4589 = vmatmul.mubr.f32.vlgmr.msra.gmra.mrb[0].mxu0 %v3234_v42  ;;  %v3677_v33 = vld [vmem:[%s11031_s13 + $0xd88] sm:$0xff]  ;;  %v3708_v0 = vld [vmem:[%s11031_s13 + $0xe80] sm:$0xff] }
 0x3a1   : > { %8375 = vmatpush1.bf16.msra.mxu0 %v8374_v43  ;;  %4944 = vmatmul.mubr.f32.vlgmr.msra.gmra.mrb[0].mxu1 %v3234_v42  ;;  %v8396_v42 = vpack.c.bf16 %v3605_v37, %v3597_v36  ;;  %v3604_v43 = vld [vmem:[%s11031_s13 + $0xb40] sm:$0xff]  ;;  %v3687_v36 = vld [vmem:[%s11031_s13 + $0xdd8] sm:$0xff] }
 0x3a2   : > { %8695 = vmatpush1.bf16.msra.mxu1 %v8694_v44  ;;  %8377 = vmatprep.subr.bf16.mxu0 %v8376_v45  ;;  %v3598_v44 = vld [vmem:[%s11031_s13 + $0xb10] sm:$0xff]  ;;  %v8398_v57 = vpack.c.bf16 %v3604_v43, %v3596_v40  ;;  %v3684_v40 = vld [vmem:[%s11031_s13 + $0xdc0] sm:$0xff] }
 0x3a3   : > { %8697 = vmatprep.subr.bf16.mxu1 %v8696_v50  ;;  %v3606_v45 = vld [vmem:[%s11031_s13 + $0xb50] sm:$0xff]  ;;  %v3237_v50 = vld [vmem:[%s11386_s20 + $0x18] sm:$0xff]  ;;  %v3724_v16 = vld [vmem:[%s11031_s13 + $0xf00] sm:$0xff] }
 0x3a4   : > { %4659 = vmatprep.mubr.f32.mxu0 %v3237_v50  ;;  %5014 = vmatprep.mubr.f32.mxu1 %v3237_v50  ;;  %v8718_v59 = vpack.c.bf16 %v3606_v45, %v3598_v44  ;;  %v3686_v43 = vld [vmem:[%s11031_s13 + $0xdd0] sm:$0xff]  ;;  %v3693_v44 = vld [vmem:[%s11031_s13 + $0xe08] sm:$0xff]  ;;  %v3740_v26 = vld [vmem:[%s11031_s13 + $0xf80] sm:$0xff] }
 0x3a5   : > { %8379 = vmatpush1.bf16.msra.mxu0 %v8378_v61  ;;  %v3612_v61 = vld [vmem:[%s11031_s13 + $0xb80] sm:$0xff]  ;;  %v3701_v45 = vld [vmem:[%s11031_s13 + $0xe48] sm:$0xff] }
 0x3a6   : > { %8699 = vmatpush1.bf16.msra.mxu1 %v8698_v55  ;;  %8381 = vmatprep.subr.bf16.mxu0 %v8380_v54  ;;  %v3620_v55 = vld [vmem:[%s11031_s13 + $0xbc0] sm:$0xff]  ;;  %v3614_v54 = vld [vmem:[%s11031_s13 + $0xb90] sm:$0xff]  ;;  %v8420_v51 = vpack.c.bf16 %v3701_v45, %v3693_v44 }
 0x3a7   : > { %8701 = vmatprep.subr.bf16.mxu1 %v8700_v2  ;;  %v3637_v2 = vld [vmem:[%s11031_s13 + $0xc48] sm:$0xff]  ;;  %v8402_v3 = vpack.c.bf16 %v3620_v55, %v3612_v61  ;;  %v8722_v58 = vpack.c.bf16 %v3622_v63, %v3614_v54  ;;  %v3702_v61 = vld [vmem:[%s11031_s13 + $0xe50] sm:$0xff]  ;;  %v3719_v63 = vld [vmem:[%s11031_s13 + $0xed8] sm:$0xff] }
 0x3a8   : > { %v8404_v5 = vpack.c.bf16 %v3637_v2, %v3629_v1  ;;  %v3709_v55 = vld [vmem:[%s11031_s13 + $0xe88] sm:$0xff]  ;;  %v3236_v44 = vld [vmem:[%s11386_s20 + $0x10] sm:$0xff] }
 0x3a9   : > { %8383 = vmatpush1.bf16.msra.mxu0 %v8382_v6  ;;  %v3628_v6 = vld [vmem:[%s11031_s13 + $0xc00] sm:$0xff]  ;;  %v3717_v54 = vld [vmem:[%s11031_s13 + $0xec8] sm:$0xff] }
 0x3aa   : > { %8703 = vmatpush1.bf16.msra.mxu1 %v8702_v9  ;;  %8385 = vmatprep.subr.bf16.mxu0 %v8384_v10  ;;  %v3636_v9 = vld [vmem:[%s11031_s13 + $0xc40] sm:$0xff]  ;;  %v3630_v10 = vld [vmem:[%s11031_s13 + $0xc10] sm:$0xff]  ;;  %v8424_v32 = vpack.c.bf16 %v3717_v54, %v3709_v55  ;;  %v3799_v55 = vld [vmem:[%s11031_s13 + $0x1158] sm:$0xff] }
 0x3ab   : > { %8705 = vmatprep.subr.bf16.mxu1 %v8704_v13  ;;  %v3653_v13 = vld [vmem:[%s11031_s13 + $0xcc8] sm:$0xff]  ;;  %v8406_v18 = vpack.c.bf16 %v3636_v9, %v3628_v6  ;;  %v8726_v30 = vpack.c.bf16 %v3638_v11, %v3630_v10  ;;  %v3718_v6 = vld [vmem:[%s11031_s13 + $0xed0] sm:$0xff]  ;;  %v3735_v11 = vld [vmem:[%s11031_s13 + $0xf58] sm:$0xff] }
 0x3ac   : > { %v8408_v19 = vpack.c.bf16 %v3653_v13, %v3645_v12  ;;  %v3725_v9 = vld [vmem:[%s11031_s13 + $0xf08] sm:$0xff]  ;;  %v3239_v54 = vld [vmem:[%s11386_s20 + $0x28] sm:$0xff] }
 0x3ad   : > { %8387 = vmatpush1.bf16.msra.mxu0 %v8386_v38  ;;  %v3644_v38 = vld [vmem:[%s11031_s13 + $0xc80] sm:$0xff]  ;;  %v3733_v10 = vld [vmem:[%s11031_s13 + $0xf48] sm:$0xff] }
 0x3ae   : > { %8707 = vmatpush1.bf16.msra.mxu1 %v8706_v21  ;;  %8389 = vmatprep.subr.bf16.mxu0 %v8388_v22  ;;  %v3652_v21 = vld [vmem:[%s11031_s13 + $0xcc0] sm:$0xff]  ;;  %v3646_v22 = vld [vmem:[%s11031_s13 + $0xc90] sm:$0xff]  ;;  %v8428_v15 = vpack.c.bf16 %v3733_v10, %v3725_v9  ;;  %v3807_v9 = vld [vmem:[%s11031_s13 + $0x1198] sm:$0xff] }
 0x3af   : > { %8709 = vmatprep.subr.bf16.mxu1 %v8708_v4  ;;  %v3669_v4 = vld [vmem:[%s11031_s13 + $0xd48] sm:$0xff]  ;;  %v8410_v27 = vpack.c.bf16 %v3652_v21, %v3644_v38  ;;  %v8730_v28 = vpack.c.bf16 %v3654_v23, %v3646_v22  ;;  %v3734_v38 = vld [vmem:[%s11031_s13 + $0xf50] sm:$0xff]  ;;  %v3751_v23 = vld [vmem:[%s11031_s13 + $0xfd8] sm:$0xff] }
 0x3b0   : > { %v8412_v49 = vpack.c.bf16 %v3669_v4, %v3661_v24  ;;  %v3741_v21 = vld [vmem:[%s11031_s13 + $0xf88] sm:$0xff]  ;;  %v3815_v10 = vld [vmem:[%s11031_s13 + $0x11d8] sm:$0xff] }
 0x3b1   : > { %8391 = vmatpush1.bf16.msra.mxu0 %v8390_v56  ;;  %v3660_v56 = vld [vmem:[%s11031_s13 + $0xd00] sm:$0xff]  ;;  %v3749_v22 = vld [vmem:[%s11031_s13 + $0xfc8] sm:$0xff] }
 0x3b2   : > { %8711 = vmatpush1.bf16.msra.mxu1 %v8710_v8  ;;  %8393 = vmatprep.subr.bf16.mxu0 %v8392_v17  ;;  %v3668_v8 = vld [vmem:[%s11031_s13 + $0xd40] sm:$0xff]  ;;  %v3662_v17 = vld [vmem:[%s11031_s13 + $0xd10] sm:$0xff]  ;;  %v8432_v25 = vpack.c.bf16 %v3749_v22, %v3741_v21  ;;  %v3823_v21 = vld [vmem:[%s11031_s13 + $0x1218] sm:$0xff] }
 0x3b3   : > { %8713 = vmatprep.subr.bf16.mxu1 %v8712_v34  ;;  %v3685_v34 = vld [vmem:[%s11031_s13 + $0xdc8] sm:$0xff]  ;;  %v8414_v37 = vpack.c.bf16 %v3668_v8, %v3660_v56  ;;  %v8734_v46 = vpack.c.bf16 %v3670_v31, %v3662_v17  ;;  %v3750_v56 = vld [vmem:[%s11031_s13 + $0xfd0] sm:$0xff]  ;;  %v3767_v31 = vld [vmem:[%s11031_s13 + $0x1058] sm:$0xff] }
 0x3b4   : > { %v8416_v53 = vpack.c.bf16 %v3685_v34, %v3677_v33  ;;  %v3757_v8 = vld [vmem:[%s11031_s13 + $0x1008] sm:$0xff]  ;;  %v3831_v22 = vld [vmem:[%s11031_s13 + $0x1258] sm:$0xff] }
 0x3b5   : > { %8395 = vmatpush1.bf16.msra.mxu0 %v8394_v39  ;;  %v3676_v39 = vld [vmem:[%s11031_s13 + $0xd80] sm:$0xff]  ;;  %v3765_v17 = vld [vmem:[%s11031_s13 + $0x1048] sm:$0xff] }
 0x3b6   : > { %8715 = vmatpush1.bf16.msra.mxu1 %v8714_v41  ;;  %8397 = vmatprep.subr.bf16.mxu0 %v8396_v42  ;;  %v3678_v41 = vld [vmem:[%s11031_s13 + $0xd90] sm:$0xff]  ;;  %v8736_v42 = vpack.c.bf16 %v3687_v36, %v3679_v35  ;;  %v8418_v7 = vpack.c.bf16 %v3684_v40, %v3676_v39  ;;  %v8436_v35 = vpack.c.bf16 %v3765_v17, %v3757_v8  ;;  %v3756_v36 = vld [vmem:[%s11031_s13 + $0x1000] sm:$0xff]  ;;  %v3773_v40 = vld [vmem:[%s11031_s13 + $0x1088] sm:$0xff] }
 0x3b7   : > { %8717 = vmatprep.subr.bf16.mxu1 %v8716_v47  ;;  %v3695_v47 = vld [vmem:[%s11031_s13 + $0xe18] sm:$0xff]  ;;  %v8738_v50 = vpack.c.bf16 %v3686_v43, %v3678_v41  ;;  %v3766_v39 = vld [vmem:[%s11031_s13 + $0x1050] sm:$0xff]  ;;  %v3781_v41 = vld [vmem:[%s11031_s13 + $0x10c8] sm:$0xff] }
 0x3b8   : > { %v3783_v43 = vld [vmem:[%s11031_s13 + $0x10d8] sm:$0xff] }
 0x3b9   : > { %8399 = vmatpush1.bf16.msra.mxu0 %v8398_v57  ;;  %v3700_v57 = vld [vmem:[%s11031_s13 + $0xe40] sm:$0xff]  ;;  %v3839_v8 = vld [vmem:[%s11031_s13 + $0x1298] sm:$0xff] }
 0x3ba   : > { %8719 = vmatpush1.bf16.msra.mxu1 %v8718_v59  ;;  %8401 = vmatprep.subr.bf16.mxu0 %v8400_v60  ;;  %v3694_v59 = vld [vmem:[%s11031_s13 + $0xe10] sm:$0xff]  ;;  %v8740_v60 = vpack.c.bf16 %v3703_v48, %v3695_v47  ;;  %v8422_v1 = vpack.c.bf16 %v3700_v57, %v3692_v52  ;;  %v8440_v48 = vpack.c.bf16 %v3781_v41, %v3773_v40  ;;  %v3847_v17 = vld [vmem:[%s11031_s13 + $0x12d8] sm:$0xff] }
 0x3bb   : > { %8721 = vmatprep.subr.bf16.mxu1 %v8720_v62  ;;  %v3711_v62 = vld [vmem:[%s11031_s13 + $0xe98] sm:$0xff]  ;;  %v8742_v2 = vpack.c.bf16 %v3702_v61, %v3694_v59  ;;  %v3782_v57 = vld [vmem:[%s11031_s13 + $0x10d0] sm:$0xff]  ;;  %v3789_v59 = vld [vmem:[%s11031_s13 + $0x1108] sm:$0xff] }
 0x3bc   : > { %v3791_v61 = vld [vmem:[%s11031_s13 + $0x1118] sm:$0xff] }
 0x3bd   : > { %8403 = vmatpush1.bf16.msra.mxu0 %v8402_v3  ;;  %v3716_v3 = vld [vmem:[%s11031_s13 + $0xec0] sm:$0xff]  ;;  %v3855_v40 = vld [vmem:[%s11031_s13 + $0x1318] sm:$0xff] }
 0x3be   : > { %8723 = vmatpush1.bf16.msra.mxu1 %v8722_v58  ;;  %8405 = vmatprep.subr.bf16.mxu0 %v8404_v5  ;;  %v3710_v58 = vld [vmem:[%s11031_s13 + $0xe90] sm:$0xff]  ;;  %v8744_v5 = vpack.c.bf16 %v3719_v63, %v3711_v62  ;;  %v8426_v12 = vpack.c.bf16 %v3716_v3, %v3708_v0  ;;  %v8764_v3 = vpack.c.bf16 %v3799_v55, %v3791_v61  ;;  %v3863_v41 = vld [vmem:[%s11031_s13 + $0x1358] sm:$0xff] }
 0x3bf   : > { %8725 = vmatprep.subr.bf16.mxu1 %v8724_v20  ;;  %v3727_v20 = vld [vmem:[%s11031_s13 + $0xf18] sm:$0xff]  ;;  %v8746_v13 = vpack.c.bf16 %v3718_v6, %v3710_v58  ;;  %v3790_v0 = vld [vmem:[%s11031_s13 + $0x1110] sm:$0xff]  ;;  %v3813_v6 = vld [vmem:[%s11031_s13 + $0x11c8] sm:$0xff] }
 0x3c0   : > { %v3798_v58 = vld [vmem:[%s11031_s13 + $0x1150] sm:$0xff] }
 0x3c1   : > { %8407 = vmatpush1.bf16.msra.mxu0 %v8406_v18  ;;  %v3732_v18 = vld [vmem:[%s11031_s13 + $0xf40] sm:$0xff] }
 0x3c2   : > { %8727 = vmatpush1.bf16.msra.mxu1 %v8726_v30  ;;  %8409 = vmatprep.subr.bf16.mxu0 %v8408_v19  ;;  %v3726_v30 = vld [vmem:[%s11031_s13 + $0xf10] sm:$0xff]  ;;  %v8748_v19 = vpack.c.bf16 %v3735_v11, %v3727_v20  ;;  %v8430_v24 = vpack.c.bf16 %v3732_v18, %v3724_v16  ;;  %v8766_v11 = vpack.c.bf16 %v3798_v58, %v3790_v0  ;;  %v3893_v0 = vld [vmem:[%s11031_s13 + $0x1448] sm:$0xff]  ;;  %v3895_v58 = vld [vmem:[%s11031_s13 + $0x1458] sm:$0xff] }
 0x3c3   : > { %8729 = vmatprep.subr.bf16.mxu1 %v8728_v14  ;;  %v3743_v14 = vld [vmem:[%s11031_s13 + $0xf98] sm:$0xff]  ;;  %v8750_v4 = vpack.c.bf16 %v3734_v38, %v3726_v30  ;;  %v3806_v16 = vld [vmem:[%s11031_s13 + $0x1190] sm:$0xff]  ;;  %v8768_v18 = vpack.c.bf16 %v3815_v10, %v3807_v9  ;;  %v3829_v38 = vld [vmem:[%s11031_s13 + $0x1248] sm:$0xff] }
 0x3c4   : > { %v3814_v30 = vld [vmem:[%s11031_s13 + $0x11d0] sm:$0xff]  ;;  %v3884_v10 = vld [vmem:[%s11031_s13 + $0x1400] sm:$0xff] }
 0x3c5   : > { %8411 = vmatpush1.bf16.msra.mxu0 %v8410_v27  ;;  %v3748_v27 = vld [vmem:[%s11031_s13 + $0xfc0] sm:$0xff] }
 0x3c6   : > { %8731 = vmatpush1.bf16.msra.mxu1 %v8730_v28  ;;  %8413 = vmatprep.subr.bf16.mxu0 %v8412_v49  ;;  %v3742_v28 = vld [vmem:[%s11031_s13 + $0xf90] sm:$0xff]  ;;  %v8752_v49 = vpack.c.bf16 %v3751_v23, %v3743_v14  ;;  %v8434_v33 = vpack.c.bf16 %v3748_v27, %v3740_v26  ;;  %v8770_v23 = vpack.c.bf16 %v3814_v30, %v3806_v16  ;;  %v3909_v16 = vld [vmem:[%s11031_s13 + $0x14c8] sm:$0xff]  ;;  %v3911_v30 = vld [vmem:[%s11031_s13 + $0x14d8] sm:$0xff] }
 0x3c7   : > { %8733 = vmatprep.subr.bf16.mxu1 %v8732_v29  ;;  %v3759_v29 = vld [vmem:[%s11031_s13 + $0x1018] sm:$0xff]  ;;  %v8754_v34 = vpack.c.bf16 %v3750_v56, %v3742_v28  ;;  %v3822_v26 = vld [vmem:[%s11031_s13 + $0x1210] sm:$0xff]  ;;  %v8772_v27 = vpack.c.bf16 %v3831_v22, %v3823_v21  ;;  %v3845_v56 = vld [vmem:[%s11031_s13 + $0x12c8] sm:$0xff] }
 0x3c8   : > { %v3830_v28 = vld [vmem:[%s11031_s13 + $0x1250] sm:$0xff]  ;;  %v3900_v22 = vld [vmem:[%s11031_s13 + $0x1480] sm:$0xff] }
 0x3c9   : > { %8415 = vmatpush1.bf16.msra.mxu0 %v8414_v37  ;;  %v3764_v37 = vld [vmem:[%s11031_s13 + $0x1040] sm:$0xff] }
 0x3ca   : > { %8735 = vmatpush1.bf16.msra.mxu1 %v8734_v46  ;;  %8417 = vmatprep.subr.bf16.mxu0 %v8416_v53  ;;  %v3758_v46 = vld [vmem:[%s11031_s13 + $0x1010] sm:$0xff]  ;;  %v8756_v53 = vpack.c.bf16 %v3767_v31, %v3759_v29  ;;  %v8438_v45 = vpack.c.bf16 %v3764_v37, %v3756_v36  ;;  %v8774_v31 = vpack.c.bf16 %v3830_v28, %v3822_v26  ;;  %v3925_v26 = vld [vmem:[%s11031_s13 + $0x1548] sm:$0xff]  ;;  %v3927_v28 = vld [vmem:[%s11031_s13 + $0x1558] sm:$0xff] }
 0x3cb   : > { %8737 = vmatprep.subr.bf16.mxu1 %v8736_v42  ;;  %v3775_v42 = vld [vmem:[%s11031_s13 + $0x1098] sm:$0xff]  ;;  %v8758_v47 = vpack.c.bf16 %v3766_v39, %v3758_v46  ;;  %v3838_v36 = vld [vmem:[%s11031_s13 + $0x1290] sm:$0xff]  ;;  %v8776_v37 = vpack.c.bf16 %v3847_v17, %v3839_v8  ;;  %v3861_v39 = vld [vmem:[%s11031_s13 + $0x1348] sm:$0xff] }
 0x3cc   : > { %v8760_v52 = vpack.c.bf16 %v3783_v43, %v3775_v42  ;;  %v3846_v46 = vld [vmem:[%s11031_s13 + $0x12d0] sm:$0xff]  ;;  %v3916_v17 = vld [vmem:[%s11031_s13 + $0x1500] sm:$0xff] }
 0x3cd   : > { %8419 = vmatpush1.bf16.msra.mxu0 %v8418_v7  ;;  %v3772_v7 = vld [vmem:[%s11031_s13 + $0x1080] sm:$0xff]  ;;  %v8778_v43 = vpack.c.bf16 %v3846_v46, %v3838_v36  ;;  %v3941_v36 = vld [vmem:[%s11031_s13 + $0x15c8] sm:$0xff]  ;;  %v3943_v46 = vld [vmem:[%s11031_s13 + $0x15d8] sm:$0xff] }
 0x3ce   : > { %8739 = vmatpush1.bf16.msra.mxu1 %v8738_v50  ;;  %8421 = vmatprep.subr.bf16.mxu0 %v8420_v51  ;;  %v3780_v50 = vld [vmem:[%s11031_s13 + $0x10c0] sm:$0xff]  ;;  %v3774_v51 = vld [vmem:[%s11031_s13 + $0x1090] sm:$0xff] }
 0x3cf   : > { %8741 = vmatprep.subr.bf16.mxu1 %v8740_v60  ;;  %v3797_v60 = vld [vmem:[%s11031_s13 + $0x1148] sm:$0xff]  ;;  %v8442_v62 = vpack.c.bf16 %v3780_v50, %v3772_v7  ;;  %v8762_v63 = vpack.c.bf16 %v3782_v57, %v3774_v51  ;;  %v8780_v7 = vpack.c.bf16 %v3863_v41, %v3855_v40  ;;  %v3862_v50 = vld [vmem:[%s11031_s13 + $0x1350] sm:$0xff]  ;;  %v3871_v57 = vld [vmem:[%s11031_s13 + $0x1398] sm:$0xff] }
 0x3d0   : > { %v3869_v51 = vld [vmem:[%s11031_s13 + $0x1388] sm:$0xff]  ;;  %v3932_v41 = vld [vmem:[%s11031_s13 + $0x1580] sm:$0xff] }
 0x3d1   : > { %8423 = vmatpush1.bf16.msra.mxu0 %v8422_v1  ;;  %v8444_v1 = vpack.c.bf16 %v3797_v60, %v3789_v59  ;;  %v3879_v59 = vld [vmem:[%s11031_s13 + $0x13d8] sm:$0xff] }
 0x3d2   : > { %8743 = vmatpush1.bf16.msra.mxu1 %v8742_v2  ;;  %8425 = vmatprep.subr.bf16.mxu0 %v8424_v32  ;;  %v3788_v2 = vld [vmem:[%s11031_s13 + $0x1100] sm:$0xff] }
 0x3d3   : > { %8745 = vmatprep.subr.bf16.mxu1 %v8744_v5  ;;  %v3796_v32 = vld [vmem:[%s11031_s13 + $0x1140] sm:$0xff]  ;;  %v3805_v5 = vld [vmem:[%s11031_s13 + $0x1188] sm:$0xff] }
 0x3d4   : > { %v8446_v20 = vpack.c.bf16 %v3796_v32, %v3788_v2  ;;  %v3878_v2 = vld [vmem:[%s11031_s13 + $0x13d0] sm:$0xff]  ;;  %v3885_v32 = vld [vmem:[%s11031_s13 + $0x1408] sm:$0xff] }
 0x3d5   : > { %8427 = vmatpush1.bf16.msra.mxu0 %v8426_v12  ;;  %v8448_v12 = vpack.c.bf16 %v3813_v6, %v3805_v5  ;;  %v8468_v9 = vpack.c.bf16 %v3893_v0, %v3885_v32 }
 0x3d6   : > { %8747 = vmatpush1.bf16.msra.mxu1 %v8746_v13  ;;  %8429 = vmatprep.subr.bf16.mxu0 %v8428_v15  ;;  %v3804_v13 = vld [vmem:[%s11031_s13 + $0x1180] sm:$0xff] }
 0x3d7   : > { %8749 = vmatprep.subr.bf16.mxu1 %v8748_v19  ;;  %v3812_v15 = vld [vmem:[%s11031_s13 + $0x11c0] sm:$0xff]  ;;  %v3821_v19 = vld [vmem:[%s11031_s13 + $0x1208] sm:$0xff] }
 0x3d8   : > { %v8450_v14 = vpack.c.bf16 %v3812_v15, %v3804_v13  ;;  %v3894_v13 = vld [vmem:[%s11031_s13 + $0x1450] sm:$0xff]  ;;  %v3901_v15 = vld [vmem:[%s11031_s13 + $0x1488] sm:$0xff] }
 0x3d9   : > { %8431 = vmatpush1.bf16.msra.mxu0 %v8430_v24  ;;  %v8452_v24 = vpack.c.bf16 %v3829_v38, %v3821_v19  ;;  %v8472_v21 = vpack.c.bf16 %v3909_v16, %v3901_v15 }
 0x3da   : > { %8751 = vmatpush1.bf16.msra.mxu1 %v8750_v4  ;;  %8433 = vmatprep.subr.bf16.mxu0 %v8432_v25  ;;  %v3820_v4 = vld [vmem:[%s11031_s13 + $0x1200] sm:$0xff] }
 0x3db   : > { %8753 = vmatprep.subr.bf16.mxu1 %v8752_v49  ;;  %v3828_v25 = vld [vmem:[%s11031_s13 + $0x1240] sm:$0xff]  ;;  %v3837_v49 = vld [vmem:[%s11031_s13 + $0x1288] sm:$0xff] }
 0x3dc   : > { %v8454_v29 = vpack.c.bf16 %v3828_v25, %v3820_v4  ;;  %v3910_v4 = vld [vmem:[%s11031_s13 + $0x14d0] sm:$0xff]  ;;  %v3917_v25 = vld [vmem:[%s11031_s13 + $0x1508] sm:$0xff] }
 0x3dd   : > { %8435 = vmatpush1.bf16.msra.mxu0 %v8434_v33  ;;  %v8456_v33 = vpack.c.bf16 %v3845_v56, %v3837_v49  ;;  %v8476_v8 = vpack.c.bf16 %v3925_v26, %v3917_v25 }
 0x3de   : > { %8755 = vmatpush1.bf16.msra.mxu1 %v8754_v34  ;;  %8437 = vmatprep.subr.bf16.mxu0 %v8436_v35  ;;  %v3836_v34 = vld [vmem:[%s11031_s13 + $0x1280] sm:$0xff] }
 0x3df   : > { %8757 = vmatprep.subr.bf16.mxu1 %v8756_v53  ;;  %v3844_v35 = vld [vmem:[%s11031_s13 + $0x12c0] sm:$0xff]  ;;  %v3853_v53 = vld [vmem:[%s11031_s13 + $0x1308] sm:$0xff] }
 0x3e0   : > { %4660 = vmatmul.mubr.f32.vlgmr.msra.gmra.mrb[0].mxu0 %v3236_v44  ;;  %v8458_v42 = vpack.c.bf16 %v3844_v35, %v3836_v34  ;;  %v3926_v34 = vld [vmem:[%s11031_s13 + $0x1550] sm:$0xff]  ;;  %v3933_v35 = vld [vmem:[%s11031_s13 + $0x1588] sm:$0xff] }
 0x3e1   : > { %8439 = vmatpush1.bf16.msra.mxu0 %v8438_v45  ;;  %5015 = vmatmul.mubr.f32.vlgmr.msra.gmra.mrb[0].mxu1 %v3236_v44  ;;  %v8460_v44 = vpack.c.bf16 %v3861_v39, %v3853_v53  ;;  %v3852_v45 = vld [vmem:[%s11031_s13 + $0x1300] sm:$0xff]  ;;  %v8480_v40 = vpack.c.bf16 %v3941_v36, %v3933_v35 }
 0x3e2   : > { %8759 = vmatpush1.bf16.msra.mxu1 %v8758_v47  ;;  %8441 = vmatprep.subr.bf16.mxu0 %v8440_v48  ;;  %v3860_v47 = vld [vmem:[%s11031_s13 + $0x1340] sm:$0xff]  ;;  %v3854_v48 = vld [vmem:[%s11031_s13 + $0x1310] sm:$0xff] }
 0x3e3   : > { %8761 = vmatprep.subr.bf16.mxu1 %v8760_v52  ;;  %4730 = vmatprep.mubr.f32.mxu0 %v3239_v54  ;;  %v3877_v52 = vld [vmem:[%s11031_s13 + $0x13c8] sm:$0xff]  ;;  %v8462_v60 = vpack.c.bf16 %v3860_v47, %v3852_v45  ;;  %v8782_v61 = vpack.c.bf16 %v3862_v50, %v3854_v48  ;;  %v3942_v45 = vld [vmem:[%s11031_s13 + $0x15d0] sm:$0xff]  ;;  %v3959_v50 = vld [vmem:[%s11031_s13 + $0x1658] sm:$0xff] }
 0x3e4   : > { %5085 = vmatprep.mubr.f32.mxu1 %v3239_v54  ;;  %v8464_v55 = vpack.c.bf16 %v3877_v52, %v3869_v51  ;;  %v3868_v54 = vld [vmem:[%s11031_s13 + $0x1380] sm:$0xff]  ;;  %v3949_v47 = vld [vmem:[%s11031_s13 + $0x1608] sm:$0xff] }
 0x3e5   : > { %8443 = vmatpush1.bf16.msra.mxu0 %v8442_v62  ;;  %v3876_v62 = vld [vmem:[%s11031_s13 + $0x13c0] sm:$0xff]  ;;  %v3957_v48 = vld [vmem:[%s11031_s13 + $0x1648] sm:$0xff] }
 0x3e6   : > { %8763 = vmatpush1.bf16.msra.mxu1 %v8762_v63  ;;  %8445 = vmatprep.subr.bf16.mxu0 %v8444_v1  ;;  %v3870_v63 = vld [vmem:[%s11031_s13 + $0x1390] sm:$0xff]  ;;  %v8784_v1 = vpack.c.bf16 %v3879_v59, %v3871_v57  ;;  %v8466_v5 = vpack.c.bf16 %v3876_v62, %v3868_v54  ;;  %v8484_v57 = vpack.c.bf16 %v3957_v48, %v3949_v47  ;;  %v3948_v59 = vld [vmem:[%s11031_s13 + $0x1600] sm:$0xff]  ;;  %v3965_v62 = vld [vmem:[%s11031_s13 + $0x1688] sm:$0xff] }
 0x3e7   : > { %8765 = vmatprep.subr.bf16.mxu1 %v8764_v3  ;;  %v3887_v3 = vld [vmem:[%s11031_s13 + $0x1418] sm:$0xff]  ;;  %v8786_v6 = vpack.c.bf16 %v3878_v2, %v3870_v63  ;;  %v3958_v54 = vld [vmem:[%s11031_s13 + $0x1650] sm:$0xff]  ;;  %v3973_v63 = vld [vmem:[%s11031_s13 + $0x16c8] sm:$0xff] }
 0x3e8   : > { %v3975_v2 = vld [vmem:[%s11031_s13 + $0x16d8] sm:$0xff]  ;;  %v3238_v47 = vld [vmem:[%s11386_s20 + $0x20] sm:$0xff] }
 0x3e9   : > { %8447 = vmatpush1.bf16.msra.mxu0 %v8446_v20  ;;  %v3892_v20 = vld [vmem:[%s11031_s13 + $0x1440] sm:$0xff] }
 0x3ea   : > { %8767 = vmatpush1.bf16.msra.mxu1 %v8766_v11  ;;  %8449 = vmatprep.subr.bf16.mxu0 %v8448_v12  ;;  %v3886_v11 = vld [vmem:[%s11031_s13 + $0x1410] sm:$0xff]  ;;  %v8788_v12 = vpack.c.bf16 %v3895_v58, %v3887_v3  ;;  %v8470_v19 = vpack.c.bf16 %v3892_v20, %v3884_v10  ;;  %v8488_v3 = vpack.c.bf16 %v3973_v63, %v3965_v62  ;;  %v3964_v58 = vld [vmem:[%s11031_s13 + $0x1680] sm:$0xff]  ;;  %v3981_v20 = vld [vmem:[%s11031_s13 + $0x1708] sm:$0xff] }
 0x3eb   : > { %8769 = vmatprep.subr.bf16.mxu1 %v8768_v18  ;;  %v3903_v18 = vld [vmem:[%s11031_s13 + $0x1498] sm:$0xff]  ;;  %v8790_v38 = vpack.c.bf16 %v3894_v13, %v3886_v11  ;;  %v3974_v10 = vld [vmem:[%s11031_s13 + $0x16d0] sm:$0xff]  ;;  %v3989_v11 = vld [vmem:[%s11031_s13 + $0x1748] sm:$0xff] }
 0x3ec   : > { %v3991_v13 = vld [vmem:[%s11031_s13 + $0x1758] sm:$0xff]  ;;  %v3241_v63 = vld [vmem:[%s11386_s20 + $0x38] sm:$0xff] }
 0x3ed   : > { %8451 = vmatpush1.bf16.msra.mxu0 %v8450_v14  ;;  %v3908_v14 = vld [vmem:[%s11031_s13 + $0x14c0] sm:$0xff]  ;;  %v4055_v62 = vld [vmem:[%s11031_s13 + $0x1958] sm:$0xff] }
 0x3ee   : > { %8771 = vmatpush1.bf16.msra.mxu1 %v8770_v23  ;;  %8453 = vmatprep.subr.bf16.mxu0 %v8452_v24  ;;  %v3902_v23 = vld [vmem:[%s11031_s13 + $0x1490] sm:$0xff]  ;;  %v8792_v24 = vpack.c.bf16 %v3911_v30, %v3903_v18  ;;  %v8474_v49 = vpack.c.bf16 %v3908_v14, %v3900_v22  ;;  %v8492_v18 = vpack.c.bf16 %v3989_v11, %v3981_v20  ;;  %v3980_v30 = vld [vmem:[%s11031_s13 + $0x1700] sm:$0xff]  ;;  %v3997_v14 = vld [vmem:[%s11031_s13 + $0x1788] sm:$0xff] }
 0x3ef   : > { %8773 = vmatprep.subr.bf16.mxu1 %v8772_v27  ;;  %v3919_v27 = vld [vmem:[%s11031_s13 + $0x1518] sm:$0xff]  ;;  %v8794_v56 = vpack.c.bf16 %v3910_v4, %v3902_v23  ;;  %v3990_v22 = vld [vmem:[%s11031_s13 + $0x1750] sm:$0xff]  ;;  %v4005_v23 = vld [vmem:[%s11031_s13 + $0x17c8] sm:$0xff] }
 0x3f0   : > { %v4007_v4 = vld [vmem:[%s11031_s13 + $0x17d8] sm:$0xff] }
 0x3f1   : > { %8455 = vmatpush1.bf16.msra.mxu0 %v8454_v29  ;;  %v3924_v29 = vld [vmem:[%s11031_s13 + $0x1540] sm:$0xff]  ;;  %v4063_v20 = vld [vmem:[%s11031_s13 + $0x1998] sm:$0xff] }
 0x3f2   : > { %8775 = vmatpush1.bf16.msra.mxu1 %v8774_v31  ;;  %8457 = vmatprep.subr.bf16.mxu0 %v8456_v33  ;;  %v3918_v31 = vld [vmem:[%s11031_s13 + $0x1510] sm:$0xff]  ;;  %v8796_v33 = vpack.c.bf16 %v3927_v28, %v3919_v27  ;;  %v8478_v53 = vpack.c.bf16 %v3924_v29, %v3916_v17  ;;  %v8496_v27 = vpack.c.bf16 %v4005_v23, %v3997_v14  ;;  %v3996_v28 = vld [vmem:[%s11031_s13 + $0x1780] sm:$0xff]  ;;  %v4013_v29 = vld [vmem:[%s11031_s13 + $0x1808] sm:$0xff] }
 0x3f3   : > { %8777 = vmatprep.subr.bf16.mxu1 %v8776_v37  ;;  %v3935_v37 = vld [vmem:[%s11031_s13 + $0x1598] sm:$0xff]  ;;  %v8798_v39 = vpack.c.bf16 %v3926_v34, %v3918_v31  ;;  %v4006_v17 = vld [vmem:[%s11031_s13 + $0x17d0] sm:$0xff]  ;;  %v4021_v31 = vld [vmem:[%s11031_s13 + $0x1848] sm:$0xff] }
 0x3f4   : > { %v4023_v34 = vld [vmem:[%s11031_s13 + $0x1858] sm:$0xff] }
 0x3f5   : > { %8459 = vmatpush1.bf16.msra.mxu0 %v8458_v42  ;;  %v3940_v42 = vld [vmem:[%s11031_s13 + $0x15c0] sm:$0xff]  ;;  %v4071_v11 = vld [vmem:[%s11031_s13 + $0x19d8] sm:$0xff] }
 0x3f6   : > { %8779 = vmatpush1.bf16.msra.mxu1 %v8778_v43  ;;  %8461 = vmatprep.subr.bf16.mxu0 %v8460_v44  ;;  %v3934_v43 = vld [vmem:[%s11031_s13 + $0x1590] sm:$0xff]  ;;  %v8800_v44 = vpack.c.bf16 %v3943_v46, %v3935_v37  ;;  %v8482_v51 = vpack.c.bf16 %v3940_v42, %v3932_v41  ;;  %v8500_v37 = vpack.c.bf16 %v4021_v31, %v4013_v29  ;;  %v4012_v46 = vld [vmem:[%s11031_s13 + $0x1800] sm:$0xff]  ;;  %v4029_v42 = vld [vmem:[%s11031_s13 + $0x1888] sm:$0xff] }
 0x3f7   : > { %8781 = vmatprep.subr.bf16.mxu1 %v8780_v7  ;;  %v3951_v7 = vld [vmem:[%s11031_s13 + $0x1618] sm:$0xff]  ;;  %v8802_v52 = vpack.c.bf16 %v3942_v45, %v3934_v43  ;;  %v4022_v41 = vld [vmem:[%s11031_s13 + $0x1850] sm:$0xff]  ;;  %v4037_v43 = vld [vmem:[%s11031_s13 + $0x18c8] sm:$0xff] }
 0x3f8   : > { %v4039_v45 = vld [vmem:[%s11031_s13 + $0x18d8] sm:$0xff] }
 0x3f9   : > { %8463 = vmatpush1.bf16.msra.mxu0 %v8462_v60  ;;  %v3956_v60 = vld [vmem:[%s11031_s13 + $0x1640] sm:$0xff]  ;;  %v4079_v14 = vld [vmem:[%s11031_s13 + $0x1a18] sm:$0xff] }
 0x3fa   : > { %8783 = vmatpush1.bf16.msra.mxu1 %v8782_v61  ;;  %8465 = vmatprep.subr.bf16.mxu0 %v8464_v55  ;;  %v3950_v61 = vld [vmem:[%s11031_s13 + $0x1610] sm:$0xff]  ;;  %v8804_v55 = vpack.c.bf16 %v3959_v50, %v3951_v7  ;;  %v8486_v32 = vpack.c.bf16 %v3956_v60, %v3948_v59  ;;  %v8504_v50 = vpack.c.bf16 %v4037_v43, %v4029_v42  ;;  %v4087_v23 = vld [vmem:[%s11031_s13 + $0x1a58] sm:$0xff] }
 0x3fb   : > { %8785 = vmatprep.subr.bf16.mxu1 %v8784_v1  ;;  %v3967_v1 = vld [vmem:[%s11031_s13 + $0x1698] sm:$0xff]  ;;  %v8806_v0 = vpack.c.bf16 %v3958_v54, %v3950_v61  ;;  %v4038_v60 = vld [vmem:[%s11031_s13 + $0x18d0] sm:$0xff]  ;;  %v4045_v61 = vld [vmem:[%s11031_s13 + $0x1908] sm:$0xff] }
 0x3fc   : > { %v4047_v54 = vld [vmem:[%s11031_s13 + $0x1918] sm:$0xff] }
 0x3fd   : > { %8467 = vmatpush1.bf16.msra.mxu0 %v8466_v5  ;;  %v3972_v5 = vld [vmem:[%s11031_s13 + $0x16c0] sm:$0xff]  ;;  %v4095_v29 = vld [vmem:[%s11031_s13 + $0x1a98] sm:$0xff] }
 0x3fe   : > { %8787 = vmatpush1.bf16.msra.mxu1 %v8786_v6  ;;  %8469 = vmatprep.subr.bf16.mxu0 %v8468_v9  ;;  %v3966_v6 = vld [vmem:[%s11031_s13 + $0x1690] sm:$0xff]  ;;  %v8808_v9 = vpack.c.bf16 %v3975_v2, %v3967_v1  ;;  %v8490_v15 = vpack.c.bf16 %v3972_v5, %v3964_v58  ;;  %v8828_v5 = vpack.c.bf16 %v4055_v62, %v4047_v54  ;;  %v4103_v31 = vld [vmem:[%s11031_s13 + $0x1ad8] sm:$0xff] }
 0x3ff   : > { %8789 = vmatprep.subr.bf16.mxu1 %v8788_v12  ;;  %v3983_v12 = vld [vmem:[%s11031_s13 + $0x1718] sm:$0xff]  ;;  %v8810_v16 = vpack.c.bf16 %v3974_v10, %v3966_v6  ;;  %v4046_v58 = vld [vmem:[%s11031_s13 + $0x1910] sm:$0xff]  ;;  %v4069_v10 = vld [vmem:[%s11031_s13 + $0x19c8] sm:$0xff] }
 0x400   : > { %v4054_v6 = vld [vmem:[%s11031_s13 + $0x1950] sm:$0xff]  ;;  %v4111_v42 = vld [vmem:[%s11031_s13 + $0x1b18] sm:$0xff] }
 0x401   : > { %8471 = vmatpush1.bf16.msra.mxu0 %v8470_v19  ;;  %v3988_v19 = vld [vmem:[%s11031_s13 + $0x1740] sm:$0xff]  ;;  %v4119_v43 = vld [vmem:[%s11031_s13 + $0x1b58] sm:$0xff] }
 0x402   : > { %8791 = vmatpush1.bf16.msra.mxu1 %v8790_v38  ;;  %8473 = vmatprep.subr.bf16.mxu0 %v8472_v21  ;;  %v3982_v38 = vld [vmem:[%s11031_s13 + $0x1710] sm:$0xff]  ;;  %v8812_v21 = vpack.c.bf16 %v3991_v13, %v3983_v12  ;;  %v8494_v25 = vpack.c.bf16 %v3988_v19, %v3980_v30  ;;  %v8830_v13 = vpack.c.bf16 %v4054_v6, %v4046_v58  ;;  %v4149_v58 = vld [vmem:[%s11031_s13 + $0x1c48] sm:$0xff]  ;;  %v4151_v6 = vld [vmem:[%s11031_s13 + $0x1c58] sm:$0xff] }
 0x403   : > { %8793 = vmatprep.subr.bf16.mxu1 %v8792_v24  ;;  %v3999_v24 = vld [vmem:[%s11031_s13 + $0x1798] sm:$0xff]  ;;  %v8814_v26 = vpack.c.bf16 %v3990_v22, %v3982_v38  ;;  %v4062_v30 = vld [vmem:[%s11031_s13 + $0x1990] sm:$0xff]  ;;  %v8832_v19 = vpack.c.bf16 %v4071_v11, %v4063_v20  ;;  %v4085_v22 = vld [vmem:[%s11031_s13 + $0x1a48] sm:$0xff] }
 0x404   : > { %v4070_v38 = vld [vmem:[%s11031_s13 + $0x19d0] sm:$0xff]  ;;  %v4140_v11 = vld [vmem:[%s11031_s13 + $0x1c00] sm:$0xff] }
 0x405   : > { %8475 = vmatpush1.bf16.msra.mxu0 %v8474_v49  ;;  %v4004_v49 = vld [vmem:[%s11031_s13 + $0x17c0] sm:$0xff] }
 0x406   : > { %8795 = vmatpush1.bf16.msra.mxu1 %v8794_v56  ;;  %8477 = vmatprep.subr.bf16.mxu0 %v8476_v8  ;;  %v3998_v56 = vld [vmem:[%s11031_s13 + $0x1790] sm:$0xff]  ;;  %v8816_v8 = vpack.c.bf16 %v4007_v4, %v3999_v24  ;;  %v8498_v35 = vpack.c.bf16 %v4004_v49, %v3996_v28  ;;  %v8834_v4 = vpack.c.bf16 %v4070_v38, %v4062_v30  ;;  %v4165_v30 = vld [vmem:[%s11031_s13 + $0x1cc8] sm:$0xff]  ;;  %v4167_v38 = vld [vmem:[%s11031_s13 + $0x1cd8] sm:$0xff] }
 0x407   : > { %8797 = vmatprep.subr.bf16.mxu1 %v8796_v33  ;;  %v4015_v33 = vld [vmem:[%s11031_s13 + $0x1818] sm:$0xff]  ;;  %v8818_v36 = vpack.c.bf16 %v4006_v17, %v3998_v56  ;;  %v4078_v28 = vld [vmem:[%s11031_s13 + $0x1a10] sm:$0xff]  ;;  %v8836_v49 = vpack.c.bf16 %v4087_v23, %v4079_v14  ;;  %v4101_v17 = vld [vmem:[%s11031_s13 + $0x1ac8] sm:$0xff] }
 0x408   : > { %v4086_v56 = vld [vmem:[%s11031_s13 + $0x1a50] sm:$0xff]  ;;  %v4156_v23 = vld [vmem:[%s11031_s13 + $0x1c80] sm:$0xff] }
 0x409   : > { %8479 = vmatpush1.bf16.msra.mxu0 %v8478_v53  ;;  %v4020_v53 = vld [vmem:[%s11031_s13 + $0x1840] sm:$0xff] }
 0x40a   : > { %8799 = vmatpush1.bf16.msra.mxu1 %v8798_v39  ;;  %8481 = vmatprep.subr.bf16.mxu0 %v8480_v40  ;;  %v4014_v39 = vld [vmem:[%s11031_s13 + $0x1810] sm:$0xff]  ;;  %v8820_v40 = vpack.c.bf16 %v4023_v34, %v4015_v33  ;;  %v8502_v48 = vpack.c.bf16 %v4020_v53, %v4012_v46  ;;  %v8838_v34 = vpack.c.bf16 %v4086_v56, %v4078_v28  ;;  %v4181_v28 = vld [vmem:[%s11031_s13 + $0x1d48] sm:$0xff]  ;;  %v4183_v56 = vld [vmem:[%s11031_s13 + $0x1d58] sm:$0xff] }
 0x40b   : > { %8801 = vmatprep.subr.bf16.mxu1 %v8800_v44  ;;  %v4031_v44 = vld [vmem:[%s11031_s13 + $0x1898] sm:$0xff]  ;;  %v8822_v7 = vpack.c.bf16 %v4022_v41, %v4014_v39  ;;  %v4094_v46 = vld [vmem:[%s11031_s13 + $0x1a90] sm:$0xff]  ;;  %v8840_v53 = vpack.c.bf16 %v4103_v31, %v4095_v29  ;;  %v4117_v41 = vld [vmem:[%s11031_s13 + $0x1b48] sm:$0xff] }
 0x40c   : > { %v8824_v59 = vpack.c.bf16 %v4039_v45, %v4031_v44  ;;  %v4102_v39 = vld [vmem:[%s11031_s13 + $0x1ad0] sm:$0xff]  ;;  %v4172_v31 = vld [vmem:[%s11031_s13 + $0x1d00] sm:$0xff] }
 0x40d   : > { %8483 = vmatpush1.bf16.msra.mxu0 %v8482_v51  ;;  %v4028_v51 = vld [vmem:[%s11031_s13 + $0x1880] sm:$0xff]  ;;  %v8842_v45 = vpack.c.bf16 %v4102_v39, %v4094_v46  ;;  %v4197_v46 = vld [vmem:[%s11031_s13 + $0x1dc8] sm:$0xff]  ;;  %v4199_v39 = vld [vmem:[%s11031_s13 + $0x1dd8] sm:$0xff] }
 0x40e   : > { %8803 = vmatpush1.bf16.msra.mxu1 %v8802_v52  ;;  %8485 = vmatprep.subr.bf16.mxu0 %v8484_v57  ;;  %v4036_v52 = vld [vmem:[%s11031_s13 + $0x18c0] sm:$0xff]  ;;  %v4030_v57 = vld [vmem:[%s11031_s13 + $0x1890] sm:$0xff] }
 0x40f   : > { %8805 = vmatprep.subr.bf16.mxu1 %v8804_v55  ;;  %v4053_v55 = vld [vmem:[%s11031_s13 + $0x1948] sm:$0xff]  ;;  %v8506_v1 = vpack.c.bf16 %v4036_v52, %v4028_v51  ;;  %v8826_v2 = vpack.c.bf16 %v4038_v60, %v4030_v57  ;;  %v8844_v51 = vpack.c.bf16 %v4119_v43, %v4111_v42  ;;  %v4118_v52 = vld [vmem:[%s11031_s13 + $0x1b50] sm:$0xff]  ;;  %v4127_v60 = vld [vmem:[%s11031_s13 + $0x1b98] sm:$0xff] }
 0x410   : > { %v4125_v57 = vld [vmem:[%s11031_s13 + $0x1b88] sm:$0xff]  ;;  %v4188_v43 = vld [vmem:[%s11031_s13 + $0x1d80] sm:$0xff] }
 0x411   : > { %8487 = vmatpush1.bf16.msra.mxu0 %v8486_v32  ;;  %v8508_v32 = vpack.c.bf16 %v4053_v55, %v4045_v61  ;;  %v4135_v61 = vld [vmem:[%s11031_s13 + $0x1bd8] sm:$0xff] }
 0x412   : > { %8807 = vmatpush1.bf16.msra.mxu1 %v8806_v0  ;;  %8489 = vmatprep.subr.bf16.mxu0 %v8488_v3  ;;  %v4044_v0 = vld [vmem:[%s11031_s13 + $0x1900] sm:$0xff] }
 0x413   : > { %8809 = vmatprep.subr.bf16.mxu1 %v8808_v9  ;;  %v4052_v3 = vld [vmem:[%s11031_s13 + $0x1940] sm:$0xff]  ;;  %v4061_v9 = vld [vmem:[%s11031_s13 + $0x1988] sm:$0xff] }
 0x414   : > { %v8510_v12 = vpack.c.bf16 %v4052_v3, %v4044_v0  ;;  %v4134_v0 = vld [vmem:[%s11031_s13 + $0x1bd0] sm:$0xff]  ;;  %v4141_v3 = vld [vmem:[%s11031_s13 + $0x1c08] sm:$0xff] }
 0x415   : > { %8491 = vmatpush1.bf16.msra.mxu0 %v8490_v15  ;;  %v8512_v15 = vpack.c.bf16 %v4069_v10, %v4061_v9  ;;  %v8532_v20 = vpack.c.bf16 %v4149_v58, %v4141_v3 }
 0x416   : > { %8811 = vmatpush1.bf16.msra.mxu1 %v8810_v16  ;;  %8493 = vmatprep.subr.bf16.mxu0 %v8492_v18  ;;  %v4060_v16 = vld [vmem:[%s11031_s13 + $0x1980] sm:$0xff] }
 0x417   : > { %8813 = vmatprep.subr.bf16.mxu1 %v8812_v21  ;;  %v4068_v18 = vld [vmem:[%s11031_s13 + $0x19c0] sm:$0xff]  ;;  %v4077_v21 = vld [vmem:[%s11031_s13 + $0x1a08] sm:$0xff] }
 0x418   : > { %v8514_v24 = vpack.c.bf16 %v4068_v18, %v4060_v16  ;;  %v4150_v16 = vld [vmem:[%s11031_s13 + $0x1c50] sm:$0xff]  ;;  %v4157_v18 = vld [vmem:[%s11031_s13 + $0x1c88] sm:$0xff] }
 0x419   : > { %8495 = vmatpush1.bf16.msra.mxu0 %v8494_v25  ;;  %v8516_v25 = vpack.c.bf16 %v4085_v22, %v4077_v21  ;;  %v8536_v14 = vpack.c.bf16 %v4165_v30, %v4157_v18 }
 0x41a   : > { %8815 = vmatpush1.bf16.msra.mxu1 %v8814_v26  ;;  %8497 = vmatprep.subr.bf16.mxu0 %v8496_v27  ;;  %v4076_v26 = vld [vmem:[%s11031_s13 + $0x1a00] sm:$0xff] }
 0x41b   : > { %8817 = vmatprep.subr.bf16.mxu1 %v8816_v8  ;;  %v4084_v27 = vld [vmem:[%s11031_s13 + $0x1a40] sm:$0xff]  ;;  %v4093_v8 = vld [vmem:[%s11031_s13 + $0x1a88] sm:$0xff] }
 0x41c   : > { %v8518_v33 = vpack.c.bf16 %v4084_v27, %v4076_v26  ;;  %v4166_v26 = vld [vmem:[%s11031_s13 + $0x1cd0] sm:$0xff]  ;;  %v4173_v27 = vld [vmem:[%s11031_s13 + $0x1d08] sm:$0xff] }
 0x41d   : > { %8499 = vmatpush1.bf16.msra.mxu0 %v8498_v35  ;;  %v8520_v35 = vpack.c.bf16 %v4101_v17, %v4093_v8  ;;  %v8540_v29 = vpack.c.bf16 %v4181_v28, %v4173_v27 }
 0x41e   : > { %8819 = vmatpush1.bf16.msra.mxu1 %v8818_v36  ;;  %8501 = vmatprep.subr.bf16.mxu0 %v8500_v37  ;;  %v4092_v36 = vld [vmem:[%s11031_s13 + $0x1a80] sm:$0xff] }
 0x41f   : > { %8821 = vmatprep.subr.bf16.mxu1 %v8820_v40  ;;  %v4100_v37 = vld [vmem:[%s11031_s13 + $0x1ac0] sm:$0xff]  ;;  %v4109_v40 = vld [vmem:[%s11031_s13 + $0x1b08] sm:$0xff] }
 0x420   : > { %4731 = vmatmul.mubr.f32.vlgmr.msra.gmra.mrb[0].mxu0 %v3238_v47  ;;  %v8522_v44 = vpack.c.bf16 %v4100_v37, %v4092_v36  ;;  %v4182_v36 = vld [vmem:[%s11031_s13 + $0x1d50] sm:$0xff]  ;;  %v4189_v37 = vld [vmem:[%s11031_s13 + $0x1d88] sm:$0xff] }
 0x421   : > { %8503 = vmatpush1.bf16.msra.mxu0 %v8502_v48  ;;  %5086 = vmatmul.mubr.f32.vlgmr.msra.gmra.mrb[0].mxu1 %v3238_v47  ;;  %v8524_v47 = vpack.c.bf16 %v4117_v41, %v4109_v40  ;;  %v4108_v48 = vld [vmem:[%s11031_s13 + $0x1b00] sm:$0xff]  ;;  %v8544_v42 = vpack.c.bf16 %v4197_v46, %v4189_v37 }
 0x422   : > { %8823 = vmatpush1.bf16.msra.mxu1 %v8822_v7  ;;  %8505 = vmatprep.subr.bf16.mxu0 %v8504_v50  ;;  %v4116_v7 = vld [vmem:[%s11031_s13 + $0x1b40] sm:$0xff]  ;;  %v4110_v50 = vld [vmem:[%s11031_s13 + $0x1b10] sm:$0xff] }
 0x423   : > { %8825 = vmatprep.subr.bf16.mxu1 %v8824_v59  ;;  %4801 = vmatprep.mubr.f32.mxu0 %v3241_v63  ;;  %v4133_v59 = vld [vmem:[%s11031_s13 + $0x1bc8] sm:$0xff]  ;;  %v8526_v55 = vpack.c.bf16 %v4116_v7, %v4108_v48  ;;  %v8846_v54 = vpack.c.bf16 %v4118_v52, %v4110_v50  ;;  %v4198_v48 = vld [vmem:[%s11031_s13 + $0x1dd0] sm:$0xff]  ;;  %v4215_v52 = vld [vmem:[%s11031_s13 + $0x1e58] sm:$0xff] }
 0x424   : > { %5156 = vmatprep.mubr.f32.mxu1 %v3241_v63  ;;  %v8528_v62 = vpack.c.bf16 %v4133_v59, %v4125_v57  ;;  %v4124_v63 = vld [vmem:[%s11031_s13 + $0x1b80] sm:$0xff]  ;;  %v4205_v7 = vld [vmem:[%s11031_s13 + $0x1e08] sm:$0xff] }
 0x425   : > { %8507 = vmatpush1.bf16.msra.mxu0 %v8506_v1  ;;  %v4132_v1 = vld [vmem:[%s11031_s13 + $0x1bc0] sm:$0xff]  ;;  %v4213_v50 = vld [vmem:[%s11031_s13 + $0x1e48] sm:$0xff] }
 0x426   : > { %8827 = vmatpush1.bf16.msra.mxu1 %v8826_v2  ;;  %8509 = vmatprep.subr.bf16.mxu0 %v8508_v32  ;;  %v4126_v2 = vld [vmem:[%s11031_s13 + $0x1b90] sm:$0xff]  ;;  %v8848_v32 = vpack.c.bf16 %v4135_v61, %v4127_v60  ;;  %v8530_v9 = vpack.c.bf16 %v4132_v1, %v4124_v63  ;;  %v8548_v60 = vpack.c.bf16 %v4213_v50, %v4205_v7  ;;  %v4204_v61 = vld [vmem:[%s11031_s13 + $0x1e00] sm:$0xff]  ;;  %v4221_v1 = vld [vmem:[%s11031_s13 + $0x1e88] sm:$0xff] }
 0x427   : > { %8829 = vmatprep.subr.bf16.mxu1 %v8828_v5  ;;  %v4143_v5 = vld [vmem:[%s11031_s13 + $0x1c18] sm:$0xff]  ;;  %v8850_v10 = vpack.c.bf16 %v4134_v0, %v4126_v2  ;;  %v4214_v63 = vld [vmem:[%s11031_s13 + $0x1e50] sm:$0xff]  ;;  %v4229_v2 = vld [vmem:[%s11031_s13 + $0x1ec8] sm:$0xff] }
 0x428   : > { %v4231_v0 = vld [vmem:[%s11031_s13 + $0x1ed8] sm:$0xff]  ;;  %v3240_v7 = vld [vmem:[%s11386_s20 + $0x30] sm:$0xff] }
 0x429   : > { %8511 = vmatpush1.bf16.msra.mxu0 %v8510_v12  ;;  %v4148_v12 = vld [vmem:[%s11031_s13 + $0x1c40] sm:$0xff] }
 0x42a   : > { %8831 = vmatpush1.bf16.msra.mxu1 %v8830_v13  ;;  %8513 = vmatprep.subr.bf16.mxu0 %v8512_v15  ;;  %v4142_v13 = vld [vmem:[%s11031_s13 + $0x1c10] sm:$0xff]  ;;  %v8852_v15 = vpack.c.bf16 %v4151_v6, %v4143_v5  ;;  %v8534_v21 = vpack.c.bf16 %v4148_v12, %v4140_v11  ;;  %v8552_v5 = vpack.c.bf16 %v4229_v2, %v4221_v1  ;;  %v4220_v6 = vld [vmem:[%s11031_s13 + $0x1e80] sm:$0xff]  ;;  %v4237_v12 = vld [vmem:[%s11031_s13 + $0x1f08] sm:$0xff] }
 0x42b   : > { %8833 = vmatprep.subr.bf16.mxu1 %v8832_v19  ;;  %v4159_v19 = vld [vmem:[%s11031_s13 + $0x1c98] sm:$0xff]  ;;  %v8854_v22 = vpack.c.bf16 %v4150_v16, %v4142_v13  ;;  %v4230_v11 = vld [vmem:[%s11031_s13 + $0x1ed0] sm:$0xff]  ;;  %v4245_v13 = vld [vmem:[%s11031_s13 + $0x1f48] sm:$0xff] }
 0x42c   : > { %v4247_v16 = vld [vmem:[%s11031_s13 + $0x1f58] sm:$0xff] }
 0x42d   : > { %8515 = vmatpush1.bf16.msra.mxu0 %v8514_v24  ;;  %v4164_v24 = vld [vmem:[%s11031_s13 + $0x1cc0] sm:$0xff]  ;;  %v4311_v1 = vld [vmem:[%s11031_s13 + $0x2158] sm:$0xff] }
 0x42e   : > { %8835 = vmatpush1.bf16.msra.mxu1 %v8834_v4  ;;  %8517 = vmatprep.subr.bf16.mxu0 %v8516_v25  ;;  %v4158_v4 = vld [vmem:[%s11031_s13 + $0x1c90] sm:$0xff]  ;;  %v8856_v25 = vpack.c.bf16 %v4167_v38, %v4159_v19  ;;  %v8538_v8 = vpack.c.bf16 %v4164_v24, %v4156_v23  ;;  %v8556_v19 = vpack.c.bf16 %v4245_v13, %v4237_v12  ;;  %v4236_v38 = vld [vmem:[%s11031_s13 + $0x1f00] sm:$0xff]  ;;  %v4253_v24 = vld [vmem:[%s11031_s13 + $0x1f88] sm:$0xff] }
 0x42f   : > { %8837 = vmatprep.subr.bf16.mxu1 %v8836_v49  ;;  %v4175_v49 = vld [vmem:[%s11031_s13 + $0x1d18] sm:$0xff]  ;;  %v8858_v17 = vpack.c.bf16 %v4166_v26, %v4158_v4  ;;  %v4246_v23 = vld [vmem:[%s11031_s13 + $0x1f50] sm:$0xff]  ;;  %v4261_v4 = vld [vmem:[%s11031_s13 + $0x1fc8] sm:$0xff] }
 0x430   : > { %v4263_v26 = vld [vmem:[%s11031_s13 + $0x1fd8] sm:$0xff] }
 0x431   : > { %8519 = vmatpush1.bf16.msra.mxu0 %v8518_v33  ;;  %v4180_v33 = vld [vmem:[%s11031_s13 + $0x1d40] sm:$0xff]  ;;  %v3243_v2 = vld [vmem:[%s11386_s20 + $0x48] sm:$0xff] }
 0x432   : > { %8839 = vmatpush1.bf16.msra.mxu1 %v8838_v34  ;;  %8521 = vmatprep.subr.bf16.mxu0 %v8520_v35  ;;  %v4174_v34 = vld [vmem:[%s11031_s13 + $0x1d10] sm:$0xff]  ;;  %v8860_v35 = vpack.c.bf16 %v4183_v56, %v4175_v49  ;;  %v8542_v40 = vpack.c.bf16 %v4180_v33, %v4172_v31  ;;  %v8560_v49 = vpack.c.bf16 %v4261_v4, %v4253_v24  ;;  %v4252_v56 = vld [vmem:[%s11031_s13 + $0x1f80] sm:$0xff]  ;;  %v4269_v33 = vld [vmem:[%s11031_s13 + $0x2008] sm:$0xff] }
 0x433   : > { %8841 = vmatprep.subr.bf16.mxu1 %v8840_v53  ;;  %v4191_v53 = vld [vmem:[%s11031_s13 + $0x1d98] sm:$0xff]  ;;  %v8862_v41 = vpack.c.bf16 %v4182_v36, %v4174_v34  ;;  %v4262_v31 = vld [vmem:[%s11031_s13 + $0x1fd0] sm:$0xff]  ;;  %v4277_v34 = vld [vmem:[%s11031_s13 + $0x2048] sm:$0xff] }
 0x434   : > { %v4279_v36 = vld [vmem:[%s11031_s13 + $0x2058] sm:$0xff] }
 0x435   : > { %8523 = vmatpush1.bf16.msra.mxu0 %v8522_v44  ;;  %v4196_v44 = vld [vmem:[%s11031_s13 + $0x1dc0] sm:$0xff]  ;;  %v4319_v12 = vld [vmem:[%s11031_s13 + $0x2198] sm:$0xff] }
 0x436   : > { %8843 = vmatpush1.bf16.msra.mxu1 %v8842_v45  ;;  %8525 = vmatprep.subr.bf16.mxu0 %v8524_v47  ;;  %v4190_v45 = vld [vmem:[%s11031_s13 + $0x1d90] sm:$0xff]  ;;  %v8864_v47 = vpack.c.bf16 %v4199_v39, %v4191_v53  ;;  %v8546_v57 = vpack.c.bf16 %v4196_v44, %v4188_v43  ;;  %v8564_v53 = vpack.c.bf16 %v4277_v34, %v4269_v33  ;;  %v4268_v39 = vld [vmem:[%s11031_s13 + $0x2000] sm:$0xff]  ;;  %v4285_v44 = vld [vmem:[%s11031_s13 + $0x2088] sm:$0xff] }
 0x437   : > { %8845 = vmatprep.subr.bf16.mxu1 %v8844_v51  ;;  %v4207_v51 = vld [vmem:[%s11031_s13 + $0x1e18] sm:$0xff]  ;;  %v8866_v59 = vpack.c.bf16 %v4198_v48, %v4190_v45  ;;  %v4278_v43 = vld [vmem:[%s11031_s13 + $0x2050] sm:$0xff]  ;;  %v4293_v45 = vld [vmem:[%s11031_s13 + $0x20c8] sm:$0xff] }
 0x438   : > { %v4295_v48 = vld [vmem:[%s11031_s13 + $0x20d8] sm:$0xff] }
 0x439   : > { %8527 = vmatpush1.bf16.msra.mxu0 %v8526_v55  ;;  %v4212_v55 = vld [vmem:[%s11031_s13 + $0x1e40] sm:$0xff]  ;;  %v4327_v13 = vld [vmem:[%s11031_s13 + $0x21d8] sm:$0xff] }
 0x43a   : > { %8847 = vmatpush1.bf16.msra.mxu1 %v8846_v54  ;;  %8529 = vmatprep.subr.bf16.mxu0 %v8528_v62  ;;  %v4206_v54 = vld [vmem:[%s11031_s13 + $0x1e10] sm:$0xff]  ;;  %v8868_v62 = vpack.c.bf16 %v4215_v52, %v4207_v51  ;;  %v8550_v3 = vpack.c.bf16 %v4212_v55, %v4204_v61  ;;  %v8568_v52 = vpack.c.bf16 %v4293_v45, %v4285_v44  ;;  %v4335_v24 = vld [vmem:[%s11031_s13 + $0x2218] sm:$0xff] }
 0x43b   : > { %8849 = vmatprep.subr.bf16.mxu1 %v8848_v32  ;;  %v4223_v32 = vld [vmem:[%s11031_s13 + $0x1e98] sm:$0xff]  ;;  %v8870_v58 = vpack.c.bf16 %v4214_v63, %v4206_v54  ;;  %v4294_v55 = vld [vmem:[%s11031_s13 + $0x20d0] sm:$0xff]  ;;  %v4301_v54 = vld [vmem:[%s11031_s13 + $0x2108] sm:$0xff] }
 0x43c   : > { %v4303_v63 = vld [vmem:[%s11031_s13 + $0x2118] sm:$0xff] }
 0x43d   : > { %8531 = vmatpush1.bf16.msra.mxu0 %v8530_v9  ;;  %v4228_v9 = vld [vmem:[%s11031_s13 + $0x1ec0] sm:$0xff]  ;;  %v4343_v4 = vld [vmem:[%s11031_s13 + $0x2258] sm:$0xff] }
 0x43e   : > { %8851 = vmatpush1.bf16.msra.mxu1 %v8850_v10  ;;  %8533 = vmatprep.subr.bf16.mxu0 %v8532_v20  ;;  %v4222_v10 = vld [vmem:[%s11031_s13 + $0x1e90] sm:$0xff]  ;;  %v8872_v20 = vpack.c.bf16 %v4231_v0, %v4223_v32  ;;  %v8554_v18 = vpack.c.bf16 %v4228_v9, %v4220_v6  ;;  %v8892_v9 = vpack.c.bf16 %v4311_v1, %v4303_v63  ;;  %v4351_v33 = vld [vmem:[%s11031_s13 + $0x2298] sm:$0xff] }
 0x43f   : > { %8853 = vmatprep.subr.bf16.mxu1 %v8852_v15  ;;  %v4239_v15 = vld [vmem:[%s11031_s13 + $0x1f18] sm:$0xff]  ;;  %v8874_v30 = vpack.c.bf16 %v4230_v11, %v4222_v10  ;;  %v4302_v6 = vld [vmem:[%s11031_s13 + $0x2110] sm:$0xff]  ;;  %v4325_v11 = vld [vmem:[%s11031_s13 + $0x21c8] sm:$0xff] }
 0x440   : > { %v4310_v10 = vld [vmem:[%s11031_s13 + $0x2150] sm:$0xff]  ;;  %v4359_v34 = vld [vmem:[%s11031_s13 + $0x22d8] sm:$0xff] }
 0x441   : > { %8535 = vmatpush1.bf16.msra.mxu0 %v8534_v21  ;;  %v4244_v21 = vld [vmem:[%s11031_s13 + $0x1f40] sm:$0xff]  ;;  %v4367_v44 = vld [vmem:[%s11031_s13 + $0x2318] sm:$0xff] }
 0x442   : > { %8855 = vmatpush1.bf16.msra.mxu1 %v8854_v22  ;;  %8537 = vmatprep.subr.bf16.mxu0 %v8536_v14  ;;  %v4238_v22 = vld [vmem:[%s11031_s13 + $0x1f10] sm:$0xff]  ;;  %v8876_v14 = vpack.c.bf16 %v4247_v16, %v4239_v15  ;;  %v8558_v27 = vpack.c.bf16 %v4244_v21, %v4236_v38  ;;  %v8894_v16 = vpack.c.bf16 %v4310_v10, %v4302_v6  ;;  %v4375_v45 = vld [vmem:[%s11031_s13 + $0x2358] sm:$0xff]  ;;  %v4405_v6 = vld [vmem:[%s11031_s13 + $0x2448] sm:$0xff] }
 0x443   : > { %8857 = vmatprep.subr.bf16.mxu1 %v8856_v25  ;;  %v4255_v25 = vld [vmem:[%s11031_s13 + $0x1f98] sm:$0xff]  ;;  %v8878_v28 = vpack.c.bf16 %v4246_v23, %v4238_v22  ;;  %v4318_v38 = vld [vmem:[%s11031_s13 + $0x2190] sm:$0xff]  ;;  %v8896_v21 = vpack.c.bf16 %v4327_v13, %v4319_v12  ;;  %v4341_v23 = vld [vmem:[%s11031_s13 + $0x2248] sm:$0xff] }
 0x444   : > { %v4326_v22 = vld [vmem:[%s11031_s13 + $0x21d0] sm:$0xff]  ;;  %v4407_v10 = vld [vmem:[%s11031_s13 + $0x2458] sm:$0xff]  ;;  %v4396_v13 = vld [vmem:[%s11031_s13 + $0x2400] sm:$0xff] }
 0x445   : > { %8539 = vmatpush1.bf16.msra.mxu0 %v8538_v8  ;;  %v4260_v8 = vld [vmem:[%s11031_s13 + $0x1fc0] sm:$0xff] }
 0x446   : > { %8859 = vmatpush1.bf16.msra.mxu1 %v8858_v17  ;;  %8541 = vmatprep.subr.bf16.mxu0 %v8540_v29  ;;  %v4254_v17 = vld [vmem:[%s11031_s13 + $0x1f90] sm:$0xff]  ;;  %v8880_v29 = vpack.c.bf16 %v4263_v26, %v4255_v25  ;;  %v8562_v37 = vpack.c.bf16 %v4260_v8, %v4252_v56  ;;  %v8898_v26 = vpack.c.bf16 %v4326_v22, %v4318_v38  ;;  %v4421_v38 = vld [vmem:[%s11031_s13 + $0x24c8] sm:$0xff]  ;;  %v4423_v22 = vld [vmem:[%s11031_s13 + $0x24d8] sm:$0xff] }
 0x447   : > { %8861 = vmatprep.subr.bf16.mxu1 %v8860_v35  ;;  %v4271_v35 = vld [vmem:[%s11031_s13 + $0x2018] sm:$0xff]  ;;  %v8882_v46 = vpack.c.bf16 %v4262_v31, %v4254_v17  ;;  %v4334_v56 = vld [vmem:[%s11031_s13 + $0x2210] sm:$0xff]  ;;  %v8900_v8 = vpack.c.bf16 %v4343_v4, %v4335_v24  ;;  %v4357_v31 = vld [vmem:[%s11031_s13 + $0x22c8] sm:$0xff] }
 0x448   : > { %v4342_v17 = vld [vmem:[%s11031_s13 + $0x2250] sm:$0xff]  ;;  %v4412_v4 = vld [vmem:[%s11031_s13 + $0x2480] sm:$0xff] }
 0x449   : > { %8543 = vmatpush1.bf16.msra.mxu0 %v8542_v40  ;;  %v4276_v40 = vld [vmem:[%s11031_s13 + $0x2040] sm:$0xff] }
 0x44a   : > { %8863 = vmatpush1.bf16.msra.mxu1 %v8862_v41  ;;  %8545 = vmatprep.subr.bf16.mxu0 %v8544_v42  ;;  %v4270_v41 = vld [vmem:[%s11031_s13 + $0x2010] sm:$0xff]  ;;  %v8884_v42 = vpack.c.bf16 %v4279_v36, %v4271_v35  ;;  %v8566_v50 = vpack.c.bf16 %v4276_v40, %v4268_v39  ;;  %v8902_v36 = vpack.c.bf16 %v4342_v17, %v4334_v56  ;;  %v4437_v56 = vld [vmem:[%s11031_s13 + $0x2548] sm:$0xff]  ;;  %v4439_v17 = vld [vmem:[%s11031_s13 + $0x2558] sm:$0xff] }
 0x44b   : > { %8865 = vmatprep.subr.bf16.mxu1 %v8864_v47  ;;  %v4287_v47 = vld [vmem:[%s11031_s13 + $0x2098] sm:$0xff]  ;;  %v8886_v51 = vpack.c.bf16 %v4278_v43, %v4270_v41  ;;  %v4350_v39 = vld [vmem:[%s11031_s13 + $0x2290] sm:$0xff]  ;;  %v8904_v40 = vpack.c.bf16 %v4359_v34, %v4351_v33  ;;  %v4373_v43 = vld [vmem:[%s11031_s13 + $0x2348] sm:$0xff] }
 0x44c   : > { %v8888_v61 = vpack.c.bf16 %v4295_v48, %v4287_v47  ;;  %v4358_v41 = vld [vmem:[%s11031_s13 + $0x22d0] sm:$0xff]  ;;  %v4428_v34 = vld [vmem:[%s11031_s13 + $0x2500] sm:$0xff] }
 0x44d   : > { %8547 = vmatpush1.bf16.msra.mxu0 %v8546_v57  ;;  %v4284_v57 = vld [vmem:[%s11031_s13 + $0x2080] sm:$0xff]  ;;  %v8906_v48 = vpack.c.bf16 %v4358_v41, %v4350_v39  ;;  %v4453_v39 = vld [vmem:[%s11031_s13 + $0x25c8] sm:$0xff]  ;;  %v4455_v41 = vld [vmem:[%s11031_s13 + $0x25d8] sm:$0xff] }
 0x44e   : > { %8867 = vmatpush1.bf16.msra.mxu1 %v8866_v59  ;;  %8549 = vmatprep.subr.bf16.mxu0 %v8548_v60  ;;  %v4292_v59 = vld [vmem:[%s11031_s13 + $0x20c0] sm:$0xff]  ;;  %v4286_v60 = vld [vmem:[%s11031_s13 + $0x2090] sm:$0xff] }
 0x44f   : > { %8869 = vmatprep.subr.bf16.mxu1 %v8868_v62  ;;  %v4309_v62 = vld [vmem:[%s11031_s13 + $0x2148] sm:$0xff]  ;;  %v8570_v32 = vpack.c.bf16 %v4292_v59, %v4284_v57  ;;  %v8890_v0 = vpack.c.bf16 %v4294_v55, %v4286_v60  ;;  %v8908_v57 = vpack.c.bf16 %v4375_v45, %v4367_v44  ;;  %v4374_v59 = vld [vmem:[%s11031_s13 + $0x2350] sm:$0xff]  ;;  %v4383_v55 = vld [vmem:[%s11031_s13 + $0x2398] sm:$0xff] }
 0x450   : > { %v4381_v60 = vld [vmem:[%s11031_s13 + $0x2388] sm:$0xff]  ;;  %v4444_v45 = vld [vmem:[%s11031_s13 + $0x2580] sm:$0xff] }
 0x451   : > { %8551 = vmatpush1.bf16.msra.mxu0 %v8550_v3  ;;  %v8572_v3 = vpack.c.bf16 %v4309_v62, %v4301_v54  ;;  %v4391_v54 = vld [vmem:[%s11031_s13 + $0x23d8] sm:$0xff] }
 0x452   : > { %8871 = vmatpush1.bf16.msra.mxu1 %v8870_v58  ;;  %8553 = vmatprep.subr.bf16.mxu0 %v8552_v5  ;;  %v4300_v58 = vld [vmem:[%s11031_s13 + $0x2100] sm:$0xff] }
 0x453   : > { %8873 = vmatprep.subr.bf16.mxu1 %v8872_v20  ;;  %v4308_v5 = vld [vmem:[%s11031_s13 + $0x2140] sm:$0xff]  ;;  %v4317_v20 = vld [vmem:[%s11031_s13 + $0x2188] sm:$0xff] }
 0x454   : > { %v8574_v15 = vpack.c.bf16 %v4308_v5, %v4300_v58  ;;  %v4390_v58 = vld [vmem:[%s11031_s13 + $0x23d0] sm:$0xff]  ;;  %v4397_v5 = vld [vmem:[%s11031_s13 + $0x2408] sm:$0xff] }
 0x455   : > { %8555 = vmatpush1.bf16.msra.mxu0 %v8554_v18  ;;  %v8576_v18 = vpack.c.bf16 %v4325_v11, %v4317_v20  ;;  %v8596_v12 = vpack.c.bf16 %v4405_v6, %v4397_v5 }
 0x456   : > { %8875 = vmatpush1.bf16.msra.mxu1 %v8874_v30  ;;  %8557 = vmatprep.subr.bf16.mxu0 %v8556_v19  ;;  %v4316_v30 = vld [vmem:[%s11031_s13 + $0x2180] sm:$0xff] }
 0x457   : > { %8877 = vmatprep.subr.bf16.mxu1 %v8876_v14  ;;  %v4324_v19 = vld [vmem:[%s11031_s13 + $0x21c0] sm:$0xff]  ;;  %v4333_v14 = vld [vmem:[%s11031_s13 + $0x2208] sm:$0xff] }
 0x458   : > { %v8578_v25 = vpack.c.bf16 %v4324_v19, %v4316_v30  ;;  %v4406_v30 = vld [vmem:[%s11031_s13 + $0x2450] sm:$0xff]  ;;  %v4413_v19 = vld [vmem:[%s11031_s13 + $0x2488] sm:$0xff] }
 0x459   : > { %8559 = vmatpush1.bf16.msra.mxu0 %v8558_v27  ;;  %v8580_v27 = vpack.c.bf16 %v4341_v23, %v4333_v14  ;;  %v8600_v24 = vpack.c.bf16 %v4421_v38, %v4413_v19 }
 0x45a   : > { %8879 = vmatpush1.bf16.msra.mxu1 %v8878_v28  ;;  %8561 = vmatprep.subr.bf16.mxu0 %v8560_v49  ;;  %v4332_v28 = vld [vmem:[%s11031_s13 + $0x2200] sm:$0xff] }
 0x45b   : > { %8881 = vmatprep.subr.bf16.mxu1 %v8880_v29  ;;  %v4340_v49 = vld [vmem:[%s11031_s13 + $0x2240] sm:$0xff]  ;;  %v4349_v29 = vld [vmem:[%s11031_s13 + $0x2288] sm:$0xff] }
 0x45c   : > { %v8582_v35 = vpack.c.bf16 %v4340_v49, %v4332_v28  ;;  %v4422_v28 = vld [vmem:[%s11031_s13 + $0x24d0] sm:$0xff]  ;;  %v4429_v49 = vld [vmem:[%s11031_s13 + $0x2508] sm:$0xff] }
 0x45d   : > { %8563 = vmatpush1.bf16.msra.mxu0 %v8562_v37  ;;  %v8584_v37 = vpack.c.bf16 %v4357_v31, %v4349_v29  ;;  %v8604_v33 = vpack.c.bf16 %v4437_v56, %v4429_v49 }
 0x45e   : > { %8883 = vmatpush1.bf16.msra.mxu1 %v8882_v46  ;;  %8565 = vmatprep.subr.bf16.mxu0 %v8564_v53  ;;  %v4348_v46 = vld [vmem:[%s11031_s13 + $0x2280] sm:$0xff] }
 0x45f   : > { %8885 = vmatprep.subr.bf16.mxu1 %v8884_v42  ;;  %v4356_v53 = vld [vmem:[%s11031_s13 + $0x22c0] sm:$0xff]  ;;  %v4365_v42 = vld [vmem:[%s11031_s13 + $0x2308] sm:$0xff] }
 0x460   : > { %4802 = vmatmul.mubr.f32.vlgmr.msra.gmra.mrb[0].mxu0 %v3240_v7  ;;  %v8586_v47 = vpack.c.bf16 %v4356_v53, %v4348_v46  ;;  %v4438_v46 = vld [vmem:[%s11031_s13 + $0x2550] sm:$0xff]  ;;  %v4445_v53 = vld [vmem:[%s11031_s13 + $0x2588] sm:$0xff] }
 0x461   : > { %8567 = vmatpush1.bf16.msra.mxu0 %v8566_v50  ;;  %5157 = vmatmul.mubr.f32.vlgmr.msra.gmra.mrb[0].mxu1 %v3240_v7  ;;  %v8588_v7 = vpack.c.bf16 %v4373_v43, %v4365_v42  ;;  %v4364_v50 = vld [vmem:[%s11031_s13 + $0x2300] sm:$0xff]  ;;  %v8608_v44 = vpack.c.bf16 %v4453_v39, %v4445_v53 }
 0x462   : > { %8887 = vmatpush1.bf16.msra.mxu1 %v8886_v51  ;;  %8569 = vmatprep.subr.bf16.mxu0 %v8568_v52  ;;  %v4372_v51 = vld [vmem:[%s11031_s13 + $0x2340] sm:$0xff]  ;;  %v4366_v52 = vld [vmem:[%s11031_s13 + $0x2310] sm:$0xff] }
 0x463   : > { %8889 = vmatprep.subr.bf16.mxu1 %v8888_v61  ;;  %4872 = vmatprep.mubr.f32.mxu0 %v3243_v2  ;;  %v4389_v61 = vld [vmem:[%s11031_s13 + $0x23c8] sm:$0xff]  ;;  %v8590_v62 = vpack.c.bf16 %v4372_v51, %v4364_v50  ;;  %v8910_v63 = vpack.c.bf16 %v4374_v59, %v4366_v52  ;;  %v4454_v50 = vld [vmem:[%s11031_s13 + $0x25d0] sm:$0xff]  ;;  %v4471_v59 = vld [vmem:[%s11031_s13 + $0x2658] sm:$0xff] }
 0x464   : > { %5227 = vmatprep.mubr.f32.mxu1 %v3243_v2  ;;  %v8592_v1 = vpack.c.bf16 %v4389_v61, %v4381_v60  ;;  %v4380_v2 = vld [vmem:[%s11031_s13 + $0x2380] sm:$0xff]  ;;  %v4461_v51 = vld [vmem:[%s11031_s13 + $0x2608] sm:$0xff] }
 0x465   : > { %8571 = vmatpush1.bf16.msra.mxu0 %v8570_v32  ;;  %v4388_v32 = vld [vmem:[%s11031_s13 + $0x23c0] sm:$0xff]  ;;  %v4469_v52 = vld [vmem:[%s11031_s13 + $0x2648] sm:$0xff] }
 0x466   : > { %8891 = vmatpush1.bf16.msra.mxu1 %v8890_v0  ;;  %8573 = vmatprep.subr.bf16.mxu0 %v8572_v3  ;;  %v4382_v0 = vld [vmem:[%s11031_s13 + $0x2390] sm:$0xff]  ;;  %v8912_v3 = vpack.c.bf16 %v4391_v54, %v4383_v55  ;;  %v8594_v20 = vpack.c.bf16 %v4388_v32, %v4380_v2  ;;  %v8612_v55 = vpack.c.bf16 %v4469_v52, %v4461_v51  ;;  %v4460_v54 = vld [vmem:[%s11031_s13 + $0x2600] sm:$0xff]  ;;  %v4477_v32 = vld [vmem:[%s11031_s13 + $0x2688] sm:$0xff] }
 0x467   : > { %8893 = vmatprep.subr.bf16.mxu1 %v8892_v9  ;;  %v4399_v9 = vld [vmem:[%s11031_s13 + $0x2418] sm:$0xff]  ;;  %v8914_v11 = vpack.c.bf16 %v4390_v58, %v4382_v0  ;;  %v4470_v2 = vld [vmem:[%s11031_s13 + $0x2650] sm:$0xff]  ;;  %v4485_v0 = vld [vmem:[%s11031_s13 + $0x26c8] sm:$0xff] }
 0x468   : > { %v4487_v58 = vld [vmem:[%s11031_s13 + $0x26d8] sm:$0xff]  ;;  %v3242_v51 = vld [vmem:[%s11386_s20 + $0x40] sm:$0xff] }
 0x469   : > { %8575 = vmatpush1.bf16.msra.mxu0 %v8574_v15  ;;  %v4404_v15 = vld [vmem:[%s11031_s13 + $0x2440] sm:$0xff] }
 0x46a   : > { %8895 = vmatpush1.bf16.msra.mxu1 %v8894_v16  ;;  %8577 = vmatprep.subr.bf16.mxu0 %v8576_v18  ;;  %v4398_v16 = vld [vmem:[%s11031_s13 + $0x2410] sm:$0xff]  ;;  %v8916_v18 = vpack.c.bf16 %v4407_v10, %v4399_v9  ;;  %v8598_v14 = vpack.c.bf16 %v4404_v15, %v4396_v13  ;;  %v8616_v9 = vpack.c.bf16 %v4485_v0, %v4477_v32  ;;  %v4476_v10 = vld [vmem:[%s11031_s13 + $0x2680] sm:$0xff]  ;;  %v4493_v15 = vld [vmem:[%s11031_s13 + $0x2708] sm:$0xff] }
 0x46b   : > { %8897 = vmatprep.subr.bf16.mxu1 %v8896_v21  ;;  %v4415_v21 = vld [vmem:[%s11031_s13 + $0x2498] sm:$0xff]  ;;  %v8918_v23 = vpack.c.bf16 %v4406_v30, %v4398_v16  ;;  %v4486_v13 = vld [vmem:[%s11031_s13 + $0x26d0] sm:$0xff]  ;;  %v4501_v16 = vld [vmem:[%s11031_s13 + $0x2748] sm:$0xff] }
 0x46c   : > { %v4503_v30 = vld [vmem:[%s11031_s13 + $0x2758] sm:$0xff] }
 0x46d   : > { %8579 = vmatpush1.bf16.msra.mxu0 %v8578_v25  ;;  %v4420_v25 = vld [vmem:[%s11031_s13 + $0x24c0] sm:$0xff]  ;;  %v3291_v32 = vld [vmem:[%s11031_s13 + $0x178] sm:$0xff] }
 0x46e   : > { %8899 = vmatpush1.bf16.msra.mxu1 %v8898_v26  ;;  %8581 = vmatprep.subr.bf16.mxu0 %v8580_v27  ;;  %v4414_v26 = vld [vmem:[%s11031_s13 + $0x2490] sm:$0xff]  ;;  %v8920_v27 = vpack.c.bf16 %v4423_v22, %v4415_v21  ;;  %v8602_v29 = vpack.c.bf16 %v4420_v25, %v4412_v4  ;;  %v8620_v21 = vpack.c.bf16 %v4501_v16, %v4493_v15  ;;  %v4492_v22 = vld [vmem:[%s11031_s13 + $0x2700] sm:$0xff]  ;;  %v4509_v25 = vld [vmem:[%s11031_s13 + $0x2788] sm:$0xff] }
 0x46f   : > { %8901 = vmatprep.subr.bf16.mxu1 %v8900_v8  ;;  %v4431_v8 = vld [vmem:[%s11031_s13 + $0x2518] sm:$0xff]  ;;  %v8922_v31 = vpack.c.bf16 %v4422_v28, %v4414_v26  ;;  %v4502_v4 = vld [vmem:[%s11031_s13 + $0x2750] sm:$0xff]  ;;  %v4517_v26 = vld [vmem:[%s11031_s13 + $0x27c8] sm:$0xff] }
 0x470   : > { %v4519_v28 = vld [vmem:[%s11031_s13 + $0x27d8] sm:$0xff] }
 0x471   : > { %8583 = vmatpush1.bf16.msra.mxu0 %v8582_v35  ;;  %v4436_v35 = vld [vmem:[%s11031_s13 + $0x2540] sm:$0xff]  ;;  %v3299_v15 = vld [vmem:[%s11031_s13 + $0x1b8] sm:$0xff] }
 0x472   : > { %8903 = vmatpush1.bf16.msra.mxu1 %v8902_v36  ;;  %8585 = vmatprep.subr.bf16.mxu0 %v8584_v37  ;;  %v4430_v36 = vld [vmem:[%s11031_s13 + $0x2510] sm:$0xff]  ;;  %v8924_v37 = vpack.c.bf16 %v4439_v17, %v4431_v8  ;;  %v8606_v42 = vpack.c.bf16 %v4436_v35, %v4428_v34  ;;  %v8624_v8 = vpack.c.bf16 %v4517_v26, %v4509_v25  ;;  %v4508_v17 = vld [vmem:[%s11031_s13 + $0x2780] sm:$0xff]  ;;  %v3249_v35 = vld [vmem:[%s11031_s13 + $0x28] sm:$0xff] }
 0x473   : > { %8905 = vmatprep.subr.bf16.mxu1 %v8904_v40  ;;  %v4447_v40 = vld [vmem:[%s11031_s13 + $0x2598] sm:$0xff]  ;;  %v8926_v43 = vpack.c.bf16 %v4438_v46, %v4430_v36  ;;  %v4518_v34 = vld [vmem:[%s11031_s13 + $0x27d0] sm:$0xff]  ;;  %v3257_v36 = vld [vmem:[%s11031_s13 + $0x68] sm:$0xff] }
 0x474   : > { %v3259_v46 = vld [vmem:[%s11031_s13 + $0x78] sm:$0xff] }
 0x475   : > { %8587 = vmatpush1.bf16.msra.mxu0 %v8586_v47  ;;  %v4452_v47 = vld [vmem:[%s11031_s13 + $0x25c0] sm:$0xff]  ;;  %v3307_v16 = vld [vmem:[%s11031_s13 + $0x1f8] sm:$0xff] }
 0x476   : > { %8907 = vmatpush1.bf16.msra.mxu1 %v8906_v48  ;;  %8589 = vmatprep.subr.bf16.mxu0 %v8588_v7  ;;  %v4446_v48 = vld [vmem:[%s11031_s13 + $0x2590] sm:$0xff]  ;;  %v8928_v7 = vpack.c.bf16 %v4455_v41, %v4447_v40  ;;  %v8610_v60 = vpack.c.bf16 %v4452_v47, %v4444_v45  ;;  %v8948_v40 = vpack.c.bf16 %v3257_v36, %v3249_v35  ;;  %v3248_v41 = vld [vmem:[%s11031_s13 + $0x20] sm:$0xff]  ;;  %v3265_v47 = vld [vmem:[%s11031_s13 + $0xa8] sm:$0xff] }
 0x477   : > { %8909 = vmatprep.subr.bf16.mxu1 %v8908_v57  ;;  %v4463_v57 = vld [vmem:[%s11031_s13 + $0x2618] sm:$0xff]  ;;  %v8930_v61 = vpack.c.bf16 %v4454_v50, %v4446_v48  ;;  %v3258_v45 = vld [vmem:[%s11031_s13 + $0x70] sm:$0xff]  ;;  %v3273_v48 = vld [vmem:[%s11031_s13 + $0xe8] sm:$0xff] }
 0x478   : > { %v3275_v50 = vld [vmem:[%s11031_s13 + $0xf8] sm:$0xff] }
 0x479   : > { %8591 = vmatpush1.bf16.msra.mxu0 %v8590_v62  ;;  %v4468_v62 = vld [vmem:[%s11031_s13 + $0x2640] sm:$0xff]  ;;  %v3315_v25 = vld [vmem:[%s11031_s13 + $0x238] sm:$0xff] }
 0x47a   : > { %8911 = vmatpush1.bf16.msra.mxu1 %v8910_v63  ;;  %8593 = vmatprep.subr.bf16.mxu0 %v8592_v1  ;;  %v4462_v63 = vld [vmem:[%s11031_s13 + $0x2610] sm:$0xff]  ;;  %v8932_v1 = vpack.c.bf16 %v4471_v59, %v4463_v57  ;;  %v8614_v5 = vpack.c.bf16 %v4468_v62, %v4460_v54  ;;  %v8952_v59 = vpack.c.bf16 %v3273_v48, %v3265_v47  ;;  %v3323_v26 = vld [vmem:[%s11031_s13 + $0x278] sm:$0xff] }
 0x47b   : > { %8913 = vmatprep.subr.bf16.mxu1 %v8912_v3  ;;  %v4479_v3 = vld [vmem:[%s11031_s13 + $0x2698] sm:$0xff]  ;;  %v8934_v6 = vpack.c.bf16 %v4470_v2, %v4462_v63  ;;  %v3274_v62 = vld [vmem:[%s11031_s13 + $0xf0] sm:$0xff]  ;;  %v3281_v63 = vld [vmem:[%s11031_s13 + $0x128] sm:$0xff] }
 0x47c   : > { %v3283_v2 = vld [vmem:[%s11031_s13 + $0x138] sm:$0xff] }
 0x47d   : > { %8595 = vmatpush1.bf16.msra.mxu0 %v8594_v20  ;;  %v4484_v20 = vld [vmem:[%s11031_s13 + $0x26c0] sm:$0xff]  ;;  %v3331_v35 = vld [vmem:[%s11031_s13 + $0x2b8] sm:$0xff] }
 0x47e   : > { %8915 = vmatpush1.bf16.msra.mxu1 %v8914_v11  ;;  %8597 = vmatprep.subr.bf16.mxu0 %v8596_v12  ;;  %v4478_v11 = vld [vmem:[%s11031_s13 + $0x2690] sm:$0xff]  ;;  %v8936_v12 = vpack.c.bf16 %v4487_v58, %v4479_v3  ;;  %v8618_v19 = vpack.c.bf16 %v4484_v20, %v4476_v10  ;;  %v9276_v10 = vpack.c.bf16 %v3291_v32, %v3283_v2  ;;  %v3339_v36 = vld [vmem:[%s11031_s13 + $0x2f8] sm:$0xff] }
 0x47f   : > { %8917 = vmatprep.subr.bf16.mxu1 %v8916_v18  ;;  %v4495_v18 = vld [vmem:[%s11031_s13 + $0x2718] sm:$0xff]  ;;  %v8938_v38 = vpack.c.bf16 %v4486_v13, %v4478_v11  ;;  %v3290_v20 = vld [vmem:[%s11031_s13 + $0x170] sm:$0xff]  ;;  %v3297_v11 = vld [vmem:[%s11031_s13 + $0x1a8] sm:$0xff] }
 0x480   : > { %v10224_v13 = vld [vmem:[%s11386_s20 + $0x8] sm:$0xff] }
 0x481   : > { %8599 = vmatpush1.bf16.msra.mxu0 %v8598_v14  ;;  %v4500_v14 = vld [vmem:[%s11031_s13 + $0x2740] sm:$0xff]  ;;  %v3347_v47 = vld [vmem:[%s11031_s13 + $0x338] sm:$0xff] }
 0x482   : > { %8919 = vmatpush1.bf16.msra.mxu1 %v8918_v23  ;;  %8601 = vmatprep.subr.bf16.mxu0 %v8600_v24  ;;  %v4494_v23 = vld [vmem:[%s11031_s13 + $0x2710] sm:$0xff]  ;;  %v8940_v24 = vpack.c.bf16 %v4503_v30, %v4495_v18  ;;  %v8622_v49 = vpack.c.bf16 %v4500_v14, %v4492_v22  ;;  %v9280_v14 = vpack.c.bf16 %v3307_v16, %v3299_v15  ;;  %v3355_v48 = vld [vmem:[%s11031_s13 + $0x378] sm:$0xff]  ;;  %v3376_v16 = vld [vmem:[%s11031_s13 + $0x420] sm:$0xff] }
 0x483   : > { %8921 = vmatprep.subr.bf16.mxu1 %v8920_v27  ;;  %v4511_v27 = vld [vmem:[%s11031_s13 + $0x2798] sm:$0xff]  ;;  %v8942_v56 = vpack.c.bf16 %v4502_v4, %v4494_v23  ;;  %v3298_v22 = vld [vmem:[%s11031_s13 + $0x1b0] sm:$0xff]  ;;  %v3321_v4 = vld [vmem:[%s11031_s13 + $0x268] sm:$0xff] }
 0x484   : > { %v3306_v23 = vld [vmem:[%s11031_s13 + $0x1f0] sm:$0xff] }
 0x485   : > { %8603 = vmatpush1.bf16.msra.mxu0 %v8602_v29  ;;  %v4516_v29 = vld [vmem:[%s11031_s13 + $0x27c0] sm:$0xff] }
 0x486   : > { %8923 = vmatpush1.bf16.msra.mxu1 %v8922_v31  ;;  %8605 = vmatprep.subr.bf16.mxu0 %v8604_v33  ;;  %v4510_v31 = vld [vmem:[%s11031_s13 + $0x2790] sm:$0xff]  ;;  %v8944_v33 = vpack.c.bf16 %v4519_v28, %v4511_v27  ;;  %v8626_v53 = vpack.c.bf16 %v4516_v29, %v4508_v17  ;;  %v9282_v28 = vpack.c.bf16 %v3306_v23, %v3298_v22  ;;  %v3401_v22 = vld [vmem:[%s11031_s13 + $0x4e8] sm:$0xff]  ;;  %v3403_v23 = vld [vmem:[%s11031_s13 + $0x4f8] sm:$0xff] }
 0x487   : > { %8925 = vmatprep.subr.bf16.mxu1 %v8924_v37  ;;  %v3251_v37 = vld [vmem:[%s11031_s13 + $0x38] sm:$0xff]  ;;  %v8946_v39 = vpack.c.bf16 %v4518_v34, %v4510_v31  ;;  %v3314_v17 = vld [vmem:[%s11031_s13 + $0x230] sm:$0xff]  ;;  %v9284_v29 = vpack.c.bf16 %v3323_v26, %v3315_v25  ;;  %v3337_v34 = vld [vmem:[%s11031_s13 + $0x2e8] sm:$0xff] }
 0x488   : > { %v3322_v31 = vld [vmem:[%s11031_s13 + $0x270] sm:$0xff]  ;;  %v3392_v26 = vld [vmem:[%s11031_s13 + $0x4a0] sm:$0xff] }
 0x489   : > { %8607 = vmatpush1.bf16.msra.mxu0 %v8606_v42  ;;  %v3256_v42 = vld [vmem:[%s11031_s13 + $0x60] sm:$0xff] }
 0x48a   : > { %8927 = vmatpush1.bf16.msra.mxu1 %v8926_v43  ;;  %8609 = vmatprep.subr.bf16.mxu0 %v8608_v44  ;;  %v3250_v43 = vld [vmem:[%s11031_s13 + $0x30] sm:$0xff]  ;;  %v9268_v44 = vpack.c.bf16 %v3259_v46, %v3251_v37  ;;  %v8950_v52 = vpack.c.bf16 %v3256_v42, %v3248_v41  ;;  %v9286_v46 = vpack.c.bf16 %v3322_v31, %v3314_v17  ;;  %v3417_v17 = vld [vmem:[%s11031_s13 + $0x568] sm:$0xff]  ;;  %v3419_v31 = vld [vmem:[%s11031_s13 + $0x578] sm:$0xff] }
 0x48b   : > { %8929 = vmatprep.subr.bf16.mxu1 %v8928_v7  ;;  %v3267_v7 = vld [vmem:[%s11031_s13 + $0xb8] sm:$0xff]  ;;  %v9270_v57 = vpack.c.bf16 %v3258_v45, %v3250_v43  ;;  %v3330_v41 = vld [vmem:[%s11031_s13 + $0x2b0] sm:$0xff]  ;;  %v9288_v42 = vpack.c.bf16 %v3339_v36, %v3331_v35  ;;  %v3353_v45 = vld [vmem:[%s11031_s13 + $0x368] sm:$0xff] }
 0x48c   : > { %v9272_v54 = vpack.c.bf16 %v3275_v50, %v3267_v7  ;;  %v3338_v43 = vld [vmem:[%s11031_s13 + $0x2f0] sm:$0xff]  ;;  %v3408_v36 = vld [vmem:[%s11031_s13 + $0x520] sm:$0xff] }
 0x48d   : > { %8611 = vmatpush1.bf16.msra.mxu0 %v8610_v60  ;;  %v3264_v60 = vld [vmem:[%s11031_s13 + $0xa0] sm:$0xff]  ;;  %v9290_v50 = vpack.c.bf16 %v3338_v43, %v3330_v41  ;;  %v3433_v41 = vld [vmem:[%s11031_s13 + $0x5e8] sm:$0xff]  ;;  %v3435_v43 = vld [vmem:[%s11031_s13 + $0x5f8] sm:$0xff] }
 0x48e   : > { %8931 = vmatpush1.bf16.msra.mxu1 %v8930_v61  ;;  %8613 = vmatprep.subr.bf16.mxu0 %v8612_v55  ;;  %v3272_v61 = vld [vmem:[%s11031_s13 + $0xe0] sm:$0xff]  ;;  %v3266_v55 = vld [vmem:[%s11031_s13 + $0xb0] sm:$0xff] }
 0x48f   : > { %8933 = vmatprep.subr.bf16.mxu1 %v8932_v1  ;;  %v3289_v1 = vld [vmem:[%s11031_s13 + $0x168] sm:$0xff]  ;;  %v8954_v0 = vpack.c.bf16 %v3272_v61, %v3264_v60  ;;  %v9274_v3 = vpack.c.bf16 %v3274_v62, %v3266_v55  ;;  %v9292_v60 = vpack.c.bf16 %v3355_v48, %v3347_v47  ;;  %v3354_v61 = vld [vmem:[%s11031_s13 + $0x370] sm:$0xff]  ;;  %v3363_v62 = vld [vmem:[%s11031_s13 + $0x3b8] sm:$0xff] }
 0x490   : > { %v8956_v58 = vpack.c.bf16 %v3289_v1, %v3281_v63  ;;  %v3361_v55 = vld [vmem:[%s11031_s13 + $0x3a8] sm:$0xff]  ;;  %v3371_v63 = vld [vmem:[%s11031_s13 + $0x3f8] sm:$0xff]  ;;  %v3424_v48 = vld [vmem:[%s11031_s13 + $0x5a0] sm:$0xff] }
 0x491   : > { %8615 = vmatpush1.bf16.msra.mxu0 %v8614_v5  ;;  %v3280_v5 = vld [vmem:[%s11031_s13 + $0x120] sm:$0xff] }
 0x492   : > { %8935 = vmatpush1.bf16.msra.mxu1 %v8934_v6  ;;  %8617 = vmatprep.subr.bf16.mxu0 %v8616_v9  ;;  %v3288_v6 = vld [vmem:[%s11031_s13 + $0x160] sm:$0xff]  ;;  %v3282_v9 = vld [vmem:[%s11031_s13 + $0x130] sm:$0xff] }
 0x493   : > { %8937 = vmatprep.subr.bf16.mxu1 %v8936_v12  ;;  %v3305_v12 = vld [vmem:[%s11031_s13 + $0x1e8] sm:$0xff]  ;;  %v8958_v18 = vpack.c.bf16 %v3288_v6, %v3280_v5  ;;  %v9278_v30 = vpack.c.bf16 %v3290_v20, %v3282_v9  ;;  %v9296_v5 = vpack.c.bf16 %v3371_v63, %v3363_v62  ;;  %v3370_v6 = vld [vmem:[%s11031_s13 + $0x3f0] sm:$0xff]  ;;  %v3379_v20 = vld [vmem:[%s11031_s13 + $0x438] sm:$0xff] }
 0x494   : > { %v3377_v9 = vld [vmem:[%s11031_s13 + $0x428] sm:$0xff]  ;;  %v3440_v63 = vld [vmem:[%s11031_s13 + $0x620] sm:$0xff] }
 0x495   : > { %8619 = vmatpush1.bf16.msra.mxu0 %v8618_v19  ;;  %v8960_v19 = vpack.c.bf16 %v3305_v12, %v3297_v11  ;;  %v3387_v11 = vld [vmem:[%s11031_s13 + $0x478] sm:$0xff] }
 0x496   : > { %8939 = vmatpush1.bf16.msra.mxu1 %v8938_v38  ;;  %8621 = vmatprep.subr.bf16.mxu0 %v8620_v21  ;;  %v3296_v38 = vld [vmem:[%s11031_s13 + $0x1a0] sm:$0xff] }
 0x497   : > { %8941 = vmatprep.subr.bf16.mxu1 %v8940_v24  ;;  %v3304_v21 = vld [vmem:[%s11031_s13 + $0x1e0] sm:$0xff]  ;;  %v3313_v24 = vld [vmem:[%s11031_s13 + $0x228] sm:$0xff] }
 0x498   : > { %v8962_v27 = vpack.c.bf16 %v3304_v21, %v3296_v38  ;;  %v3386_v38 = vld [vmem:[%s11031_s13 + $0x470] sm:$0xff]  ;;  %v3393_v21 = vld [vmem:[%s11031_s13 + $0x4a8] sm:$0xff] }
 0x499   : > { %8623 = vmatpush1.bf16.msra.mxu0 %v8622_v49  ;;  %v8964_v49 = vpack.c.bf16 %v3321_v4, %v3313_v24  ;;  %v8984_v25 = vpack.c.bf16 %v3401_v22, %v3393_v21 }
 0x49a   : > { %8943 = vmatpush1.bf16.msra.mxu1 %v8942_v56  ;;  %8625 = vmatprep.subr.bf16.mxu0 %v8624_v8  ;;  %v3312_v56 = vld [vmem:[%s11031_s13 + $0x220] sm:$0xff] }
 0x49b   : > { %8945 = vmatprep.subr.bf16.mxu1 %v8944_v33  ;;  %v3320_v8 = vld [vmem:[%s11031_s13 + $0x260] sm:$0xff]  ;;  %v3329_v33 = vld [vmem:[%s11031_s13 + $0x2a8] sm:$0xff] }
 0x49c   : > { %v8966_v37 = vpack.c.bf16 %v3320_v8, %v3312_v56  ;;  %v3402_v56 = vld [vmem:[%s11031_s13 + $0x4f0] sm:$0xff]  ;;  %v3409_v8 = vld [vmem:[%s11031_s13 + $0x528] sm:$0xff] }
 0x49d   : > { %8627 = vmatpush1.bf16.msra.mxu0 %v8626_v53  ;;  %v8968_v53 = vpack.c.bf16 %v3337_v34, %v3329_v33  ;;  %v8988_v35 = vpack.c.bf16 %v3417_v17, %v3409_v8 }
 0x49e   : > { %8947 = vmatpush1.bf16.msra.mxu1 %v8946_v39  ;;  %8949 = vmatprep.subr.bf16.mxu0 %v8948_v40  ;;  %v3328_v39 = vld [vmem:[%s11031_s13 + $0x2a0] sm:$0xff] }
 0x49f   : > { %9269 = vmatprep.subr.bf16.mxu1 %v9268_v44  ;;  %v3336_v40 = vld [vmem:[%s11031_s13 + $0x2e0] sm:$0xff]  ;;  %v3345_v44 = vld [vmem:[%s11031_s13 + $0x328] sm:$0xff] }
 0x4a0   : > { %4873 = vmatmul.mubr.f32.vlgmr.msra.gmra.mrb[0].mxu0 %v3242_v51  ;;  %v8970_v7 = vpack.c.bf16 %v3336_v40, %v3328_v39  ;;  %v3418_v39 = vld [vmem:[%s11031_s13 + $0x570] sm:$0xff]  ;;  %v3425_v40 = vld [vmem:[%s11031_s13 + $0x5a8] sm:$0xff] }
 0x4a1   : > { %5228 = vmatmul.mubr.f32.vlgmr.msra.gmra.mrb[0].mxu1 %v3242_v51  ;;  %8951 = vmatpush1.bf16.msra.mxu0 %v8950_v52  ;;  %v8972_v51 = vpack.c.bf16 %v3353_v45, %v3345_v44  ;;  %v3344_v52 = vld [vmem:[%s11031_s13 + $0x320] sm:$0xff]  ;;  %v8992_v47 = vpack.c.bf16 %v3433_v41, %v3425_v40 }
 0x4a2   : > { %9271 = vmatpush1.bf16.msra.mxu1 %v9270_v57  ;;  %8953 = vmatprep.subr.bf16.mxu0 %v8952_v59  ;;  %v3352_v57 = vld [vmem:[%s11031_s13 + $0x360] sm:$0xff]  ;;  %v3346_v59 = vld [vmem:[%s11031_s13 + $0x330] sm:$0xff] }
 0x4a3   : > { %9273 = vmatprep.subr.bf16.mxu1 %v9272_v54  ;;  %5298 = vmatprep.mubr.f32.mxu0 %v10224_v13  ;;  %v3369_v54 = vld [vmem:[%s11031_s13 + $0x3e8] sm:$0xff]  ;;  %v8974_v1 = vpack.c.bf16 %v3352_v57, %v3344_v52  ;;  %v9294_v2 = vpack.c.bf16 %v3354_v61, %v3346_v59  ;;  %v3434_v52 = vld [vmem:[%s11031_s13 + $0x5f0] sm:$0xff]  ;;  %v3451_v61 = vld [vmem:[%s11031_s13 + $0x678] sm:$0xff] }
 0x4a4   : > { %5653 = vmatprep.mubr.f32.mxu1 %v10224_v13  ;;  %v8976_v32 = vpack.c.bf16 %v3369_v54, %v3361_v55  ;;  %v3441_v57 = vld [vmem:[%s11031_s13 + $0x628] sm:$0xff] }
 0x4a5   : > { %8955 = vmatpush1.bf16.msra.mxu0 %v8954_v0  ;;  %v3360_v0 = vld [vmem:[%s11031_s13 + $0x3a0] sm:$0xff]  ;;  %v3449_v59 = vld [vmem:[%s11031_s13 + $0x668] sm:$0xff] }
 0x4a6   : > { %9275 = vmatpush1.bf16.msra.mxu1 %v9274_v3  ;;  %8957 = vmatprep.subr.bf16.mxu0 %v8956_v58  ;;  %v3368_v3 = vld [vmem:[%s11031_s13 + $0x3e0] sm:$0xff]  ;;  %v3362_v58 = vld [vmem:[%s11031_s13 + $0x3b0] sm:$0xff]  ;;  %v8996_v62 = vpack.c.bf16 %v3449_v59, %v3441_v57 }
 0x4a7   : > { %9277 = vmatprep.subr.bf16.mxu1 %v9276_v10  ;;  %v3385_v10 = vld [vmem:[%s11031_s13 + $0x468] sm:$0xff]  ;;  %v8978_v12 = vpack.c.bf16 %v3368_v3, %v3360_v0  ;;  %v9298_v13 = vpack.c.bf16 %v3370_v6, %v3362_v58  ;;  %v3450_v0 = vld [vmem:[%s11031_s13 + $0x670] sm:$0xff]  ;;  %v3467_v6 = vld [vmem:[%s11031_s13 + $0x6f8] sm:$0xff] }
 0x4a8   : > { %v8980_v15 = vpack.c.bf16 %v3385_v10, %v3377_v9  ;;  %v3457_v3 = vld [vmem:[%s11031_s13 + $0x6a8] sm:$0xff] }
 0x4a9   : > { %8959 = vmatpush1.bf16.msra.mxu0 %v8958_v18  ;;  %v3384_v18 = vld [vmem:[%s11031_s13 + $0x460] sm:$0xff]  ;;  %v3465_v58 = vld [vmem:[%s11031_s13 + $0x6e8] sm:$0xff] }
 0x4aa   : > { %9279 = vmatpush1.bf16.msra.mxu1 %v9278_v30  ;;  %8961 = vmatprep.subr.bf16.mxu0 %v8960_v19  ;;  %v3378_v30 = vld [vmem:[%s11031_s13 + $0x430] sm:$0xff]  ;;  %v9300_v19 = vpack.c.bf16 %v3387_v11, %v3379_v20  ;;  %v8982_v24 = vpack.c.bf16 %v3384_v18, %v3376_v16  ;;  %v9000_v20 = vpack.c.bf16 %v3465_v58, %v3457_v3  ;;  %v3456_v11 = vld [vmem:[%s11031_s13 + $0x6a0] sm:$0xff]  ;;  %v3473_v18 = vld [vmem:[%s11031_s13 + $0x728] sm:$0xff] }
 0x4ab   : > { %9281 = vmatprep.subr.bf16.mxu1 %v9280_v14  ;;  %v3395_v14 = vld [vmem:[%s11031_s13 + $0x4b8] sm:$0xff]  ;;  %v9302_v4 = vpack.c.bf16 %v3386_v38, %v3378_v30  ;;  %v3466_v16 = vld [vmem:[%s11031_s13 + $0x6f0] sm:$0xff]  ;;  %v3481_v30 = vld [vmem:[%s11031_s13 + $0x768] sm:$0xff] }
 0x4ac   : > { %v3483_v38 = vld [vmem:[%s11031_s13 + $0x778] sm:$0xff] }
 0x4ad   : > { %8963 = vmatpush1.bf16.msra.mxu0 %v8962_v27  ;;  %v3400_v27 = vld [vmem:[%s11031_s13 + $0x4e0] sm:$0xff]  ;;  %v3547_v3 = vld [vmem:[%s11031_s13 + $0x978] sm:$0xff] }
 0x4ae   : > { %9283 = vmatpush1.bf16.msra.mxu1 %v9282_v28  ;;  %8965 = vmatprep.subr.bf16.mxu0 %v8964_v49  ;;  %v3394_v28 = vld [vmem:[%s11031_s13 + $0x4b0] sm:$0xff]  ;;  %v9304_v49 = vpack.c.bf16 %v3403_v23, %v3395_v14  ;;  %v8986_v33 = vpack.c.bf16 %v3400_v27, %v3392_v26  ;;  %v9004_v14 = vpack.c.bf16 %v3481_v30, %v3473_v18  ;;  %v3472_v23 = vld [vmem:[%s11031_s13 + $0x720] sm:$0xff]  ;;  %v3489_v27 = vld [vmem:[%s11031_s13 + $0x7a8] sm:$0xff] }
 0x4af   : > { %9285 = vmatprep.subr.bf16.mxu1 %v9284_v29  ;;  %v3411_v29 = vld [vmem:[%s11031_s13 + $0x538] sm:$0xff]  ;;  %v9306_v34 = vpack.c.bf16 %v3402_v56, %v3394_v28  ;;  %v3482_v26 = vld [vmem:[%s11031_s13 + $0x770] sm:$0xff]  ;;  %v3497_v28 = vld [vmem:[%s11031_s13 + $0x7e8] sm:$0xff] }
 0x4b0   : > { %v3499_v56 = vld [vmem:[%s11031_s13 + $0x7f8] sm:$0xff] }
 0x4b1   : > { %8967 = vmatpush1.bf16.msra.mxu0 %v8966_v37  ;;  %v3416_v37 = vld [vmem:[%s11031_s13 + $0x560] sm:$0xff]  ;;  %v3555_v18 = vld [vmem:[%s11031_s13 + $0x9b8] sm:$0xff] }
 0x4b2   : > { %9287 = vmatpush1.bf16.msra.mxu1 %v9286_v46  ;;  %8969 = vmatprep.subr.bf16.mxu0 %v8968_v53  ;;  %v3410_v46 = vld [vmem:[%s11031_s13 + $0x530] sm:$0xff]  ;;  %v9308_v53 = vpack.c.bf16 %v3419_v31, %v3411_v29  ;;  %v8990_v44 = vpack.c.bf16 %v3416_v37, %v3408_v36  ;;  %v9008_v29 = vpack.c.bf16 %v3497_v28, %v3489_v27  ;;  %v3488_v31 = vld [vmem:[%s11031_s13 + $0x7a0] sm:$0xff]  ;;  %v3505_v37 = vld [vmem:[%s11031_s13 + $0x828] sm:$0xff] }
 0x4b3   : > { %9289 = vmatprep.subr.bf16.mxu1 %v9288_v42  ;;  %v3427_v42 = vld [vmem:[%s11031_s13 + $0x5b8] sm:$0xff]  ;;  %v9310_v45 = vpack.c.bf16 %v3418_v39, %v3410_v46  ;;  %v3498_v36 = vld [vmem:[%s11031_s13 + $0x7f0] sm:$0xff]  ;;  %v3513_v46 = vld [vmem:[%s11031_s13 + $0x868] sm:$0xff] }
 0x4b4   : > { %v3515_v39 = vld [vmem:[%s11031_s13 + $0x878] sm:$0xff] }
 0x4b5   : > { %8971 = vmatpush1.bf16.msra.mxu0 %v8970_v7  ;;  %v3432_v7 = vld [vmem:[%s11031_s13 + $0x5e0] sm:$0xff]  ;;  %v3563_v30 = vld [vmem:[%s11031_s13 + $0x9f8] sm:$0xff] }
 0x4b6   : > { %9291 = vmatpush1.bf16.msra.mxu1 %v9290_v50  ;;  %8973 = vmatprep.subr.bf16.mxu0 %v8972_v51  ;;  %v3426_v50 = vld [vmem:[%s11031_s13 + $0x5b0] sm:$0xff]  ;;  %v9312_v51 = vpack.c.bf16 %v3435_v43, %v3427_v42  ;;  %v8994_v55 = vpack.c.bf16 %v3432_v7, %v3424_v48  ;;  %v9012_v42 = vpack.c.bf16 %v3513_v46, %v3505_v37  ;;  %v3504_v43 = vld [vmem:[%s11031_s13 + $0x820] sm:$0xff]  ;;  %v3521_v7 = vld [vmem:[%s11031_s13 + $0x8a8] sm:$0xff] }
 0x4b7   : > { %9293 = vmatprep.subr.bf16.mxu1 %v9292_v60  ;;  %v3443_v60 = vld [vmem:[%s11031_s13 + $0x638] sm:$0xff]  ;;  %v9314_v54 = vpack.c.bf16 %v3434_v52, %v3426_v50  ;;  %v3514_v48 = vld [vmem:[%s11031_s13 + $0x870] sm:$0xff]  ;;  %v3529_v50 = vld [vmem:[%s11031_s13 + $0x8e8] sm:$0xff] }
 0x4b8   : > { %v3531_v52 = vld [vmem:[%s11031_s13 + $0x8f8] sm:$0xff] }
 0x4b9   : > { %8975 = vmatpush1.bf16.msra.mxu0 %v8974_v1  ;;  %v3448_v1 = vld [vmem:[%s11031_s13 + $0x660] sm:$0xff]  ;;  %v3571_v27 = vld [vmem:[%s11031_s13 + $0xa38] sm:$0xff] }
 0x4ba   : > { %9295 = vmatpush1.bf16.msra.mxu1 %v9294_v2  ;;  %8977 = vmatprep.subr.bf16.mxu0 %v8976_v32  ;;  %v3442_v2 = vld [vmem:[%s11031_s13 + $0x630] sm:$0xff]  ;;  %v9316_v32 = vpack.c.bf16 %v3451_v61, %v3443_v60  ;;  %v8998_v9 = vpack.c.bf16 %v3448_v1, %v3440_v63  ;;  %v9016_v60 = vpack.c.bf16 %v3529_v50, %v3521_v7  ;;  %v3520_v61 = vld [vmem:[%s11031_s13 + $0x8a0] sm:$0xff]  ;;  %v3537_v1 = vld [vmem:[%s11031_s13 + $0x928] sm:$0xff] }
 0x4bb   : > { %9297 = vmatprep.subr.bf16.mxu1 %v9296_v5  ;;  %v3459_v5 = vld [vmem:[%s11031_s13 + $0x6b8] sm:$0xff]  ;;  %v9318_v10 = vpack.c.bf16 %v3450_v0, %v3442_v2  ;;  %v3530_v63 = vld [vmem:[%s11031_s13 + $0x8f0] sm:$0xff]  ;;  %v3545_v2 = vld [vmem:[%s11031_s13 + $0x968] sm:$0xff] }
 0x4bc   : > { %v3539_v0 = vld [vmem:[%s11031_s13 + $0x938] sm:$0xff] }
 0x4bd   : > { %8979 = vmatpush1.bf16.msra.mxu0 %v8978_v12  ;;  %v3464_v12 = vld [vmem:[%s11031_s13 + $0x6e0] sm:$0xff]  ;;  %v3579_v28 = vld [vmem:[%s11031_s13 + $0xa78] sm:$0xff] }
 0x4be   : > { %9299 = vmatpush1.bf16.msra.mxu1 %v9298_v13  ;;  %8981 = vmatprep.subr.bf16.mxu0 %v8980_v15  ;;  %v3458_v13 = vld [vmem:[%s11031_s13 + $0x6b0] sm:$0xff]  ;;  %v9320_v15 = vpack.c.bf16 %v3467_v6, %v3459_v5  ;;  %v9002_v21 = vpack.c.bf16 %v3464_v12, %v3456_v11  ;;  %v9020_v6 = vpack.c.bf16 %v3545_v2, %v3537_v1  ;;  %v3587_v37 = vld [vmem:[%s11031_s13 + $0xab8] sm:$0xff] }
 0x4bf   : > { %9301 = vmatprep.subr.bf16.mxu1 %v9300_v19  ;;  %v3475_v19 = vld [vmem:[%s11031_s13 + $0x738] sm:$0xff]  ;;  %v9322_v22 = vpack.c.bf16 %v3466_v16, %v3458_v13  ;;  %v9340_v11 = vpack.c.bf16 %v3547_v3, %v3539_v0  ;;  %v3546_v12 = vld [vmem:[%s11031_s13 + $0x970] sm:$0xff]  ;;  %v3553_v13 = vld [vmem:[%s11031_s13 + $0x9a8] sm:$0xff] }
 0x4c0   : > { %v10226_v16 = vld [vmem:[%s11386_s20 + $0x18] sm:$0xff]  ;;  %v3595_v46 = vld [vmem:[%s11031_s13 + $0xaf8] sm:$0xff] }
 0x4c1   : > { %8983 = vmatpush1.bf16.msra.mxu0 %v8982_v24  ;;  %v3480_v24 = vld [vmem:[%s11031_s13 + $0x760] sm:$0xff]  ;;  %v3603_v7 = vld [vmem:[%s11031_s13 + $0xb38] sm:$0xff] }
 0x4c2   : > { %9303 = vmatpush1.bf16.msra.mxu1 %v9302_v4  ;;  %8985 = vmatprep.subr.bf16.mxu0 %v8984_v25  ;;  %v3474_v4 = vld [vmem:[%s11031_s13 + $0x730] sm:$0xff]  ;;  %v9324_v25 = vpack.c.bf16 %v3483_v38, %v3475_v19  ;;  %v9006_v8 = vpack.c.bf16 %v3480_v24, %v3472_v23  ;;  %v9344_v24 = vpack.c.bf16 %v3563_v30, %v3555_v18  ;;  %v3611_v50 = vld [vmem:[%s11031_s13 + $0xb78] sm:$0xff]  ;;  %v3632_v30 = vld [vmem:[%s11031_s13 + $0xc20] sm:$0xff] }
 0x4c3   : > { %9305 = vmatprep.subr.bf16.mxu1 %v9304_v49  ;;  %v3491_v49 = vld [vmem:[%s11031_s13 + $0x7b8] sm:$0xff]  ;;  %v9326_v17 = vpack.c.bf16 %v3482_v26, %v3474_v4  ;;  %v3554_v23 = vld [vmem:[%s11031_s13 + $0x9b0] sm:$0xff]  ;;  %v3577_v26 = vld [vmem:[%s11031_s13 + $0xa68] sm:$0xff] }
 0x4c4   : > { %v3562_v4 = vld [vmem:[%s11031_s13 + $0x9f0] sm:$0xff]  ;;  %v3619_v1 = vld [vmem:[%s11031_s13 + $0xbb8] sm:$0xff] }
 0x4c5   : > { %8987 = vmatpush1.bf16.msra.mxu0 %v8986_v33  ;;  %v3496_v33 = vld [vmem:[%s11031_s13 + $0x7e0] sm:$0xff]  ;;  %v3627_v2 = vld [vmem:[%s11031_s13 + $0xbf8] sm:$0xff] }
 0x4c6   : > { %9307 = vmatpush1.bf16.msra.mxu1 %v9306_v34  ;;  %8989 = vmatprep.subr.bf16.mxu0 %v8988_v35  ;;  %v3490_v34 = vld [vmem:[%s11031_s13 + $0x7b0] sm:$0xff]  ;;  %v9328_v35 = vpack.c.bf16 %v3499_v56, %v3491_v49  ;;  %v9010_v40 = vpack.c.bf16 %v3496_v33, %v3488_v31  ;;  %v9346_v56 = vpack.c.bf16 %v3562_v4, %v3554_v23  ;;  %v3657_v23 = vld [vmem:[%s11031_s13 + $0xce8] sm:$0xff]  ;;  %v3659_v4 = vld [vmem:[%s11031_s13 + $0xcf8] sm:$0xff] }
 0x4c7   : > { %9309 = vmatprep.subr.bf16.mxu1 %v9308_v53  ;;  %v3507_v53 = vld [vmem:[%s11031_s13 + $0x838] sm:$0xff]  ;;  %v9330_v41 = vpack.c.bf16 %v3498_v36, %v3490_v34  ;;  %v3570_v31 = vld [vmem:[%s11031_s13 + $0xa30] sm:$0xff]  ;;  %v9348_v33 = vpack.c.bf16 %v3579_v28, %v3571_v27  ;;  %v3593_v36 = vld [vmem:[%s11031_s13 + $0xae8] sm:$0xff] }
 0x4c8   : > { %v3578_v34 = vld [vmem:[%s11031_s13 + $0xa70] sm:$0xff]  ;;  %v3648_v28 = vld [vmem:[%s11031_s13 + $0xca0] sm:$0xff] }
 0x4c9   : > { %8991 = vmatpush1.bf16.msra.mxu0 %v8990_v44  ;;  %v3512_v44 = vld [vmem:[%s11031_s13 + $0x860] sm:$0xff] }
 0x4ca   : > { %9311 = vmatpush1.bf16.msra.mxu1 %v9310_v45  ;;  %8993 = vmatprep.subr.bf16.mxu0 %v8992_v47  ;;  %v3506_v45 = vld [vmem:[%s11031_s13 + $0x830] sm:$0xff]  ;;  %v9332_v47 = vpack.c.bf16 %v3515_v39, %v3507_v53  ;;  %v9014_v57 = vpack.c.bf16 %v3512_v44, %v3504_v43  ;;  %v9350_v39 = vpack.c.bf16 %v3578_v34, %v3570_v31  ;;  %v3673_v31 = vld [vmem:[%s11031_s13 + $0xd68] sm:$0xff]  ;;  %v3675_v34 = vld [vmem:[%s11031_s13 + $0xd78] sm:$0xff] }
 0x4cb   : > { %9313 = vmatprep.subr.bf16.mxu1 %v9312_v51  ;;  %v3523_v51 = vld [vmem:[%s11031_s13 + $0x8b8] sm:$0xff]  ;;  %v9334_v59 = vpack.c.bf16 %v3514_v48, %v3506_v45  ;;  %v3586_v43 = vld [vmem:[%s11031_s13 + $0xab0] sm:$0xff]  ;;  %v9352_v44 = vpack.c.bf16 %v3595_v46, %v3587_v37  ;;  %v3609_v48 = vld [vmem:[%s11031_s13 + $0xb68] sm:$0xff] }
 0x4cc   : > { %v3594_v45 = vld [vmem:[%s11031_s13 + $0xaf0] sm:$0xff]  ;;  %v3664_v46 = vld [vmem:[%s11031_s13 + $0xd20] sm:$0xff] }
 0x4cd   : > { %8995 = vmatpush1.bf16.msra.mxu0 %v8994_v55  ;;  %v3528_v55 = vld [vmem:[%s11031_s13 + $0x8e0] sm:$0xff] }
 0x4ce   : > { %9315 = vmatpush1.bf16.msra.mxu1 %v9314_v54  ;;  %8997 = vmatprep.subr.bf16.mxu0 %v8996_v62  ;;  %v3522_v54 = vld [vmem:[%s11031_s13 + $0x8b0] sm:$0xff]  ;;  %v9336_v62 = vpack.c.bf16 %v3531_v52, %v3523_v51  ;;  %v9018_v58 = vpack.c.bf16 %v3528_v55, %v3520_v61  ;;  %v9354_v52 = vpack.c.bf16 %v3594_v45, %v3586_v43  ;;  %v3689_v43 = vld [vmem:[%s11031_s13 + $0xde8] sm:$0xff]  ;;  %v3691_v45 = vld [vmem:[%s11031_s13 + $0xdf8] sm:$0xff] }
 0x4cf   : > { %9317 = vmatprep.subr.bf16.mxu1 %v9316_v32  ;;  %v10225_v32 = vld [vmem:[%s11386_s20] sm:$0xff]  ;;  %v9338_v5 = vpack.c.bf16 %v3530_v63, %v3522_v54  ;;  %v9356_v55 = vpack.c.bf16 %v3611_v50, %v3603_v7  ;;  %v3625_v63 = vld [vmem:[%s11031_s13 + $0xbe8] sm:$0xff]  ;;  %v3680_v50 = vld [vmem:[%s11031_s13 + $0xda0] sm:$0xff] }
 0x4d0   : > { %v3602_v61 = vld [vmem:[%s11031_s13 + $0xb30] sm:$0xff] }
 0x4d1   : > { %8999 = vmatpush1.bf16.msra.mxu0 %v8998_v9  ;;  %v3536_v9 = vld [vmem:[%s11031_s13 + $0x920] sm:$0xff]  ;;  %v3610_v54 = vld [vmem:[%s11031_s13 + $0xb70] sm:$0xff] }
 0x4d2   : > { %9319 = vmatpush1.bf16.msra.mxu1 %v9318_v10  ;;  %9001 = vmatprep.subr.bf16.mxu0 %v9000_v20  ;;  %v3544_v10 = vld [vmem:[%s11031_s13 + $0x960] sm:$0xff]  ;;  %v3538_v20 = vld [vmem:[%s11031_s13 + $0x930] sm:$0xff]  ;;  %v9358_v0 = vpack.c.bf16 %v3610_v54, %v3602_v61  ;;  %v3705_v61 = vld [vmem:[%s11031_s13 + $0xe68] sm:$0xff] }
 0x4d3   : > { %9321 = vmatprep.subr.bf16.mxu1 %v9320_v15  ;;  %v3561_v15 = vld [vmem:[%s11031_s13 + $0x9e8] sm:$0xff]  ;;  %v9022_v19 = vpack.c.bf16 %v3544_v10, %v3536_v9  ;;  %v9342_v38 = vpack.c.bf16 %v3546_v12, %v3538_v20  ;;  %v9360_v9 = vpack.c.bf16 %v3627_v2, %v3619_v1  ;;  %v3626_v10 = vld [vmem:[%s11031_s13 + $0xbf0] sm:$0xff]  ;;  %v3635_v12 = vld [vmem:[%s11031_s13 + $0xc38] sm:$0xff] }
 0x4d4   : > { %v3633_v20 = vld [vmem:[%s11031_s13 + $0xc28] sm:$0xff]  ;;  %v3707_v54 = vld [vmem:[%s11031_s13 + $0xe78] sm:$0xff]  ;;  %v3696_v2 = vld [vmem:[%s11031_s13 + $0xe20] sm:$0xff] }
 0x4d5   : > { %9003 = vmatpush1.bf16.msra.mxu0 %v9002_v21  ;;  %v9024_v21 = vpack.c.bf16 %v3561_v15, %v3553_v13  ;;  %v3643_v13 = vld [vmem:[%s11031_s13 + $0xc78] sm:$0xff] }
 0x4d6   : > { %9323 = vmatpush1.bf16.msra.mxu1 %v9322_v22  ;;  %9005 = vmatprep.subr.bf16.mxu0 %v9004_v14  ;;  %v3552_v22 = vld [vmem:[%s11031_s13 + $0x9a0] sm:$0xff] }
 0x4d7   : > { %9325 = vmatprep.subr.bf16.mxu1 %v9324_v25  ;;  %v3560_v14 = vld [vmem:[%s11031_s13 + $0x9e0] sm:$0xff]  ;;  %v3569_v25 = vld [vmem:[%s11031_s13 + $0xa28] sm:$0xff] }
 0x4d8   : > { %v9026_v49 = vpack.c.bf16 %v3560_v14, %v3552_v22  ;;  %v3642_v22 = vld [vmem:[%s11031_s13 + $0xc70] sm:$0xff]  ;;  %v3649_v14 = vld [vmem:[%s11031_s13 + $0xca8] sm:$0xff] }
 0x4d9   : > { %9007 = vmatpush1.bf16.msra.mxu0 %v9006_v8  ;;  %v9028_v8 = vpack.c.bf16 %v3577_v26, %v3569_v25  ;;  %v9048_v27 = vpack.c.bf16 %v3657_v23, %v3649_v14 }
 0x4da   : > { %9327 = vmatpush1.bf16.msra.mxu1 %v9326_v17  ;;  %9009 = vmatprep.subr.bf16.mxu0 %v9008_v29  ;;  %v3568_v17 = vld [vmem:[%s11031_s13 + $0xa20] sm:$0xff] }
 0x4db   : > { %9329 = vmatprep.subr.bf16.mxu1 %v9328_v35  ;;  %v3576_v29 = vld [vmem:[%s11031_s13 + $0xa60] sm:$0xff]  ;;  %v3585_v35 = vld [vmem:[%s11031_s13 + $0xaa8] sm:$0xff] }
 0x4dc   : > { %v9030_v53 = vpack.c.bf16 %v3576_v29, %v3568_v17  ;;  %v3658_v17 = vld [vmem:[%s11031_s13 + $0xcf0] sm:$0xff]  ;;  %v3665_v29 = vld [vmem:[%s11031_s13 + $0xd28] sm:$0xff] }
 0x4dd   : > { %9011 = vmatpush1.bf16.msra.mxu0 %v9010_v40  ;;  %v9032_v40 = vpack.c.bf16 %v3593_v36, %v3585_v35  ;;  %v9052_v37 = vpack.c.bf16 %v3673_v31, %v3665_v29 }
 0x4de   : > { %9331 = vmatpush1.bf16.msra.mxu1 %v9330_v41  ;;  %9013 = vmatprep.subr.bf16.mxu0 %v9012_v42  ;;  %v3584_v41 = vld [vmem:[%s11031_s13 + $0xaa0] sm:$0xff] }
 0x4df   : > { %9333 = vmatprep.subr.bf16.mxu1 %v9332_v47  ;;  %v3592_v42 = vld [vmem:[%s11031_s13 + $0xae0] sm:$0xff]  ;;  %v3601_v47 = vld [vmem:[%s11031_s13 + $0xb28] sm:$0xff] }
 0x4e0   : > { %5299 = vmatmul.mubr.f32.vlgmr.msra.gmra.mrb[2].mxu0 %v10225_v32  ;;  %v9034_v51 = vpack.c.bf16 %v3592_v42, %v3584_v41  ;;  %v3674_v41 = vld [vmem:[%s11031_s13 + $0xd70] sm:$0xff]  ;;  %v3681_v42 = vld [vmem:[%s11031_s13 + $0xda8] sm:$0xff] }
 0x4e1   : > { %9015 = vmatpush1.bf16.msra.mxu0 %v9014_v57  ;;  %5654 = vmatmul.mubr.f32.vlgmr.msra.gmra.mrb[2].mxu1 %v10225_v32  ;;  %v9036_v57 = vpack.c.bf16 %v3609_v48, %v3601_v47  ;;  %v9056_v7 = vpack.c.bf16 %v3689_v43, %v3681_v42 }
 0x4e2   : > { %9335 = vmatpush1.bf16.msra.mxu1 %v9334_v59  ;;  %9017 = vmatprep.subr.bf16.mxu0 %v9016_v60  ;;  %v3600_v59 = vld [vmem:[%s11031_s13 + $0xb20] sm:$0xff] }
 0x4e3   : > { %9337 = vmatprep.subr.bf16.mxu1 %v9336_v62  ;;  %5369 = vmatprep.mubr.f32.mxu0 %v10226_v16  ;;  %v3608_v60 = vld [vmem:[%s11031_s13 + $0xb60] sm:$0xff]  ;;  %v3617_v62 = vld [vmem:[%s11031_s13 + $0xba8] sm:$0xff] }
 0x4e4   : > { %5724 = vmatprep.mubr.f32.mxu1 %v10226_v16  ;;  %v9038_v32 = vpack.c.bf16 %v3608_v60, %v3600_v59  ;;  %v9040_v3 = vpack.c.bf16 %v3625_v63, %v3617_v62  ;;  %v3690_v59 = vld [vmem:[%s11031_s13 + $0xdf0] sm:$0xff]  ;;  %v3697_v60 = vld [vmem:[%s11031_s13 + $0xe28] sm:$0xff] }
 0x4e5   : > { %9019 = vmatpush1.bf16.msra.mxu0 %v9018_v58  ;;  %v3616_v58 = vld [vmem:[%s11031_s13 + $0xba0] sm:$0xff]  ;;  %v9060_v1 = vpack.c.bf16 %v3705_v61, %v3697_v60 }
 0x4e6   : > { %9339 = vmatpush1.bf16.msra.mxu1 %v9338_v5  ;;  %9021 = vmatprep.subr.bf16.mxu0 %v9020_v6  ;;  %v3624_v5 = vld [vmem:[%s11031_s13 + $0xbe0] sm:$0xff]  ;;  %v3618_v6 = vld [vmem:[%s11031_s13 + $0xbb0] sm:$0xff] }
 0x4e7   : > { %9341 = vmatprep.subr.bf16.mxu1 %v9340_v11  ;;  %v3641_v11 = vld [vmem:[%s11031_s13 + $0xc68] sm:$0xff]  ;;  %v9042_v15 = vpack.c.bf16 %v3624_v5, %v3616_v58  ;;  %v9362_v16 = vpack.c.bf16 %v3626_v10, %v3618_v6  ;;  %v3706_v58 = vld [vmem:[%s11031_s13 + $0xe70] sm:$0xff]  ;;  %v3723_v10 = vld [vmem:[%s11031_s13 + $0xef8] sm:$0xff] }
 0x4e8   : > { %v9044_v18 = vpack.c.bf16 %v3641_v11, %v3633_v20  ;;  %v3713_v5 = vld [vmem:[%s11031_s13 + $0xea8] sm:$0xff] }
 0x4e9   : > { %9023 = vmatpush1.bf16.msra.mxu0 %v9022_v19  ;;  %v3640_v19 = vld [vmem:[%s11031_s13 + $0xc60] sm:$0xff]  ;;  %v3721_v6 = vld [vmem:[%s11031_s13 + $0xee8] sm:$0xff] }
 0x4ea   : > { %9343 = vmatpush1.bf16.msra.mxu1 %v9342_v38  ;;  %9025 = vmatprep.subr.bf16.mxu0 %v9024_v21  ;;  %v3634_v38 = vld [vmem:[%s11031_s13 + $0xc30] sm:$0xff]  ;;  %v9364_v21 = vpack.c.bf16 %v3643_v13, %v3635_v12  ;;  %v9046_v25 = vpack.c.bf16 %v3640_v19, %v3632_v30  ;;  %v9064_v12 = vpack.c.bf16 %v3721_v6, %v3713_v5  ;;  %v3712_v13 = vld [vmem:[%s11031_s13 + $0xea0] sm:$0xff]  ;;  %v3729_v19 = vld [vmem:[%s11031_s13 + $0xf28] sm:$0xff] }
 0x4eb   : > { %9345 = vmatprep.subr.bf16.mxu1 %v9344_v24  ;;  %v3651_v24 = vld [vmem:[%s11031_s13 + $0xcb8] sm:$0xff]  ;;  %v9366_v26 = vpack.c.bf16 %v3642_v22, %v3634_v38  ;;  %v3722_v30 = vld [vmem:[%s11031_s13 + $0xef0] sm:$0xff]  ;;  %v3737_v38 = vld [vmem:[%s11031_s13 + $0xf68] sm:$0xff] }
 0x4ec   : > { %v3739_v22 = vld [vmem:[%s11031_s13 + $0xf78] sm:$0xff] }
 0x4ed   : > { %9027 = vmatpush1.bf16.msra.mxu0 %v9026_v49  ;;  %v3656_v49 = vld [vmem:[%s11031_s13 + $0xce0] sm:$0xff]  ;;  %v3803_v5 = vld [vmem:[%s11031_s13 + $0x1178] sm:$0xff] }
 0x4ee   : > { %9347 = vmatpush1.bf16.msra.mxu1 %v9346_v56  ;;  %9029 = vmatprep.subr.bf16.mxu0 %v9028_v8  ;;  %v3650_v56 = vld [vmem:[%s11031_s13 + $0xcb0] sm:$0xff]  ;;  %v9368_v8 = vpack.c.bf16 %v3659_v4, %v3651_v24  ;;  %v9050_v35 = vpack.c.bf16 %v3656_v49, %v3648_v28  ;;  %v9068_v24 = vpack.c.bf16 %v3737_v38, %v3729_v19  ;;  %v3728_v4 = vld [vmem:[%s11031_s13 + $0xf20] sm:$0xff]  ;;  %v3745_v49 = vld [vmem:[%s11031_s13 + $0xfa8] sm:$0xff] }
 0x4ef   : > { %9349 = vmatprep.subr.bf16.mxu1 %v9348_v33  ;;  %v3667_v33 = vld [vmem:[%s11031_s13 + $0xd38] sm:$0xff]  ;;  %v9370_v36 = vpack.c.bf16 %v3658_v17, %v3650_v56  ;;  %v3738_v28 = vld [vmem:[%s11031_s13 + $0xf70] sm:$0xff]  ;;  %v3753_v56 = vld [vmem:[%s11031_s13 + $0xfe8] sm:$0xff] }
 0x4f0   : > { %v3755_v17 = vld [vmem:[%s11031_s13 + $0xff8] sm:$0xff] }
 0x4f1   : > { %9031 = vmatpush1.bf16.msra.mxu0 %v9030_v53  ;;  %v3672_v53 = vld [vmem:[%s11031_s13 + $0xd60] sm:$0xff]  ;;  %v3811_v19 = vld [vmem:[%s11031_s13 + $0x11b8] sm:$0xff] }
 0x4f2   : > { %9351 = vmatpush1.bf16.msra.mxu1 %v9350_v39  ;;  %9033 = vmatprep.subr.bf16.mxu0 %v9032_v40  ;;  %v3666_v39 = vld [vmem:[%s11031_s13 + $0xd30] sm:$0xff]  ;;  %v9372_v40 = vpack.c.bf16 %v3675_v34, %v3667_v33  ;;  %v9054_v47 = vpack.c.bf16 %v3672_v53, %v3664_v46  ;;  %v9072_v33 = vpack.c.bf16 %v3753_v56, %v3745_v49  ;;  %v3744_v34 = vld [vmem:[%s11031_s13 + $0xfa0] sm:$0xff]  ;;  %v3761_v53 = vld [vmem:[%s11031_s13 + $0x1028] sm:$0xff] }
 0x4f3   : > { %9353 = vmatprep.subr.bf16.mxu1 %v9352_v44  ;;  %v3683_v44 = vld [vmem:[%s11031_s13 + $0xdb8] sm:$0xff]  ;;  %v9374_v48 = vpack.c.bf16 %v3674_v41, %v3666_v39  ;;  %v3754_v46 = vld [vmem:[%s11031_s13 + $0xff0] sm:$0xff]  ;;  %v3769_v39 = vld [vmem:[%s11031_s13 + $0x1068] sm:$0xff] }
 0x4f4   : > { %v3771_v41 = vld [vmem:[%s11031_s13 + $0x1078] sm:$0xff] }
 0x4f5   : > { %9035 = vmatpush1.bf16.msra.mxu0 %v9034_v51  ;;  %v3688_v51 = vld [vmem:[%s11031_s13 + $0xde0] sm:$0xff]  ;;  %v3819_v38 = vld [vmem:[%s11031_s13 + $0x11f8] sm:$0xff] }
 0x4f6   : > { %9355 = vmatpush1.bf16.msra.mxu1 %v9354_v52  ;;  %9037 = vmatprep.subr.bf16.mxu0 %v9036_v57  ;;  %v3682_v52 = vld [vmem:[%s11031_s13 + $0xdb0] sm:$0xff]  ;;  %v9376_v57 = vpack.c.bf16 %v3691_v45, %v3683_v44  ;;  %v9058_v62 = vpack.c.bf16 %v3688_v51, %v3680_v50  ;;  %v9076_v44 = vpack.c.bf16 %v3769_v39, %v3761_v53  ;;  %v3760_v45 = vld [vmem:[%s11031_s13 + $0x1020] sm:$0xff]  ;;  %v3777_v51 = vld [vmem:[%s11031_s13 + $0x10a8] sm:$0xff] }
 0x4f7   : > { %9357 = vmatprep.subr.bf16.mxu1 %v9356_v55  ;;  %v3699_v55 = vld [vmem:[%s11031_s13 + $0xe38] sm:$0xff]  ;;  %v9378_v63 = vpack.c.bf16 %v3690_v59, %v3682_v52  ;;  %v3770_v50 = vld [vmem:[%s11031_s13 + $0x1070] sm:$0xff]  ;;  %v3785_v52 = vld [vmem:[%s11031_s13 + $0x10e8] sm:$0xff] }
 0x4f8   : > { %v3787_v59 = vld [vmem:[%s11031_s13 + $0x10f8] sm:$0xff] }
 0x4f9   : > { %9039 = vmatpush1.bf16.msra.mxu0 %v9038_v32  ;;  %v3704_v32 = vld [vmem:[%s11031_s13 + $0xe60] sm:$0xff]  ;;  %v3827_v49 = vld [vmem:[%s11031_s13 + $0x1238] sm:$0xff] }
 0x4fa   : > { %9359 = vmatpush1.bf16.msra.mxu1 %v9358_v0  ;;  %9041 = vmatprep.subr.bf16.mxu0 %v9040_v3  ;;  %v3698_v0 = vld [vmem:[%s11031_s13 + $0xe30] sm:$0xff]  ;;  %v9380_v3 = vpack.c.bf16 %v3707_v54, %v3699_v55  ;;  %v9062_v20 = vpack.c.bf16 %v3704_v32, %v3696_v2  ;;  %v9080_v55 = vpack.c.bf16 %v3785_v52, %v3777_v51  ;;  %v3776_v54 = vld [vmem:[%s11031_s13 + $0x10a0] sm:$0xff]  ;;  %v3793_v32 = vld [vmem:[%s11031_s13 + $0x1128] sm:$0xff] }
 0x4fb   : > { %9361 = vmatprep.subr.bf16.mxu1 %v9360_v9  ;;  %v3715_v9 = vld [vmem:[%s11031_s13 + $0xeb8] sm:$0xff]  ;;  %v9382_v11 = vpack.c.bf16 %v3706_v58, %v3698_v0  ;;  %v3786_v2 = vld [vmem:[%s11031_s13 + $0x10f0] sm:$0xff]  ;;  %v3801_v0 = vld [vmem:[%s11031_s13 + $0x1168] sm:$0xff] }
 0x4fc   : > { %v3795_v58 = vld [vmem:[%s11031_s13 + $0x1138] sm:$0xff] }
 0x4fd   : > { %9043 = vmatpush1.bf16.msra.mxu0 %v9042_v15  ;;  %v3720_v15 = vld [vmem:[%s11031_s13 + $0xee0] sm:$0xff]  ;;  %v3835_v56 = vld [vmem:[%s11031_s13 + $0x1278] sm:$0xff] }
 0x4fe   : > { %9363 = vmatpush1.bf16.msra.mxu1 %v9362_v16  ;;  %9045 = vmatprep.subr.bf16.mxu0 %v9044_v18  ;;  %v3714_v16 = vld [vmem:[%s11031_s13 + $0xeb0] sm:$0xff]  ;;  %v9384_v18 = vpack.c.bf16 %v3723_v10, %v3715_v9  ;;  %v9066_v14 = vpack.c.bf16 %v3720_v15, %v3712_v13  ;;  %v9084_v10 = vpack.c.bf16 %v3801_v0, %v3793_v32  ;;  %v3843_v53 = vld [vmem:[%s11031_s13 + $0x12b8] sm:$0xff] }
 0x4ff   : > { %9365 = vmatprep.subr.bf16.mxu1 %v9364_v21  ;;  %v3731_v21 = vld [vmem:[%s11031_s13 + $0xf38] sm:$0xff]  ;;  %v9386_v23 = vpack.c.bf16 %v3722_v30, %v3714_v16  ;;  %v9404_v13 = vpack.c.bf16 %v3803_v5, %v3795_v58  ;;  %v3802_v15 = vld [vmem:[%s11031_s13 + $0x1170] sm:$0xff]  ;;  %v3809_v16 = vld [vmem:[%s11031_s13 + $0x11a8] sm:$0xff] }
 0x500   : > { %v10228_v30 = vld [vmem:[%s11386_s20 + $0x28] sm:$0xff] }
 0x501   : > { %9047 = vmatpush1.bf16.msra.mxu0 %v9046_v25  ;;  %v3736_v25 = vld [vmem:[%s11031_s13 + $0xf60] sm:$0xff]  ;;  %v3851_v39 = vld [vmem:[%s11031_s13 + $0x12f8] sm:$0xff] }
 0x502   : > { %9367 = vmatpush1.bf16.msra.mxu1 %v9366_v26  ;;  %9049 = vmatprep.subr.bf16.mxu0 %v9048_v27  ;;  %v3730_v26 = vld [vmem:[%s11031_s13 + $0xf30] sm:$0xff]  ;;  %v9388_v27 = vpack.c.bf16 %v3739_v22, %v3731_v21  ;;  %v9070_v29 = vpack.c.bf16 %v3736_v25, %v3728_v4  ;;  %v9408_v25 = vpack.c.bf16 %v3819_v38, %v3811_v19  ;;  %v3859_v51 = vld [vmem:[%s11031_s13 + $0x1338] sm:$0xff]  ;;  %v3888_v38 = vld [vmem:[%s11031_s13 + $0x1420] sm:$0xff] }
 0x503   : > { %9369 = vmatprep.subr.bf16.mxu1 %v9368_v8  ;;  %v3747_v8 = vld [vmem:[%s11031_s13 + $0xfb8] sm:$0xff]  ;;  %v9390_v31 = vpack.c.bf16 %v3738_v28, %v3730_v26  ;;  %v3810_v4 = vld [vmem:[%s11031_s13 + $0x11b0] sm:$0xff]  ;;  %v3833_v28 = vld [vmem:[%s11031_s13 + $0x1268] sm:$0xff] }
 0x504   : > { %v3818_v26 = vld [vmem:[%s11031_s13 + $0x11f0] sm:$0xff]  ;;  %v3867_v52 = vld [vmem:[%s11031_s13 + $0x1378] sm:$0xff] }
 0x505   : > { %9051 = vmatpush1.bf16.msra.mxu0 %v9050_v35  ;;  %v3752_v35 = vld [vmem:[%s11031_s13 + $0xfe0] sm:$0xff]  ;;  %v3875_v32 = vld [vmem:[%s11031_s13 + $0x13b8] sm:$0xff] }
 0x506   : > { %9371 = vmatpush1.bf16.msra.mxu1 %v9370_v36  ;;  %9053 = vmatprep.subr.bf16.mxu0 %v9052_v37  ;;  %v3746_v36 = vld [vmem:[%s11031_s13 + $0xfb0] sm:$0xff]  ;;  %v9392_v37 = vpack.c.bf16 %v3755_v17, %v3747_v8  ;;  %v9074_v42 = vpack.c.bf16 %v3752_v35, %v3744_v34  ;;  %v9410_v17 = vpack.c.bf16 %v3818_v26, %v3810_v4  ;;  %v3883_v0 = vld [vmem:[%s11031_s13 + $0x13f8] sm:$0xff]  ;;  %v3913_v4 = vld [vmem:[%s11031_s13 + $0x14e8] sm:$0xff] }
 0x507   : > { %9373 = vmatprep.subr.bf16.mxu1 %v9372_v40  ;;  %v3763_v40 = vld [vmem:[%s11031_s13 + $0x1038] sm:$0xff]  ;;  %v9394_v43 = vpack.c.bf16 %v3754_v46, %v3746_v36  ;;  %v3826_v34 = vld [vmem:[%s11031_s13 + $0x1230] sm:$0xff]  ;;  %v9412_v35 = vpack.c.bf16 %v3835_v56, %v3827_v49  ;;  %v3849_v46 = vld [vmem:[%s11031_s13 + $0x12e8] sm:$0xff] }
 0x508   : > { %v3834_v36 = vld [vmem:[%s11031_s13 + $0x1270] sm:$0xff]  ;;  %v3915_v26 = vld [vmem:[%s11031_s13 + $0x14f8] sm:$0xff]  ;;  %v3904_v56 = vld [vmem:[%s11031_s13 + $0x14a0] sm:$0xff] }
 0x509   : > { %9055 = vmatpush1.bf16.msra.mxu0 %v9054_v47  ;;  %v3768_v47 = vld [vmem:[%s11031_s13 + $0x1060] sm:$0xff] }
 0x50a   : > { %9375 = vmatpush1.bf16.msra.mxu1 %v9374_v48  ;;  %9057 = vmatprep.subr.bf16.mxu0 %v9056_v7  ;;  %v3762_v48 = vld [vmem:[%s11031_s13 + $0x1030] sm:$0xff]  ;;  %v9396_v7 = vpack.c.bf16 %v3771_v41, %v3763_v40  ;;  %v9078_v60 = vpack.c.bf16 %v3768_v47, %v3760_v45  ;;  %v9414_v41 = vpack.c.bf16 %v3834_v36, %v3826_v34  ;;  %v3929_v34 = vld [vmem:[%s11031_s13 + $0x1568] sm:$0xff]  ;;  %v3931_v36 = vld [vmem:[%s11031_s13 + $0x1578] sm:$0xff] }
 0x50b   : > { %9377 = vmatprep.subr.bf16.mxu1 %v9376_v57  ;;  %v3779_v57 = vld [vmem:[%s11031_s13 + $0x10b8] sm:$0xff]  ;;  %v9398_v61 = vpack.c.bf16 %v3770_v50, %v3762_v48  ;;  %v3842_v45 = vld [vmem:[%s11031_s13 + $0x12b0] sm:$0xff]  ;;  %v9416_v47 = vpack.c.bf16 %v3851_v39, %v3843_v53  ;;  %v3865_v50 = vld [vmem:[%s11031_s13 + $0x1368] sm:$0xff] }
 0x50c   : > { %v3850_v48 = vld [vmem:[%s11031_s13 + $0x12f0] sm:$0xff]  ;;  %v3920_v39 = vld [vmem:[%s11031_s13 + $0x1520] sm:$0xff] }
 0x50d   : > { %9059 = vmatpush1.bf16.msra.mxu0 %v9058_v62  ;;  %v3784_v62 = vld [vmem:[%s11031_s13 + $0x10e0] sm:$0xff] }
 0x50e   : > { %9379 = vmatpush1.bf16.msra.mxu1 %v9378_v63  ;;  %9061 = vmatprep.subr.bf16.mxu0 %v9060_v1  ;;  %v3778_v63 = vld [vmem:[%s11031_s13 + $0x10b0] sm:$0xff]  ;;  %v9400_v1 = vpack.c.bf16 %v3787_v59, %v3779_v57  ;;  %v9082_v6 = vpack.c.bf16 %v3784_v62, %v3776_v54  ;;  %v9418_v59 = vpack.c.bf16 %v3850_v48, %v3842_v45  ;;  %v3945_v45 = vld [vmem:[%s11031_s13 + $0x15e8] sm:$0xff]  ;;  %v3947_v48 = vld [vmem:[%s11031_s13 + $0x15f8] sm:$0xff] }
 0x50f   : > { %9381 = vmatprep.subr.bf16.mxu1 %v9380_v3  ;;  %v10227_v3 = vld [vmem:[%s11386_s20 + $0x10] sm:$0xff]  ;;  %v9402_v9 = vpack.c.bf16 %v3786_v2, %v3778_v63  ;;  %v3858_v54 = vld [vmem:[%s11031_s13 + $0x1330] sm:$0xff]  ;;  %v9420_v62 = vpack.c.bf16 %v3867_v52, %v3859_v51  ;;  %v3881_v2 = vld [vmem:[%s11031_s13 + $0x13e8] sm:$0xff] }
 0x510   : > { %v3866_v63 = vld [vmem:[%s11031_s13 + $0x1370] sm:$0xff]  ;;  %v3936_v52 = vld [vmem:[%s11031_s13 + $0x15a0] sm:$0xff] }
 0x511   : > { %9063 = vmatpush1.bf16.msra.mxu0 %v9062_v20  ;;  %v3792_v20 = vld [vmem:[%s11031_s13 + $0x1120] sm:$0xff]  ;;  %v9422_v58 = vpack.c.bf16 %v3866_v63, %v3858_v54  ;;  %v3961_v54 = vld [vmem:[%s11031_s13 + $0x1668] sm:$0xff]  ;;  %v3963_v63 = vld [vmem:[%s11031_s13 + $0x1678] sm:$0xff] }
 0x512   : > { %9383 = vmatpush1.bf16.msra.mxu1 %v9382_v11  ;;  %9065 = vmatprep.subr.bf16.mxu0 %v9064_v12  ;;  %v3800_v11 = vld [vmem:[%s11031_s13 + $0x1160] sm:$0xff]  ;;  %v3794_v12 = vld [vmem:[%s11031_s13 + $0x1130] sm:$0xff] }
 0x513   : > { %9385 = vmatprep.subr.bf16.mxu1 %v9384_v18  ;;  %v3817_v18 = vld [vmem:[%s11031_s13 + $0x11e8] sm:$0xff]  ;;  %v9086_v21 = vpack.c.bf16 %v3800_v11, %v3792_v20  ;;  %v9406_v22 = vpack.c.bf16 %v3802_v15, %v3794_v12  ;;  %v9424_v20 = vpack.c.bf16 %v3883_v0, %v3875_v32  ;;  %v3882_v11 = vld [vmem:[%s11031_s13 + $0x13f0] sm:$0xff]  ;;  %v3891_v15 = vld [vmem:[%s11031_s13 + $0x1438] sm:$0xff] }
 0x514   : > { %v3889_v12 = vld [vmem:[%s11031_s13 + $0x1428] sm:$0xff]  ;;  %v3952_v0 = vld [vmem:[%s11031_s13 + $0x1620] sm:$0xff] }
 0x515   : > { %9067 = vmatpush1.bf16.msra.mxu0 %v9066_v14  ;;  %v9088_v14 = vpack.c.bf16 %v3817_v18, %v3809_v16  ;;  %v3899_v16 = vld [vmem:[%s11031_s13 + $0x1478] sm:$0xff] }
 0x516   : > { %9387 = vmatpush1.bf16.msra.mxu1 %v9386_v23  ;;  %9069 = vmatprep.subr.bf16.mxu0 %v9068_v24  ;;  %v3808_v23 = vld [vmem:[%s11031_s13 + $0x11a0] sm:$0xff] }
 0x517   : > { %9389 = vmatprep.subr.bf16.mxu1 %v9388_v27  ;;  %v3816_v24 = vld [vmem:[%s11031_s13 + $0x11e0] sm:$0xff]  ;;  %v3825_v27 = vld [vmem:[%s11031_s13 + $0x1228] sm:$0xff] }
 0x518   : > { %v9090_v8 = vpack.c.bf16 %v3816_v24, %v3808_v23  ;;  %v3898_v23 = vld [vmem:[%s11031_s13 + $0x1470] sm:$0xff]  ;;  %v3905_v24 = vld [vmem:[%s11031_s13 + $0x14a8] sm:$0xff] }
 0x519   : > { %9071 = vmatpush1.bf16.msra.mxu0 %v9070_v29  ;;  %v9092_v29 = vpack.c.bf16 %v3833_v28, %v3825_v27  ;;  %v9112_v49 = vpack.c.bf16 %v3913_v4, %v3905_v24 }
 0x51a   : > { %9391 = vmatpush1.bf16.msra.mxu1 %v9390_v31  ;;  %9073 = vmatprep.subr.bf16.mxu0 %v9072_v33  ;;  %v3824_v31 = vld [vmem:[%s11031_s13 + $0x1220] sm:$0xff] }
 0x51b   : > { %9393 = vmatprep.subr.bf16.mxu1 %v9392_v37  ;;  %v3832_v33 = vld [vmem:[%s11031_s13 + $0x1260] sm:$0xff]  ;;  %v3841_v37 = vld [vmem:[%s11031_s13 + $0x12a8] sm:$0xff] }
 0x51c   : > { %v9094_v40 = vpack.c.bf16 %v3832_v33, %v3824_v31  ;;  %v3914_v31 = vld [vmem:[%s11031_s13 + $0x14f0] sm:$0xff]  ;;  %v3921_v33 = vld [vmem:[%s11031_s13 + $0x1528] sm:$0xff] }
 0x51d   : > { %9075 = vmatpush1.bf16.msra.mxu0 %v9074_v42  ;;  %v9096_v42 = vpack.c.bf16 %v3849_v46, %v3841_v37  ;;  %v9116_v53 = vpack.c.bf16 %v3929_v34, %v3921_v33 }
 0x51e   : > { %9395 = vmatpush1.bf16.msra.mxu1 %v9394_v43  ;;  %9077 = vmatprep.subr.bf16.mxu0 %v9076_v44  ;;  %v3840_v43 = vld [vmem:[%s11031_s13 + $0x12a0] sm:$0xff] }
 0x51f   : > { %9397 = vmatprep.subr.bf16.mxu1 %v9396_v7  ;;  %v3848_v44 = vld [vmem:[%s11031_s13 + $0x12e0] sm:$0xff]  ;;  %v3857_v7 = vld [vmem:[%s11031_s13 + $0x1328] sm:$0xff] }
 0x520   : > { %5370 = vmatmul.mubr.f32.vlgmr.msra.gmra.mrb[2].mxu0 %v10227_v3  ;;  %v9098_v57 = vpack.c.bf16 %v3848_v44, %v3840_v43  ;;  %v3930_v43 = vld [vmem:[%s11031_s13 + $0x1570] sm:$0xff]  ;;  %v3937_v44 = vld [vmem:[%s11031_s13 + $0x15a8] sm:$0xff] }
 0x521   : > { %9079 = vmatpush1.bf16.msra.mxu0 %v9078_v60  ;;  %5725 = vmatmul.mubr.f32.vlgmr.msra.gmra.mrb[2].mxu1 %v10227_v3  ;;  %v9100_v60 = vpack.c.bf16 %v3865_v50, %v3857_v7  ;;  %v9120_v51 = vpack.c.bf16 %v3945_v45, %v3937_v44 }
 0x522   : > { %9399 = vmatpush1.bf16.msra.mxu1 %v9398_v61  ;;  %9081 = vmatprep.subr.bf16.mxu0 %v9080_v55  ;;  %v3856_v61 = vld [vmem:[%s11031_s13 + $0x1320] sm:$0xff] }
 0x523   : > { %9401 = vmatprep.subr.bf16.mxu1 %v9400_v1  ;;  %5440 = vmatprep.mubr.f32.mxu0 %v10228_v30  ;;  %v3864_v55 = vld [vmem:[%s11031_s13 + $0x1360] sm:$0xff]  ;;  %v3873_v1 = vld [vmem:[%s11031_s13 + $0x13a8] sm:$0xff] }
 0x524   : > { %5795 = vmatprep.mubr.f32.mxu1 %v10228_v30  ;;  %v9102_v3 = vpack.c.bf16 %v3864_v55, %v3856_v61  ;;  %v9104_v5 = vpack.c.bf16 %v3881_v2, %v3873_v1  ;;  %v3946_v61 = vld [vmem:[%s11031_s13 + $0x15f0] sm:$0xff]  ;;  %v3953_v55 = vld [vmem:[%s11031_s13 + $0x1628] sm:$0xff] }
 0x525   : > { %9083 = vmatpush1.bf16.msra.mxu0 %v9082_v6  ;;  %v3872_v6 = vld [vmem:[%s11031_s13 + $0x13a0] sm:$0xff]  ;;  %v9124_v32 = vpack.c.bf16 %v3961_v54, %v3953_v55 }
 0x526   : > { %9403 = vmatpush1.bf16.msra.mxu1 %v9402_v9  ;;  %9085 = vmatprep.subr.bf16.mxu0 %v9084_v10  ;;  %v3880_v9 = vld [vmem:[%s11031_s13 + $0x13e0] sm:$0xff]  ;;  %v3874_v10 = vld [vmem:[%s11031_s13 + $0x13b0] sm:$0xff] }
 0x527   : > { %9405 = vmatprep.subr.bf16.mxu1 %v9404_v13  ;;  %v3897_v13 = vld [vmem:[%s11031_s13 + $0x1468] sm:$0xff]  ;;  %v9106_v18 = vpack.c.bf16 %v3880_v9, %v3872_v6  ;;  %v9426_v30 = vpack.c.bf16 %v3882_v11, %v3874_v10  ;;  %v3962_v6 = vld [vmem:[%s11031_s13 + $0x1670] sm:$0xff]  ;;  %v3979_v11 = vld [vmem:[%s11031_s13 + $0x16f8] sm:$0xff] }
 0x528   : > { %v9108_v19 = vpack.c.bf16 %v3897_v13, %v3889_v12  ;;  %v3969_v9 = vld [vmem:[%s11031_s13 + $0x16a8] sm:$0xff] }
 0x529   : > { %9087 = vmatpush1.bf16.msra.mxu0 %v9086_v21  ;;  %v3896_v21 = vld [vmem:[%s11031_s13 + $0x1460] sm:$0xff]  ;;  %v3977_v10 = vld [vmem:[%s11031_s13 + $0x16e8] sm:$0xff] }
 0x52a   : > { %9407 = vmatpush1.bf16.msra.mxu1 %v9406_v22  ;;  %9089 = vmatprep.subr.bf16.mxu0 %v9088_v14  ;;  %v3890_v22 = vld [vmem:[%s11031_s13 + $0x1430] sm:$0xff]  ;;  %v9428_v14 = vpack.c.bf16 %v3899_v16, %v3891_v15  ;;  %v9110_v27 = vpack.c.bf16 %v3896_v21, %v3888_v38  ;;  %v9128_v15 = vpack.c.bf16 %v3977_v10, %v3969_v9  ;;  %v3968_v16 = vld [vmem:[%s11031_s13 + $0x16a0] sm:$0xff]  ;;  %v3985_v21 = vld [vmem:[%s11031_s13 + $0x1728] sm:$0xff] }
 0x52b   : > { %9409 = vmatprep.subr.bf16.mxu1 %v9408_v25  ;;  %v3907_v25 = vld [vmem:[%s11031_s13 + $0x14b8] sm:$0xff]  ;;  %v9430_v28 = vpack.c.bf16 %v3898_v23, %v3890_v22  ;;  %v3978_v38 = vld [vmem:[%s11031_s13 + $0x16f0] sm:$0xff]  ;;  %v3993_v22 = vld [vmem:[%s11031_s13 + $0x1768] sm:$0xff] }
 0x52c   : > { %v3995_v23 = vld [vmem:[%s11031_s13 + $0x1778] sm:$0xff] }
 0x52d   : > { %9091 = vmatpush1.bf16.msra.mxu0 %v9090_v8  ;;  %v3912_v8 = vld [vmem:[%s11031_s13 + $0x14e0] sm:$0xff]  ;;  %v4059_v9 = vld [vmem:[%s11031_s13 + $0x1978] sm:$0xff] }
 0x52e   : > { %9411 = vmatpush1.bf16.msra.mxu1 %v9410_v17  ;;  %9093 = vmatprep.subr.bf16.mxu0 %v9092_v29  ;;  %v3906_v17 = vld [vmem:[%s11031_s13 + $0x14b0] sm:$0xff]  ;;  %v9432_v29 = vpack.c.bf16 %v3915_v26, %v3907_v25  ;;  %v9114_v37 = vpack.c.bf16 %v3912_v8, %v3904_v56  ;;  %v9132_v25 = vpack.c.bf16 %v3993_v22, %v3985_v21  ;;  %v3984_v26 = vld [vmem:[%s11031_s13 + $0x1720] sm:$0xff]  ;;  %v4001_v8 = vld [vmem:[%s11031_s13 + $0x17a8] sm:$0xff] }
 0x52f   : > { %9413 = vmatprep.subr.bf16.mxu1 %v9412_v35  ;;  %v3923_v35 = vld [vmem:[%s11031_s13 + $0x1538] sm:$0xff]  ;;  %v9434_v46 = vpack.c.bf16 %v3914_v31, %v3906_v17  ;;  %v3994_v56 = vld [vmem:[%s11031_s13 + $0x1770] sm:$0xff]  ;;  %v4009_v17 = vld [vmem:[%s11031_s13 + $0x17e8] sm:$0xff] }
 0x530   : > { %v4011_v31 = vld [vmem:[%s11031_s13 + $0x17f8] sm:$0xff] }
 0x531   : > { %9095 = vmatpush1.bf16.msra.mxu0 %v9094_v40  ;;  %v3928_v40 = vld [vmem:[%s11031_s13 + $0x1560] sm:$0xff]  ;;  %v4067_v21 = vld [vmem:[%s11031_s13 + $0x19b8] sm:$0xff] }
 0x532   : > { %9415 = vmatpush1.bf16.msra.mxu1 %v9414_v41  ;;  %9097 = vmatprep.subr.bf16.mxu0 %v9096_v42  ;;  %v3922_v41 = vld [vmem:[%s11031_s13 + $0x1530] sm:$0xff]  ;;  %v9436_v42 = vpack.c.bf16 %v3931_v36, %v3923_v35  ;;  %v9118_v7 = vpack.c.bf16 %v3928_v40, %v3920_v39  ;;  %v9136_v35 = vpack.c.bf16 %v4009_v17, %v4001_v8  ;;  %v4000_v36 = vld [vmem:[%s11031_s13 + $0x17a0] sm:$0xff]  ;;  %v4017_v40 = vld [vmem:[%s11031_s13 + $0x1828] sm:$0xff] }
 0x533   : > { %9417 = vmatprep.subr.bf16.mxu1 %v9416_v47  ;;  %v3939_v47 = vld [vmem:[%s11031_s13 + $0x15b8] sm:$0xff]  ;;  %v9438_v50 = vpack.c.bf16 %v3930_v43, %v3922_v41  ;;  %v4010_v39 = vld [vmem:[%s11031_s13 + $0x17f0] sm:$0xff]  ;;  %v4025_v41 = vld [vmem:[%s11031_s13 + $0x1868] sm:$0xff] }
 0x534   : > { %v4027_v43 = vld [vmem:[%s11031_s13 + $0x1878] sm:$0xff] }
 0x535   : > { %9099 = vmatpush1.bf16.msra.mxu0 %v9098_v57  ;;  %v3944_v57 = vld [vmem:[%s11031_s13 + $0x15e0] sm:$0xff]  ;;  %v4075_v22 = vld [vmem:[%s11031_s13 + $0x19f8] sm:$0xff] }
 0x536   : > { %9419 = vmatpush1.bf16.msra.mxu1 %v9418_v59  ;;  %9101 = vmatprep.subr.bf16.mxu0 %v9100_v60  ;;  %v3938_v59 = vld [vmem:[%s11031_s13 + $0x15b0] sm:$0xff]  ;;  %v9440_v60 = vpack.c.bf16 %v3947_v48, %v3939_v47  ;;  %v9122_v1 = vpack.c.bf16 %v3944_v57, %v3936_v52  ;;  %v9140_v47 = vpack.c.bf16 %v4025_v41, %v4017_v40  ;;  %v4016_v48 = vld [vmem:[%s11031_s13 + $0x1820] sm:$0xff]  ;;  %v4033_v57 = vld [vmem:[%s11031_s13 + $0x18a8] sm:$0xff] }
 0x537   : > { %9421 = vmatprep.subr.bf16.mxu1 %v9420_v62  ;;  %v3955_v62 = vld [vmem:[%s11031_s13 + $0x1638] sm:$0xff]  ;;  %v9442_v2 = vpack.c.bf16 %v3946_v61, %v3938_v59  ;;  %v4026_v52 = vld [vmem:[%s11031_s13 + $0x1870] sm:$0xff]  ;;  %v4041_v59 = vld [vmem:[%s11031_s13 + $0x18e8] sm:$0xff] }
 0x538   : > { %v4043_v61 = vld [vmem:[%s11031_s13 + $0x18f8] sm:$0xff] }
 0x539   : > { %9103 = vmatpush1.bf16.msra.mxu0 %v9102_v3  ;;  %v3960_v3 = vld [vmem:[%s11031_s13 + $0x1660] sm:$0xff]  ;;  %v4083_v8 = vld [vmem:[%s11031_s13 + $0x1a38] sm:$0xff] }
 0x53a   : > { %9423 = vmatpush1.bf16.msra.mxu1 %v9422_v58  ;;  %9105 = vmatprep.subr.bf16.mxu0 %v9104_v5  ;;  %v3954_v58 = vld [vmem:[%s11031_s13 + $0x1630] sm:$0xff]  ;;  %v9444_v5 = vpack.c.bf16 %v3963_v63, %v3955_v62  ;;  %v9126_v12 = vpack.c.bf16 %v3960_v3, %v3952_v0  ;;  %v9144_v62 = vpack.c.bf16 %v4041_v59, %v4033_v57  ;;  %v4032_v63 = vld [vmem:[%s11031_s13 + $0x18a0] sm:$0xff]  ;;  %v4049_v3 = vld [vmem:[%s11031_s13 + $0x1928] sm:$0xff] }
 0x53b   : > { %9425 = vmatprep.subr.bf16.mxu1 %v9424_v20  ;;  %v3971_v20 = vld [vmem:[%s11031_s13 + $0x16b8] sm:$0xff]  ;;  %v9446_v13 = vpack.c.bf16 %v3962_v6, %v3954_v58  ;;  %v4042_v0 = vld [vmem:[%s11031_s13 + $0x18f0] sm:$0xff]  ;;  %v4057_v58 = vld [vmem:[%s11031_s13 + $0x1968] sm:$0xff] }
 0x53c   : > { %v4051_v6 = vld [vmem:[%s11031_s13 + $0x1938] sm:$0xff]  ;;  %v3223_v57 = vld [vmem:[#allocation3] sm:$0xff] }
 0x53d   : > { %9107 = vmatpush1.bf16.msra.mxu0 %v9106_v18  ;;  %v3976_v18 = vld [vmem:[%s11031_s13 + $0x16e0] sm:$0xff]  ;;  %v4091_v17 = vld [vmem:[%s11031_s13 + $0x1a78] sm:$0xff] }
 0x53e   : > { %9427 = vmatpush1.bf16.msra.mxu1 %v9426_v30  ;;  %9109 = vmatprep.subr.bf16.mxu0 %v9108_v19  ;;  %v3970_v30 = vld [vmem:[%s11031_s13 + $0x16b0] sm:$0xff]  ;;  %v9448_v19 = vpack.c.bf16 %v3979_v11, %v3971_v20  ;;  %v9130_v24 = vpack.c.bf16 %v3976_v18, %v3968_v16  ;;  %v9148_v11 = vpack.c.bf16 %v4057_v58, %v4049_v3  ;;  %v4099_v40 = vld [vmem:[%s11031_s13 + $0x1ab8] sm:$0xff] }
 0x53f   : > { %9429 = vmatprep.subr.bf16.mxu1 %v9428_v14  ;;  %v3987_v14 = vld [vmem:[%s11031_s13 + $0x1738] sm:$0xff]  ;;  %v9450_v4 = vpack.c.bf16 %v3978_v38, %v3970_v30  ;;  %v9468_v16 = vpack.c.bf16 %v4059_v9, %v4051_v6  ;;  %v4058_v18 = vld [vmem:[%s11031_s13 + $0x1970] sm:$0xff]  ;;  %v4065_v30 = vld [vmem:[%s11031_s13 + $0x19a8] sm:$0xff] }
 0x540   : > { %v10230_v38 = vld [vmem:[%s11386_s20 + $0x38] sm:$0xff]  ;;  %v4107_v41 = vld [vmem:[%s11031_s13 + $0x1af8] sm:$0xff] }
 0x541   : > { %9111 = vmatpush1.bf16.msra.mxu0 %v9110_v27  ;;  %v3992_v27 = vld [vmem:[%s11031_s13 + $0x1760] sm:$0xff]  ;;  %v4115_v59 = vld [vmem:[%s11031_s13 + $0x1b38] sm:$0xff]  ;;  %v4129_v6 = vld [vmem:[%s11031_s13 + $0x1ba8] sm:$0xff] }
 0x542   : > { %9431 = vmatpush1.bf16.msra.mxu1 %v9430_v28  ;;  %9113 = vmatprep.subr.bf16.mxu0 %v9112_v49  ;;  %v3986_v28 = vld [vmem:[%s11031_s13 + $0x1730] sm:$0xff]  ;;  %v9452_v49 = vpack.c.bf16 %v3995_v23, %v3987_v14  ;;  %v9134_v33 = vpack.c.bf16 %v3992_v27, %v3984_v26  ;;  %v9472_v27 = vpack.c.bf16 %v4075_v22, %v4067_v21  ;;  %v4137_v9 = vld [vmem:[%s11031_s13 + $0x1be8] sm:$0xff]  ;;  %v4128_v22 = vld [vmem:[%s11031_s13 + $0x1ba0] sm:$0xff] }
 0x543   : > { %9433 = vmatprep.subr.bf16.mxu1 %v9432_v29  ;;  %v4003_v29 = vld [vmem:[%s11031_s13 + $0x17b8] sm:$0xff]  ;;  %v9454_v34 = vpack.c.bf16 %v3994_v56, %v3986_v28  ;;  %v4066_v26 = vld [vmem:[%s11031_s13 + $0x19b0] sm:$0xff]  ;;  %v4089_v56 = vld [vmem:[%s11031_s13 + $0x1a68] sm:$0xff]  ;;  %v9168_v21 = vpack.c.bf16 %v4137_v9, %v4129_v6 }
 0x544   : > { %v4074_v28 = vld [vmem:[%s11031_s13 + $0x19f0] sm:$0xff] }
 0x545   : > { %9115 = vmatpush1.bf16.msra.mxu0 %v9114_v37  ;;  %v4008_v37 = vld [vmem:[%s11031_s13 + $0x17e0] sm:$0xff]  ;;  %v4194_v6 = vld [vmem:[%s11031_s13 + $0x1db0] sm:$0xff] }
 0x546   : > { %9435 = vmatpush1.bf16.msra.mxu1 %v9434_v46  ;;  %9117 = vmatprep.subr.bf16.mxu0 %v9116_v53  ;;  %v4002_v46 = vld [vmem:[%s11031_s13 + $0x17b0] sm:$0xff]  ;;  %v9456_v53 = vpack.c.bf16 %v4011_v31, %v4003_v29  ;;  %v9138_v44 = vpack.c.bf16 %v4008_v37, %v4000_v36  ;;  %v9474_v31 = vpack.c.bf16 %v4074_v28, %v4066_v26  ;;  %v4153_v26 = vld [vmem:[%s11031_s13 + $0x1c68] sm:$0xff]  ;;  %v4155_v28 = vld [vmem:[%s11031_s13 + $0x1c78] sm:$0xff] }
 0x547   : > { %9437 = vmatprep.subr.bf16.mxu1 %v9436_v42  ;;  %v4019_v42 = vld [vmem:[%s11031_s13 + $0x1838] sm:$0xff]  ;;  %v9458_v45 = vpack.c.bf16 %v4010_v39, %v4002_v46  ;;  %v4082_v36 = vld [vmem:[%s11031_s13 + $0x1a30] sm:$0xff]  ;;  %v9476_v37 = vpack.c.bf16 %v4091_v17, %v4083_v8  ;;  %v4105_v39 = vld [vmem:[%s11031_s13 + $0x1ae8] sm:$0xff] }
 0x548   : > { %v4090_v46 = vld [vmem:[%s11031_s13 + $0x1a70] sm:$0xff]  ;;  %v4144_v17 = vld [vmem:[%s11031_s13 + $0x1c20] sm:$0xff] }
 0x549   : > { %9119 = vmatpush1.bf16.msra.mxu0 %v9118_v7  ;;  %v4024_v7 = vld [vmem:[%s11031_s13 + $0x1860] sm:$0xff] }
 0x54a   : > { %9439 = vmatpush1.bf16.msra.mxu1 %v9438_v50  ;;  %9121 = vmatprep.subr.bf16.mxu0 %v9120_v51  ;;  %v4018_v50 = vld [vmem:[%s11031_s13 + $0x1830] sm:$0xff]  ;;  %v9460_v51 = vpack.c.bf16 %v4027_v43, %v4019_v42  ;;  %v9142_v55 = vpack.c.bf16 %v4024_v7, %v4016_v48  ;;  %v9478_v43 = vpack.c.bf16 %v4090_v46, %v4082_v36  ;;  %v4169_v36 = vld [vmem:[%s11031_s13 + $0x1ce8] sm:$0xff]  ;;  %v4171_v46 = vld [vmem:[%s11031_s13 + $0x1cf8] sm:$0xff] }
 0x54b   : > { %9441 = vmatprep.subr.bf16.mxu1 %v9440_v60  ;;  %v4035_v60 = vld [vmem:[%s11031_s13 + $0x18b8] sm:$0xff]  ;;  %v9462_v54 = vpack.c.bf16 %v4026_v52, %v4018_v50  ;;  %v4098_v48 = vld [vmem:[%s11031_s13 + $0x1ab0] sm:$0xff]  ;;  %v9480_v7 = vpack.c.bf16 %v4107_v41, %v4099_v40  ;;  %v4121_v52 = vld [vmem:[%s11031_s13 + $0x1b68] sm:$0xff] }
 0x54c   : > { %v4106_v50 = vld [vmem:[%s11031_s13 + $0x1af0] sm:$0xff]  ;;  %v4160_v41 = vld [vmem:[%s11031_s13 + $0x1ca0] sm:$0xff] }
 0x54d   : > { %9123 = vmatpush1.bf16.msra.mxu0 %v9122_v1  ;;  %v4040_v1 = vld [vmem:[%s11031_s13 + $0x18e0] sm:$0xff] }
 0x54e   : > { %9443 = vmatpush1.bf16.msra.mxu1 %v9442_v2  ;;  %9125 = vmatprep.subr.bf16.mxu0 %v9124_v32  ;;  %v4034_v2 = vld [vmem:[%s11031_s13 + $0x18b0] sm:$0xff]  ;;  %v9464_v32 = vpack.c.bf16 %v4043_v61, %v4035_v60  ;;  %v9146_v10 = vpack.c.bf16 %v4040_v1, %v4032_v63  ;;  %v4123_v60 = vld [vmem:[%s11031_s13 + $0x1b78] sm:$0xff]  ;;  %v3225_v61 = vld [vmem:[#allocation3 + $0x10] sm:$0xff]  ;;  %v9482_v63 = vpack.c.bf16 %v4106_v50, %v4098_v48 }
 0x54f   : > { %9445 = vmatprep.subr.bf16.mxu1 %v9444_v5  ;;  %v10229_v5 = vld [vmem:[%s11386_s20 + $0x20] sm:$0xff]  ;;  %v9466_v20 = vpack.c.bf16 %v4042_v0, %v4034_v2  ;;  %v4112_v2 = vld [vmem:[%s11031_s13 + $0x1b20] sm:$0xff]  ;;  %v9484_v58 = vpack.c.bf16 %v4123_v60, %v4115_v59  ;;  %v4185_v48 = vld [vmem:[%s11031_s13 + $0x1d68] sm:$0xff] }
 0x550   : > { %v4114_v0 = vld [vmem:[%s11031_s13 + $0x1b30] sm:$0xff]  ;;  %v4187_v50 = vld [vmem:[%s11031_s13 + $0x1d78] sm:$0xff]  ;;  %v4176_v59 = vld [vmem:[%s11031_s13 + $0x1d20] sm:$0xff] }
 0x551   : > { %9127 = vmatpush1.bf16.msra.mxu0 %v9126_v12  ;;  %v4048_v12 = vld [vmem:[%s11031_s13 + $0x1920] sm:$0xff] }
 0x552   : > { %9447 = vmatpush1.bf16.msra.mxu1 %v9446_v13  ;;  %9129 = vmatprep.subr.bf16.mxu0 %v9128_v15  ;;  %v4056_v13 = vld [vmem:[%s11031_s13 + $0x1960] sm:$0xff]  ;;  %v4050_v15 = vld [vmem:[%s11031_s13 + $0x1930] sm:$0xff] }
 0x553   : > { %9449 = vmatprep.subr.bf16.mxu1 %v9448_v19  ;;  %v4073_v19 = vld [vmem:[%s11031_s13 + $0x19e8] sm:$0xff]  ;;  %v9150_v14 = vpack.c.bf16 %v4056_v13, %v4048_v12  ;;  %v9470_v23 = vpack.c.bf16 %v4058_v18, %v4050_v15  ;;  %v4131_v12 = vld [vmem:[%s11031_s13 + $0x1bb8] sm:$0xff]  ;;  %v4184_v60 = vld [vmem:[%s11031_s13 + $0x1d60] sm:$0xff] }
 0x554   : > { %v4139_v13 = vld [vmem:[%s11031_s13 + $0x1bf8] sm:$0xff] }
 0x555   : > { %9131 = vmatpush1.bf16.msra.mxu0 %v9130_v24  ;;  %v9152_v24 = vpack.c.bf16 %v4073_v19, %v4065_v30 }
 0x556   : > { %9451 = vmatpush1.bf16.msra.mxu1 %v9450_v4  ;;  %9133 = vmatprep.subr.bf16.mxu0 %v9132_v25  ;;  %v4064_v4 = vld [vmem:[%s11031_s13 + $0x19a0] sm:$0xff] }
 0x557   : > { %9453 = vmatprep.subr.bf16.mxu1 %v9452_v49  ;;  %v4072_v25 = vld [vmem:[%s11031_s13 + $0x19e0] sm:$0xff]  ;;  %v4081_v49 = vld [vmem:[%s11031_s13 + $0x1a28] sm:$0xff] }
 0x558   : > { %v9154_v29 = vpack.c.bf16 %v4072_v25, %v4064_v4  ;;  %v4138_v4 = vld [vmem:[%s11031_s13 + $0x1bf0] sm:$0xff]  ;;  %v4145_v25 = vld [vmem:[%s11031_s13 + $0x1c28] sm:$0xff] }
 0x559   : > { %9135 = vmatpush1.bf16.msra.mxu0 %v9134_v33  ;;  %v9156_v33 = vpack.c.bf16 %v4089_v56, %v4081_v49  ;;  %v9172_v8 = vpack.c.bf16 %v4153_v26, %v4145_v25 }
 0x55a   : > { %9455 = vmatpush1.bf16.msra.mxu1 %v9454_v34  ;;  %9137 = vmatprep.subr.bf16.mxu0 %v9136_v35  ;;  %v4080_v34 = vld [vmem:[%s11031_s13 + $0x1a20] sm:$0xff] }
 0x55b   : > { %9457 = vmatprep.subr.bf16.mxu1 %v9456_v53  ;;  %v4088_v35 = vld [vmem:[%s11031_s13 + $0x1a60] sm:$0xff]  ;;  %v4097_v53 = vld [vmem:[%s11031_s13 + $0x1aa8] sm:$0xff] }
 0x55c   : > { %v9158_v42 = vpack.c.bf16 %v4088_v35, %v4080_v34  ;;  %v4154_v34 = vld [vmem:[%s11031_s13 + $0x1c70] sm:$0xff]  ;;  %v4161_v35 = vld [vmem:[%s11031_s13 + $0x1ca8] sm:$0xff] }
 0x55d   : > { %9139 = vmatpush1.bf16.msra.mxu0 %v9138_v44  ;;  %v9160_v44 = vpack.c.bf16 %v4105_v39, %v4097_v53  ;;  %v9176_v40 = vpack.c.bf16 %v4169_v36, %v4161_v35 }
 0x55e   : > { %9459 = vmatpush1.bf16.msra.mxu1 %v9458_v45  ;;  %9141 = vmatprep.subr.bf16.mxu0 %v9140_v47  ;;  %v4096_v45 = vld [vmem:[%s11031_s13 + $0x1aa0] sm:$0xff] }
 0x55f   : > { %9461 = vmatprep.subr.bf16.mxu1 %v9460_v51  ;;  %v4104_v47 = vld [vmem:[%s11031_s13 + $0x1ae0] sm:$0xff]  ;;  %v4113_v51 = vld [vmem:[%s11031_s13 + $0x1b28] sm:$0xff] }
 0x560   : > { %5441 = vmatmul.mubr.f32.vlgmr.msra.gmra.mrb[2].mxu0 %v10229_v5  ;;  %v9164_v1 = vpack.c.bf16 %v4121_v52, %v4113_v51 }
 0x561   : > { %9143 = vmatpush1.bf16.msra.mxu0 %v9142_v55  ;;  %5796 = vmatmul.mubr.f32.vlgmr.msra.gmra.mrb[2].mxu1 %v10229_v5  ;;  %v3224_v55 = vld [vmem:[#allocation3 + $0x8] sm:$0xff]  ;;  %v4122_v5 = vld [vmem:[%s11031_s13 + $0x1b70] sm:$0xff] }
 0x562   : > { %9463 = vmatpush1.bf16.msra.mxu1 %v9462_v54  ;;  %9145 = vmatprep.subr.bf16.mxu0 %v9144_v62  ;;  %v3226_v54 = vld [vmem:[#allocation3 + $0x18] sm:$0xff]  ;;  %v9162_v62 = vpack.c.bf16 %v4104_v47, %v4096_v45  ;;  %v4170_v45 = vld [vmem:[%s11031_s13 + $0x1cf0] sm:$0xff] }
 0x563   : > { %9465 = vmatprep.subr.bf16.mxu1 %v9464_v32  ;;  %5511 = vmatprep.mubr.f32.mxu0 %v10230_v38  ;;  %v4120_v32 = vld [vmem:[%s11031_s13 + $0x1b60] sm:$0xff]  ;;  %v4177_v47 = vld [vmem:[%s11031_s13 + $0x1d28] sm:$0xff] }
 0x564   : > { %5866 = vmatprep.mubr.f32.mxu1 %v10230_v38  ;;  %v9166_v30 = vpack.c.bf16 %v4120_v32, %v4112_v2  ;;  %v9486_v38 = vpack.c.bf16 %v4122_v5, %v4114_v0  ;;  %v4203_v2 = vld [vmem:[%s11031_s13 + $0x1df8] sm:$0xff]  ;;  %v9182_v32 = vpack.c.bf16 %v4184_v60, %v4176_v59  ;;  %v4200_v5 = vld [vmem:[%s11031_s13 + $0x1de0] sm:$0xff]  ;;  %v4266_v59 = vld [vmem:[%s11031_s13 + $0x1ff0] sm:$0xff] }
 0x565   : > { %9147 = vmatpush1.bf16.msra.mxu0 %v9146_v10  ;;  %v4273_v60 = vld [vmem:[%s11031_s13 + $0x2028] sm:$0xff] }
 0x566   : > { %9467 = vmatpush1.bf16.msra.mxu1 %v9466_v20  ;;  %9149 = vmatprep.subr.bf16.mxu0 %v9148_v11 }
 0x567   : > { %9469 = vmatprep.subr.bf16.mxu1 %v9468_v16 }
 0x569   : > { %9151 = vmatpush1.bf16.msra.mxu0 %v9150_v14  ;;  %v4136_v14 = vld [vmem:[%s11031_s13 + $0x1be0] sm:$0xff] }
 0x56a   : > { %9471 = vmatpush1.bf16.msra.mxu1 %v9470_v23  ;;  %9153 = vmatprep.subr.bf16.mxu0 %v9152_v24  ;;  %v4130_v23 = vld [vmem:[%s11031_s13 + $0x1bb0] sm:$0xff]  ;;  %v9488_v24 = vpack.c.bf16 %v4139_v13, %v4131_v12  ;;  %v9170_v49 = vpack.c.bf16 %v4136_v14, %v4128_v22  ;;  %v4211_v12 = vld [vmem:[%s11031_s13 + $0x1e38] sm:$0xff]  ;;  %v4225_v14 = vld [vmem:[%s11031_s13 + $0x1ea8] sm:$0xff] }
 0x56b   : > { %9473 = vmatprep.subr.bf16.mxu1 %v9472_v27  ;;  %v4147_v27 = vld [vmem:[%s11031_s13 + $0x1c38] sm:$0xff]  ;;  %v9490_v56 = vpack.c.bf16 %v4138_v4, %v4130_v23  ;;  %v4218_v22 = vld [vmem:[%s11031_s13 + $0x1e70] sm:$0xff]  ;;  %v4233_v23 = vld [vmem:[%s11031_s13 + $0x1ee8] sm:$0xff] }
 0x56c   : > { %v4219_v13 = vld [vmem:[%s11031_s13 + $0x1e78] sm:$0xff] }
 0x56d   : > { %9155 = vmatpush1.bf16.msra.mxu0 %v9154_v29  ;;  %v4152_v29 = vld [vmem:[%s11031_s13 + $0x1c60] sm:$0xff]  ;;  %v4235_v4 = vld [vmem:[%s11031_s13 + $0x1ef8] sm:$0xff] }
 0x56e   : > { %9475 = vmatpush1.bf16.msra.mxu1 %v9474_v31  ;;  %9157 = vmatprep.subr.bf16.mxu0 %v9156_v33  ;;  %v4146_v31 = vld [vmem:[%s11031_s13 + $0x1c30] sm:$0xff]  ;;  %v9492_v33 = vpack.c.bf16 %v4155_v28, %v4147_v27  ;;  %v9174_v53 = vpack.c.bf16 %v4152_v29, %v4144_v17  ;;  %v9192_v27 = vpack.c.bf16 %v4233_v23, %v4225_v14  ;;  %v4224_v28 = vld [vmem:[%s11031_s13 + $0x1ea0] sm:$0xff]  ;;  %v4241_v29 = vld [vmem:[%s11031_s13 + $0x1f28] sm:$0xff] }
 0x56f   : > { %9477 = vmatprep.subr.bf16.mxu1 %v9476_v37  ;;  %v4163_v37 = vld [vmem:[%s11031_s13 + $0x1cb8] sm:$0xff]  ;;  %v9494_v39 = vpack.c.bf16 %v4154_v34, %v4146_v31  ;;  %v4234_v17 = vld [vmem:[%s11031_s13 + $0x1ef0] sm:$0xff]  ;;  %v4249_v31 = vld [vmem:[%s11031_s13 + $0x1f68] sm:$0xff] }
 0x570   : > { %v4251_v34 = vld [vmem:[%s11031_s13 + $0x1f78] sm:$0xff] }
 0x571   : > { %9159 = vmatpush1.bf16.msra.mxu0 %v9158_v42  ;;  %v4168_v42 = vld [vmem:[%s11031_s13 + $0x1ce0] sm:$0xff]  ;;  %v4315_v14 = vld [vmem:[%s11031_s13 + $0x2178] sm:$0xff] }
 0x572   : > { %9479 = vmatpush1.bf16.msra.mxu1 %v9478_v43  ;;  %9161 = vmatprep.subr.bf16.mxu0 %v9160_v44  ;;  %v4162_v43 = vld [vmem:[%s11031_s13 + $0x1cb0] sm:$0xff]  ;;  %v9496_v44 = vpack.c.bf16 %v4171_v46, %v4163_v37  ;;  %v9178_v51 = vpack.c.bf16 %v4168_v42, %v4160_v41  ;;  %v9196_v37 = vpack.c.bf16 %v4249_v31, %v4241_v29  ;;  %v4240_v46 = vld [vmem:[%s11031_s13 + $0x1f20] sm:$0xff]  ;;  %v4257_v42 = vld [vmem:[%s11031_s13 + $0x1fa8] sm:$0xff] }
 0x573   : > { %v4874_v3 = vpop.f32.mrb[0].mxu0  ;;  %9481 = vmatprep.subr.bf16.mxu1 %v9480_v7  ;;  %v4179_v7 = vld [vmem:[%s11031_s13 + $0x1d38] sm:$0xff]  ;;  %v9498_v52 = vpack.c.bf16 %v4170_v45, %v4162_v43  ;;  %v4250_v41 = vld [vmem:[%s11031_s13 + $0x1f70] sm:$0xff]  ;;  %v4265_v43 = vld [vmem:[%s11031_s13 + $0x1fe8] sm:$0xff] }
 0x574   : > { %v5944_v10 = vadd.f32 %v4874_v3, %v3223_v57  ;;  %v5229_v20 = vpop.f32.mrb[0].mxu1  ;;  %v4876_v11 = vpop.f32.mrb[1].mxu0  ;;  %v9180_v57 = vpack.c.bf16 %v4185_v48, %v4177_v47  ;;  %v4267_v45 = vld [vmem:[%s11031_s13 + $0x1ff8] sm:$0xff] }
 0x575   : > { %v5946_v15 = vadd.f32 %v5229_v20, %v3225_v61  ;;  %v5945_v16 = vadd.f32 %v4876_v11, %v3224_v55  ;;  %v5231_v18 = vpop.f32.mrb[1].mxu1  ;;  %9163 = vmatpush1.bf16.msra.mxu0 %v9162_v62  ;;  %v4178_v61 = vld [vmem:[%s11031_s13 + $0x1d30] sm:$0xff]  ;;  %v9500_v55 = vpack.c.bf16 %v4187_v50, %v4179_v7  ;;  %v4193_v62 = vld [vmem:[%s11031_s13 + $0x1da8] sm:$0xff]  ;;  %v9200_v7 = vpack.c.bf16 %v4265_v43, %v4257_v42  ;;  %v4256_v50 = vld [vmem:[%s11031_s13 + $0x1fa0] sm:$0xff] }
 0x576   : > { %5952 = vst [vmem:[#allocation3] sm:$0xff] %v5944_v10  ;;  %v5947_v19 = vadd.f32 %v5231_v18, %v3226_v54  ;;  %9483 = vmatpush1.bf16.msra.mxu1 %v9482_v63  ;;  %9165 = vmatprep.subr.bf16.mxu0 %v9164_v1  ;;  %v4186_v54 = vld [vmem:[%s11031_s13 + $0x1d70] sm:$0xff]  ;;  %v4201_v63 = vld [vmem:[%s11031_s13 + $0x1de8] sm:$0xff]  ;;  %v4195_v1 = vld [vmem:[%s11031_s13 + $0x1db8] sm:$0xff] }
 0x577   : > { %5954 = vst [vmem:[#allocation3 + $0x10] sm:$0xff] %v5946_v15  ;;  %5953 = vst [vmem:[#allocation3 + $0x8] sm:$0xff] %v5945_v16  ;;  %9485 = vmatprep.subr.bf16.mxu1 %v9484_v58  ;;  %v9502_v0 = vpack.c.bf16 %v4186_v54, %v4178_v61  ;;  %v9184_v3 = vpack.c.bf16 %v4201_v63, %v4193_v62  ;;  %v4192_v58 = vld [vmem:[%s11031_s13 + $0x1da0] sm:$0xff]  ;;  %v9504_v9 = vpack.c.bf16 %v4203_v2, %v4195_v1  ;;  %v4202_v10 = vld [vmem:[%s11031_s13 + $0x1df0] sm:$0xff] }
 0x578   : > { %5955 = vst [vmem:[#allocation3 + $0x18] sm:$0xff] %v5947_v19  ;;  %v4209_v20 = vld [vmem:[%s11031_s13 + $0x1e28] sm:$0xff]  ;;  %v9186_v15 = vpack.c.bf16 %v4200_v5, %v4192_v58  ;;  %v9506_v16 = vpack.c.bf16 %v4202_v10, %v4194_v6  ;;  %v4216_v19 = vld [vmem:[%s11031_s13 + $0x1e60] sm:$0xff]  ;;  %v4283_v54 = vld [vmem:[%s11031_s13 + $0x2078] sm:$0xff] }
 0x579   : > { %9167 = vmatpush1.bf16.msra.mxu0 %v9166_v30  ;;  %v4217_v11 = vld [vmem:[%s11031_s13 + $0x1e68] sm:$0xff]  ;;  %v4208_v30 = vld [vmem:[%s11031_s13 + $0x1e20] sm:$0xff]  ;;  %v4282_v58 = vld [vmem:[%s11031_s13 + $0x2070] sm:$0xff] }
 0x57a   : > { %9487 = vmatpush1.bf16.msra.mxu1 %v9486_v38  ;;  %9169 = vmatprep.subr.bf16.mxu0 %v9168_v21  ;;  %v9188_v18 = vpack.c.bf16 %v4217_v11, %v4209_v20  ;;  %v4210_v38 = vld [vmem:[%s11031_s13 + $0x1e30] sm:$0xff]  ;;  %v9508_v21 = vpack.c.bf16 %v4219_v13, %v4211_v12  ;;  %v9190_v25 = vpack.c.bf16 %v4216_v19, %v4208_v30  ;;  %v4281_v61 = vld [vmem:[%s11031_s13 + $0x2068] sm:$0xff]  ;;  %v4272_v2 = vld [vmem:[%s11031_s13 + $0x2020] sm:$0xff] }
 0x57b   : > { %9489 = vmatprep.subr.bf16.mxu1 %v9488_v24  ;;  %v4227_v24 = vld [vmem:[%s11031_s13 + $0x1eb8] sm:$0xff]  ;;  %v9510_v26 = vpack.c.bf16 %v4218_v22, %v4210_v38  ;;  %v9204_v1 = vpack.c.bf16 %v4281_v61, %v4273_v60  ;;  %v4289_v5 = vld [vmem:[%s11031_s13 + $0x20a8] sm:$0xff]  ;;  %v4288_v13 = vld [vmem:[%s11031_s13 + $0x20a0] sm:$0xff] }
 0x57c   : > { %v4297_v6 = vld [vmem:[%s11031_s13 + $0x20e8] sm:$0xff]  ;;  %v4299_v10 = vld [vmem:[%s11031_s13 + $0x20f8] sm:$0xff]  ;;  %v4298_v30 = vld [vmem:[%s11031_s13 + $0x20f0] sm:$0xff] }
 0x57d   : > { %9171 = vmatpush1.bf16.msra.mxu0 %v9170_v49  ;;  %v4232_v49 = vld [vmem:[%s11031_s13 + $0x1ee0] sm:$0xff]  ;;  %v9208_v12 = vpack.c.bf16 %v4297_v6, %v4289_v5  ;;  %v4305_v19 = vld [vmem:[%s11031_s13 + $0x2128] sm:$0xff]  ;;  %v4307_v22 = vld [vmem:[%s11031_s13 + $0x2138] sm:$0xff] }
 0x57e   : > { %9491 = vmatpush1.bf16.msra.mxu1 %v9490_v56  ;;  %9173 = vmatprep.subr.bf16.mxu0 %v9172_v8  ;;  %v4226_v56 = vld [vmem:[%s11031_s13 + $0x1eb0] sm:$0xff]  ;;  %v9512_v8 = vpack.c.bf16 %v4235_v4, %v4227_v24  ;;  %v9194_v35 = vpack.c.bf16 %v4232_v49, %v4224_v28  ;;  %v4313_v38 = vld [vmem:[%s11031_s13 + $0x2168] sm:$0xff]  ;;  %v9532_v28 = vpack.c.bf16 %v4315_v14, %v4307_v22  ;;  %v4323_v29 = vld [vmem:[%s11031_s13 + $0x21b8] sm:$0xff] }
 0x57f   : > { %9493 = vmatprep.subr.bf16.mxu1 %v9492_v33  ;;  %v4243_v33 = vld [vmem:[%s11031_s13 + $0x1f38] sm:$0xff]  ;;  %v9514_v36 = vpack.c.bf16 %v4234_v17, %v4226_v56  ;;  %v9212_v4 = vpack.c.bf16 %v4313_v38, %v4305_v19  ;;  %v4314_v49 = vld [vmem:[%s11031_s13 + $0x2170] sm:$0xff]  ;;  %v4321_v56 = vld [vmem:[%s11031_s13 + $0x21a8] sm:$0xff] }
 0x580   : > { %v10232_v17 = vld [vmem:[%s11386_s20 + $0x48] sm:$0xff] }
 0x581   : > { %9175 = vmatpush1.bf16.msra.mxu0 %v9174_v53  ;;  %v4248_v53 = vld [vmem:[%s11031_s13 + $0x1f60] sm:$0xff]  ;;  %v4331_v31 = vld [vmem:[%s11031_s13 + $0x21f8] sm:$0xff] }
 0x582   : > { %9495 = vmatpush1.bf16.msra.mxu1 %v9494_v39  ;;  %9177 = vmatprep.subr.bf16.mxu0 %v9176_v40  ;;  %v4242_v39 = vld [vmem:[%s11031_s13 + $0x1f30] sm:$0xff]  ;;  %v9516_v40 = vpack.c.bf16 %v4251_v34, %v4243_v33  ;;  %v9198_v47 = vpack.c.bf16 %v4248_v53, %v4240_v46  ;;  %v9536_v53 = vpack.c.bf16 %v4331_v31, %v4323_v29  ;;  %v4339_v42 = vld [vmem:[%s11031_s13 + $0x2238] sm:$0xff]  ;;  %v4400_v31 = vld [vmem:[%s11031_s13 + $0x2420] sm:$0xff] }
 0x583   : > { %9497 = vmatprep.subr.bf16.mxu1 %v9496_v44  ;;  %v4259_v44 = vld [vmem:[%s11031_s13 + $0x1fb8] sm:$0xff]  ;;  %v9518_v48 = vpack.c.bf16 %v4250_v41, %v4242_v39  ;;  %v4322_v46 = vld [vmem:[%s11031_s13 + $0x21b0] sm:$0xff]  ;;  %v4345_v41 = vld [vmem:[%s11031_s13 + $0x2268] sm:$0xff] }
 0x584   : > { %v4330_v39 = vld [vmem:[%s11031_s13 + $0x21f0] sm:$0xff]  ;;  %v4347_v43 = vld [vmem:[%s11031_s13 + $0x2278] sm:$0xff] }
 0x585   : > { %9179 = vmatpush1.bf16.msra.mxu0 %v9178_v51  ;;  %v4264_v51 = vld [vmem:[%s11031_s13 + $0x1fe0] sm:$0xff]  ;;  %v4355_v60 = vld [vmem:[%s11031_s13 + $0x22b8] sm:$0xff] }
 0x586   : > { %9499 = vmatpush1.bf16.msra.mxu1 %v9498_v52  ;;  %9181 = vmatprep.subr.bf16.mxu0 %v9180_v57  ;;  %v4258_v52 = vld [vmem:[%s11031_s13 + $0x1fb0] sm:$0xff]  ;;  %v9520_v57 = vpack.c.bf16 %v4267_v45, %v4259_v44  ;;  %v9202_v62 = vpack.c.bf16 %v4264_v51, %v4256_v50  ;;  %v9538_v45 = vpack.c.bf16 %v4330_v39, %v4322_v46  ;;  %v4363_v61 = vld [vmem:[%s11031_s13 + $0x22f8] sm:$0xff]  ;;  %v4425_v46 = vld [vmem:[%s11031_s13 + $0x24e8] sm:$0xff] }
 0x587   : > { %9501 = vmatprep.subr.bf16.mxu1 %v9500_v55  ;;  %v4275_v55 = vld [vmem:[%s11031_s13 + $0x2038] sm:$0xff]  ;;  %v9522_v63 = vpack.c.bf16 %v4266_v59, %v4258_v52  ;;  %v4338_v50 = vld [vmem:[%s11031_s13 + $0x2230] sm:$0xff]  ;;  %v9540_v51 = vpack.c.bf16 %v4347_v43, %v4339_v42  ;;  %v4361_v59 = vld [vmem:[%s11031_s13 + $0x22e8] sm:$0xff] }
 0x588   : > { %v4346_v52 = vld [vmem:[%s11031_s13 + $0x2270] sm:$0xff]  ;;  %v4371_v5 = vld [vmem:[%s11031_s13 + $0x2338] sm:$0xff]  ;;  %v4416_v43 = vld [vmem:[%s11031_s13 + $0x24a0] sm:$0xff] }
 0x589   : > { %9183 = vmatpush1.bf16.msra.mxu0 %v9182_v32  ;;  %v4280_v32 = vld [vmem:[%s11031_s13 + $0x2060] sm:$0xff]  ;;  %v4379_v6 = vld [vmem:[%s11031_s13 + $0x2378] sm:$0xff] }
 0x58a   : > { %9503 = vmatpush1.bf16.msra.mxu1 %v9502_v0  ;;  %9185 = vmatprep.subr.bf16.mxu0 %v9184_v3  ;;  %v4274_v0 = vld [vmem:[%s11031_s13 + $0x2030] sm:$0xff]  ;;  %v9524_v3 = vpack.c.bf16 %v4283_v54, %v4275_v55  ;;  %v9206_v20 = vpack.c.bf16 %v4280_v32, %v4272_v2  ;;  %v9542_v54 = vpack.c.bf16 %v4346_v52, %v4338_v50  ;;  %v4387_v19 = vld [vmem:[%s11031_s13 + $0x23b8] sm:$0xff]  ;;  %v4441_v50 = vld [vmem:[%s11031_s13 + $0x2568] sm:$0xff] }
 0x58b   : > { %9505 = vmatprep.subr.bf16.mxu1 %v9504_v9  ;;  %v4291_v9 = vld [vmem:[%s11031_s13 + $0x20b8] sm:$0xff]  ;;  %v9526_v11 = vpack.c.bf16 %v4282_v58, %v4274_v0  ;;  %v4354_v2 = vld [vmem:[%s11031_s13 + $0x22b0] sm:$0xff]  ;;  %v9544_v32 = vpack.c.bf16 %v4363_v61, %v4355_v60  ;;  %v4377_v58 = vld [vmem:[%s11031_s13 + $0x2368] sm:$0xff] }
 0x58c   : > { %v4362_v0 = vld [vmem:[%s11031_s13 + $0x22f0] sm:$0xff]  ;;  %v4395_v38 = vld [vmem:[%s11031_s13 + $0x23f8] sm:$0xff]  ;;  %v4432_v61 = vld [vmem:[%s11031_s13 + $0x2520] sm:$0xff] }
 0x58d   : > { %9187 = vmatpush1.bf16.msra.mxu0 %v9186_v15  ;;  %v4296_v15 = vld [vmem:[%s11031_s13 + $0x20e0] sm:$0xff]  ;;  %v4427_v39 = vld [vmem:[%s11031_s13 + $0x24f8] sm:$0xff] }
 0x58e   : > { %9507 = vmatpush1.bf16.msra.mxu1 %v9506_v16  ;;  %9189 = vmatprep.subr.bf16.mxu0 %v9188_v18  ;;  %v4290_v16 = vld [vmem:[%s11031_s13 + $0x20b0] sm:$0xff]  ;;  %v9528_v18 = vpack.c.bf16 %v4299_v10, %v4291_v9  ;;  %v9210_v23 = vpack.c.bf16 %v4296_v15, %v4288_v13  ;;  %v9546_v10 = vpack.c.bf16 %v4362_v0, %v4354_v2  ;;  %v4443_v52 = vld [vmem:[%s11031_s13 + $0x2578] sm:$0xff]  ;;  %v4457_v2 = vld [vmem:[%s11031_s13 + $0x25e8] sm:$0xff] }
 0x58f   : > { %9509 = vmatprep.subr.bf16.mxu1 %v9508_v21  ;;  %v10231_v21 = vld [vmem:[%s11386_s20 + $0x30] sm:$0xff]  ;;  %v9530_v24 = vpack.c.bf16 %v4298_v30, %v4290_v16  ;;  %v4370_v13 = vld [vmem:[%s11031_s13 + $0x2330] sm:$0xff]  ;;  %v9548_v15 = vpack.c.bf16 %v4379_v6, %v4371_v5  ;;  %v4393_v30 = vld [vmem:[%s11031_s13 + $0x23e8] sm:$0xff] }
 0x590   : > { %v4378_v16 = vld [vmem:[%s11031_s13 + $0x2370] sm:$0xff]  ;;  %v4459_v0 = vld [vmem:[%s11031_s13 + $0x25f8] sm:$0xff]  ;;  %v4448_v6 = vld [vmem:[%s11031_s13 + $0x25a0] sm:$0xff] }
 0x591   : > { %9191 = vmatpush1.bf16.msra.mxu0 %v9190_v25  ;;  %v4304_v25 = vld [vmem:[%s11031_s13 + $0x2120] sm:$0xff]  ;;  %v9550_v22 = vpack.c.bf16 %v4378_v16, %v4370_v13  ;;  %v4473_v13 = vld [vmem:[%s11031_s13 + $0x2668] sm:$0xff]  ;;  %v4475_v16 = vld [vmem:[%s11031_s13 + $0x2678] sm:$0xff] }
 0x592   : > { %9511 = vmatpush1.bf16.msra.mxu1 %v9510_v26  ;;  %9193 = vmatprep.subr.bf16.mxu0 %v9192_v27  ;;  %v4312_v26 = vld [vmem:[%s11031_s13 + $0x2160] sm:$0xff]  ;;  %v4306_v27 = vld [vmem:[%s11031_s13 + $0x2130] sm:$0xff] }
 0x593   : > { %9513 = vmatprep.subr.bf16.mxu1 %v9512_v8  ;;  %v4329_v8 = vld [vmem:[%s11031_s13 + $0x21e8] sm:$0xff]  ;;  %v9214_v33 = vpack.c.bf16 %v4312_v26, %v4304_v25  ;;  %v9534_v34 = vpack.c.bf16 %v4314_v49, %v4306_v27  ;;  %v9552_v25 = vpack.c.bf16 %v4395_v38, %v4387_v19  ;;  %v4394_v26 = vld [vmem:[%s11031_s13 + $0x23f0] sm:$0xff]  ;;  %v4403_v49 = vld [vmem:[%s11031_s13 + $0x2438] sm:$0xff] }
 0x594   : > { %v4401_v27 = vld [vmem:[%s11031_s13 + $0x2428] sm:$0xff]  ;;  %v4464_v38 = vld [vmem:[%s11031_s13 + $0x2620] sm:$0xff] }
 0x595   : > { %9195 = vmatpush1.bf16.msra.mxu0 %v9194_v35  ;;  %v9216_v35 = vpack.c.bf16 %v4329_v8, %v4321_v56  ;;  %v4411_v56 = vld [vmem:[%s11031_s13 + $0x2478] sm:$0xff] }
 0x596   : > { %9515 = vmatpush1.bf16.msra.mxu1 %v9514_v36  ;;  %9197 = vmatprep.subr.bf16.mxu0 %v9196_v37  ;;  %v4320_v36 = vld [vmem:[%s11031_s13 + $0x21a0] sm:$0xff] }
 0x597   : > { %9517 = vmatprep.subr.bf16.mxu1 %v9516_v40  ;;  %v4328_v37 = vld [vmem:[%s11031_s13 + $0x21e0] sm:$0xff]  ;;  %v4337_v40 = vld [vmem:[%s11031_s13 + $0x2228] sm:$0xff] }
 0x598   : > { %v9218_v44 = vpack.c.bf16 %v4328_v37, %v4320_v36  ;;  %v4410_v36 = vld [vmem:[%s11031_s13 + $0x2470] sm:$0xff]  ;;  %v4417_v37 = vld [vmem:[%s11031_s13 + $0x24a8] sm:$0xff] }
 0x599   : > { %9199 = vmatpush1.bf16.msra.mxu0 %v9198_v47  ;;  %v9220_v47 = vpack.c.bf16 %v4345_v41, %v4337_v40  ;;  %v9240_v42 = vpack.c.bf16 %v4425_v46, %v4417_v37 }
 0x59a   : > { %9519 = vmatpush1.bf16.msra.mxu1 %v9518_v48  ;;  %9201 = vmatprep.subr.bf16.mxu0 %v9200_v7  ;;  %v4336_v48 = vld [vmem:[%s11031_s13 + $0x2220] sm:$0xff] }
 0x59b   : > { %9521 = vmatprep.subr.bf16.mxu1 %v9520_v57  ;;  %v4344_v7 = vld [vmem:[%s11031_s13 + $0x2260] sm:$0xff]  ;;  %v4353_v57 = vld [vmem:[%s11031_s13 + $0x22a8] sm:$0xff] }
 0x59c   : > { %v9222_v55 = vpack.c.bf16 %v4344_v7, %v4336_v48  ;;  %v4426_v48 = vld [vmem:[%s11031_s13 + $0x24f0] sm:$0xff]  ;;  %v4433_v7 = vld [vmem:[%s11031_s13 + $0x2528] sm:$0xff] }
 0x59d   : > { %9203 = vmatpush1.bf16.msra.mxu0 %v9202_v62  ;;  %v9224_v62 = vpack.c.bf16 %v4361_v59, %v4353_v57  ;;  %v9244_v60 = vpack.c.bf16 %v4441_v50, %v4433_v7 }
 0x59e   : > { %9523 = vmatpush1.bf16.msra.mxu1 %v9522_v63  ;;  %9205 = vmatprep.subr.bf16.mxu0 %v9204_v1  ;;  %v4352_v63 = vld [vmem:[%s11031_s13 + $0x22a0] sm:$0xff] }
 0x59f   : > { %9525 = vmatprep.subr.bf16.mxu1 %v9524_v3  ;;  %v4360_v1 = vld [vmem:[%s11031_s13 + $0x22e0] sm:$0xff]  ;;  %v4369_v3 = vld [vmem:[%s11031_s13 + $0x2328] sm:$0xff] }
 0x5a0   : > { %5512 = vmatmul.mubr.f32.vlgmr.msra.gmra.mrb[2].mxu0 %v10231_v21  ;;  %v9226_v9 = vpack.c.bf16 %v4360_v1, %v4352_v63  ;;  %v4442_v63 = vld [vmem:[%s11031_s13 + $0x2570] sm:$0xff]  ;;  %v4449_v1 = vld [vmem:[%s11031_s13 + $0x25a8] sm:$0xff] }
 0x5a1   : > { %9207 = vmatpush1.bf16.msra.mxu0 %v9206_v20  ;;  %5867 = vmatmul.mubr.f32.vlgmr.msra.gmra.mrb[2].mxu1 %v10231_v21  ;;  %v9228_v20 = vpack.c.bf16 %v4377_v58, %v4369_v3  ;;  %v9248_v5 = vpack.c.bf16 %v4457_v2, %v4449_v1  ;;  %v3229_v1 = vld [vmem:[#allocation3 + $0x30] sm:$0xff]  ;;  %v3228_v2 = vld [vmem:[#allocation3 + $0x28] sm:$0xff] }
 0x5a2   : > { %9527 = vmatpush1.bf16.msra.mxu1 %v9526_v11  ;;  %9209 = vmatprep.subr.bf16.mxu0 %v9208_v12  ;;  %v4368_v11 = vld [vmem:[%s11031_s13 + $0x2320] sm:$0xff] }
 0x5a3   : > { %9529 = vmatprep.subr.bf16.mxu1 %v9528_v18  ;;  %5582 = vmatprep.mubr.f32.mxu0 %v10232_v17  ;;  %v4376_v12 = vld [vmem:[%s11031_s13 + $0x2360] sm:$0xff]  ;;  %v4385_v18 = vld [vmem:[%s11031_s13 + $0x23a8] sm:$0xff] }
 0x5a4   : > { %5937 = vmatprep.mubr.f32.mxu1 %v10232_v17  ;;  %v9230_v21 = vpack.c.bf16 %v4376_v12, %v4368_v11  ;;  %v9232_v14 = vpack.c.bf16 %v4393_v30, %v4385_v18  ;;  %v4458_v11 = vld [vmem:[%s11031_s13 + $0x25f0] sm:$0xff]  ;;  %v4465_v12 = vld [vmem:[%s11031_s13 + $0x2628] sm:$0xff] }
 0x5a5   : > { %9211 = vmatpush1.bf16.msra.mxu0 %v9210_v23  ;;  %v4384_v23 = vld [vmem:[%s11031_s13 + $0x23a0] sm:$0xff]  ;;  %v9252_v19 = vpack.c.bf16 %v4473_v13, %v4465_v12  ;;  %v6084_v12 = vld [vmem:[#allocation14 + $0x20] sm:$0xff] (!%p7433_p10) }
 0x5a6   : > { %9531 = vmatpush1.bf16.msra.mxu1 %v9530_v24  ;;  %9213 = vmatprep.subr.bf16.mxu0 %v9212_v4  ;;  %v4392_v24 = vld [vmem:[%s11031_s13 + $0x23e0] sm:$0xff]  ;;  %v4386_v4 = vld [vmem:[%s11031_s13 + $0x23b0] sm:$0xff] }
 0x5a7   : > { %9533 = vmatprep.subr.bf16.mxu1 %v9532_v28  ;;  %v4409_v28 = vld [vmem:[%s11031_s13 + $0x2468] sm:$0xff]  ;;  %v9234_v8 = vpack.c.bf16 %v4392_v24, %v4384_v23  ;;  %v9554_v17 = vpack.c.bf16 %v4394_v26, %v4386_v4  ;;  %v4474_v23 = vld [vmem:[%s11031_s13 + $0x2670] sm:$0xff]  ;;  %v4491_v26 = vld [vmem:[%s11031_s13 + $0x26f8] sm:$0xff] }
 0x5a8   : > { %v9236_v29 = vpack.c.bf16 %v4409_v28, %v4401_v27  ;;  %v4481_v24 = vld [vmem:[%s11031_s13 + $0x26a8] sm:$0xff]  ;;  %v6080_v13 = vld [vmem:[#allocation14] sm:$0xff] (!%p7433_p10) }
 0x5a9   : > { %9215 = vmatpush1.bf16.msra.mxu0 %v9214_v33  ;;  %v4408_v33 = vld [vmem:[%s11031_s13 + $0x2460] sm:$0xff]  ;;  %v4489_v4 = vld [vmem:[%s11031_s13 + $0x26e8] sm:$0xff] }
 0x5aa   : > { %9535 = vmatpush1.bf16.msra.mxu1 %v9534_v34  ;;  %9217 = vmatprep.subr.bf16.mxu0 %v9216_v35  ;;  %v4402_v34 = vld [vmem:[%s11031_s13 + $0x2430] sm:$0xff]  ;;  %v9556_v35 = vpack.c.bf16 %v4411_v56, %v4403_v49  ;;  %v9238_v40 = vpack.c.bf16 %v4408_v33, %v4400_v31  ;;  %v9256_v49 = vpack.c.bf16 %v4489_v4, %v4481_v24  ;;  %v4480_v56 = vld [vmem:[%s11031_s13 + $0x26a0] sm:$0xff]  ;;  %v4497_v33 = vld [vmem:[%s11031_s13 + $0x2728] sm:$0xff] }
 0x5ab   : > { %9537 = vmatprep.subr.bf16.mxu1 %v9536_v53  ;;  %v4419_v53 = vld [vmem:[%s11031_s13 + $0x24b8] sm:$0xff]  ;;  %v9558_v41 = vpack.c.bf16 %v4410_v36, %v4402_v34  ;;  %v4490_v31 = vld [vmem:[%s11031_s13 + $0x26f0] sm:$0xff]  ;;  %v4505_v34 = vld [vmem:[%s11031_s13 + $0x2768] sm:$0xff] }
 0x5ac   : > { %v4507_v36 = vld [vmem:[%s11031_s13 + $0x2778] sm:$0xff] }
 0x5ad   : > { %9219 = vmatpush1.bf16.msra.mxu0 %v9218_v44  ;;  %v4424_v44 = vld [vmem:[%s11031_s13 + $0x24e0] sm:$0xff] }
 0x5ae   : > { %9539 = vmatpush1.bf16.msra.mxu1 %v9538_v45  ;;  %9221 = vmatprep.subr.bf16.mxu0 %v9220_v47  ;;  %v4418_v45 = vld [vmem:[%s11031_s13 + $0x24b0] sm:$0xff]  ;;  %v9560_v47 = vpack.c.bf16 %v4427_v39, %v4419_v53  ;;  %v9242_v57 = vpack.c.bf16 %v4424_v44, %v4416_v43  ;;  %v9260_v53 = vpack.c.bf16 %v4505_v34, %v4497_v33  ;;  %v4496_v39 = vld [vmem:[%s11031_s13 + $0x2720] sm:$0xff]  ;;  %v4513_v44 = vld [vmem:[%s11031_s13 + $0x27a8] sm:$0xff]  ;;  %v5974_v33 = vlaneseq (!%p7433_p10) }
 0x5af   : > { %9541 = vmatprep.subr.bf16.mxu1 %v9540_v51  ;;  %v4435_v51 = vld [vmem:[%s11031_s13 + $0x2538] sm:$0xff]  ;;  %v9562_v59 = vpack.c.bf16 %v4426_v48, %v4418_v45  ;;  %v4506_v43 = vld [vmem:[%s11031_s13 + $0x2770] sm:$0xff]  ;;  %v4521_v45 = vld [vmem:[%s11031_s13 + $0x27e8] sm:$0xff] }
 0x5b0   : > { %v4523_v48 = vld [vmem:[%s11031_s13 + $0x27f8] sm:$0xff] }
 0x5b1   : > { %9223 = vmatpush1.bf16.msra.mxu0 %v9222_v55  ;;  %v4440_v55 = vld [vmem:[%s11031_s13 + $0x2560] sm:$0xff] }
 0x5b2   : > { %9543 = vmatpush1.bf16.msra.mxu1 %v9542_v54  ;;  %9225 = vmatprep.subr.bf16.mxu0 %v9224_v62  ;;  %v4434_v54 = vld [vmem:[%s11031_s13 + $0x2530] sm:$0xff]  ;;  %v9564_v62 = vpack.c.bf16 %v4443_v52, %v4435_v51  ;;  %v9246_v3 = vpack.c.bf16 %v4440_v55, %v4432_v61  ;;  %v9264_v51 = vpack.c.bf16 %v4521_v45, %v4513_v44  ;;  %v4512_v52 = vld [vmem:[%s11031_s13 + $0x27a0] sm:$0xff]  ;;  %v6117_v44 = vld [vmem:[#allocation14 + $0x128] sm:$0xff] (!%p7433_p10) }
 0x5b3   : > { %9545 = vmatprep.subr.bf16.mxu1 %v9544_v32  ;;  %v4451_v32 = vld [vmem:[%s11031_s13 + $0x25b8] sm:$0xff]  ;;  %v9566_v58 = vpack.c.bf16 %v4442_v63, %v4434_v54  ;;  %v4522_v61 = vld [vmem:[%s11031_s13 + $0x27f0] sm:$0xff] }
 0x5b4   : > { %v3227_v63 = vld [vmem:[#allocation3 + $0x20] sm:$0xff] }
 0x5b5   : > { %9227 = vmatpush1.bf16.msra.mxu0 %v9226_v9  ;;  %v4456_v9 = vld [vmem:[%s11031_s13 + $0x25e0] sm:$0xff]  ;;  %v6120_v45 = vld [vmem:[#allocation14 + $0x140] sm:$0xff] (!%p7433_p10) }
 0x5b6   : > { %9547 = vmatpush1.bf16.msra.mxu1 %v9546_v10  ;;  %9229 = vmatprep.subr.bf16.mxu0 %v9228_v20  ;;  %v4450_v10 = vld [vmem:[%s11031_s13 + $0x25b0] sm:$0xff]  ;;  %v9568_v20 = vpack.c.bf16 %v4459_v0, %v4451_v32  ;;  %v9250_v18 = vpack.c.bf16 %v4456_v9, %v4448_v6  ;;  %v3230_v0 = vld [vmem:[#allocation3 + $0x38] sm:$0xff] }
 0x5b7   : > { %9549 = vmatprep.subr.bf16.mxu1 %v9548_v15  ;;  %v4467_v15 = vld [vmem:[%s11031_s13 + $0x2638] sm:$0xff]  ;;  %v9570_v30 = vpack.c.bf16 %v4458_v11, %v4450_v10 }
 0x5b8   : > { %v6081_v11 = vld [vmem:[#allocation14 + $0x8] sm:$0xff] (!%p7433_p10) }
 0x5b9   : > { %9231 = vmatpush1.bf16.msra.mxu0 %v9230_v21  ;;  %v4472_v21 = vld [vmem:[%s11031_s13 + $0x2660] sm:$0xff] }
 0x5ba   : > { %9551 = vmatpush1.bf16.msra.mxu1 %v9550_v22  ;;  %9233 = vmatprep.subr.bf16.mxu0 %v9232_v14  ;;  %v4466_v22 = vld [vmem:[%s11031_s13 + $0x2630] sm:$0xff]  ;;  %v9572_v14 = vpack.c.bf16 %v4475_v16, %v4467_v15  ;;  %v9254_v27 = vpack.c.bf16 %v4472_v21, %v4464_v38  ;;  %v9588_v15 = vpack.c.bf16 (!%p7433_p10), %v6084_v12, %v6081_v11  ;;  %v6083_v16 = vld [vmem:[#allocation14 + $0x18] sm:$0xff] (!%p7433_p10)  ;;  %v6086_v21 = vld [vmem:[#allocation14 + $0x30] sm:$0xff] (!%p7433_p10) }
 0x5bb   : > { %9553 = vmatprep.subr.bf16.mxu1 %v9552_v25  ;;  %v4483_v25 = vld [vmem:[%s11031_s13 + $0x26b8] sm:$0xff]  ;;  %v9574_v28 = vpack.c.bf16 %v4474_v23, %v4466_v22  ;;  %v6096_v23 = vld [vmem:[#allocation14 + $0x80] sm:$0xff] (!%p7433_p10) }
 0x5bc   : > { %v6089_v22 = vld [vmem:[#allocation14 + $0x48] sm:$0xff] (!%p7433_p10) }
 0x5bd   : > { %9235 = vmatpush1.bf16.msra.mxu0 %v9234_v8  ;;  %v4488_v8 = vld [vmem:[%s11031_s13 + $0x26e0] sm:$0xff]  ;;  %v9594_v24 = vpack.c.bf16 (!%p7433_p10), %v6089_v22, %v6086_v21  ;;  %v6128_v22 = vld [vmem:[#allocation14 + $0x180] sm:$0xff] (!%p7433_p10) }
 0x5be   : > { %9555 = vmatpush1.bf16.msra.mxu1 %v9554_v17  ;;  %9237 = vmatprep.subr.bf16.mxu0 %v9236_v29  ;;  %v4482_v17 = vld [vmem:[%s11031_s13 + $0x26b0] sm:$0xff]  ;;  %v9576_v29 = vpack.c.bf16 %v4491_v26, %v4483_v25  ;;  %v9258_v37 = vpack.c.bf16 %v4488_v8, %v4480_v56  ;;  %v6095_v26 = vld [vmem:[#allocation14 + $0x78] sm:$0xff] (!%p7433_p10)  ;;  %v6098_v8 = vld [vmem:[#allocation14 + $0x90] sm:$0xff] (!%p7433_p10) }
 0x5bf   : > { %9557 = vmatprep.subr.bf16.mxu1 %v9556_v35  ;;  %v4499_v35 = vld [vmem:[%s11031_s13 + $0x2738] sm:$0xff]  ;;  %v9578_v46 = vpack.c.bf16 %v4490_v31, %v4482_v17  ;;  %v6092_v25 = vld [vmem:[#allocation14 + $0x60] sm:$0xff] (!%p7433_p10) }
 0x5c0   : > { %v6101_v17 = vld [vmem:[#allocation14 + $0xa8] sm:$0xff] (!%p7433_p10)  ;;  %v6108_v31 = vld [vmem:[#allocation14 + $0xe0] sm:$0xff] (!%p7433_p10) }
 0x5c1   : > { %9239 = vmatpush1.bf16.msra.mxu0 %v9238_v40  ;;  %v4504_v40 = vld [vmem:[%s11031_s13 + $0x2760] sm:$0xff]  ;;  %v9602_v34 = vpack.c.bf16 (!%p7433_p10), %v6101_v17, %v6098_v8 }
 0x5c2   : > { %9559 = vmatpush1.bf16.msra.mxu1 %v9558_v41  ;;  %9241 = vmatprep.subr.bf16.mxu0 %v9240_v42  ;;  %v4498_v41 = vld [vmem:[%s11031_s13 + $0x2730] sm:$0xff]  ;;  %v9580_v42 = vpack.c.bf16 %v4507_v36, %v4499_v35  ;;  %v9262_v7 = vpack.c.bf16 %v4504_v40, %v4496_v39  ;;  %v12591_v39 = vshrl.u32 (!%p7433_p10), %v5974_v33, 7  ;;  %v6094_v17 = vld [vmem:[#allocation14 + $0x70] sm:$0xff] (!%p7433_p10) }
 0x5c3   : > { %9561 = vmatprep.subr.bf16.mxu1 %v9560_v47  ;;  %v4515_v47 = vld [vmem:[%s11031_s13 + $0x27b8] sm:$0xff]  ;;  %v9582_v50 = vpack.c.bf16 %v4506_v43, %v4498_v41  ;;  %v6104_v36 = vld [vmem:[#allocation14 + $0xc0] sm:$0xff] (!%p7433_p10) }
 0x5c4   : > { %v6113_v43 = vld [vmem:[#allocation14 + $0x108] sm:$0xff] (!%p7433_p10)  ;;  %v6148_v33 = vld [vmem:[#allocation14 + $0x220] sm:$0xff] (!%p7433_p10) }
 0x5c5   : > { %9243 = vmatpush1.bf16.msra.mxu0 %v9242_v57  ;;  %v4520_v57 = vld [vmem:[%s11031_s13 + $0x27e0] sm:$0xff] }
 0x5c6   : > { %9563 = vmatpush1.bf16.msra.mxu1 %v9562_v59  ;;  %9245 = vmatprep.subr.bf16.mxu0 %v9244_v60  ;;  %v9584_v59 = vpack.c.bf16 %v4523_v48, %v4515_v47  ;;  %v4514_v60 = vld [vmem:[%s11031_s13 + $0x27b0] sm:$0xff]  ;;  %v9266_v55 = vpack.c.bf16 %v4520_v57, %v4512_v52  ;;  %v12594_v47 = vsub.s32 (!%p7433_p10), 1, %v12591_v39  ;;  %v5965_v52 = vld [vmem:[#allocation3 + $0x8] sm:$0xff] (!%p7433_p10)  ;;  %v12596_v57 = vld [vmem:[#allocation11] sm:$0xff] (!%p7433_p10) }
 0x5c7   : > { %9565 = vmatprep.subr.bf16.mxu1 %v9564_v62  ;;  %v9586_v54 = vpack.c.bf16 %v4522_v61, %v4514_v60  ;;  %v10233_v62 = vld [vmem:[%s11386_s20 + $0x40] sm:$0xff]  ;;  %v6126_v60 = vld [vmem:[#allocation14 + $0x170] sm:$0xff] (!%p7433_p10) }
 0x5c8   : > { %v5981_v61 = vrot.slane (!%p7433_p10), %v12596_v57, %v12594_v47 }
 0x5c9   : > { %9247 = vmatpush1.bf16.msra.mxu0 %v9246_v3 }
 0x5ca   : > { %9567 = vmatpush1.bf16.msra.mxu1 %v9566_v58  ;;  %9249 = vmatprep.subr.bf16.mxu0 %v9248_v5 }
 0x5cb   : > { %9569 = vmatprep.subr.bf16.mxu1 %v9568_v20 }
 0x5cd   : > { %9251 = vmatpush1.bf16.msra.mxu0 %v9250_v18  ;;  %v6087_v18 = vld [vmem:[#allocation14 + $0x38] sm:$0xff] (!%p7433_p10) }
 0x5ce   : > { %9571 = vmatpush1.bf16.msra.mxu1 %v9570_v30  ;;  %9253 = vmatprep.subr.bf16.mxu0 %v9252_v19  ;;  %v6090_v30 = vld [vmem:[#allocation14 + $0x50] sm:$0xff] (!%p7433_p10)  ;;  %v9590_v19 = vpack.c.bf16 (!%p7433_p10), %v6083_v16, %v6080_v13  ;;  %v6136_v13 = vld [vmem:[#allocation14 + $0x1c0] sm:$0xff] (!%p7433_p10) }
 0x5cf   : > { %9573 = vmatprep.subr.bf16.mxu1 %v9572_v14  ;;  %v9592_v38 = vpack.c.bf16 (!%p7433_p10), %v6090_v30, %v6087_v18  ;;  %v6093_v14 = vld [vmem:[#allocation14 + $0x68] sm:$0xff] (!%p7433_p10)  ;;  %v6088_v18 = vld [vmem:[#allocation14 + $0x40] sm:$0xff] (!%p7433_p10)  ;;  %v6091_v30 = vld [vmem:[#allocation14 + $0x58] sm:$0xff] (!%p7433_p10) }
 0x5d0   : > { %v9596_v4 = vpack.c.bf16 (!%p7433_p10), %v6096_v23, %v6093_v14  ;;  %v9850_v23 = vpack.c.bf16 (!%p7433_p10), %v6091_v30, %v6088_v18  ;;  %v6152_v18 = vld [vmem:[#allocation14 + $0x240] sm:$0xff] (!%p7433_p10)  ;;  %v6155_v30 = vld [vmem:[#allocation14 + $0x258] sm:$0xff] (!%p7433_p10) }
 0x5d1   : > { %9255 = vmatpush1.bf16.msra.mxu0 %v9254_v27  ;;  %v6099_v27 = vld [vmem:[#allocation14 + $0x98] sm:$0xff] (!%p7433_p10) }
 0x5d2   : > { %9575 = vmatpush1.bf16.msra.mxu1 %v9574_v28  ;;  %9257 = vmatprep.subr.bf16.mxu0 %v9256_v49  ;;  %v6102_v28 = vld [vmem:[#allocation14 + $0xb0] sm:$0xff] (!%p7433_p10)  ;;  %v9598_v49 = vpack.c.bf16 (!%p7433_p10), %v6095_v26, %v6092_v25  ;;  %v6131_v25 = vld [vmem:[#allocation14 + $0x198] sm:$0xff] (!%p7433_p10) }
 0x5d3   : > { %9577 = vmatprep.subr.bf16.mxu1 %v9576_v29  ;;  %v9600_v56 = vpack.c.bf16 (!%p7433_p10), %v6102_v28, %v6099_v27  ;;  %v6105_v29 = vld [vmem:[#allocation14 + $0xc8] sm:$0xff] (!%p7433_p10)  ;;  %v6135_v26 = vld [vmem:[#allocation14 + $0x1b8] sm:$0xff] (!%p7433_p10) }
 0x5d4   : > { %v9604_v35 = vpack.c.bf16 (!%p7433_p10), %v6108_v31, %v6105_v29  ;;  %v6145_v27 = vld [vmem:[#allocation14 + $0x208] sm:$0xff] (!%p7433_p10) }
 0x5d5   : > { %9259 = vmatpush1.bf16.msra.mxu0 %v9258_v37  ;;  %v6107_v37 = vld [vmem:[#allocation14 + $0xd8] sm:$0xff] (!%p7433_p10)  ;;  %v6097_v29 = vld [vmem:[#allocation14 + $0x88] sm:$0xff] (!%p7433_p10) }
 0x5d6   : > { %9579 = vmatpush1.bf16.msra.mxu1 %v9578_v46  ;;  %9261 = vmatprep.subr.bf16.mxu0 %v9260_v53  ;;  %v6111_v46 = vld [vmem:[#allocation14 + $0xf8] sm:$0xff] (!%p7433_p10)  ;;  %v6114_v53 = vld [vmem:[#allocation14 + $0x110] sm:$0xff] (!%p7433_p10)  ;;  %v9606_v40 = vpack.c.bf16 (!%p7433_p10), %v6107_v37, %v6104_v36  ;;  %v6137_v37 = vld [vmem:[#allocation14 + $0x1c8] sm:$0xff] (!%p7433_p10) }
 0x5d7   : > { %9581 = vmatprep.subr.bf16.mxu1 %v9580_v42  ;;  %v9608_v41 = vpack.c.bf16 (!%p7433_p10), %v6114_v53, %v6111_v46  ;;  %v6110_v42 = vld [vmem:[#allocation14 + $0xf0] sm:$0xff] (!%p7433_p10)  ;;  %v9854_v46 = vpack.c.bf16 (!%p7433_p10), %v6097_v29, %v6094_v17 }
 0x5d8   : > { %v9610_v48 = vpack.c.bf16 (!%p7433_p10), %v6113_v43, %v6110_v42  ;;  %v6134_v36 = vld [vmem:[#allocation14 + $0x1b0] sm:$0xff] (!%p7433_p10)  ;;  %v6100_v42 = vld [vmem:[#allocation14 + $0xa0] sm:$0xff] (!%p7433_p10)  ;;  %v6103_v43 = vld [vmem:[#allocation14 + $0xb8] sm:$0xff] (!%p7433_p10) }
 0x5d9   : > { %9263 = vmatpush1.bf16.msra.mxu0 %v9262_v7  ;;  %v6116_v7 = vld [vmem:[#allocation14 + $0x120] sm:$0xff] (!%p7433_p10)  ;;  %v6158_v29 = vld [vmem:[#allocation14 + $0x270] sm:$0xff] (!%p7433_p10) }
 0x5da   : > { %9583 = vmatpush1.bf16.msra.mxu1 %v9582_v50  ;;  %9265 = vmatprep.subr.bf16.mxu0 %v9264_v51  ;;  %v9612_v50 = vpack.c.bf16 (!%p7433_p10), %v6120_v45, %v6117_v44  ;;  %v6119_v51 = vld [vmem:[#allocation14 + $0x138] sm:$0xff] (!%p7433_p10)  ;;  %v6144_v44 = vld [vmem:[#allocation14 + $0x200] sm:$0xff] (!%p7433_p10)  ;;  %v6154_v45 = vld [vmem:[#allocation14 + $0x250] sm:$0xff] (!%p7433_p10) }
 0x5db   : > { %9585 = vmatprep.subr.bf16.mxu1 %v9584_v59  ;;  %v6123_v59 = vld [vmem:[#allocation14 + $0x158] sm:$0xff] (!%p7433_p10) }
 0x5dd   : > { %9267 = vmatpush1.bf16.msra.mxu0 %v9266_v55  ;;  %v12600_v55 = vld [vmem:[#allocation12] sm:$0xff] (!%p7433_p10) }
 0x5de   : > { %9587 = vmatpush1.bf16.msra.mxu1 %v9586_v54  ;;  %9589 = vmatprep.subr.bf16.mxu0 (!%p7433_p10), %v9588_v15  ;;  %v6031_v54 = vrot.slane (!%p7433_p10), %v12600_v55, %v12594_v47  ;;  %v6139_v15 = vld [vmem:[#allocation14 + $0x1d8] sm:$0xff] (!%p7433_p10) }
 0x5df   : > { %v9848_v16 = vpack.c.bf16 (!%p7433_p10), %v6139_v15, %v6136_v13  ;;  %v6166_v13 = vld [vmem:[#allocation14 + $0x2b0] sm:$0xff] (!%p7433_p10)  ;;  %v6169_v15 = vld [vmem:[#allocation14 + $0x2c8] sm:$0xff] (!%p7433_p10) }
 0x5e0   : > { %5583 = vmatmul.mubr.f32.vlgmr.msra.gmra.mrb[2].mxu0 %v10233_v62 }
 0x5e1   : > { %5938 = vmatmul.mubr.f32.vlgmr.msra.gmra.mrb[2].mxu1 %v10233_v62  ;;  %9591 = vmatpush1.bf16.msra.mxu0 (!%p7433_p10), %v9590_v19  ;;  %v6130_v62 = vld [vmem:[#allocation14 + $0x190] sm:$0xff] (!%p7433_p10) }
 0x5e2   : > { %9593 = vmatprep.subr.bf16.mxu0 (!%p7433_p10), %v9592_v38  ;;  %v5992_v38 = vsub.s32 (!%p7433_p10), 4, %v12591_v39 }
 0x5e4   : > { %v12616_v31 = vrot.slane (!%p7433_p10), %v12600_v55, %v5992_v38 }
 0x5e5   : > { %9595 = vmatpush1.bf16.msra.mxu0 (!%p7433_p10), %v9594_v24  ;;  %v6142_v24 = vld [vmem:[#allocation14 + $0x1f0] sm:$0xff] (!%p7433_p10) }
 0x5e6   : > { %9597 = vmatprep.subr.bf16.mxu0 (!%p7433_p10), %v9596_v4  ;;  %v9852_v8 = vpack.c.bf16 (!%p7433_p10), %v6145_v27, %v6142_v24  ;;  %v9868_v24 = vpack.c.bf16 (!%p7433_p10), %v6169_v15, %v6166_v13  ;;  %v6172_v27 = vld [vmem:[#allocation14 + $0x2e0] sm:$0xff] (!%p7433_p10)  ;;  %v6238_v15 = vld [vmem:[#allocation14 + $0x4f0] sm:$0xff] (!%p7433_p10) }
 0x5e7   : > { %v6180_v13 = vld [vmem:[#allocation14 + $0x320] sm:$0xff] (!%p7433_p10) }
 0x5e9   : > { %9599 = vmatpush1.bf16.msra.mxu0 (!%p7433_p10), %v9598_v49  ;;  %v12613_v49 = vrot.slane (!%p7433_p10), %v12596_v57, %v5992_v38  ;;  %v6159_v38 = vld [vmem:[#allocation14 + $0x278] sm:$0xff] (!%p7433_p10) }
 0x5ea   : > { %9601 = vmatprep.subr.bf16.mxu0 (!%p7433_p10), %v9600_v56  ;;  %v6138_v56 = vld [vmem:[#allocation14 + $0x1d0] sm:$0xff] (!%p7433_p10) }
 0x5eb   : > { %v9624_v53 = vpack.c.bf16 (!%p7433_p10), %v6138_v56, %v6135_v26  ;;  %v5964_v26 = vld [vmem:[#allocation3] sm:$0xff] (!%p7433_p10)  ;;  %v6175_v56 = vld [vmem:[#allocation14 + $0x2f8] sm:$0xff] (!%p7433_p10) }
 0x5ed   : > { %9603 = vmatpush1.bf16.msra.mxu0 (!%p7433_p10), %v9602_v34  ;;  %v6151_v34 = vld [vmem:[#allocation14 + $0x238] sm:$0xff] (!%p7433_p10) }
 0x5ee   : > { %9605 = vmatprep.subr.bf16.mxu0 (!%p7433_p10), %v9604_v35  ;;  %v9622_v35 = vpack.c.bf16 (!%p7433_p10), %v6131_v25, %v6128_v22  ;;  %v6121_v25 = vld [vmem:[#allocation14 + $0x148] sm:$0xff] (!%p7433_p10) }
 0x5f1   : > { %9607 = vmatpush1.bf16.msra.mxu0 (!%p7433_p10), %v9606_v40  ;;  %v6141_v40 = vld [vmem:[#allocation14 + $0x1e8] sm:$0xff] (!%p7433_p10) }
 0x5f2   : > { %9609 = vmatprep.subr.bf16.mxu0 (!%p7433_p10), %v9608_v41  ;;  %v9856_v41 = vpack.c.bf16 (!%p7433_p10), %v6151_v34, %v6148_v33  ;;  %v6161_v33 = vld [vmem:[#allocation14 + $0x288] sm:$0xff] (!%p7433_p10) }
 0x5f5   : > { %9611 = vmatpush1.bf16.msra.mxu0 (!%p7433_p10), %v9610_v48  ;;  %v6157_v48 = vld [vmem:[#allocation14 + $0x268] sm:$0xff] (!%p7433_p10) }
 0x5f6   : > { %9613 = vmatprep.subr.bf16.mxu0 (!%p7433_p10), %v9612_v50  ;;  %v6140_v50 = vld [vmem:[#allocation14 + $0x1e0] sm:$0xff] (!%p7433_p10) }
 0x6b2   : > { %5963 = sbr.rel (%p7433_p10) target bundleno = 2418 (0x972), region = 120 }
 0x6b3   : > { %v5584_v32 = vpop.f32.mrb[2].mxu0 }
 0x6b4   : > { %v5948_v3 = vadd.f32 %v5584_v32, %v3227_v63  ;;  %v5939_v58 = vpop.f32.mrb[2].mxu1  ;;  %v5586_v5 = vpop.f32.mrb[3].mxu0  ;;  %v6133_v63 = vld [vmem:[#allocation14 + $0x1a8] sm:$0xff] (!%p7433_p10)  ;;  %v6015_v32 = vmul.f32 (!%p7433_p10), %v5981_v61, %v5965_v52  ;;  %v9858_v52 = vpack.c.bf16 (!%p7433_p10), %v6103_v43, %v6100_v42  ;;  %v9860_v61 = vpack.c.bf16 (!%p7433_p10), %v6157_v48, %v6154_v45  ;;  %v6226_v42 = vld [vmem:[#allocation14 + $0x490] sm:$0xff] (!%p7433_p10)  ;;  %v6164_v45 = vld [vmem:[#allocation14 + $0x2a0] sm:$0xff] (!%p7433_p10) }
 0x6b5   : > { %v5950_v6 = vadd.f32 %v5939_v58, %v3229_v1  ;;  %v5949_v9 = vadd.f32 %v5586_v5, %v3228_v2  ;;  %v5941_v10 = vpop.f32.mrb[3].mxu1  ;;  %v9614_v1 = vpack.c.bf16 (!%p7433_p10), %v6119_v51, %v6116_v7  ;;  %v6122_v2 = vld [vmem:[#allocation14 + $0x150] sm:$0xff] (!%p7433_p10)  ;;  %v9616_v58 = vpack.c.bf16 (!%p7433_p10), %v6126_v60, %v6123_v59  ;;  %v6125_v5 = vld [vmem:[#allocation14 + $0x168] sm:$0xff] (!%p7433_p10)  ;;  %v6143_v51 = vld [vmem:[#allocation14 + $0x1f8] sm:$0xff] (!%p7433_p10) }
 0x6b6   : > { %5956 = vst [vmem:[#allocation3 + $0x20] sm:$0xff] %v5948_v3  ;;  %v5951_v20 = vadd.f32 %v5941_v10, %v3230_v0  ;;  %v9844_v0 = vpack.c.bf16 (!%p7433_p10), %v6133_v63, %v6130_v62  ;;  %v6082_v3 = vld [vmem:[#allocation14 + $0x10] sm:$0xff] (!%p7433_p10)  ;;  %v5996_v10 = vsub.s32 (!%p7433_p10), 5, %v12591_v39  ;;  %v6065_v11 = vadd.f32 (!%p7433_p10), %v6031_v54, %v6015_v32  ;;  %v6147_v60 = vld [vmem:[#allocation14 + $0x218] sm:$0xff] (!%p7433_p10)  ;;  %v6109_v62 = vld [vmem:[#allocation14 + $0xe8] sm:$0xff] (!%p7433_p10) }
 0x6b7   : > { %5958 = vst [vmem:[#allocation3 + $0x30] sm:$0xff] %v5950_v6  ;;  %5957 = vst [vmem:[#allocation3 + $0x28] sm:$0xff] %v5949_v9  ;;  %v6129_v6 = vld [vmem:[#allocation14 + $0x188] sm:$0xff] (!%p7433_p10)  ;;  %9615 = vmatpush1.bf16.msra.mxu0 (!%p7433_p10), %v9614_v1  ;;  %v9618_v21 = vpack.c.bf16 (!%p7433_p10), %v6125_v5, %v6122_v2  ;;  %v9626_v7 = vpack.c.bf16 (!%p7433_p10), %v6137_v37, %v6134_v36  ;;  %v9628_v59 = vpack.c.bf16 (!%p7433_p10), %v6144_v44, %v6141_v40  ;;  %v6106_v54 = vld [vmem:[#allocation14 + $0xd0] sm:$0xff] (!%p7433_p10) }
 0x6b8   : > { %5959 = vst [vmem:[#allocation3 + $0x38] sm:$0xff] %v5951_v20  ;;  %v6085_v9 = vld [vmem:[#allocation14 + $0x28] sm:$0xff] (!%p7433_p10)  ;;  %v6132_v20 = vld [vmem:[#allocation14 + $0x1a0] sm:$0xff] (!%p7433_p10)  ;;  %9845 = vmatprep.subr.bf16.mxu1 (!%p7433_p10), %v9844_v0  ;;  %v12606_v19 = vrot.slane (!%p7433_p10), %v12596_v57, %v5996_v10  ;;  %v6073_v14 = vmax.f32 (!%p7433_p10), %v6065_v11, 0.0  ;;  %9617 = vmatprep.subr.bf16.mxu0 (!%p7433_p10), %v9616_v58  ;;  %v12610_v28 = vrot.slane (!%p7433_p10), %v12600_v55, %v5996_v10  ;;  %v6150_v63 = vld [vmem:[#allocation14 + $0x230] sm:$0xff] (!%p7433_p10) }
 0x6b9   : > { %v9846_v12 = vpack.c.bf16 %v6085_v9, %v6082_v3  ;;  %v9620_v4 = vpack.c.bf16 %v6132_v20, %v6129_v6  ;;  %v6160_v1 = vld [vmem:[#allocation14 + $0x280] sm:$0xff]  ;;  %v6163_v2 = vld [vmem:[#allocation14 + $0x298] sm:$0xff]  ;;  %v9630_v32 = vpack.c.bf16 %v6143_v51, %v6140_v50  ;;  %v6146_v0 = vld [vmem:[#allocation14 + $0x210] sm:$0xff]  ;;  %v9862_v58 = vpack.c.bf16 %v6109_v62, %v6106_v54 }
 0x6ba   : > { %6528 = vmatprep.mubr.f32.mxu0 %v6073_v14  ;;  %6812 = vmatprep.mubr.f32.mxu1 %v6073_v14  ;;  %v6149_v3 = vld [vmem:[#allocation14 + $0x228] sm:$0xff]  ;;  %v9632_v5 = vpack.c.bf16 %v6150_v63, %v6147_v60  ;;  %v12619_v9 = vsub.s32 0, %v12591_v39  ;;  %v9864_v10 = vpack.c.bf16 %v6163_v2, %v6160_v1  ;;  %v6112_v20 = vld [vmem:[#allocation14 + $0x100] sm:$0xff]  ;;  %v6115_v11 = vld [vmem:[#allocation14 + $0x118] sm:$0xff]  ;;  %v9642_v44 = vpack.c.bf16 %v6161_v33, %v6158_v29 }
 0x6bb   : > { %9847 = vmatpush3.bf16.msra.mxu1 %v9846_v12  ;;  %9619 = vmatpush1.bf16.msra.mxu0 %v9618_v21  ;;  %v6153_v6 = vld [vmem:[#allocation14 + $0x248] sm:$0xff]  ;;  %v6156_v12 = vld [vmem:[#allocation14 + $0x260] sm:$0xff]  ;;  %v9866_v21 = vpack.c.bf16 %v6115_v11, %v6112_v20  ;;  %v6162_v14 = vld [vmem:[#allocation14 + $0x290] sm:$0xff] }
 0x6bc   : > { %9849 = vmatprep.subr.bf16.mxu1 %v9848_v16  ;;  %9621 = vmatprep.subr.bf16.mxu0 %v9620_v4  ;;  %v9634_v16 = vpack.c.bf16 %v6149_v3, %v6146_v0  ;;  %v9636_v22 = vpack.c.bf16 %v6156_v12, %v6153_v6  ;;  %v6118_v4 = vld [vmem:[#allocation14 + $0x130] sm:$0xff]  ;;  %v9640_v17 = vpack.c.bf16 %v6162_v14, %v6159_v38  ;;  %v6127_v40 = vld [vmem:[#allocation14 + $0x178] sm:$0xff]  ;;  %v6229_v43 = vld [vmem:[#allocation14 + $0x4a8] sm:$0xff]  ;;  %v6004_v3 = vsub.s32 7, %v12591_v39 }
 0x6bd   : > { %v9870_v34 = vpack.c.bf16 %v6121_v25, %v6118_v4  ;;  %v6027_v37 = vrot.slane %v12600_v55, %v12619_v9  ;;  %v6167_v48 = vld [vmem:[#allocation14 + $0x2b8] sm:$0xff]  ;;  %v6178_v60 = vld [vmem:[#allocation14 + $0x310] sm:$0xff]  ;;  %v6232_v62 = vld [vmem:[#allocation14 + $0x4c0] sm:$0xff]  ;;  %v6000_v12 = vsub.s32 6, %v12591_v39 }
 0x6be   : > { %v6171_v51 = vld [vmem:[#allocation14 + $0x2d8] sm:$0xff]  ;;  %v6174_v54 = vld [vmem:[#allocation14 + $0x2f0] sm:$0xff]  ;;  %v9646_v1 = vpack.c.bf16 %v6167_v48, %v6164_v45  ;;  %v6184_v20 = vld [vmem:[#allocation14 + $0x340] sm:$0xff] }
 0x6bf   : > { %9851 = vmatpush3.bf16.msra.mxu1 %v9850_v23  ;;  %9623 = vmatpush1.bf16.msra.mxu0 %v9622_v35  ;;  %v5977_v23 = vrot.slane %v12596_v57, %v12619_v9  ;;  %v6165_v35 = vld [vmem:[#allocation14 + $0x2a8] sm:$0xff]  ;;  %v6235_v63 = vld [vmem:[#allocation14 + $0x4d8] sm:$0xff]  ;;  %v6170_v2 = vld [vmem:[#allocation14 + $0x2d0] sm:$0xff]  ;;  %v12635_v38 = vrot.slane %v12596_v57, %v6000_v12 }
 0x6c0   : > { %9853 = vmatprep.subr.bf16.mxu1 %v9852_v8  ;;  %9625 = vmatprep.subr.bf16.mxu0 %v9624_v53  ;;  %v9638_v8 = vpack.c.bf16 %v6155_v30, %v6152_v18  ;;  %v6124_v53 = vld [vmem:[#allocation14 + $0x160] sm:$0xff]  ;;  %v6187_v11 = vld [vmem:[#allocation14 + $0x358] sm:$0xff]  ;;  %v5988_v18 = vsub.s32 3, %v12591_v39  ;;  %v12632_v30 = vrot.slane %v12596_v57, %v6004_v3 }
 0x6c1   : > { %v6014_v36 = vmul.f32 %v5977_v23, %v5964_v26  ;;  %v6179_v14 = vld [vmem:[#allocation14 + $0x318] sm:$0xff]  ;;  %v9882_v23 = vpack.c.bf16 %v6187_v11, %v6184_v20  ;;  %v6244_v29 = vld [vmem:[#allocation14 + $0x520] sm:$0xff]  ;;  %v6194_v20 = vld [vmem:[#allocation14 + $0x390] sm:$0xff] }
 0x6c2   : > { %v6183_v25 = vld [vmem:[#allocation14 + $0x338] sm:$0xff]  ;;  %v6192_v48 = vld [vmem:[#allocation14 + $0x380] sm:$0xff]  ;;  %v6197_v11 = vld [vmem:[#allocation14 + $0x3a8] sm:$0xff] }
 0x6c3   : > { %9855 = vmatpush3.bf16.msra.mxu1 %v9854_v46  ;;  %9627 = vmatpush1.bf16.msra.mxu0 %v9626_v7  ;;  %v9872_v46 = vpack.c.bf16 %v6175_v56, %v6172_v27  ;;  %v9874_v7 = vpack.c.bf16 %v6127_v40, %v6124_v53  ;;  %v6190_v27 = vld [vmem:[#allocation14 + $0x370] sm:$0xff]  ;;  %v6193_v56 = vld [vmem:[#allocation14 + $0x388] sm:$0xff]  ;;  %v6247_v33 = vld [vmem:[#allocation14 + $0x538] sm:$0xff]  ;;  %v6039_v40 = vrot.slane %v12600_v55, %v5988_v18 }
 0x6c4   : > { %9857 = vmatprep.subr.bf16.mxu1 %v9856_v41  ;;  %9629 = vmatprep.subr.bf16.mxu0 %v9628_v59  ;;  %v6168_v41 = vld [vmem:[#allocation14 + $0x2c0] sm:$0xff]  ;;  %v9876_v59 = vpack.c.bf16 %v6229_v43, %v6226_v42  ;;  %v9886_v53 = vpack.c.bf16 %v6193_v56, %v6190_v27  ;;  %v9888_v42 = vpack.c.bf16 %v6247_v33, %v6244_v29  ;;  %v5967_v45 = vld [vmem:[#allocation3 + $0x18] sm:$0xff]  ;;  %v5966_v56 = vld [vmem:[#allocation3 + $0x10] sm:$0xff] }
 0x6c5   : > { %v9644_v50 = vpack.c.bf16 %v6168_v41, %v6165_v35  ;;  %v6196_v43 = vld [vmem:[#allocation14 + $0x3a0] sm:$0xff]  ;;  %v6207_v29 = vld [vmem:[#allocation14 + $0x3f8] sm:$0xff] }
 0x6c7   : > { %9859 = vmatpush3.bf16.msra.mxu1 %v9858_v52  ;;  %9631 = vmatpush1.bf16.msra.mxu0 %v9630_v32  ;;  %v12625_v52 = vadd.f32 %v6027_v37, %v6014_v36  ;;  %v6173_v32 = vld [vmem:[#allocation14 + $0x2e8] sm:$0xff]  ;;  %v6182_v36 = vld [vmem:[#allocation14 + $0x330] sm:$0xff] }
 0x6c8   : > { %9861 = vmatprep.subr.bf16.mxu1 %v9860_v61  ;;  %9633 = vmatprep.subr.bf16.mxu0 %v9632_v5  ;;  %v6181_v61 = vld [vmem:[#allocation14 + $0x328] sm:$0xff] }
 0x6c9   : > { %v9878_v0 = vpack.c.bf16 %v6181_v61, %v6178_v60  ;;  %v6177_v5 = vld [vmem:[#allocation14 + $0x308] sm:$0xff]  ;;  %v6072_v6 = vmax.f32 %v12625_v52, 0.0  ;;  %v6191_v60 = vld [vmem:[#allocation14 + $0x378] sm:$0xff] }
 0x6ca   : > { %v9652_v4 = vpack.c.bf16 %v6180_v13, %v6177_v5  ;;  %v6185_v37 = vld [vmem:[#allocation14 + $0x348] sm:$0xff] }
 0x6cb   : > { %9863 = vmatpush3.bf16.msra.mxu1 %v9862_v58  ;;  %9635 = vmatpush1.bf16.msra.mxu0 %v9634_v16  ;;  %v9648_v58 = vpack.c.bf16 %v6174_v54, %v6171_v51  ;;  %v6241_v16 = vld [vmem:[#allocation14 + $0x508] sm:$0xff]  ;;  %v9658_v52 = vpack.c.bf16 %v6185_v37, %v6182_v36  ;;  %v6210_v36 = vld [vmem:[#allocation14 + $0x410] sm:$0xff]  ;;  %v6268_v37 = vld [vmem:[#allocation14 + $0x5e0] sm:$0xff] }
 0x6cc   : > { %9865 = vmatprep.subr.bf16.mxu1 %v9864_v10  ;;  %9637 = vmatprep.subr.bf16.mxu0 %v9636_v22  ;;  %v9880_v10 = vpack.c.bf16 %v6235_v63, %v6232_v62  ;;  %v6176_v22 = vld [vmem:[#allocation14 + $0x300] sm:$0xff]  ;;  %v9884_v26 = vpack.c.bf16 %v6241_v16, %v6238_v15  ;;  %v6195_v63 = vld [vmem:[#allocation14 + $0x398] sm:$0xff]  ;;  %v6201_v15 = vld [vmem:[#allocation14 + $0x3c8] sm:$0xff] }
 0x6cd   : > { %v9654_v35 = vpack.c.bf16 %v6179_v14, %v6176_v22  ;;  %v6204_v22 = vld [vmem:[#allocation14 + $0x3e0] sm:$0xff]  ;;  %v6262_v14 = vld [vmem:[#allocation14 + $0x5b0] sm:$0xff] }
 0x6cf   : > { %9867 = vmatpush3.bf16.msra.mxu1 %v9866_v21  ;;  %9639 = vmatpush1.bf16.msra.mxu0 %v9638_v8  ;;  %v9650_v21 = vpack.c.bf16 %v6173_v32, %v6170_v2  ;;  %v12641_v8 = vrot.slane %v12600_v55, %v6000_v12  ;;  %v6202_v2 = vld [vmem:[#allocation14 + $0x3d0] sm:$0xff]  ;;  %v6205_v32 = vld [vmem:[#allocation14 + $0x3e8] sm:$0xff] }
 0x6d0   : > { %9869 = vmatprep.subr.bf16.mxu1 %v9868_v24  ;;  %9641 = vmatprep.subr.bf16.mxu0 %v9640_v17  ;;  %v12638_v24 = vrot.slane %v12600_v55, %v6004_v3  ;;  %v6186_v17 = vld [vmem:[#allocation14 + $0x350] sm:$0xff]  ;;  %v6256_v3 = vld [vmem:[#allocation14 + $0x580] sm:$0xff]  ;;  %v9894_v12 = vpack.c.bf16 %v6205_v32, %v6202_v2 }
 0x6d1   : > { %v9656_v41 = vpack.c.bf16 %v6186_v17, %v6183_v25  ;;  %v6200_v25 = vld [vmem:[#allocation14 + $0x3c0] sm:$0xff]  ;;  %v9668_v17 = vpack.c.bf16 %v6204_v22, %v6201_v15  ;;  %v6274_v32 = vld [vmem:[#allocation14 + $0x610] sm:$0xff] }
 0x6d2   : > { %v6280_v22 = vld [vmem:[#allocation14 + $0x640] sm:$0xff] }
 0x6d3   : > { %9871 = vmatpush3.bf16.msra.mxu1 %v9870_v34  ;;  %9643 = vmatpush1.bf16.msra.mxu0 %v9642_v44  ;;  %v5989_v34 = vrot.slane %v12596_v57, %v5988_v18  ;;  %v6199_v44 = vld [vmem:[#allocation14 + $0x3b8] sm:$0xff]  ;;  %v6208_v18 = vld [vmem:[#allocation14 + $0x400] sm:$0xff] }
 0x6d4   : > { %9873 = vmatprep.subr.bf16.mxu1 %v9872_v46  ;;  %9645 = vmatprep.subr.bf16.mxu0 %v9644_v50  ;;  %v6189_v46 = vld [vmem:[#allocation14 + $0x368] sm:$0xff]  ;;  %v9890_v61 = vpack.c.bf16 %v6199_v44, %v6196_v43  ;;  %v9672_v44 = vpack.c.bf16 %v6210_v36, %v6207_v29  ;;  %v6224_v29 = vld [vmem:[#allocation14 + $0x480] sm:$0xff]  ;;  %v6231_v36 = vld [vmem:[#allocation14 + $0x4b8] sm:$0xff] }
 0x6d5   : > { %v6253_v50 = vld [vmem:[#allocation14 + $0x568] sm:$0xff]  ;;  %v6017_v51 = vmul.f32 %v5989_v34, %v5967_v45  ;;  %v9660_v62 = vpack.c.bf16 %v6192_v48, %v6189_v46  ;;  %v6214_v34 = vld [vmem:[#allocation14 + $0x430] sm:$0xff]  ;;  %v6271_v46 = vld [vmem:[#allocation14 + $0x5f8] sm:$0xff] }
 0x6d6   : > { %v6213_v45 = vld [vmem:[#allocation14 + $0x428] sm:$0xff]  ;;  %v9904_v48 = vpack.c.bf16 %v6271_v46, %v6268_v37  ;;  %v6286_v37 = vld [vmem:[#allocation14 + $0x670] sm:$0xff] }
 0x6d7   : > { %9875 = vmatpush3.bf16.msra.mxu1 %v9874_v7  ;;  %9647 = vmatpush1.bf16.msra.mxu0 %v9646_v1  ;;  %v6250_v7 = vld [vmem:[#allocation14 + $0x550] sm:$0xff]  ;;  %v6067_v54 = vadd.f32 %v6039_v40, %v6017_v51  ;;  %v6216_v51 = vld [vmem:[#allocation14 + $0x440] sm:$0xff]  ;;  %v6289_v46 = vld [vmem:[#allocation14 + $0x688] sm:$0xff] }
 0x6d8   : > { %9877 = vmatprep.subr.bf16.mxu1 %v9876_v59  ;;  %9649 = vmatprep.subr.bf16.mxu0 %v9648_v58  ;;  %v6188_v59 = vld [vmem:[#allocation14 + $0x360] sm:$0xff]  ;;  %v9892_v1 = vpack.c.bf16 %v6253_v50, %v6250_v7  ;;  %v6259_v58 = vld [vmem:[#allocation14 + $0x598] sm:$0xff] }
 0x6d9   : > { %v6075_v5 = vmax.f32 %v6067_v54, 0.0  ;;  %v9896_v16 = vpack.c.bf16 %v6259_v58, %v6256_v3  ;;  %v6220_v7 = vld [vmem:[#allocation14 + $0x460] sm:$0xff]  ;;  %v6223_v50 = vld [vmem:[#allocation14 + $0x478] sm:$0xff]  ;;  %v6222_v3 = vld [vmem:[#allocation14 + $0x470] sm:$0xff] }
 0x6da   : > { %6813 = vmatmul.mubr.f32.vlgmr.msra.gmra.mrb[0].mxu1 %v6072_v6  ;;  %v6215_v54 = vld [vmem:[#allocation14 + $0x438] sm:$0xff]  ;;  %v6328_v58 = vld [vmem:[#allocation14 + $0x7c0] sm:$0xff] }
 0x6db   : > { %9879 = vmatpush3.bf16.msra.mxu1 %v9878_v0  ;;  %9651 = vmatpush1.bf16.msra.mxu0 %v9650_v21  ;;  %v6198_v0 = vld [vmem:[#allocation14 + $0x3b0] sm:$0xff]  ;;  %v6211_v21 = vld [vmem:[#allocation14 + $0x418] sm:$0xff] }
 0x6dc   : > { %9881 = vmatprep.subr.bf16.mxu1 %v9880_v10  ;;  %9653 = vmatprep.subr.bf16.mxu0 %v9652_v4  ;;  %v9662_v10 = vpack.c.bf16 %v6191_v60, %v6188_v59  ;;  %v9664_v13 = vpack.c.bf16 %v6198_v0, %v6195_v63  ;;  %v9666_v4 = vpack.c.bf16 %v6197_v11, %v6194_v20  ;;  %v6325_v59 = vld [vmem:[#allocation14 + $0x7a8] sm:$0xff] }
 0x6dd   : > { %6882 = vmatprep.mubr.f32.mxu1 %v6075_v5  ;;  %v9898_v27 = vpack.c.bf16 %v6211_v21, %v6208_v18  ;;  %v9676_v63 = vpack.c.bf16 %v6216_v51, %v6213_v45  ;;  %v6277_v0 = vld [vmem:[#allocation14 + $0x628] sm:$0xff]  ;;  %v6240_v51 = vld [vmem:[#allocation14 + $0x500] sm:$0xff] }
 0x6de   : > { %6529 = vmatmul.mubr.f32.vlgmr.msra.gmra.mrb[0].mxu0 %v6072_v6  ;;  %v12646_v6 = vsub.s32 2, %v12591_v39  ;;  %v9910_v15 = vpack.c.bf16 %v6277_v0, %v6274_v32  ;;  %v6237_v45 = vld [vmem:[#allocation14 + $0x4e8] sm:$0xff]  ;;  %v6298_v32 = vld [vmem:[#allocation14 + $0x6d0] sm:$0xff] }
 0x6df   : > { %9883 = vmatpush3.bf16.msra.mxu1 %v9882_v23  ;;  %9655 = vmatpush1.bf16.msra.mxu0 %v9654_v35  ;;  %v6265_v23 = vld [vmem:[#allocation14 + $0x5c8] sm:$0xff] }
 0x6e0   : > { %9885 = vmatprep.subr.bf16.mxu1 %v9884_v26  ;;  %9657 = vmatprep.subr.bf16.mxu0 %v9656_v41  ;;  %v5985_v39 = vrot.slane %v12596_v57, %v12646_v6  ;;  %v6203_v26 = vld [vmem:[#allocation14 + $0x3d8] sm:$0xff]  ;;  %v9900_v33 = vpack.c.bf16 %v6265_v23, %v6262_v14  ;;  %v6217_v35 = vld [vmem:[#allocation14 + $0x448] sm:$0xff]  ;;  %v6035_v57 = vrot.slane %v12600_v55, %v12646_v6  ;;  %v6206_v41 = vld [vmem:[#allocation14 + $0x3f0] sm:$0xff] }
 0x6e1   : > { %6599 = vmatprep.mubr.f32.mxu0 %v6075_v5  ;;  %v9670_v40 = vpack.c.bf16 %v6203_v26, %v6200_v25  ;;  %v9902_v43 = vpack.c.bf16 %v6217_v35, %v6214_v34  ;;  %v6331_v5 = vld [vmem:[#allocation14 + $0x7d8] sm:$0xff]  ;;  %v6334_v25 = vld [vmem:[#allocation14 + $0x7f0] sm:$0xff]  ;;  %v6337_v26 = vld [vmem:[#allocation14 + $0x808] sm:$0xff] }
 0x6e2   : > { %v9912_v21 = vpack.c.bf16 %v6331_v5, %v6328_v58  ;;  %v6283_v14 = vld [vmem:[#allocation14 + $0x658] sm:$0xff]  ;;  %v6301_v0 = vld [vmem:[#allocation14 + $0x6e8] sm:$0xff]  ;;  %v6352_v58 = vld [vmem:[#allocation14 + $0x880] sm:$0xff] }
 0x6e3   : > { %9887 = vmatpush3.bf16.msra.mxu1 %v9886_v53  ;;  %9659 = vmatpush1.bf16.msra.mxu0 %v9658_v52  ;;  %v6016_v53 = vmul.f32 %v5985_v39, %v5966_v56  ;;  %v6322_v52 = vld [vmem:[#allocation14 + $0x790] sm:$0xff]  ;;  %v5968_v39 = vld [vmem:[#allocation3 + $0x20] sm:$0xff]  ;;  %v9914_v34 = vpack.c.bf16 %v6283_v14, %v6280_v22  ;;  %v6355_v5 = vld [vmem:[#allocation14 + $0x898] sm:$0xff] }
 0x6e4   : > { %9889 = vmatprep.subr.bf16.mxu1 %v9888_v42  ;;  %9661 = vmatprep.subr.bf16.mxu0 %v9660_v62  ;;  %v6209_v42 = vld [vmem:[#allocation14 + $0x408] sm:$0xff]  ;;  %v9906_v62 = vpack.c.bf16 %v6223_v50, %v6220_v7  ;;  %v9908_v2 = vpack.c.bf16 %v6325_v59, %v6322_v52  ;;  %v6292_v7 = vld [vmem:[#allocation14 + $0x6a0] sm:$0xff]  ;;  %v6295_v50 = vld [vmem:[#allocation14 + $0x6b8] sm:$0xff] }
 0x6e5   : > { %v12652_v60 = vadd.f32 %v6035_v57, %v6016_v53  ;;  %v9674_v55 = vpack.c.bf16 %v6209_v42, %v6206_v41  ;;  %v6340_v57 = vld [vmem:[#allocation14 + $0x820] sm:$0xff]  ;;  %v6230_v42 = vld [vmem:[#allocation14 + $0x4b0] sm:$0xff]  ;;  %v6349_v59 = vld [vmem:[#allocation14 + $0x868] sm:$0xff] }
 0x6e6   : > { %v6346_v52 = vld [vmem:[#allocation14 + $0x850] sm:$0xff]  ;;  %v6307_v22 = vld [vmem:[#allocation14 + $0x718] sm:$0xff]  ;;  %v6252_v14 = vld [vmem:[#allocation14 + $0x560] sm:$0xff] }
 0x6e7   : > { %9891 = vmatpush3.bf16.msra.mxu1 %v9890_v61  ;;  %9663 = vmatpush1.bf16.msra.mxu0 %v9662_v10  ;;  %v6212_v61 = vld [vmem:[#allocation14 + $0x420] sm:$0xff]  ;;  %v6218_v10 = vld [vmem:[#allocation14 + $0x450] sm:$0xff]  ;;  %v6074_v20 = vmax.f32 %v12652_v60, 0.0 }
 0x6e8   : > { %9893 = vmatprep.subr.bf16.mxu1 %v9892_v1  ;;  %9665 = vmatprep.subr.bf16.mxu0 %v9664_v13  ;;  %v6219_v1 = vld [vmem:[#allocation14 + $0x458] sm:$0xff]  ;;  %v9678_v11 = vpack.c.bf16 %v6215_v54, %v6212_v61  ;;  %v6225_v13 = vld [vmem:[#allocation14 + $0x488] sm:$0xff]  ;;  %v6236_v61 = vld [vmem:[#allocation14 + $0x4e0] sm:$0xff] }
 0x6e9   : > { %v9680_v18 = vpack.c.bf16 %v6222_v3, %v6219_v1  ;;  %v6239_v54 = vld [vmem:[#allocation14 + $0x4f8] sm:$0xff]  ;;  %v6246_v3 = vld [vmem:[#allocation14 + $0x530] sm:$0xff] }
 0x6ea   : > { %v6243_v1 = vld [vmem:[#allocation14 + $0x518] sm:$0xff] }
 0x6eb   : > { %9895 = vmatpush3.bf16.msra.mxu1 %v9894_v12  ;;  %9667 = vmatpush1.bf16.msra.mxu0 %v9666_v4  ;;  %v6221_v12 = vld [vmem:[#allocation14 + $0x468] sm:$0xff]  ;;  %v6228_v4 = vld [vmem:[#allocation14 + $0x4a0] sm:$0xff] }
 0x6ec   : > { %9897 = vmatprep.subr.bf16.mxu1 %v9896_v16  ;;  %9669 = vmatprep.subr.bf16.mxu0 %v9668_v17  ;;  %v5969_v16 = vld [vmem:[#allocation3 + $0x28] sm:$0xff]  ;;  %v9682_v17 = vpack.c.bf16 %v6221_v12, %v6218_v10  ;;  %v9684_v35 = vpack.c.bf16 %v6228_v4, %v6225_v13  ;;  %v9694_v10 = vpack.c.bf16 %v6239_v54, %v6236_v61  ;;  %v6248_v4 = vld [vmem:[#allocation14 + $0x540] sm:$0xff]  ;;  %v6263_v54 = vld [vmem:[#allocation14 + $0x5b8] sm:$0xff] }
 0x6ed   : > { %v6019_v23 = vmul.f32 %v12606_v19, %v5969_v16  ;;  %v6245_v12 = vld [vmem:[#allocation14 + $0x528] sm:$0xff]  ;;  %v9926_v13 = vpack.c.bf16 %v6301_v0, %v6298_v32  ;;  %v6260_v61 = vld [vmem:[#allocation14 + $0x5a0] sm:$0xff]  ;;  %v6270_v0 = vld [vmem:[#allocation14 + $0x5f0] sm:$0xff] }
 0x6ee   : > { %v6249_v16 = vld [vmem:[#allocation14 + $0x548] sm:$0xff] }
 0x6ef   : > { %9899 = vmatpush3.bf16.msra.mxu1 %v9898_v27  ;;  %9671 = vmatpush1.bf16.msra.mxu0 %v9670_v40  ;;  %v6018_v27 = vmul.f32 %v12613_v49, %v5968_v39  ;;  %v12660_v56 = vadd.f32 %v12610_v28, %v6019_v23  ;;  %v9916_v49 = vpack.c.bf16 %v6337_v26, %v6334_v25  ;;  %v6234_v28 = vld [vmem:[#allocation14 + $0x4d0] sm:$0xff]  ;;  %v6343_v40 = vld [vmem:[#allocation14 + $0x838] sm:$0xff]  ;;  %v6361_v39 = vld [vmem:[#allocation14 + $0x8c8] sm:$0xff] }
 0x6f0   : > { %9901 = vmatprep.subr.bf16.mxu1 %v9900_v33  ;;  %9673 = vmatprep.subr.bf16.mxu0 %v9672_v44  ;;  %v6227_v33 = vld [vmem:[#allocation14 + $0x498] sm:$0xff]  ;;  %v9688_v44 = vpack.c.bf16 %v6234_v28, %v6231_v36  ;;  %v6358_v23 = vld [vmem:[#allocation14 + $0x8b0] sm:$0xff]  ;;  %v6313_v36 = vld [vmem:[#allocation14 + $0x748] sm:$0xff] }
 0x6f1   : > { %v12663_v19 = vadd.f32 %v12616_v31, %v6018_v27  ;;  %v6077_v53 = vmax.f32 %v12660_v56, 0.0  ;;  %v9686_v41 = vpack.c.bf16 %v6227_v33, %v6224_v29  ;;  %v6233_v31 = vld [vmem:[#allocation14 + $0x4c8] sm:$0xff]  ;;  %v6251_v26 = vld [vmem:[#allocation14 + $0x558] sm:$0xff]  ;;  %v9700_v33 = vpack.c.bf16 %v6252_v14, %v6249_v16  ;;  %v6430_v14 = vld [vmem:[#allocation14 + $0xaf0] sm:$0xff] }
 0x6f2   : > { %v6255_v27 = vld [vmem:[#allocation14 + $0x578] sm:$0xff]  ;;  %v6373_v32 = vld [vmem:[#allocation14 + $0x928] sm:$0xff]  ;;  %v6296_v56 = vld [vmem:[#allocation14 + $0x6c0] sm:$0xff] }
 0x6f3   : > { %9903 = vmatpush3.bf16.msra.mxu1 %v9902_v43  ;;  %9675 = vmatpush1.bf16.msra.mxu0 %v9674_v55  ;;  %v9918_v43 = vpack.c.bf16 %v6289_v46, %v6286_v37  ;;  %v9690_v55 = vpack.c.bf16 %v6233_v31, %v6230_v42  ;;  %v6364_v37 = vld [vmem:[#allocation14 + $0x8e0] sm:$0xff]  ;;  %v6367_v46 = vld [vmem:[#allocation14 + $0x8f8] sm:$0xff]  ;;  %v6254_v42 = vld [vmem:[#allocation14 + $0x570] sm:$0xff] }
 0x6f4   : > { %9905 = vmatprep.subr.bf16.mxu1 %v9904_v48  ;;  %9677 = vmatprep.subr.bf16.mxu0 %v9676_v63  ;;  %v9920_v48 = vpack.c.bf16 %v6343_v40, %v6340_v57  ;;  %v9692_v63 = vpack.c.bf16 %v6240_v51, %v6237_v45  ;;  %v5970_v57 = vld [vmem:[#allocation3 + $0x30] sm:$0xff]  ;;  %v6257_v31 = vld [vmem:[#allocation14 + $0x588] sm:$0xff]  ;;  %v6319_v51 = vld [vmem:[#allocation14 + $0x778] sm:$0xff] }
 0x6f5   : > { %v6020_v40 = vmul.f32 %v12635_v38, %v5970_v57  ;;  %v6264_v38 = vld [vmem:[#allocation14 + $0x5c0] sm:$0xff]  ;;  %v6281_v57 = vld [vmem:[#allocation14 + $0x648] sm:$0xff] }
 0x6f7   : > { %9907 = vmatpush3.bf16.msra.mxu1 %v9906_v62  ;;  %9679 = vmatpush1.bf16.msra.mxu0 %v9678_v11  ;;  %v9922_v62 = vpack.c.bf16 %v6295_v50, %v6292_v7  ;;  %v6242_v11 = vld [vmem:[#allocation14 + $0x510] sm:$0xff]  ;;  %v9936_v7 = vpack.c.bf16 %v6367_v46, %v6364_v37  ;;  %v6316_v50 = vld [vmem:[#allocation14 + $0x760] sm:$0xff]  ;;  %v6439_v37 = vld [vmem:[#allocation14 + $0xb38] sm:$0xff] }
 0x6f8   : > { %9909 = vmatprep.subr.bf16.mxu1 %v9908_v2  ;;  %9681 = vmatprep.subr.bf16.mxu0 %v9680_v18  ;;  %v9924_v2 = vpack.c.bf16 %v6349_v59, %v6346_v52  ;;  %v9928_v18 = vpack.c.bf16 %v6355_v5, %v6352_v58  ;;  %v9698_v25 = vpack.c.bf16 %v6245_v12, %v6242_v11  ;;  %v6418_v52 = vld [vmem:[#allocation14 + $0xa90] sm:$0xff]  ;;  %v6421_v59 = vld [vmem:[#allocation14 + $0xaa8] sm:$0xff]  ;;  %v6076_v58 = vmax.f32 %v12663_v19, 0.0  ;;  %v6396_v19 = vld [vmem:[#allocation14 + $0x9e0] sm:$0xff] }
 0x6f9   : > { %v9710_v5 = vpack.c.bf16 %v6263_v54, %v6260_v61  ;;  %v6269_v11 = vld [vmem:[#allocation14 + $0x5e8] sm:$0xff]  ;;  %v6291_v61 = vld [vmem:[#allocation14 + $0x698] sm:$0xff] }
 0x6fa   : > { %6883 = vmatmul.mubr.f32.vlgmr.msra.gmra.mrb[2].mxu1 %v6074_v20 }
 0x6fb   : > { %9911 = vmatpush3.bf16.msra.mxu1 %v9910_v15  ;;  %6952 = vmatprep.mubr.f32.mxu1 %v6077_v53  ;;  %v9696_v15 = vpack.c.bf16 %v6246_v3, %v6243_v1  ;;  %v9940_v1 = vpack.c.bf16 %v6421_v59, %v6418_v52  ;;  %v6424_v3 = vld [vmem:[#allocation14 + $0xac0] sm:$0xff]  ;;  %v6287_v52 = vld [vmem:[#allocation14 + $0x678] sm:$0xff] }
 0x6fc   : > { %9913 = vmatprep.subr.bf16.mxu1 %v9912_v21  ;;  %9683 = vmatpush1.bf16.msra.mxu0 %v9682_v17  ;;  %v6304_v21 = vld [vmem:[#allocation14 + $0x700] sm:$0xff]  ;;  %v6258_v17 = vld [vmem:[#allocation14 + $0x590] sm:$0xff] }
 0x6fd   : > { %9685 = vmatprep.subr.bf16.mxu0 %v9684_v35  ;;  %v9930_v29 = vpack.c.bf16 %v6307_v22, %v6304_v21  ;;  %v6310_v35 = vld [vmem:[#allocation14 + $0x730] sm:$0xff]  ;;  %v9704_v45 = vpack.c.bf16 %v6258_v17, %v6255_v27  ;;  %v6379_v21 = vld [vmem:[#allocation14 + $0x958] sm:$0xff]  ;;  %v6276_v22 = vld [vmem:[#allocation14 + $0x620] sm:$0xff] }
 0x6ff   : > { %9915 = vmatpush3.bf16.msra.mxu1 %v9914_v34  ;;  %v9932_v34 = vpack.c.bf16 %v6361_v39, %v6358_v23  ;;  %v6433_v23 = vld [vmem:[#allocation14 + $0xb08] sm:$0xff] }
 0x700   : > { %9917 = vmatprep.subr.bf16.mxu1 %v9916_v49  ;;  %9687 = vmatpush1.bf16.msra.mxu0 %v9686_v41  ;;  %v5971_v49 = vld [vmem:[#allocation3 + $0x38] sm:$0xff]  ;;  %v9702_v41 = vpack.c.bf16 %v6251_v26, %v6248_v4 }
 0x701   : > { %9689 = vmatprep.subr.bf16.mxu0 %v9688_v44  ;;  %v6021_v28 = vmul.f32 %v12632_v30, %v5971_v49  ;;  %v12674_v30 = vadd.f32 %v12641_v8, %v6020_v40  ;;  %v6427_v8 = vld [vmem:[#allocation14 + $0xad8] sm:$0xff]  ;;  %v6436_v49 = vld [vmem:[#allocation14 + $0xb20] sm:$0xff] }
 0x702   : > { %v9944_v16 = vpack.c.bf16 %v6427_v8, %v6424_v3  ;;  %v6275_v26 = vld [vmem:[#allocation14 + $0x618] sm:$0xff]  ;;  %v6297_v8 = vld [vmem:[#allocation14 + $0x6c8] sm:$0xff] }
 0x703   : > { %9919 = vmatpush3.bf16.msra.mxu1 %v9918_v43  ;;  %v9934_v43 = vpack.c.bf16 %v6313_v36, %v6310_v35  ;;  %v12671_v44 = vadd.f32 %v12638_v24, %v6021_v28  ;;  %v9938_v24 = vpack.c.bf16 %v6319_v51, %v6316_v50  ;;  %v6385_v35 = vld [vmem:[#allocation14 + $0x988] sm:$0xff]  ;;  %v6282_v36 = vld [vmem:[#allocation14 + $0x650] sm:$0xff] }
 0x704   : > { %9921 = vmatprep.subr.bf16.mxu1 %v9920_v48  ;;  %9691 = vmatpush1.bf16.msra.mxu0 %v9690_v55  ;;  %v6261_v48 = vld [vmem:[#allocation14 + $0x5a8] sm:$0xff]  ;;  %v9706_v55 = vpack.c.bf16 %v6257_v31, %v6254_v42  ;;  %v6278_v28 = vld [vmem:[#allocation14 + $0x630] sm:$0xff]  ;;  %v9952_v31 = vpack.c.bf16 %v6439_v37, %v6436_v49  ;;  %v6412_v49 = vld [vmem:[#allocation14 + $0xa60] sm:$0xff] }
 0x705   : > { %9693 = vmatprep.subr.bf16.mxu0 %v9692_v63  ;;  %v6267_v63 = vld [vmem:[#allocation14 + $0x5d8] sm:$0xff]  ;;  %v6079_v39 = vmax.f32 %v12671_v44, 0.0  ;;  %v6285_v42 = vld [vmem:[#allocation14 + $0x668] sm:$0xff]  ;;  %v9722_v51 = vpack.c.bf16 %v6281_v57, %v6278_v28  ;;  %v6312_v28 = vld [vmem:[#allocation14 + $0x740] sm:$0xff] }
 0x706   : > { %v6445_v50 = vld [vmem:[#allocation14 + $0xb68] sm:$0xff]  ;;  %v6415_v37 = vld [vmem:[#allocation14 + $0xa78] sm:$0xff]  ;;  %v6392_v44 = vld [vmem:[#allocation14 + $0x9c0] sm:$0xff] }
 0x707   : > { %9923 = vmatpush3.bf16.msra.mxu1 %v9922_v62  ;;  %v9708_v62 = vpack.c.bf16 %v6264_v38, %v6261_v48  ;;  %v6288_v48 = vld [vmem:[#allocation14 + $0x680] sm:$0xff] }
 0x708   : > { %9925 = vmatprep.subr.bf16.mxu1 %v9924_v2  ;;  %9695 = vmatpush1.bf16.msra.mxu0 %v9694_v10  ;;  %v6370_v2 = vld [vmem:[#allocation14 + $0x910] sm:$0xff]  ;;  %v6284_v38 = vld [vmem:[#allocation14 + $0x660] sm:$0xff] }
 0x709   : > { %9697 = vmatprep.subr.bf16.mxu0 %v9696_v15  ;;  %v6266_v10 = vld [vmem:[#allocation14 + $0x5d0] sm:$0xff]  ;;  %v9942_v12 = vpack.c.bf16 %v6373_v32, %v6370_v2  ;;  %v6273_v15 = vld [vmem:[#allocation14 + $0x608] sm:$0xff]  ;;  %v6451_v2 = vld [vmem:[#allocation14 + $0xb98] sm:$0xff]  ;;  %v9726_v60 = vpack.c.bf16 %v6287_v52, %v6284_v38 }
 0x70a   : > { %v9714_v4 = vpack.c.bf16 %v6269_v11, %v6266_v10  ;;  %v9716_v17 = vpack.c.bf16 %v6276_v22, %v6273_v15  ;;  %v6293_v32 = vld [vmem:[#allocation14 + $0x6a8] sm:$0xff]  ;;  %v6400_v10 = vld [vmem:[#allocation14 + $0xa00] sm:$0xff]  ;;  %v6403_v11 = vld [vmem:[#allocation14 + $0xa18] sm:$0xff] }
 0x70b   : > { %9927 = vmatpush3.bf16.msra.mxu1 %v9926_v13  ;;  %v9712_v13 = vpack.c.bf16 %v6270_v0, %v6267_v63  ;;  %v6294_v63 = vld [vmem:[#allocation14 + $0x6b0] sm:$0xff]  ;;  %v6457_v15 = vld [vmem:[#allocation14 + $0xbc8] sm:$0xff]  ;;  %v6303_v22 = vld [vmem:[#allocation14 + $0x6f8] sm:$0xff] }
 0x70c   : > { %9929 = vmatprep.subr.bf16.mxu1 %v9928_v18  ;;  %9699 = vmatpush1.bf16.msra.mxu0 %v9698_v25  ;;  %v6376_v18 = vld [vmem:[#allocation14 + $0x940] sm:$0xff]  ;;  %v9728_v3 = vpack.c.bf16 %v6294_v63, %v6291_v61  ;;  %v6317_v38 = vld [vmem:[#allocation14 + $0x768] sm:$0xff]  ;;  %v6330_v63 = vld [vmem:[#allocation14 + $0x7d0] sm:$0xff] }
 0x70d   : > { %9701 = vmatprep.subr.bf16.mxu0 %v9700_v33  ;;  %v6272_v25 = vld [vmem:[#allocation14 + $0x600] sm:$0xff]  ;;  %v9946_v27 = vpack.c.bf16 %v6379_v21, %v6376_v18  ;;  %v9948_v33 = vpack.c.bf16 %v6433_v23, %v6430_v14  ;;  %v9962_v18 = vpack.c.bf16 %v6403_v11, %v6400_v10  ;;  %v6406_v23 = vld [vmem:[#allocation14 + $0xa30] sm:$0xff]  ;;  %v6321_v52 = vld [vmem:[#allocation14 + $0x788] sm:$0xff] }
 0x70e   : > { %v9718_v46 = vpack.c.bf16 %v6275_v26, %v6272_v25  ;;  %v6306_v25 = vld [vmem:[#allocation14 + $0x710] sm:$0xff]  ;;  %v6460_v26 = vld [vmem:[#allocation14 + $0xbe0] sm:$0xff]  ;;  %v6335_v10 = vld [vmem:[#allocation14 + $0x7f8] sm:$0xff] }
 0x70f   : > { %9931 = vmatpush3.bf16.msra.mxu1 %v9930_v29  ;;  %v6279_v29 = vld [vmem:[#allocation14 + $0x638] sm:$0xff] }
 0x710   : > { %9933 = vmatprep.subr.bf16.mxu1 %v9932_v34  ;;  %9703 = vmatpush1.bf16.msra.mxu0 %v9702_v41  ;;  %v6382_v34 = vld [vmem:[#allocation14 + $0x970] sm:$0xff]  ;;  %v9720_v41 = vpack.c.bf16 %v6282_v36, %v6279_v29  ;;  %v6339_v11 = vld [vmem:[#allocation14 + $0x818] sm:$0xff] }
 0x711   : > { %9705 = vmatprep.subr.bf16.mxu0 %v9704_v45  ;;  %v9950_v40 = vpack.c.bf16 %v6385_v35, %v6382_v34  ;;  %v6391_v45 = vld [vmem:[#allocation14 + $0x9b8] sm:$0xff]  ;;  %v6302_v29 = vld [vmem:[#allocation14 + $0x6f0] sm:$0xff]  ;;  %v9736_v34 = vpack.c.bf16 %v6306_v25, %v6303_v22  ;;  %v6305_v35 = vld [vmem:[#allocation14 + $0x708] sm:$0xff] }
 0x712   : > { %v9738_v57 = vpack.c.bf16 %v6305_v35, %v6302_v29  ;;  %v6354_v25 = vld [vmem:[#allocation14 + $0x890] sm:$0xff]  ;;  %v6353_v29 = vld [vmem:[#allocation14 + $0x888] sm:$0xff] }
 0x713   : > { %9935 = vmatpush3.bf16.msra.mxu1 %v9934_v43  ;;  %v6388_v43 = vld [vmem:[#allocation14 + $0x9a0] sm:$0xff] }
 0x714   : > { %9937 = vmatprep.subr.bf16.mxu1 %v9936_v7  ;;  %9707 = vmatpush1.bf16.msra.mxu0 %v9706_v55  ;;  %v6442_v7 = vld [vmem:[#allocation14 + $0xb50] sm:$0xff]  ;;  %v9954_v59 = vpack.c.bf16 %v6391_v45, %v6388_v43  ;;  %v9724_v55 = vpack.c.bf16 %v6288_v48, %v6285_v42  ;;  %v6308_v42 = vld [vmem:[#allocation14 + $0x720] sm:$0xff]  ;;  %v6315_v43 = vld [vmem:[#allocation14 + $0x758] sm:$0xff]  ;;  %v6078_v48 = vmax.f32 %v12674_v30, 0.0 }
 0x715   : > { %9709 = vmatprep.subr.bf16.mxu0 %v9708_v62  ;;  %v9956_v54 = vpack.c.bf16 %v6445_v50, %v6442_v7  ;;  %v6397_v62 = vld [vmem:[#allocation14 + $0x9e8] sm:$0xff]  ;;  %v6318_v45 = vld [vmem:[#allocation14 + $0x770] sm:$0xff] }
 0x716   : > { %v9744_v50 = vpack.c.bf16 %v6318_v45, %v6315_v43  ;;  %v6372_v43 = vld [vmem:[#allocation14 + $0x920] sm:$0xff] }
 0x717   : > { %9939 = vmatpush3.bf16.msra.mxu1 %v9938_v24  ;;  %v6394_v24 = vld [vmem:[#allocation14 + $0x9d0] sm:$0xff] }
 0x718   : > { %9941 = vmatprep.subr.bf16.mxu1 %v9940_v1  ;;  %9711 = vmatpush1.bf16.msra.mxu0 %v9710_v5  ;;  %v6448_v1 = vld [vmem:[#allocation14 + $0xb80] sm:$0xff]  ;;  %v9958_v0 = vpack.c.bf16 %v6397_v62, %v6394_v24  ;;  %v6323_v24 = vld [vmem:[#allocation14 + $0x798] sm:$0xff] }
 0x719   : > { %9713 = vmatprep.subr.bf16.mxu0 %v9712_v13  ;;  %v9960_v5 = vpack.c.bf16 %v6451_v2, %v6448_v1  ;;  %v6454_v13 = vld [vmem:[#allocation14 + $0xbb0] sm:$0xff]  ;;  %v6327_v62 = vld [vmem:[#allocation14 + $0x7b8] sm:$0xff] }
 0x71a   : > { %6953 = vmatmul.mubr.f32.vlgmr.msra.gmra.mrb[4].mxu1 %v6076_v58  ;;  %v9964_v14 = vpack.c.bf16 %v6457_v15, %v6454_v13  ;;  %v9752_v2 = vpack.c.bf16 %v6330_v63, %v6327_v62  ;;  %v6384_v62 = vld [vmem:[#allocation14 + $0x980] sm:$0xff] }
 0x71b   : > { %9943 = vmatpush3.bf16.msra.mxu1 %v9942_v12  ;;  %7022 = vmatprep.mubr.f32.mxu1 %v6079_v39  ;;  %v6300_v12 = vld [vmem:[#allocation14 + $0x6e0] sm:$0xff] }
 0x71c   : > { %9945 = vmatprep.subr.bf16.mxu1 %v9944_v16  ;;  %9715 = vmatpush1.bf16.msra.mxu0 %v9714_v4  ;;  %v9732_v21 = vpack.c.bf16 %v6300_v12, %v6297_v8  ;;  %v6409_v4 = vld [vmem:[#allocation14 + $0xa48] sm:$0xff]  ;;  %v6342_v12 = vld [vmem:[#allocation14 + $0x830] sm:$0xff] }
 0x71d   : > { %9717 = vmatprep.subr.bf16.mxu0 %v9716_v17  ;;  %v9760_v15 = vpack.c.bf16 %v6342_v12, %v6339_v11  ;;  %v6399_v12 = vld [vmem:[#allocation14 + $0x9f8] sm:$0xff] }
 0x71f   : > { %9947 = vmatpush3.bf16.msra.mxu1 %v9946_v27  ;;  %6600 = vmatmul.mubr.f32.vlgmr.msra.gmra.mrb[0].mxu0 %v6074_v20  ;;  %v6290_v20 = vld [vmem:[#allocation14 + $0x690] sm:$0xff]  ;;  %v6463_v27 = vld [vmem:[#allocation14 + $0xbf8] sm:$0xff] }
 0x720   : > { %9949 = vmatprep.subr.bf16.mxu1 %v9948_v33  ;;  %9719 = vmatpush1.bf16.msra.mxu0 %v9718_v46  ;;  %v9730_v16 = vpack.c.bf16 %v6293_v32, %v6290_v20  ;;  %v9966_v33 = vpack.c.bf16 %v6409_v4, %v6406_v23  ;;  %v9968_v36 = vpack.c.bf16 %v6463_v27, %v6460_v26  ;;  %v6309_v46 = vld [vmem:[#allocation14 + $0x728] sm:$0xff]  ;;  %v6347_v23 = vld [vmem:[#allocation14 + $0x858] sm:$0xff] }
 0x721   : > { %9721 = vmatprep.subr.bf16.mxu0 %v9720_v41  ;;  %6670 = vmatprep.mubr.f32.mxu0 %v6077_v53  ;;  %v6299_v53 = vld [vmem:[#allocation14 + $0x6d8] sm:$0xff]  ;;  %v9740_v41 = vpack.c.bf16 %v6312_v28, %v6309_v46  ;;  %v6329_v20 = vld [vmem:[#allocation14 + $0x7c8] sm:$0xff]  ;;  %v6366_v28 = vld [vmem:[#allocation14 + $0x8f0] sm:$0xff] }
 0x722   : > { %v9734_v17 = vpack.c.bf16 %v6299_v53, %v6296_v56  ;;  %v6333_v32 = vld [vmem:[#allocation14 + $0x7e8] sm:$0xff]  ;;  %v6351_v4 = vld [vmem:[#allocation14 + $0x878] sm:$0xff] }
 0x723   : > { %9951 = vmatpush3.bf16.msra.mxu1 %v9950_v40  ;;  %v9970_v40 = vpack.c.bf16 %v6415_v37, %v6412_v49  ;;  %v6341_v56 = vld [vmem:[#allocation14 + $0x828] sm:$0xff]  ;;  %v9768_v27 = vpack.c.bf16 %v6354_v25, %v6351_v4  ;;  %v6356_v49 = vld [vmem:[#allocation14 + $0x8a0] sm:$0xff]  ;;  %v6359_v37 = vld [vmem:[#allocation14 + $0x8b8] sm:$0xff] }
 0x724   : > { %9953 = vmatprep.subr.bf16.mxu1 %v9952_v31  ;;  %9723 = vmatpush1.bf16.msra.mxu0 %v9722_v51  ;;  %v6311_v31 = vld [vmem:[#allocation14 + $0x738] sm:$0xff]  ;;  %v6314_v51 = vld [vmem:[#allocation14 + $0x750] sm:$0xff]  ;;  %v6345_v53 = vld [vmem:[#allocation14 + $0x848] sm:$0xff] }
 0x725   : > { %9725 = vmatprep.subr.bf16.mxu0 %v9724_v55  ;;  %v9742_v7 = vpack.c.bf16 %v6311_v31, %v6308_v42  ;;  %v9746_v55 = vpack.c.bf16 %v6317_v38, %v6314_v51  ;;  %v6363_v46 = vld [vmem:[#allocation14 + $0x8d8] sm:$0xff]  ;;  %v6365_v42 = vld [vmem:[#allocation14 + $0x8e8] sm:$0xff] }
 0x726   : > { %v6369_v31 = vld [vmem:[#allocation14 + $0x908] sm:$0xff]  ;;  %v6371_v51 = vld [vmem:[#allocation14 + $0x918] sm:$0xff] }
 0x727   : > { %9955 = vmatpush3.bf16.msra.mxu1 %v9954_v59  ;;  %v6324_v59 = vld [vmem:[#allocation14 + $0x7a0] sm:$0xff]  ;;  %v6375_v38 = vld [vmem:[#allocation14 + $0x938] sm:$0xff] }
 0x728   : > { %9957 = vmatprep.subr.bf16.mxu1 %v9956_v54  ;;  %9727 = vmatpush1.bf16.msra.mxu0 %v9726_v60  ;;  %v9748_v61 = vpack.c.bf16 %v6324_v59, %v6321_v52  ;;  %v6320_v54 = vld [vmem:[#allocation14 + $0x780] sm:$0xff]  ;;  %v6326_v60 = vld [vmem:[#allocation14 + $0x7b0] sm:$0xff]  ;;  %v6407_v4 = vld [vmem:[#allocation14 + $0xa38] sm:$0xff] }
 0x729   : > { %9729 = vmatprep.subr.bf16.mxu0 %v9728_v3  ;;  %v9750_v1 = vpack.c.bf16 %v6323_v24, %v6320_v54  ;;  %v9754_v3 = vpack.c.bf16 %v6329_v20, %v6326_v60  ;;  %v6378_v52 = vld [vmem:[#allocation14 + $0x950] sm:$0xff]  ;;  %v6377_v54 = vld [vmem:[#allocation14 + $0x948] sm:$0xff]  ;;  %v6383_v60 = vld [vmem:[#allocation14 + $0x978] sm:$0xff] }
 0x72a   : > { %v6381_v24 = vld [vmem:[#allocation14 + $0x968] sm:$0xff]  ;;  %v6387_v20 = vld [vmem:[#allocation14 + $0x998] sm:$0xff] }
 0x72b   : > { %9959 = vmatpush3.bf16.msra.mxu1 %v9958_v0  ;;  %v6336_v0 = vld [vmem:[#allocation14 + $0x800] sm:$0xff]  ;;  %v6411_v25 = vld [vmem:[#allocation14 + $0xa58] sm:$0xff] }
 0x72c   : > { %9961 = vmatprep.subr.bf16.mxu1 %v9960_v5  ;;  %9731 = vmatpush1.bf16.msra.mxu0 %v9730_v16  ;;  %v9756_v8 = vpack.c.bf16 %v6336_v0, %v6333_v32  ;;  %v6332_v5 = vld [vmem:[#allocation14 + $0x7e0] sm:$0xff]  ;;  %v6338_v16 = vld [vmem:[#allocation14 + $0x810] sm:$0xff] }
 0x72d   : > { %9733 = vmatprep.subr.bf16.mxu0 %v9732_v21  ;;  %v9758_v13 = vpack.c.bf16 %v6335_v10, %v6332_v5  ;;  %v9762_v21 = vpack.c.bf16 %v6341_v56, %v6338_v16  ;;  %v6390_v32 = vld [vmem:[#allocation14 + $0x9b0] sm:$0xff]  ;;  %v6389_v5 = vld [vmem:[#allocation14 + $0x9a8] sm:$0xff] }
 0x72e   : > { %v6393_v10 = vld [vmem:[#allocation14 + $0x9c8] sm:$0xff]  ;;  %v6398_v56 = vld [vmem:[#allocation14 + $0x9f0] sm:$0xff] }
 0x72f   : > { %9963 = vmatpush3.bf16.msra.mxu1 %v9962_v18  ;;  %v6348_v18 = vld [vmem:[#allocation14 + $0x860] sm:$0xff]  ;;  %v9796_v11 = vpack.c.bf16 %v6396_v19, %v6393_v10  ;;  %v6449_v10 = vld [vmem:[#allocation14 + $0xb88] sm:$0xff] }
 0x730   : > { %9965 = vmatprep.subr.bf16.mxu1 %v9964_v14  ;;  %9735 = vmatpush1.bf16.msra.mxu0 %v9734_v17  ;;  %v9764_v22 = vpack.c.bf16 %v6348_v18, %v6345_v53  ;;  %v6344_v14 = vld [vmem:[#allocation14 + $0x840] sm:$0xff]  ;;  %v6350_v17 = vld [vmem:[#allocation14 + $0x870] sm:$0xff]  ;;  %v6401_v53 = vld [vmem:[#allocation14 + $0xa08] sm:$0xff] }
 0x731   : > { %9737 = vmatprep.subr.bf16.mxu0 %v9736_v34  ;;  %v9766_v26 = vpack.c.bf16 %v6347_v23, %v6344_v14  ;;  %v6360_v34 = vld [vmem:[#allocation14 + $0x8c0] sm:$0xff]  ;;  %v9770_v35 = vpack.c.bf16 %v6353_v29, %v6350_v17  ;;  %v6405_v18 = vld [vmem:[#allocation14 + $0xa28] sm:$0xff]  ;;  %v6410_v29 = vld [vmem:[#allocation14 + $0xa50] sm:$0xff] }
 0x732   : > { %v6404_v23 = vld [vmem:[#allocation14 + $0xa20] sm:$0xff]  ;;  %v6453_v19 = vld [vmem:[#allocation14 + $0xba8] sm:$0xff] }
 0x733   : > { %9967 = vmatpush3.bf16.msra.mxu1 %v9966_v33  ;;  %v6357_v33 = vld [vmem:[#allocation14 + $0x8a8] sm:$0xff] }
 0x734   : > { %9969 = vmatprep.subr.bf16.mxu1 %v9968_v36  ;;  %9739 = vmatpush1.bf16.msra.mxu0 %v9738_v57  ;;  %v9772_v36 = vpack.c.bf16 %v6360_v34, %v6357_v33  ;;  %v9774_v57 = vpack.c.bf16 %v6359_v37, %v6356_v49  ;;  %v6413_v33 = vld [vmem:[#allocation14 + $0xa68] sm:$0xff]  ;;  %v6416_v37 = vld [vmem:[#allocation14 + $0xa80] sm:$0xff] }
 0x735   : > { %9741 = vmatprep.subr.bf16.mxu0 %v9740_v41  ;;  %v6362_v41 = vld [vmem:[#allocation14 + $0x8d0] sm:$0xff]  ;;  %v6417_v34 = vld [vmem:[#allocation14 + $0xa88] sm:$0xff] }
 0x736   : > { %v9778_v45 = vpack.c.bf16 %v6365_v42, %v6362_v41  ;;  %v6422_v42 = vld [vmem:[#allocation14 + $0xab0] sm:$0xff] }
 0x737   : > { %9971 = vmatpush3.bf16.msra.mxu1 %v9970_v40  ;;  %v9776_v40 = vpack.c.bf16 %v6366_v28, %v6363_v46  ;;  %v6419_v46 = vld [vmem:[#allocation14 + $0xa98] sm:$0xff] }
 0x738   : > { %9743 = vmatpush1.bf16.msra.mxu0 %v9742_v7  ;;  %v9780_v7 = vpack.c.bf16 %v6372_v43, %v6369_v31  ;;  %v6423_v28 = vld [vmem:[#allocation14 + $0xab8] sm:$0xff]  ;;  %v6425_v31 = vld [vmem:[#allocation14 + $0xac8] sm:$0xff] }
 0x739   : > { %9745 = vmatprep.subr.bf16.mxu0 %v9744_v50  ;;  %v6368_v50 = vld [vmem:[#allocation14 + $0x900] sm:$0xff]  ;;  %v6429_v43 = vld [vmem:[#allocation14 + $0xae8] sm:$0xff] }
 0x73a   : > { %7023 = vmatmul.mubr.f32.vlgmr.msra.gmra.mrb[6].mxu1 %v6078_v48  ;;  %v9782_v59 = vpack.c.bf16 %v6371_v51, %v6368_v50  ;;  %v6428_v51 = vld [vmem:[#allocation14 + $0xae0] sm:$0xff] }
 0x73c   : > { %9747 = vmatpush1.bf16.msra.mxu0 %v9746_v55  ;;  %v9784_v55 = vpack.c.bf16 %v6378_v52, %v6375_v38  ;;  %v6431_v38 = vld [vmem:[#allocation14 + $0xaf8] sm:$0xff] }
 0x73d   : > { %9749 = vmatprep.subr.bf16.mxu0 %v9748_v61  ;;  %v6374_v61 = vld [vmem:[#allocation14 + $0x930] sm:$0xff]  ;;  %v6435_v52 = vld [vmem:[#allocation14 + $0xb18] sm:$0xff] }
 0x73e   : > { %v9786_v63 = vpack.c.bf16 %v6377_v54, %v6374_v61  ;;  %v6434_v54 = vld [vmem:[#allocation14 + $0xb10] sm:$0xff] }
 0x740   : > { %9751 = vmatpush1.bf16.msra.mxu0 %v9750_v1  ;;  %v9788_v1 = vpack.c.bf16 %v6384_v62, %v6381_v24  ;;  %v6437_v24 = vld [vmem:[#allocation14 + $0xb28] sm:$0xff] }
 0x741   : > { %9753 = vmatprep.subr.bf16.mxu0 %v9752_v2  ;;  %v6380_v2 = vld [vmem:[#allocation14 + $0x960] sm:$0xff]  ;;  %v6441_v62 = vld [vmem:[#allocation14 + $0xb48] sm:$0xff] }
 0x742   : > { %v9790_v0 = vpack.c.bf16 %v6383_v60, %v6380_v2  ;;  %v6440_v60 = vld [vmem:[#allocation14 + $0xb40] sm:$0xff] }
 0x744   : > { %9755 = vmatpush1.bf16.msra.mxu0 %v9754_v3  ;;  %v9792_v3 = vpack.c.bf16 %v6390_v32, %v6387_v20  ;;  %v6443_v20 = vld [vmem:[#allocation14 + $0xb58] sm:$0xff] }
 0x745   : > { %9757 = vmatprep.subr.bf16.mxu0 %v9756_v8  ;;  %v6386_v8 = vld [vmem:[#allocation14 + $0x990] sm:$0xff]  ;;  %v6447_v32 = vld [vmem:[#allocation14 + $0xb78] sm:$0xff] }
 0x748   : > { %9759 = vmatpush1.bf16.msra.mxu0 %v9758_v13  ;;  %v6402_v13 = vld [vmem:[#allocation14 + $0xa10] sm:$0xff] }
 0x749   : > { %9761 = vmatprep.subr.bf16.mxu0 %v9760_v15  ;;  %v9800_v16 = vpack.c.bf16 %v6402_v13, %v6399_v12  ;;  %v6455_v12 = vld [vmem:[#allocation14 + $0xbb8] sm:$0xff] }
 0x74a   : > { %v6459_v13 = vld [vmem:[#allocation14 + $0xbd8] sm:$0xff] }
 0x74c   : > { %9763 = vmatpush1.bf16.msra.mxu0 %v9762_v21  ;;  %v6408_v21 = vld [vmem:[#allocation14 + $0xa40] sm:$0xff] }
 0x74d   : > { %9765 = vmatprep.subr.bf16.mxu0 %v9764_v22  ;;  %v9802_v22 = vpack.c.bf16 %v6401_v53, %v6398_v56  ;;  %v9804_v14 = vpack.c.bf16 %v6408_v21, %v6405_v18  ;;  %v6461_v56 = vld [vmem:[#allocation14 + $0xbe8] sm:$0xff]  ;;  %v7088_v21 = vld [vmem:[#allocation18 + $0x88] sm:$0xff] }
 0x74e   : > { %v7087_v18 = vld [vmem:[#allocation18 + $0x80] sm:$0xff] }
 0x750   : > { %9767 = vmatpush1.bf16.msra.mxu0 %v9766_v26  ;;  %v6414_v26 = vld [vmem:[#allocation14 + $0xa70] sm:$0xff] }
 0x751   : > { %9769 = vmatprep.subr.bf16.mxu0 %v9768_v27  ;;  %v9806_v27 = vpack.c.bf16 %v6407_v4, %v6404_v23  ;;  %v9808_v17 = vpack.c.bf16 %v6414_v26, %v6411_v25  ;;  %v9972_v23 = vpack.c.bf16 %v7088_v21, %v7087_v18  ;;  %v7072_v4 = vld [vmem:[#allocation18 + $0x8] sm:$0xff]  ;;  %v7089_v25 = vld [vmem:[#allocation18 + $0x90] sm:$0xff]  ;;  %v7090_v26 = vld [vmem:[#allocation18 + $0x98] sm:$0xff]  ;;  %v10624_v18 = vmov 0.0|0.0  }
 0x753   : > { %9973 = vmatprep.subr.bf16.mxu1 %v9972_v23 }
 0x754   : > { %9771 = vmatpush1.bf16.msra.mxu0 %v9770_v35  ;;  %v6420_v35 = vld [vmem:[#allocation14 + $0xaa0] sm:$0xff] }
 0x755   : > { %9773 = vmatprep.subr.bf16.mxu0 %v9772_v36  ;;  %v9810_v36 = vpack.c.bf16 %v6413_v33, %v6410_v29  ;;  %v9812_v49 = vpack.c.bf16 %v6420_v35, %v6417_v34  ;;  %v7073_v29 = vld [vmem:[#allocation18 + $0x10] sm:$0xff]  ;;  %v7074_v33 = vld [vmem:[#allocation18 + $0x18] sm:$0xff]  ;;  %v7091_v34 = vld [vmem:[#allocation18 + $0xa0] sm:$0xff] }
 0x756   : > { %v7092_v35 = vld [vmem:[#allocation18 + $0xa8] sm:$0xff] }
 0x758   : > { %9775 = vmatpush1.bf16.msra.mxu0 %v9774_v57  ;;  %v6426_v57 = vld [vmem:[#allocation14 + $0xad0] sm:$0xff] }
 0x759   : > { %9777 = vmatprep.subr.bf16.mxu0 %v9776_v40  ;;  %v9814_v40 = vpack.c.bf16 %v6419_v46, %v6416_v37  ;;  %v9816_v41 = vpack.c.bf16 %v6426_v57, %v6423_v28  ;;  %v9980_v37 = vpack.c.bf16 %v7092_v35, %v7091_v34  ;;  %v7075_v46 = vld [vmem:[#allocation18 + $0x20] sm:$0xff]  ;;  %v7076_v28 = vld [vmem:[#allocation18 + $0x28] sm:$0xff]  ;;  %v7093_v57 = vld [vmem:[#allocation18 + $0xb0] sm:$0xff] }
 0x75c   : > { %9779 = vmatpush1.bf16.msra.mxu0 %v9778_v45  ;;  %v6432_v45 = vld [vmem:[#allocation14 + $0xb00] sm:$0xff] }
 0x75d   : > { %9781 = vmatprep.subr.bf16.mxu0 %v9780_v7  ;;  %v9818_v7 = vpack.c.bf16 %v6425_v31, %v6422_v42  ;;  %v9820_v50 = vpack.c.bf16 %v6432_v45, %v6429_v43  ;;  %v7077_v31 = vld [vmem:[#allocation18 + $0x30] sm:$0xff]  ;;  %v7078_v43 = vld [vmem:[#allocation18 + $0x38] sm:$0xff]  ;;  %v7095_v45 = vld [vmem:[#allocation18 + $0xc0] sm:$0xff] }
 0x75f   : > { %6671 = vmatmul.mubr.f32.vlgmr.msra.gmra.mrb[0].mxu0 %v6076_v58  ;;  %v9794_v58 = vpack.c.bf16 %v6389_v5, %v6386_v8  ;;  %v6446_v5 = vld [vmem:[#allocation14 + $0xb70] sm:$0xff] }
 0x760   : > { %9783 = vmatpush1.bf16.msra.mxu0 %v9782_v59  ;;  %6741 = vmatprep.mubr.f32.mxu0 %v6079_v39  ;;  %v6395_v39 = vld [vmem:[#allocation14 + $0x9d8] sm:$0xff]  ;;  %v6438_v59 = vld [vmem:[#allocation14 + $0xb30] sm:$0xff] }
 0x761   : > { %9785 = vmatprep.subr.bf16.mxu0 %v9784_v55  ;;  %v9798_v15 = vpack.c.bf16 %v6395_v39, %v6392_v44  ;;  %v9822_v55 = vpack.c.bf16 %v6431_v38, %v6428_v51  ;;  %v9824_v61 = vpack.c.bf16 %v6438_v59, %v6435_v52  ;;  %v6452_v39 = vld [vmem:[#allocation14 + $0xba0] sm:$0xff]  ;;  %v7079_v38 = vld [vmem:[#allocation18 + $0x40] sm:$0xff]  ;;  %v7080_v52 = vld [vmem:[#allocation18 + $0x48] sm:$0xff] }
 0x762   : > { %v9838_v53 = vpack.c.bf16 %v6455_v12, %v6452_v39  ;;  %v7097_v59 = vld [vmem:[#allocation18 + $0xd0] sm:$0xff] }
 0x763   : > { %v7101_v12 = vld [vmem:[#allocation18 + $0xf0] sm:$0xff] }
 0x764   : > { %9787 = vmatpush1.bf16.msra.mxu0 %v9786_v63  ;;  %v6444_v63 = vld [vmem:[#allocation14 + $0xb60] sm:$0xff] }
 0x765   : > { %9789 = vmatprep.subr.bf16.mxu0 %v9788_v1  ;;  %v9826_v1 = vpack.c.bf16 %v6437_v24, %v6434_v54  ;;  %v9828_v2 = vpack.c.bf16 %v6444_v63, %v6441_v62  ;;  %v7081_v24 = vld [vmem:[#allocation18 + $0x50] sm:$0xff]  ;;  %v7082_v62 = vld [vmem:[#allocation18 + $0x58] sm:$0xff] }
 0x766   : > { %v9994_v63 = vpack.c.bf16 %v7082_v62, %v7081_v24 }
 0x768   : > { %9791 = vmatpush1.bf16.msra.mxu0 %v9790_v0  ;;  %v6450_v0 = vld [vmem:[#allocation14 + $0xb90] sm:$0xff] }
 0x769   : > { %9793 = vmatprep.subr.bf16.mxu0 %v9792_v3  ;;  %v9830_v3 = vpack.c.bf16 %v6443_v20, %v6440_v60  ;;  %v9832_v8 = vpack.c.bf16 %v6450_v0, %v6447_v32 }
 0x76c   : > { %9795 = vmatpush1.bf16.msra.mxu0 %v9794_v58  ;;  %v6456_v58 = vld [vmem:[#allocation14 + $0xbc0] sm:$0xff] }
 0x76d   : > { %9797 = vmatprep.subr.bf16.mxu0 %v9796_v11  ;;  %v9834_v11 = vpack.c.bf16 %v6449_v10, %v6446_v5  ;;  %v9836_v44 = vpack.c.bf16 %v6456_v58, %v6453_v19  ;;  %v7099_v10 = vld [vmem:[#allocation18 + $0xe0] sm:$0xff]  ;;  %v7100_v19 = vld [vmem:[#allocation18 + $0xe8] sm:$0xff] }
 0x76e   : > { %v9996_v58 = vpack.c.bf16 %v7100_v19, %v7099_v10  ;;  %v7434_v19 = vld [vmem:[#allocation20] ss:$0 sm:$0xff] }
 0x770   : > { %9799 = vmatpush1.bf16.msra.mxu0 %v9798_v15  ;;  %v6462_v15 = vld [vmem:[#allocation14 + $0xbf0] sm:$0xff] }
 0x771   : > { %9801 = vmatprep.subr.bf16.mxu0 %v9800_v16  ;;  %v6458_v16 = vld [vmem:[#allocation14 + $0xbd0] sm:$0xff] }
 0x774   : > { %9803 = vmatpush1.bf16.msra.mxu0 %v9802_v22  ;;  %v7071_v22 = vld [vmem:[#allocation18] sm:$0xff] }
 0x775   : > { %9805 = vmatprep.subr.bf16.mxu0 %v9804_v14  ;;  %v9840_v14 = vpack.c.bf16 %v6462_v15, %v6459_v13  ;;  %v7102_v13 = vld [vmem:[#allocation18 + $0xf8] sm:$0xff] }
 0x776   : > { %v10000_v15 = vpack.c.bf16 %v7102_v13, %v7101_v12 }
 0x778   : > { %9807 = vmatpush1.bf16.msra.mxu0 %v9806_v27  ;;  %v9974_v27 = vpack.c.bf16 %v7072_v4, %v7071_v22  ;;  %v7028_v4 = vld [vmem:[#allocation15] sm:$0x7] }
 0x779   : > { %9809 = vmatprep.subr.bf16.mxu0 %v9808_v17  ;;  %v9976_v17 = vpack.c.bf16 %v7090_v26, %v7089_v25  ;;  %v7033_v25 = vrot.slane %v7028_v4, %v12619_v9  ;;  %v7048_v26 = vld [vmem:[#allocation17] sm:$0x7]  ;;  %v7041_v62 = vrot.slane %v7028_v4, %v12646_v6 }
 0x77a   : > { %9975 = vmatpush3.bf16.msra.mxu1 %v9974_v27  ;;  %v7037_v27 = vrot.slane %v7028_v4, %v12594_v47 }
 0x77b   : > { %9977 = vmatprep.subr.bf16.mxu1 %v9976_v17  ;;  %v7053_v17 = vrot.slane %v7048_v26, %v12619_v9  ;;  %v10626_v9 = vmov 0.0  }
 0x77c   : > { %9811 = vmatpush1.bf16.msra.mxu0 %v9810_v36  ;;  %v9842_v36 = vpack.c.bf16 %v6461_v56, %v6458_v16  ;;  %v7085_v16 = vld [vmem:[#allocation18 + $0x70] sm:$0xff]  ;;  %v7086_v56 = vld [vmem:[#allocation18 + $0x78] sm:$0xff] }
 0x77d   : > { %9813 = vmatprep.subr.bf16.mxu0 %v9812_v49  ;;  %v9978_v49 = vpack.c.bf16 %v7074_v33, %v7073_v29  ;;  %v7057_v33 = vrot.slane %v7048_v26, %v12594_v47  ;;  %v7107_v47 = vld [vmem:[#allocation18 + $0x120] sm:$0xff] }
 0x77f   : > { %9979 = vmatpush3.bf16.msra.mxu1 %v9978_v49 }
 0x780   : > { %9815 = vmatpush1.bf16.msra.mxu0 %v9814_v40  ;;  %v7094_v40 = vld [vmem:[#allocation18 + $0xb8] sm:$0xff]  ;;  %9981 = vmatprep.subr.bf16.mxu1 %v9980_v37  ;;  %v7103_v37 = vld [vmem:[#allocation18 + $0x100] sm:$0xff] }
 0x781   : > { %9817 = vmatprep.subr.bf16.mxu0 %v9816_v41  ;;  %v9982_v41 = vpack.c.bf16 %v7076_v28, %v7075_v46  ;;  %v9984_v42 = vpack.c.bf16 %v7094_v40, %v7093_v57  ;;  %v7104_v46 = vld [vmem:[#allocation18 + $0x108] sm:$0xff] }
 0x782   : > { %v10005_v40 = vpack.c.bf16 %v7104_v46, %v7103_v37 }
 0x783   : > { %9983 = vmatpush3.bf16.msra.mxu1 %v9982_v41 }
 0x784   : > { %9819 = vmatpush1.bf16.msra.mxu0 %v9818_v7  ;;  %v7096_v7 = vld [vmem:[#allocation18 + $0xc8] sm:$0xff]  ;;  %9985 = vmatprep.subr.bf16.mxu1 %v9984_v42  ;;  %v7105_v42 = vld [vmem:[#allocation18 + $0x110] sm:$0xff] }
 0x785   : > { %9821 = vmatprep.subr.bf16.mxu0 %v9820_v50  ;;  %v9986_v50 = vpack.c.bf16 %v7078_v43, %v7077_v31  ;;  %v9988_v51 = vpack.c.bf16 %v7096_v7, %v7095_v45  ;;  %v7106_v31 = vld [vmem:[#allocation18 + $0x118] sm:$0xff]  ;;  %v7108_v45 = vld [vmem:[#allocation18 + $0x128] sm:$0xff] }
 0x786   : > { %v10008_v43 = vpack.c.bf16 %v7106_v31, %v7105_v42  ;;  %v10011_v7 = vpack.c.bf16 %v7108_v45, %v7107_v47 }
 0x787   : > { %9987 = vmatpush3.bf16.msra.mxu1 %v9986_v50  ;;  %v7109_v50 = vld [vmem:[#allocation18 + $0x130] sm:$0xff] }
 0x788   : > { %9823 = vmatpush1.bf16.msra.mxu0 %v9822_v55  ;;  %v7098_v55 = vld [vmem:[#allocation18 + $0xd8] sm:$0xff]  ;;  %9989 = vmatprep.subr.bf16.mxu1 %v9988_v51 }
 0x789   : > { %9825 = vmatprep.subr.bf16.mxu0 %v9824_v61  ;;  %v9990_v61 = vpack.c.bf16 %v7080_v52, %v7079_v38  ;;  %v9992_v54 = vpack.c.bf16 %v7098_v55, %v7097_v59  ;;  %v7110_v51 = vld [vmem:[#allocation18 + $0x138] sm:$0xff]  ;;  %v7111_v52 = vld [vmem:[#allocation18 + $0x140] sm:$0xff]  ;;  %v7112_v59 = vld [vmem:[#allocation18 + $0x148] sm:$0xff] }
 0x78a   : > { %v10014_v38 = vpack.c.bf16 %v7110_v51, %v7109_v50  ;;  %v10017_v55 = vpack.c.bf16 %v7112_v59, %v7111_v52 }
 0x78b   : > { %9991 = vmatpush3.bf16.msra.mxu1 %v9990_v61  ;;  %v7113_v61 = vld [vmem:[#allocation18 + $0x150] sm:$0xff] }
 0x78c   : > { %9827 = vmatpush1.bf16.msra.mxu0 %v9826_v1  ;;  %9993 = vmatprep.subr.bf16.mxu1 %v9992_v54  ;;  %v7114_v54 = vld [vmem:[#allocation18 + $0x158] sm:$0xff] }
 0x78d   : > { %9829 = vmatprep.subr.bf16.mxu0 %v9828_v2  ;;  %v10020_v24 = vpack.c.bf16 %v7114_v54, %v7113_v61 }
 0x78f   : > { %9995 = vmatpush3.bf16.msra.mxu1 %v9994_v63  ;;  %v7115_v63 = vld [vmem:[#allocation18 + $0x160] sm:$0xff] }
 0x790   : > { %9831 = vmatpush1.bf16.msra.mxu0 %v9830_v3  ;;  %9997 = vmatprep.subr.bf16.mxu1 %v9996_v58 }
 0x791   : > { %9833 = vmatprep.subr.bf16.mxu0 %v9832_v8 }
 0x794   : > { %9835 = vmatpush1.bf16.msra.mxu0 %v9834_v11  ;;  %v7083_v11 = vld [vmem:[#allocation18 + $0x60] sm:$0xff] }
 0x795   : > { %9837 = vmatprep.subr.bf16.mxu0 %v9836_v44  ;;  %v7084_v44 = vld [vmem:[#allocation18 + $0x68] sm:$0xff] }
 0x796   : > { %v9998_v39 = vpack.c.bf16 %v7084_v44, %v7083_v11 }
 0x798   : > { %9839 = vmatpush1.bf16.msra.mxu0 %v9838_v53  ;;  %9999 = vmatpush3.bf16.msra.mxu1 %v9998_v39  ;;  %v10002_v53 = vpack.c.bf16 %v7086_v56, %v7085_v16 }
 0x799   : > { %9841 = vmatprep.subr.bf16.mxu0 %v9840_v14  ;;  %10001 = vmatprep.subr.bf16.mxu1 %v10000_v15 }
 0x79c   : > { %9843 = vmatpush1.bf16.msra.mxu0 %v9842_v36  ;;  %10003 = vmatpush3.bf16.msra.mxu1 %v10002_v53 }
 0x79d   : > { %10004 = vmatprep.subr.bf16.mxu1 %v10624_v18 }
 0x79f   : > { %6742 = vmatmul.mubr.f32.vlgmr.msra.gmra.mrb[0].mxu0 %v6078_v48 }
 0x7ad   : > { %v7473_v1 = vpop.f32.mrb[0].mxu1 }
 0x7ae   : > { %v7474_v30 = vpop.f32.mrb[1].mxu1 }
 0x7af   : > { %v7475_v48 = vadd.f32 %v7474_v30, %v7473_v1  ;;  %v7116_v1 = vld [vmem:[#allocation18 + $0x168] sm:$0xff] }
 0x7b0   : > { %v10023_v30 = vpack.c.bf16 %v7116_v1, %v7115_v63 }
 0x7cd   : > { %v7508_v2 = vpop.f32.mrb[2].mxu1 }
 0x7ce   : > { %v7509_v60 = vpop.f32.mrb[3].mxu1 }
 0x7cf   : > { %v7510_v20 = vadd.f32 %v7509_v60, %v7508_v2  ;;  %v7061_v2 = vrot.slane %v7048_v26, %v12646_v6  ;;  %v7117_v60 = vld [vmem:[#allocation18 + $0x170] sm:$0xff] }
 0x7d1   : > { %v6885_v32 = vadd.f32 %v7510_v20, %v7475_v48  ;;  %v7118_v20 = vld [vmem:[#allocation18 + $0x178] sm:$0xff] }
 0x7ed   : > { %v7543_v0 = vpop.f32.mrb[4].mxu1 }
 0x7ee   : > { %v7544_v3 = vpop.f32.mrb[5].mxu1 }
 0x7ef   : > { %v7545_v8 = vadd.f32 %v7544_v3, %v7543_v0 }
 0x7f1   : > { %v6955_v5 = vadd.f32 %v7545_v8, %v6885_v32  ;;  %v10026_v32 = vpack.c.bf16 %v7118_v20, %v7117_v60 }
 0x80d   : > { %v7578_v21 = vpop.f32.mrb[6].mxu1 }
 0x80e   : > { %v7579_v22 = vpop.f32.mrb[7].mxu1 }
 0x80f   : > { %v7580_v14 = vadd.f32 %v7579_v22, %v7578_v21 }
 0x811   : > { %v7025_v23 = vadd.f32 %v7580_v14, %v6955_v5 }
 0x813   : > { %v7047_v48 = vmul.f32 %v7041_v62, %v7025_v23 }
 0x815   : > { %v7067_v0 = vadd.f32 %v7061_v2, %v7047_v48 }
 0x817   : > { %v7070_v3 = vmax.f32 %v7067_v0, 0.0 }
 0x872   : > { %v6743_v29 = vpop.f32.mrb[0].mxu0 }
 0x873   : > { %v7045_v34 = vmul.f32 %v7033_v25, %v6743_v29  ;;  %v6745_v35 = vpop.f32.mrb[1].mxu0 }
 0x874   : > { %v7046_v36 = vmul.f32 %v7037_v27, %v6745_v35 }
 0x875   : > { %v7065_v49 = vadd.f32 %v7053_v17, %v7045_v34 }
 0x876   : > { %v7066_v28 = vadd.f32 %v7057_v33, %v7046_v36 }
 0x877   : > { %v7068_v41 = vmax.f32 %v7065_v49, 0.0 }
 0x878   : > { %v7069_v57 = vmax.f32 %v7066_v28, 0.0 }
 0x87a   : > { %7190 = vmatprep.mubr.f32.mxu1 %v7069_v57 }
 0x87b   : > { %7191 = vmatmul.mubr.f32.vlgmr.msra.gmra.mrb[8].mxu1 %v7068_v41 }
 0x87c   : > { %10006 = vmatpush3.bf16.msra.mxu1 %v10005_v40  ;;  %7665 = vmatprep.mubr.msk.f32.mxu1 %vm10625_vm0, %v10626_v9 }
 0x87d   : > { %10007 = vmatprep.subr.bf16.mxu1 %v10624_v18 }
 0x880   : > { %10009 = vmatpush3.bf16.msra.mxu1 %v10008_v43 }
 0x881   : > { %10010 = vmatprep.subr.bf16.mxu1 %v10624_v18 }
 0x884   : > { %10012 = vmatpush3.bf16.msra.mxu1 %v10011_v7 }
 0x885   : > { %10013 = vmatprep.subr.bf16.mxu1 %v10624_v18 }
 0x888   : > { %10015 = vmatpush3.bf16.msra.mxu1 %v10014_v38 }
 0x889   : > { %10016 = vmatprep.subr.bf16.mxu1 %v10624_v18 }
 0x88c   : > { %10018 = vmatpush3.bf16.msra.mxu1 %v10017_v55 }
 0x88d   : > { %10019 = vmatprep.subr.bf16.mxu1 %v10624_v18 }
 0x890   : > { %10021 = vmatpush3.bf16.msra.mxu1 %v10020_v24 }
 0x891   : > { %10022 = vmatprep.subr.bf16.mxu1 %v10624_v18 }
 0x894   : > { %10024 = vmatpush3.bf16.msra.mxu1 %v10023_v30 }
 0x895   : > { %10025 = vmatprep.subr.bf16.mxu1 %v10624_v18 }
 0x898   : > { %10027 = vmatpush3.bf16.msra.mxu1 %v10026_v32 }
 0x89b   : > { %7666 = vmatmul.mubr.f32.vlgmr.msra.gmra.mrb[10].mxu1 %v7070_v3 }
 0x94e   : > { %v7613_v8 = vpop.f32.mrb[8].mxu1 }
 0x94f   : > { %v7614_v5 = vpop.f32.mrb[9].mxu1 }
 0x950   : > { %v7615_v10 = vadd.f32 %v7614_v5, %v7613_v8 }
 0x952   : > { %v7193_v58 = vadd.f32 %v7615_v10, %v7434_v19 }
 0x96e   : > { %v7262_v11 = vpop.f32.mrb[10].mxu1 }
 0x96f   : > { %v7263_v44 = vadd.f32 %v7262_v11, %v7193_v58  ;;  %v7667_v6 = vpop.f32.mrb[11].mxu1 }
 0x971   : > { %7266 = vst [vmem:[%s12769_s21] sm:$0xff] %v7263_v44 }
 0x972 PF: > { %p27_p11 = scmp.ge.s32.totalorder %s10957_s15, 6   ;;  %s12770_s21 = smov %s10594_s22 }
 0x973   : > { %s12771_s22 = smov %s10598_s23  ;;  %s12772_s23 = smov %s10969_s0 }
 0x974   : > { %s12773_s24 = smov %s10957_s15  ;;  %29 = sbr.rel (!%p27_p11) target bundleno = 12 (0xc), region = 157 }
 0x97b   :  { %7278 = vsyncpa [#allocation5], 1 }
 0x97c   :  { %7280 = vsyncpa [#allocation5 + $0x1], 1 }
 0x97d   :  { %7281 = vsyncpa [#allocation7], 1 }
 0x97e   :  { %7282 = vsyncpa [#allocation10], 1 }
 0x97f   :  { %7284 = vsyncpa [#allocation10 + $0x1], 1 }
 0x980   :  { %7285 = vsyncpa [#allocation13], 1 }
 0x981   :  { %7286 = vsyncpa [#allocation16], 1 }
 0x982   :  { %7287 = vsyncpa [#allocation19], 1 }

</bundles_post_ra>
